<compile_context>
chip_gen: v6e
topology: v6e:2x2x1
jax: 0.10.0
libtpu: 0.0.40
codegen_flags: <defaults>
</compile_context>

<pallas_src>
import math

import jax
import jax.numpy as jnp
from jax.experimental import pallas as pl
from jax.experimental.pallas import tpu as pltpu

FEATURE_DIM = 9
D_MODEL = 64
NHEAD = 4
HEAD_DIM = D_MODEL // NHEAD
NUM_LAYERS = 3
NUM_CLASSES = 4
DIM_FF = 2048          # nn.TransformerEncoderLayer default dim_feedforward
EPS = 1e-5             # nn.LayerNorm default eps
NEG_INF = -1e9         # additive key-padding mask value


# ----------------------------------------------------------------------------
# Sinusoidal positional encoding (same construction as PositionalEncoding)
# ----------------------------------------------------------------------------
def build_pe(seq_len, d_model):
    pos = jnp.arange(seq_len, dtype=jnp.float32)[:, None]
    div = jnp.exp(
        jnp.arange(0, d_model, 2, dtype=jnp.float32) * (-math.log(10000.0) / d_model)
    )
    pe = jnp.zeros((seq_len, d_model), jnp.float32)
    pe = pe.at[:, 0::2].set(jnp.sin(pos * div))
    pe = pe.at[:, 1::2].set(jnp.cos(pos * div))
    return pe


def _layer_norm(x, g, b):
    mu = jnp.mean(x, axis=-1, keepdims=True)
    var = jnp.mean((x - mu) ** 2, axis=-1, keepdims=True)
    return (x - mu) * jax.lax.rsqrt(var + EPS) * g + b


# ----------------------------------------------------------------------------
# Fused per-batch kernel: one grid step == one sequence.
# ----------------------------------------------------------------------------
def fused_forward_kernel(
    x_ref, pe_ref, amask_ref, poolw_ref,
    w_in_ref, b_in_ref,
    wq_ref, bq_ref, wk_ref, bk_ref, wv_ref, bv_ref,
    wo_ref, bo_ref, g1_ref, be1_ref,
    w1_ref, b1_ref, w2_ref, b2_ref, g2_ref, be2_ref,
    wc_ref, bc_ref,
    o_ref,
    attn_scratch,
):
    bf16 = jnp.bfloat16
    f32 = jnp.float32
    scale = 1.0 / math.sqrt(HEAD_DIM)

    amask = amask_ref[0]                                   # [1, S] additive key mask

    # Input projection + positional encoding (f32 residual stream).
    x = x_ref[0]                                           # [S, F]
    h = (jnp.dot(x.astype(bf16), w_in_ref[...], preferred_element_type=f32)
         + b_in_ref[...] + pe_ref[...])                    # [S, D] f32

    # Statically unrolled post-norm encoder layers (weights indexed with a
    # compile-time layer index -> plain VMEM slices, always resident).
    for l in range(NUM_LAYERS):
        hb = h.astype(bf16)
        # Fold the 1/sqrt(head_dim) scale into q once per layer.
        q = (jnp.dot(hb, wq_ref[l], preferred_element_type=f32) + bq_ref[l]) * scale
        k = jnp.dot(hb, wk_ref[l], preferred_element_type=f32) + bk_ref[l]
        v = jnp.dot(hb, wv_ref[l], preferred_element_type=f32) + bv_ref[l]

        # Multi-head attention.  Each head's [S, 16] output lands in the [S, 64]
        # scratch at its column offset; the output projection is a single K=64
        # matmul afterwards.
        for hd in range(NHEAD):
            lo = hd * HEAD_DIM
            qh = q[:, lo:lo + HEAD_DIM].astype(bf16)
            kh = k[:, lo:lo + HEAD_DIM].astype(bf16)
            vh = v[:, lo:lo + HEAD_DIM].astype(bf16)
            scores = jax.lax.dot_general(
                qh, kh, (((1,), (1,)), ((), ())),
                preferred_element_type=f32) + amask        # [S, S] f32
            m = jnp.max(scores, axis=-1, keepdims=True)
            e = jnp.exp(scores - m)
            rowsum = jnp.sum(e, axis=-1, keepdims=True)
            oh_un = jnp.dot(e.astype(bf16), vh, preferred_element_type=f32)  # [S, Dh]
            # Deferred normalization: EUP approximate reciprocal (free slot).
            oh = oh_un * pl.reciprocal(rowsum, approx=True)
            attn_scratch[:, pl.ds(lo, HEAD_DIM)] = oh

        attn = (jnp.dot(attn_scratch[...].astype(bf16), wo_ref[l],
                        preferred_element_type=f32) + bo_ref[l])             # [S, D]

        # residual + LayerNorm 1
        x1 = _layer_norm(h + attn, g1_ref[l], be1_ref[l])

        # feed-forward (ReLU); [S, 2048] intermediate lives only in vregs/VMEM
        h1 = jnp.maximum(
            jnp.dot(x1.astype(bf16), w1_ref[l], preferred_element_type=f32)
            + b1_ref[l], 0.0)
        h2 = (jnp.dot(h1.astype(bf16), w2_ref[l], preferred_element_type=f32)
              + b2_ref[l])

        # residual + LayerNorm 2
        h = _layer_norm(x1 + h2, g2_ref[l], be2_ref[l])

    # Masked mean-pool: [1, S] pooling weights (keep/count) @ [S, D].
    pooled = jnp.dot(poolw_ref[0], h, preferred_element_type=f32)            # [1, D]
    logits = (jnp.dot(pooled.astype(bf16), wc_ref[...],
                      preferred_element_type=f32) + bc_ref[...])             # [1, C]
    o_ref[...] = logits[None, :, :]


# ----------------------------------------------------------------------------
# Wrapper: builds tiny per-batch masks / pooling weights and launches the grid.
# ----------------------------------------------------------------------------
def forward(x, padding_mask, params):
    B, S, F = x.shape
    f32 = jnp.float32

    amask = jnp.where(padding_mask, NEG_INF, 0.0).astype(f32).reshape(B, 1, S)
    keep = (~padding_mask).astype(f32)                            # [B, S], 1 = keep
    counts = jnp.maximum(keep.sum(axis=1, keepdims=True), 1.0)    # guard empty seqs
    poolw = (keep / counts).reshape(B, 1, S)
    pe = params["pe"][:S]                                         # [S, D]

    const2 = lambda b: (0, 0)
    const3 = lambda b: (0, 0, 0)
    L, D, FF, C = NUM_LAYERS, D_MODEL, DIM_FF, NUM_CLASSES

    in_specs = [
        pl.BlockSpec((1, S, F), lambda b: (b, 0, 0)),     # x           (per batch)
        pl.BlockSpec((S, D), const2),                     # pe          (resident)
        pl.BlockSpec((1, 1, S), lambda b: (b, 0, 0)),     # key mask    (per batch)
        pl.BlockSpec((1, 1, S), lambda b: (b, 0, 0)),     # pool weights(per batch)
        pl.BlockSpec((F, D), const2),                     # w_in
        pl.BlockSpec((1, D), const2),                     # b_in
        pl.BlockSpec((L, D, D), const3),                  # wq
        pl.BlockSpec((L, 1, D), const3),                  # bq
        pl.BlockSpec((L, D, D), const3),                  # wk
        pl.BlockSpec((L, 1, D), const3),                  # bk
        pl.BlockSpec((L, D, D), const3),                  # wv
        pl.BlockSpec((L, 1, D), const3),                  # bv
        pl.BlockSpec((L, D, D), const3),                  # wo
        pl.BlockSpec((L, 1, D), const3),                  # bo
        pl.BlockSpec((L, 1, D), const3),                  # g1
        pl.BlockSpec((L, 1, D), const3),                  # be1
        pl.BlockSpec((L, D, FF), const3),                 # w1
        pl.BlockSpec((L, 1, FF), const3),                 # b1
        pl.BlockSpec((L, FF, D), const3),                 # w2
        pl.BlockSpec((L, 1, D), const3),                  # b2
        pl.BlockSpec((L, 1, D), const3),                  # g2
        pl.BlockSpec((L, 1, D), const3),                  # be2
        pl.BlockSpec((D, C), const2),                     # wc
        pl.BlockSpec((1, C), const2),                     # bc
    ]

    out = pl.pallas_call(
        fused_forward_kernel,
        out_shape=jax.ShapeDtypeStruct((B, 1, C), f32),
        grid_spec=pltpu.PrefetchScalarGridSpec(
            num_scalar_prefetch=0,
            grid=(B,),
            in_specs=in_specs,
            out_specs=pl.BlockSpec((1, 1, C), lambda b: (b, 0, 0)),
            scratch_shapes=[pltpu.VMEM((S, D_MODEL), jnp.float32)],
        ),
        compiler_params=pltpu.CompilerParams(
            dimension_semantics=("parallel",),
            # bf16 weights ~1.7 MiB (x2 buffering) + f32 biases/LN + small
            # activations; 32 MiB leaves ample headroom and fits v7x's 64 MiB.
            vmem_limit_bytes=32 << 20,
        ),
    )(x.astype(f32), pe, amask, poolw,
      params["w_in"], params["b_in"],
      params["wq"], params["bq"], params["wk"], params["bk"],
      params["wv"], params["bv"], params["wo"], params["bo"],
      params["g1"], params["be1"],
      params["w1"], params["b1"], params["w2"], params["b2"],
      params["g2"], params["be2"],
      params["wc"], params["bc"])
    return out[:, 0, :]


# ----------------------------------------------------------------------------
# Pure-JAX reference implementing the identical precision policy (bf16 matmul
# operands, f32 accumulation) for the correctness check.
# ----------------------------------------------------------------------------
def reference_forward(x, padding_mask, params):
    B, S, _ = x.shape
    f32, bf16 = jnp.float32, jnp.bfloat16
    scale = 1.0 / math.sqrt(HEAD_DIM)

    def proj(a, w, b):
        return jnp.einsum("...k,kn->...n", a.astype(bf16), w,
                          preferred_element_type=f32) + b

    h = proj(x, params["w_in"], params["b_in"]) + params["pe"][None, :S, :]
    amask = jnp.where(padding_mask, NEG_INF, 0.0).astype(f32)[:, None, None, :]
    for l in range(NUM_LAYERS):
        q = proj(h, params["wq"][l], params["bq"][l]) * scale
        k = proj(h, params["wk"][l], params["bk"][l])
        v = proj(h, params["wv"][l], params["bv"][l])
        qh = q.reshape(B, S, NHEAD, HEAD_DIM).transpose(0, 2, 1, 3)
        kh = k.reshape(B, S, NHEAD, HEAD_DIM).transpose(0, 2, 1, 3)
        vh = v.reshape(B, S, NHEAD, HEAD_DIM).transpose(0, 2, 1, 3)
        scores = jnp.einsum("bhqd,bhkd->bhqk", qh.astype(bf16), kh.astype(bf16),
                            preferred_element_type=f32) + amask
        m = scores.max(-1, keepdims=True)
        e = jnp.exp(scores - m)
        denom = e.sum(-1, keepdims=True)
        oh = jnp.einsum("bhqk,bhkd->bhqd", e.astype(bf16), vh.astype(bf16),
                        preferred_element_type=f32) / denom
        attn = oh.transpose(0, 2, 1, 3).reshape(B, S, D_MODEL)
        attn = proj(attn, params["wo"][l], params["bo"][l])
        x1 = _layer_norm(h + attn, params["g1"][l], params["be1"][l])
        h1 = jnp.maximum(proj(x1, params["w1"][l], params["b1"][l]), 0.0)
        h2 = proj(h1, params["w2"][l], params["b2"][l])
        h = _layer_norm(x1 + h2, params["g2"][l], params["be2"][l])
    keep = (~padding_mask).astype(f32)
    pooled = (h * keep[..., None]).sum(1) / jnp.maximum(
        keep.sum(1, keepdims=True), 1.0)
    return proj(pooled, params["wc"], params["bc"])


# ----------------------------------------------------------------------------
# Deterministic parameter init (layer weights stacked along a leading L axis,
# matmul weights stored in bf16, biases / LayerNorm params / PE in f32).
# ----------------------------------------------------------------------------
def init_params(key, seq_len):
    keys = iter(jax.random.split(key, 64))
    bf16 = jnp.bfloat16

    def nrm(shape, scale=0.05):
        return (scale * jax.random.normal(next(keys), shape)).astype(jnp.float32)

    def stack(make):
        return jnp.stack([make() for _ in range(NUM_LAYERS)], axis=0)

    params = {
        "w_in": nrm((FEATURE_DIM, D_MODEL)).astype(bf16),
        "b_in": nrm((1, D_MODEL)),
        "pe": build_pe(seq_len, D_MODEL),
        "wq": stack(lambda: nrm((D_MODEL, D_MODEL))).astype(bf16),
        "bq": stack(lambda: nrm((1, D_MODEL))),
        "wk": stack(lambda: nrm((D_MODEL, D_MODEL))).astype(bf16),
        "bk": stack(lambda: nrm((1, D_MODEL))),
        "wv": stack(lambda: nrm((D_MODEL, D_MODEL))).astype(bf16),
        "bv": stack(lambda: nrm((1, D_MODEL))),
        "wo": stack(lambda: nrm((D_MODEL, D_MODEL))).astype(bf16),
        "bo": stack(lambda: nrm((1, D_MODEL))),
        "g1": jnp.ones((NUM_LAYERS, 1, D_MODEL), jnp.float32),
        "be1": jnp.zeros((NUM_LAYERS, 1, D_MODEL), jnp.float32),
        "w1": stack(lambda: nrm((D_MODEL, DIM_FF))).astype(bf16),
        "b1": stack(lambda: nrm((1, DIM_FF))),
        "w2": stack(lambda: nrm((DIM_FF, D_MODEL))).astype(bf16),
        "b2": stack(lambda: nrm((1, D_MODEL))),
        "g2": jnp.ones((NUM_LAYERS, 1, D_MODEL), jnp.float32),
        "be2": jnp.zeros((NUM_LAYERS, 1, D_MODEL), jnp.float32),
        "wc": nrm((D_MODEL, NUM_CLASSES)).astype(bf16),
        "bc": nrm((1, NUM_CLASSES)),
    }
    return params


if __name__ == "__main__":
    B, S = 2, 8
    key = jax.random.PRNGKey(0)
    kx, kp = jax.random.split(key)

    x = jax.random.normal(kx, (B, S, FEATURE_DIM), dtype=jnp.float32)
    lengths = jnp.array([8, 5])
    padding_mask = jnp.arange(S)[None, :] >= lengths[:, None]   # True == PAD

    params = init_params(kp, S)

    logits = jax.block_until_ready(forward(x, padding_mask, params))
    ref = reference_forward(x, padding_mask, params)

    assert logits.shape == (B, NUM_CLASSES)
    assert jnp.allclose(logits, ref, atol=2e-2, rtol=2e-2), (logits, ref)
    print("KERNEL_OK")
</pallas_src>

<mosaic_0001>
module attributes {stable_mosaic.version = 11 : i64} {
  func.func @fused_forward_kernel(%arg0: i32, %arg1: memref<1x8x9xf32, #tpu.memory_space<vmem>>, %arg2: memref<8x64xf32, #tpu.memory_space<vmem>>, %arg3: memref<1x1x8xf32, #tpu.memory_space<vmem>>, %arg4: memref<1x1x8xf32, #tpu.memory_space<vmem>>, %arg5: memref<9x64xbf16, #tpu.memory_space<vmem>>, %arg6: memref<1x64xf32, #tpu.memory_space<vmem>>, %arg7: memref<3x64x64xbf16, #tpu.memory_space<vmem>>, %arg8: memref<3x1x64xf32, #tpu.memory_space<vmem>>, %arg9: memref<3x64x64xbf16, #tpu.memory_space<vmem>>, %arg10: memref<3x1x64xf32, #tpu.memory_space<vmem>>, %arg11: memref<3x64x64xbf16, #tpu.memory_space<vmem>>, %arg12: memref<3x1x64xf32, #tpu.memory_space<vmem>>, %arg13: memref<3x64x64xbf16, #tpu.memory_space<vmem>>, %arg14: memref<3x1x64xf32, #tpu.memory_space<vmem>>, %arg15: memref<3x1x64xf32, #tpu.memory_space<vmem>>, %arg16: memref<3x1x64xf32, #tpu.memory_space<vmem>>, %arg17: memref<3x64x2048xbf16, #tpu.memory_space<vmem>>, %arg18: memref<3x1x2048xf32, #tpu.memory_space<vmem>>, %arg19: memref<3x2048x64xbf16, #tpu.memory_space<vmem>>, %arg20: memref<3x1x64xf32, #tpu.memory_space<vmem>>, %arg21: memref<3x1x64xf32, #tpu.memory_space<vmem>>, %arg22: memref<3x1x64xf32, #tpu.memory_space<vmem>>, %arg23: memref<64x4xbf16, #tpu.memory_space<vmem>>, %arg24: memref<1x4xf32, #tpu.memory_space<vmem>>, %arg25: memref<1x1x4xf32, #tpu.memory_space<vmem>>, %arg26: memref<8x64xf32, #tpu.memory_space<vmem>>) attributes {dimension_semantics = [#tpu.dimension_semantics<parallel>], iteration_bounds = array<i64: 2>, scalar_prefetch = 0 : i64, scratch_operands = 1 : i64, tpu.core_type = #tpu.core_type<tc>, window_params = [{transform_indices = @transform_0, window_bounds = array<i64: 1, 8, 9>}, {pipeline_mode = #tpu.pipeline_mode<synchronous>, transform_indices = @transform_1, window_bounds = array<i64: 8, 64>}, {transform_indices = @transform_2, window_bounds = array<i64: 1, 1, 8>}, {transform_indices = @transform_3, window_bounds = array<i64: 1, 1, 8>}, {pipeline_mode = #tpu.pipeline_mode<synchronous>, transform_indices = @transform_4, window_bounds = array<i64: 9, 64>}, {pipeline_mode = #tpu.pipeline_mode<synchronous>, transform_indices = @transform_5, window_bounds = array<i64: 1, 64>}, {pipeline_mode = #tpu.pipeline_mode<synchronous>, transform_indices = @transform_6, window_bounds = array<i64: 3, 64, 64>}, {pipeline_mode = #tpu.pipeline_mode<synchronous>, transform_indices = @transform_7, window_bounds = array<i64: 3, 1, 64>}, {pipeline_mode = #tpu.pipeline_mode<synchronous>, transform_indices = @transform_8, window_bounds = array<i64: 3, 64, 64>}, {pipeline_mode = #tpu.pipeline_mode<synchronous>, transform_indices = @transform_9, window_bounds = array<i64: 3, 1, 64>}, {pipeline_mode = #tpu.pipeline_mode<synchronous>, transform_indices = @transform_10, window_bounds = array<i64: 3, 64, 64>}, {pipeline_mode = #tpu.pipeline_mode<synchronous>, transform_indices = @transform_11, window_bounds = array<i64: 3, 1, 64>}, {pipeline_mode = #tpu.pipeline_mode<synchronous>, transform_indices = @transform_12, window_bounds = array<i64: 3, 64, 64>}, {pipeline_mode = #tpu.pipeline_mode<synchronous>, transform_indices = @transform_13, window_bounds = array<i64: 3, 1, 64>}, {pipeline_mode = #tpu.pipeline_mode<synchronous>, transform_indices = @transform_14, window_bounds = array<i64: 3, 1, 64>}, {pipeline_mode = #tpu.pipeline_mode<synchronous>, transform_indices = @transform_15, window_bounds = array<i64: 3, 1, 64>}, {pipeline_mode = #tpu.pipeline_mode<synchronous>, transform_indices = @transform_16, window_bounds = array<i64: 3, 64, 2048>}, {pipeline_mode = #tpu.pipeline_mode<synchronous>, transform_indices = @transform_17, window_bounds = array<i64: 3, 1, 2048>}, {pipeline_mode = #tpu.pipeline_mode<synchronous>, transform_indices = @transform_18, window_bounds = array<i64: 3, 2048, 64>}, {pipeline_mode = #tpu.pipeline_mode<synchronous>, transform_indices = @transform_19, window_bounds = array<i64: 3, 1, 64>}, {pipeline_mode = #tpu.pipeline_mode<synchronous>, transform_indices = @transform_20, window_bounds = array<i64: 3, 1, 64>}, {pipeline_mode = #tpu.pipeline_mode<synchronous>, transform_indices = @transform_21, window_bounds = array<i64: 3, 1, 64>}, {pipeline_mode = #tpu.pipeline_mode<synchronous>, transform_indices = @transform_22, window_bounds = array<i64: 64, 4>}, {pipeline_mode = #tpu.pipeline_mode<synchronous>, transform_indices = @transform_23, window_bounds = array<i64: 1, 4>}, {transform_indices = @transform_24, window_bounds = array<i64: 1, 1, 4>}]} {
    %c0 = arith.constant 0 : index
    %c0_0 = arith.constant 0 : index
    %c0_1 = arith.constant 0 : index
    %0 = vector.load %arg3[%c0, %c0_0, %c0_1] : memref<1x1x8xf32, #tpu.memory_space<vmem>>, vector<1x1x8xf32>
    %1 = vector.shape_cast %0 : vector<1x1x8xf32> to vector<1x8xf32>
    %c0_2 = arith.constant 0 : index
    %c0_3 = arith.constant 0 : index
    %c0_4 = arith.constant 0 : index
    %2 = vector.load %arg1[%c0_2, %c0_3, %c0_4] : memref<1x8x9xf32, #tpu.memory_space<vmem>>, vector<1x8x9xf32>
    %3 = vector.shape_cast %2 : vector<1x8x9xf32> to vector<8x9xf32>
    %4 = arith.truncf %3 : vector<8x9xf32> to vector<8x9xbf16>
    %c0_5 = arith.constant 0 : index
    %c0_6 = arith.constant 0 : index
    %5 = vector.load %arg5[%c0_5, %c0_6] : memref<9x64xbf16, #tpu.memory_space<vmem>>, vector<9x64xbf16>
    %cst = arith.constant dense<0.000000e+00> : vector<8x64xf32>
    %6 = tpu.matmul %4, %5, %cst {dimension_numbers = #tpu.dot_dimension_numbers<[1], [0], [0], [1], [0, 0, 1, 1], [], []>} : vector<8x9xbf16>, vector<9x64xbf16>, vector<8x64xf32> -> vector<8x64xf32>
    %c0_7 = arith.constant 0 : index
    %c0_8 = arith.constant 0 : index
    %7 = vector.load %arg6[%c0_7, %c0_8] : memref<1x64xf32, #tpu.memory_space<vmem>>, vector<1x64xf32>
    %8 = vector.broadcast %7 : vector<1x64xf32> to vector<8x64xf32>
    %9 = arith.addf %6, %8 : vector<8x64xf32>
    %c0_9 = arith.constant 0 : index
    %c0_10 = arith.constant 0 : index
    %10 = vector.load %arg2[%c0_9, %c0_10] : memref<8x64xf32, #tpu.memory_space<vmem>>, vector<8x64xf32>
    %11 = arith.addf %9, %10 : vector<8x64xf32>
    %12 = arith.truncf %11 : vector<8x64xf32> to vector<8x64xbf16>
    %c0_11 = arith.constant 0 : index
    %c0_12 = arith.constant 0 : index
    %c0_13 = arith.constant 0 : index
    %13 = vector.load %arg7[%c0_11, %c0_12, %c0_13] : memref<3x64x64xbf16, #tpu.memory_space<vmem>>, vector<1x64x64xbf16>
    %14 = vector.shape_cast %13 : vector<1x64x64xbf16> to vector<64x64xbf16>
    %cst_14 = arith.constant dense<0.000000e+00> : vector<8x64xf32>
    %15 = tpu.matmul %12, %14, %cst_14 {dimension_numbers = #tpu.dot_dimension_numbers<[1], [0], [0], [1], [0, 0, 1, 1], [], []>} : vector<8x64xbf16>, vector<64x64xbf16>, vector<8x64xf32> -> vector<8x64xf32>
    %c0_15 = arith.constant 0 : index
    %c0_16 = arith.constant 0 : index
    %c0_17 = arith.constant 0 : index
    %16 = vector.load %arg8[%c0_15, %c0_16, %c0_17] : memref<3x1x64xf32, #tpu.memory_space<vmem>>, vector<1x1x64xf32>
    %17 = vector.shape_cast %16 : vector<1x1x64xf32> to vector<1x64xf32>
    %18 = vector.broadcast %17 : vector<1x64xf32> to vector<8x64xf32>
    %19 = arith.addf %15, %18 : vector<8x64xf32>
    %cst_18 = arith.constant 2.500000e-01 : f32
    %20 = vector.broadcast %cst_18 : f32 to vector<8x64xf32>
    %21 = arith.mulf %19, %20 : vector<8x64xf32>
    %c0_19 = arith.constant 0 : index
    %c0_20 = arith.constant 0 : index
    %c0_21 = arith.constant 0 : index
    %22 = vector.load %arg9[%c0_19, %c0_20, %c0_21] : memref<3x64x64xbf16, #tpu.memory_space<vmem>>, vector<1x64x64xbf16>
    %23 = vector.shape_cast %22 : vector<1x64x64xbf16> to vector<64x64xbf16>
    %cst_22 = arith.constant dense<0.000000e+00> : vector<8x64xf32>
    %24 = tpu.matmul %12, %23, %cst_22 {dimension_numbers = #tpu.dot_dimension_numbers<[1], [0], [0], [1], [0, 0, 1, 1], [], []>} : vector<8x64xbf16>, vector<64x64xbf16>, vector<8x64xf32> -> vector<8x64xf32>
    %c0_23 = arith.constant 0 : index
    %c0_24 = arith.constant 0 : index
    %c0_25 = arith.constant 0 : index
    %25 = vector.load %arg10[%c0_23, %c0_24, %c0_25] : memref<3x1x64xf32, #tpu.memory_space<vmem>>, vector<1x1x64xf32>
    %26 = vector.shape_cast %25 : vector<1x1x64xf32> to vector<1x64xf32>
    %27 = vector.broadcast %26 : vector<1x64xf32> to vector<8x64xf32>
    %28 = arith.addf %24, %27 : vector<8x64xf32>
    %c0_26 = arith.constant 0 : index
    %c0_27 = arith.constant 0 : index
    %c0_28 = arith.constant 0 : index
    %29 = vector.load %arg11[%c0_26, %c0_27, %c0_28] : memref<3x64x64xbf16, #tpu.memory_space<vmem>>, vector<1x64x64xbf16>
    %30 = vector.shape_cast %29 : vector<1x64x64xbf16> to vector<64x64xbf16>
    %cst_29 = arith.constant dense<0.000000e+00> : vector<8x64xf32>
    %31 = tpu.matmul %12, %30, %cst_29 {dimension_numbers = #tpu.dot_dimension_numbers<[1], [0], [0], [1], [0, 0, 1, 1], [], []>} : vector<8x64xbf16>, vector<64x64xbf16>, vector<8x64xf32> -> vector<8x64xf32>
    %c0_30 = arith.constant 0 : index
    %c0_31 = arith.constant 0 : index
    %c0_32 = arith.constant 0 : index
    %32 = vector.load %arg12[%c0_30, %c0_31, %c0_32] : memref<3x1x64xf32, #tpu.memory_space<vmem>>, vector<1x1x64xf32>
    %33 = vector.shape_cast %32 : vector<1x1x64xf32> to vector<1x64xf32>
    %34 = vector.broadcast %33 : vector<1x64xf32> to vector<8x64xf32>
    %35 = arith.addf %31, %34 : vector<8x64xf32>
    %36 = vector.extract_strided_slice %21 {offsets = [0, 0], sizes = [8, 16], strides = [1, 1]} : vector<8x64xf32> to vector<8x16xf32>
    %37 = arith.truncf %36 : vector<8x16xf32> to vector<8x16xbf16>
    %38 = vector.extract_strided_slice %28 {offsets = [0, 0], sizes = [8, 16], strides = [1, 1]} : vector<8x64xf32> to vector<8x16xf32>
    %39 = arith.truncf %38 : vector<8x16xf32> to vector<8x16xbf16>
    %40 = vector.extract_strided_slice %35 {offsets = [0, 0], sizes = [8, 16], strides = [1, 1]} : vector<8x64xf32> to vector<8x16xf32>
    %41 = arith.truncf %40 : vector<8x16xf32> to vector<8x16xbf16>
    %cst_33 = arith.constant dense<0.000000e+00> : vector<8x8xf32>
    %42 = tpu.matmul %37, %39, %cst_33 {dimension_numbers = #tpu.dot_dimension_numbers<[1], [1], [0], [0], [0, 0, 1, 0], [], []>} : vector<8x16xbf16>, vector<8x16xbf16>, vector<8x8xf32> -> vector<8x8xf32>
    %43 = vector.broadcast %1 : vector<1x8xf32> to vector<8x8xf32>
    %44 = arith.addf %42, %43 : vector<8x8xf32>
    %cst_34 = arith.constant dense<0xFF800000> : vector<8xf32>
    %45 = vector.multi_reduction <maximumf>, %44, %cst_34 [1] : vector<8x8xf32> to vector<8xf32>
    %46 = vector.shape_cast %45 : vector<8xf32> to vector<8x1xf32>
    %47 = vector.broadcast %46 : vector<8x1xf32> to vector<8x8xf32>
    %48 = arith.subf %44, %47 : vector<8x8xf32>
    %49 = math.exp %48 : vector<8x8xf32>
    %cst_35 = arith.constant dense<0.000000e+00> : vector<8xf32>
    %50 = vector.multi_reduction <add>, %49, %cst_35 [1] : vector<8x8xf32> to vector<8xf32>
    %51 = vector.shape_cast %50 : vector<8xf32> to vector<8x1xf32>
    %52 = arith.truncf %49 : vector<8x8xf32> to vector<8x8xbf16>
    %cst_36 = arith.constant dense<0.000000e+00> : vector<8x16xf32>
    %53 = tpu.matmul %52, %41, %cst_36 {dimension_numbers = #tpu.dot_dimension_numbers<[1], [0], [0], [1], [0, 0, 1, 1], [], []>} : vector<8x8xbf16>, vector<8x16xbf16>, vector<8x16xf32> -> vector<8x16xf32>
    %54 = tpu.reciprocal %51 {approx = true} : vector<8x1xf32> -> vector<8x1xf32>
    %55 = vector.broadcast %54 : vector<8x1xf32> to vector<8x16xf32>
    %56 = arith.mulf %53, %55 : vector<8x16xf32>
    %c0_37 = arith.constant 0 : index
    %c0_38 = arith.constant 0 : index
    %57 = vector.load %arg26[%c0_37, %c0_38] : memref<8x64xf32, #tpu.memory_space<vmem>>, vector<8x16xf32>
    tpu.vector_store %arg26[%c0_37, %c0_38], %56 {strides = array<i32>} : memref<8x64xf32, #tpu.memory_space<vmem>>, vector<8x16xf32>,
    %58 = vector.extract_strided_slice %21 {offsets = [0, 16], sizes = [8, 16], strides = [1, 1]} : vector<8x64xf32> to vector<8x16xf32>
    %59 = arith.truncf %58 : vector<8x16xf32> to vector<8x16xbf16>
    %60 = vector.extract_strided_slice %28 {offsets = [0, 16], sizes = [8, 16], strides = [1, 1]} : vector<8x64xf32> to vector<8x16xf32>
    %61 = arith.truncf %60 : vector<8x16xf32> to vector<8x16xbf16>
    %62 = vector.extract_strided_slice %35 {offsets = [0, 16], sizes = [8, 16], strides = [1, 1]} : vector<8x64xf32> to vector<8x16xf32>
    %63 = arith.truncf %62 : vector<8x16xf32> to vector<8x16xbf16>
    %cst_39 = arith.constant dense<0.000000e+00> : vector<8x8xf32>
    %64 = tpu.matmul %59, %61, %cst_39 {dimension_numbers = #tpu.dot_dimension_numbers<[1], [1], [0], [0], [0, 0, 1, 0], [], []>} : vector<8x16xbf16>, vector<8x16xbf16>, vector<8x8xf32> -> vector<8x8xf32>
    %65 = vector.broadcast %1 : vector<1x8xf32> to vector<8x8xf32>
    %66 = arith.addf %64, %65 : vector<8x8xf32>
    %cst_40 = arith.constant dense<0xFF800000> : vector<8xf32>
    %67 = vector.multi_reduction <maximumf>, %66, %cst_40 [1] : vector<8x8xf32> to vector<8xf32>
    %68 = vector.shape_cast %67 : vector<8xf32> to vector<8x1xf32>
    %69 = vector.broadcast %68 : vector<8x1xf32> to vector<8x8xf32>
    %70 = arith.subf %66, %69 : vector<8x8xf32>
    %71 = math.exp %70 : vector<8x8xf32>
    %cst_41 = arith.constant dense<0.000000e+00> : vector<8xf32>
    %72 = vector.multi_reduction <add>, %71, %cst_41 [1] : vector<8x8xf32> to vector<8xf32>
    %73 = vector.shape_cast %72 : vector<8xf32> to vector<8x1xf32>
    %74 = arith.truncf %71 : vector<8x8xf32> to vector<8x8xbf16>
    %cst_42 = arith.constant dense<0.000000e+00> : vector<8x16xf32>
    %75 = tpu.matmul %74, %63, %cst_42 {dimension_numbers = #tpu.dot_dimension_numbers<[1], [0], [0], [1], [0, 0, 1, 1], [], []>} : vector<8x8xbf16>, vector<8x16xbf16>, vector<8x16xf32> -> vector<8x16xf32>
    %76 = tpu.reciprocal %73 {approx = true} : vector<8x1xf32> -> vector<8x1xf32>
    %77 = vector.broadcast %76 : vector<8x1xf32> to vector<8x16xf32>
    %78 = arith.mulf %75, %77 : vector<8x16xf32>
    %c0_43 = arith.constant 0 : index
    %c16 = arith.constant 16 : index
    %79 = vector.load %arg26[%c0_43, %c16] : memref<8x64xf32, #tpu.memory_space<vmem>>, vector<8x16xf32>
    tpu.vector_store %arg26[%c0_43, %c16], %78 {strides = array<i32>} : memref<8x64xf32, #tpu.memory_space<vmem>>, vector<8x16xf32>,
    %80 = vector.extract_strided_slice %21 {offsets = [0, 32], sizes = [8, 16], strides = [1, 1]} : vector<8x64xf32> to vector<8x16xf32>
    %81 = arith.truncf %80 : vector<8x16xf32> to vector<8x16xbf16>
    %82 = vector.extract_strided_slice %28 {offsets = [0, 32], sizes = [8, 16], strides = [1, 1]} : vector<8x64xf32> to vector<8x16xf32>
    %83 = arith.truncf %82 : vector<8x16xf32> to vector<8x16xbf16>
    %84 = vector.extract_strided_slice %35 {offsets = [0, 32], sizes = [8, 16], strides = [1, 1]} : vector<8x64xf32> to vector<8x16xf32>
    %85 = arith.truncf %84 : vector<8x16xf32> to vector<8x16xbf16>
    %cst_44 = arith.constant dense<0.000000e+00> : vector<8x8xf32>
    %86 = tpu.matmul %81, %83, %cst_44 {dimension_numbers = #tpu.dot_dimension_numbers<[1], [1], [0], [0], [0, 0, 1, 0], [], []>} : vector<8x16xbf16>, vector<8x16xbf16>, vector<8x8xf32> -> vector<8x8xf32>
    %87 = vector.broadcast %1 : vector<1x8xf32> to vector<8x8xf32>
    %88 = arith.addf %86, %87 : vector<8x8xf32>
    %cst_45 = arith.constant dense<0xFF800000> : vector<8xf32>
    %89 = vector.multi_reduction <maximumf>, %88, %cst_45 [1] : vector<8x8xf32> to vector<8xf32>
    %90 = vector.shape_cast %89 : vector<8xf32> to vector<8x1xf32>
    %91 = vector.broadcast %90 : vector<8x1xf32> to vector<8x8xf32>
    %92 = arith.subf %88, %91 : vector<8x8xf32>
    %93 = math.exp %92 : vector<8x8xf32>
    %cst_46 = arith.constant dense<0.000000e+00> : vector<8xf32>
    %94 = vector.multi_reduction <add>, %93, %cst_46 [1] : vector<8x8xf32> to vector<8xf32>
    %95 = vector.shape_cast %94 : vector<8xf32> to vector<8x1xf32>
    %96 = arith.truncf %93 : vector<8x8xf32> to vector<8x8xbf16>
    %cst_47 = arith.constant dense<0.000000e+00> : vector<8x16xf32>
    %97 = tpu.matmul %96, %85, %cst_47 {dimension_numbers = #tpu.dot_dimension_numbers<[1], [0], [0], [1], [0, 0, 1, 1], [], []>} : vector<8x8xbf16>, vector<8x16xbf16>, vector<8x16xf32> -> vector<8x16xf32>
    %98 = tpu.reciprocal %95 {approx = true} : vector<8x1xf32> -> vector<8x1xf32>
    %99 = vector.broadcast %98 : vector<8x1xf32> to vector<8x16xf32>
    %100 = arith.mulf %97, %99 : vector<8x16xf32>
    %c0_48 = arith.constant 0 : index
    %c32 = arith.constant 32 : index
    %101 = vector.load %arg26[%c0_48, %c32] : memref<8x64xf32, #tpu.memory_space<vmem>>, vector<8x16xf32>
    tpu.vector_store %arg26[%c0_48, %c32], %100 {strides = array<i32>} : memref<8x64xf32, #tpu.memory_space<vmem>>, vector<8x16xf32>,
    %102 = vector.extract_strided_slice %21 {offsets = [0, 48], sizes = [8, 16], strides = [1, 1]} : vector<8x64xf32> to vector<8x16xf32>
    %103 = arith.truncf %102 : vector<8x16xf32> to vector<8x16xbf16>
    %104 = vector.extract_strided_slice %28 {offsets = [0, 48], sizes = [8, 16], strides = [1, 1]} : vector<8x64xf32> to vector<8x16xf32>
    %105 = arith.truncf %104 : vector<8x16xf32> to vector<8x16xbf16>
    %106 = vector.extract_strided_slice %35 {offsets = [0, 48], sizes = [8, 16], strides = [1, 1]} : vector<8x64xf32> to vector<8x16xf32>
    %107 = arith.truncf %106 : vector<8x16xf32> to vector<8x16xbf16>
    %cst_49 = arith.constant dense<0.000000e+00> : vector<8x8xf32>
    %108 = tpu.matmul %103, %105, %cst_49 {dimension_numbers = #tpu.dot_dimension_numbers<[1], [1], [0], [0], [0, 0, 1, 0], [], []>} : vector<8x16xbf16>, vector<8x16xbf16>, vector<8x8xf32> -> vector<8x8xf32>
    %109 = vector.broadcast %1 : vector<1x8xf32> to vector<8x8xf32>
    %110 = arith.addf %108, %109 : vector<8x8xf32>
    %cst_50 = arith.constant dense<0xFF800000> : vector<8xf32>
    %111 = vector.multi_reduction <maximumf>, %110, %cst_50 [1] : vector<8x8xf32> to vector<8xf32>
    %112 = vector.shape_cast %111 : vector<8xf32> to vector<8x1xf32>
    %113 = vector.broadcast %112 : vector<8x1xf32> to vector<8x8xf32>
    %114 = arith.subf %110, %113 : vector<8x8xf32>
    %115 = math.exp %114 : vector<8x8xf32>
    %cst_51 = arith.constant dense<0.000000e+00> : vector<8xf32>
    %116 = vector.multi_reduction <add>, %115, %cst_51 [1] : vector<8x8xf32> to vector<8xf32>
    %117 = vector.shape_cast %116 : vector<8xf32> to vector<8x1xf32>
    %118 = arith.truncf %115 : vector<8x8xf32> to vector<8x8xbf16>
    %cst_52 = arith.constant dense<0.000000e+00> : vector<8x16xf32>
    %119 = tpu.matmul %118, %107, %cst_52 {dimension_numbers = #tpu.dot_dimension_numbers<[1], [0], [0], [1], [0, 0, 1, 1], [], []>} : vector<8x8xbf16>, vector<8x16xbf16>, vector<8x16xf32> -> vector<8x16xf32>
    %120 = tpu.reciprocal %117 {approx = true} : vector<8x1xf32> -> vector<8x1xf32>
    %121 = vector.broadcast %120 : vector<8x1xf32> to vector<8x16xf32>
    %122 = arith.mulf %119, %121 : vector<8x16xf32>
    %c0_53 = arith.constant 0 : index
    %c48 = arith.constant 48 : index
    %123 = vector.load %arg26[%c0_53, %c48] : memref<8x64xf32, #tpu.memory_space<vmem>>, vector<8x16xf32>
    tpu.vector_store %arg26[%c0_53, %c48], %122 {strides = array<i32>} : memref<8x64xf32, #tpu.memory_space<vmem>>, vector<8x16xf32>,
    %c0_54 = arith.constant 0 : index
    %c0_55 = arith.constant 0 : index
    %124 = vector.load %arg26[%c0_54, %c0_55] : memref<8x64xf32, #tpu.memory_space<vmem>>, vector<8x64xf32>
    %125 = arith.truncf %124 : vector<8x64xf32> to vector<8x64xbf16>
    %c0_56 = arith.constant 0 : index
    %c0_57 = arith.constant 0 : index
    %c0_58 = arith.constant 0 : index
    %126 = vector.load %arg13[%c0_56, %c0_57, %c0_58] : memref<3x64x64xbf16, #tpu.memory_space<vmem>>, vector<1x64x64xbf16>
    %127 = vector.shape_cast %126 : vector<1x64x64xbf16> to vector<64x64xbf16>
    %cst_59 = arith.constant dense<0.000000e+00> : vector<8x64xf32>
    %128 = tpu.matmul %125, %127, %cst_59 {dimension_numbers = #tpu.dot_dimension_numbers<[1], [0], [0], [1], [0, 0, 1, 1], [], []>} : vector<8x64xbf16>, vector<64x64xbf16>, vector<8x64xf32> -> vector<8x64xf32>
    %c0_60 = arith.constant 0 : index
    %c0_61 = arith.constant 0 : index
    %c0_62 = arith.constant 0 : index
    %129 = vector.load %arg14[%c0_60, %c0_61, %c0_62] : memref<3x1x64xf32, #tpu.memory_space<vmem>>, vector<1x1x64xf32>
    %130 = vector.shape_cast %129 : vector<1x1x64xf32> to vector<1x64xf32>
    %131 = vector.broadcast %130 : vector<1x64xf32> to vector<8x64xf32>
    %132 = arith.addf %128, %131 : vector<8x64xf32>
    %133 = arith.addf %11, %132 : vector<8x64xf32>
    %c0_63 = arith.constant 0 : index
    %c0_64 = arith.constant 0 : index
    %c0_65 = arith.constant 0 : index
    %134 = vector.load %arg15[%c0_63, %c0_64, %c0_65] : memref<3x1x64xf32, #tpu.memory_space<vmem>>, vector<1x1x64xf32>
    %135 = vector.shape_cast %134 : vector<1x1x64xf32> to vector<1x64xf32>
    %c0_66 = arith.constant 0 : index
    %c0_67 = arith.constant 0 : index
    %c0_68 = arith.constant 0 : index
    %136 = vector.load %arg16[%c0_66, %c0_67, %c0_68] : memref<3x1x64xf32, #tpu.memory_space<vmem>>, vector<1x1x64xf32>
    %137 = vector.shape_cast %136 : vector<1x1x64xf32> to vector<1x64xf32>
    %cst_69 = arith.constant dense<0.000000e+00> : vector<8xf32>
    %138 = vector.multi_reduction <add>, %133, %cst_69 [1] : vector<8x64xf32> to vector<8xf32>
    %139 = vector.shape_cast %138 : vector<8xf32> to vector<8x1xf32>
    %cst_70 = arith.constant 6.400000e+01 : f32
    %140 = vector.broadcast %cst_70 : f32 to vector<8x1xf32>
    %141 = arith.divf %139, %140 : vector<8x1xf32>
    %142 = vector.broadcast %141 : vector<8x1xf32> to vector<8x64xf32>
    %143 = arith.subf %133, %142 : vector<8x64xf32>
    %144 = arith.mulf %143, %143 : vector<8x64xf32>
    %cst_71 = arith.constant dense<0.000000e+00> : vector<8xf32>
    %145 = vector.multi_reduction <add>, %144, %cst_71 [1] : vector<8x64xf32> to vector<8xf32>
    %146 = vector.shape_cast %145 : vector<8xf32> to vector<8x1xf32>
    %cst_72 = arith.constant 6.400000e+01 : f32
    %147 = vector.broadcast %cst_72 : f32 to vector<8x1xf32>
    %148 = arith.divf %146, %147 : vector<8x1xf32>
    %149 = vector.broadcast %141 : vector<8x1xf32> to vector<8x64xf32>
    %150 = arith.subf %133, %149 : vector<8x64xf32>
    %cst_73 = arith.constant 9.99999974E-6 : f32
    %151 = vector.broadcast %cst_73 : f32 to vector<8x1xf32>
    %152 = arith.addf %148, %151 : vector<8x1xf32>
    %153 = math.rsqrt %152 : vector<8x1xf32>
    %154 = vector.broadcast %153 : vector<8x1xf32> to vector<8x64xf32>
    %155 = arith.mulf %150, %154 : vector<8x64xf32>
    %156 = vector.broadcast %135 : vector<1x64xf32> to vector<8x64xf32>
    %157 = arith.mulf %155, %156 : vector<8x64xf32>
    %158 = vector.broadcast %137 : vector<1x64xf32> to vector<8x64xf32>
    %159 = arith.addf %157, %158 : vector<8x64xf32>
    %160 = arith.truncf %159 : vector<8x64xf32> to vector<8x64xbf16>
    %c0_74 = arith.constant 0 : index
    %c0_75 = arith.constant 0 : index
    %c0_76 = arith.constant 0 : index
    %161 = vector.load %arg17[%c0_74, %c0_75, %c0_76] : memref<3x64x2048xbf16, #tpu.memory_space<vmem>>, vector<1x64x2048xbf16>
    %162 = vector.shape_cast %161 : vector<1x64x2048xbf16> to vector<64x2048xbf16>
    %cst_77 = arith.constant dense<0.000000e+00> : vector<8x2048xf32>
    %163 = tpu.matmul %160, %162, %cst_77 {dimension_numbers = #tpu.dot_dimension_numbers<[1], [0], [0], [1], [0, 0, 1, 1], [], []>} : vector<8x64xbf16>, vector<64x2048xbf16>, vector<8x2048xf32> -> vector<8x2048xf32>
    %c0_78 = arith.constant 0 : index
    %c0_79 = arith.constant 0 : index
    %c0_80 = arith.constant 0 : index
    %164 = vector.load %arg18[%c0_78, %c0_79, %c0_80] : memref<3x1x2048xf32, #tpu.memory_space<vmem>>, vector<1x1x2048xf32>
    %165 = vector.shape_cast %164 : vector<1x1x2048xf32> to vector<1x2048xf32>
    %166 = vector.broadcast %165 : vector<1x2048xf32> to vector<8x2048xf32>
    %167 = arith.addf %163, %166 : vector<8x2048xf32>
    %cst_81 = arith.constant 0.000000e+00 : f32
    %168 = vector.broadcast %cst_81 : f32 to vector<8x2048xf32>
    %169 = arith.maximumf %167, %168 : vector<8x2048xf32>
    %170 = arith.truncf %169 : vector<8x2048xf32> to vector<8x2048xbf16>
    %c0_82 = arith.constant 0 : index
    %c0_83 = arith.constant 0 : index
    %c0_84 = arith.constant 0 : index
    %171 = vector.load %arg19[%c0_82, %c0_83, %c0_84] : memref<3x2048x64xbf16, #tpu.memory_space<vmem>>, vector<1x2048x64xbf16>
    %172 = vector.shape_cast %171 : vector<1x2048x64xbf16> to vector<2048x64xbf16>
    %cst_85 = arith.constant dense<0.000000e+00> : vector<8x64xf32>
    %173 = tpu.matmul %170, %172, %cst_85 {dimension_numbers = #tpu.dot_dimension_numbers<[1], [0], [0], [1], [0, 0, 1, 1], [], []>} : vector<8x2048xbf16>, vector<2048x64xbf16>, vector<8x64xf32> -> vector<8x64xf32>
    %c0_86 = arith.constant 0 : index
    %c0_87 = arith.constant 0 : index
    %c0_88 = arith.constant 0 : index
    %174 = vector.load %arg20[%c0_86, %c0_87, %c0_88] : memref<3x1x64xf32, #tpu.memory_space<vmem>>, vector<1x1x64xf32>
    %175 = vector.shape_cast %174 : vector<1x1x64xf32> to vector<1x64xf32>
    %176 = vector.broadcast %175 : vector<1x64xf32> to vector<8x64xf32>
    %177 = arith.addf %173, %176 : vector<8x64xf32>
    %178 = arith.addf %159, %177 : vector<8x64xf32>
    %c0_89 = arith.constant 0 : index
    %c0_90 = arith.constant 0 : index
    %c0_91 = arith.constant 0 : index
    %179 = vector.load %arg21[%c0_89, %c0_90, %c0_91] : memref<3x1x64xf32, #tpu.memory_space<vmem>>, vector<1x1x64xf32>
    %180 = vector.shape_cast %179 : vector<1x1x64xf32> to vector<1x64xf32>
    %c0_92 = arith.constant 0 : index
    %c0_93 = arith.constant 0 : index
    %c0_94 = arith.constant 0 : index
    %181 = vector.load %arg22[%c0_92, %c0_93, %c0_94] : memref<3x1x64xf32, #tpu.memory_space<vmem>>, vector<1x1x64xf32>
    %182 = vector.shape_cast %181 : vector<1x1x64xf32> to vector<1x64xf32>
    %cst_95 = arith.constant dense<0.000000e+00> : vector<8xf32>
    %183 = vector.multi_reduction <add>, %178, %cst_95 [1] : vector<8x64xf32> to vector<8xf32>
    %184 = vector.shape_cast %183 : vector<8xf32> to vector<8x1xf32>
    %cst_96 = arith.constant 6.400000e+01 : f32
    %185 = vector.broadcast %cst_96 : f32 to vector<8x1xf32>
    %186 = arith.divf %184, %185 : vector<8x1xf32>
    %187 = vector.broadcast %186 : vector<8x1xf32> to vector<8x64xf32>
    %188 = arith.subf %178, %187 : vector<8x64xf32>
    %189 = arith.mulf %188, %188 : vector<8x64xf32>
    %cst_97 = arith.constant dense<0.000000e+00> : vector<8xf32>
    %190 = vector.multi_reduction <add>, %189, %cst_97 [1] : vector<8x64xf32> to vector<8xf32>
    %191 = vector.shape_cast %190 : vector<8xf32> to vector<8x1xf32>
    %cst_98 = arith.constant 6.400000e+01 : f32
    %192 = vector.broadcast %cst_98 : f32 to vector<8x1xf32>
    %193 = arith.divf %191, %192 : vector<8x1xf32>
    %194 = vector.broadcast %186 : vector<8x1xf32> to vector<8x64xf32>
    %195 = arith.subf %178, %194 : vector<8x64xf32>
    %cst_99 = arith.constant 9.99999974E-6 : f32
    %196 = vector.broadcast %cst_99 : f32 to vector<8x1xf32>
    %197 = arith.addf %193, %196 : vector<8x1xf32>
    %198 = math.rsqrt %197 : vector<8x1xf32>
    %199 = vector.broadcast %198 : vector<8x1xf32> to vector<8x64xf32>
    %200 = arith.mulf %195, %199 : vector<8x64xf32>
    %201 = vector.broadcast %180 : vector<1x64xf32> to vector<8x64xf32>
    %202 = arith.mulf %200, %201 : vector<8x64xf32>
    %203 = vector.broadcast %182 : vector<1x64xf32> to vector<8x64xf32>
    %204 = arith.addf %202, %203 : vector<8x64xf32>
    %205 = arith.truncf %204 : vector<8x64xf32> to vector<8x64xbf16>
    %c1 = arith.constant 1 : index
    %c0_100 = arith.constant 0 : index
    %c0_101 = arith.constant 0 : index
    %206 = vector.load %arg7[%c1, %c0_100, %c0_101] : memref<3x64x64xbf16, #tpu.memory_space<vmem>>, vector<1x64x64xbf16>
    %207 = vector.shape_cast %206 : vector<1x64x64xbf16> to vector<64x64xbf16>
    %cst_102 = arith.constant dense<0.000000e+00> : vector<8x64xf32>
    %208 = tpu.matmul %205, %207, %cst_102 {dimension_numbers = #tpu.dot_dimension_numbers<[1], [0], [0], [1], [0, 0, 1, 1], [], []>} : vector<8x64xbf16>, vector<64x64xbf16>, vector<8x64xf32> -> vector<8x64xf32>
    %c1_103 = arith.constant 1 : index
    %c0_104 = arith.constant 0 : index
    %c0_105 = arith.constant 0 : index
    %209 = vector.load %arg8[%c1_103, %c0_104, %c0_105] : memref<3x1x64xf32, #tpu.memory_space<vmem>>, vector<1x1x64xf32>
    %210 = vector.shape_cast %209 : vector<1x1x64xf32> to vector<1x64xf32>
    %211 = vector.broadcast %210 : vector<1x64xf32> to vector<8x64xf32>
    %212 = arith.addf %208, %211 : vector<8x64xf32>
    %cst_106 = arith.constant 2.500000e-01 : f32
    %213 = vector.broadcast %cst_106 : f32 to vector<8x64xf32>
    %214 = arith.mulf %212, %213 : vector<8x64xf32>
    %c1_107 = arith.constant 1 : index
    %c0_108 = arith.constant 0 : index
    %c0_109 = arith.constant 0 : index
    %215 = vector.load %arg9[%c1_107, %c0_108, %c0_109] : memref<3x64x64xbf16, #tpu.memory_space<vmem>>, vector<1x64x64xbf16>
    %216 = vector.shape_cast %215 : vector<1x64x64xbf16> to vector<64x64xbf16>
    %cst_110 = arith.constant dense<0.000000e+00> : vector<8x64xf32>
    %217 = tpu.matmul %205, %216, %cst_110 {dimension_numbers = #tpu.dot_dimension_numbers<[1], [0], [0], [1], [0, 0, 1, 1], [], []>} : vector<8x64xbf16>, vector<64x64xbf16>, vector<8x64xf32> -> vector<8x64xf32>
    %c1_111 = arith.constant 1 : index
    %c0_112 = arith.constant 0 : index
    %c0_113 = arith.constant 0 : index
    %218 = vector.load %arg10[%c1_111, %c0_112, %c0_113] : memref<3x1x64xf32, #tpu.memory_space<vmem>>, vector<1x1x64xf32>
    %219 = vector.shape_cast %218 : vector<1x1x64xf32> to vector<1x64xf32>
    %220 = vector.broadcast %219 : vector<1x64xf32> to vector<8x64xf32>
    %221 = arith.addf %217, %220 : vector<8x64xf32>
    %c1_114 = arith.constant 1 : index
    %c0_115 = arith.constant 0 : index
    %c0_116 = arith.constant 0 : index
    %222 = vector.load %arg11[%c1_114, %c0_115, %c0_116] : memref<3x64x64xbf16, #tpu.memory_space<vmem>>, vector<1x64x64xbf16>
    %223 = vector.shape_cast %222 : vector<1x64x64xbf16> to vector<64x64xbf16>
    %cst_117 = arith.constant dense<0.000000e+00> : vector<8x64xf32>
    %224 = tpu.matmul %205, %223, %cst_117 {dimension_numbers = #tpu.dot_dimension_numbers<[1], [0], [0], [1], [0, 0, 1, 1], [], []>} : vector<8x64xbf16>, vector<64x64xbf16>, vector<8x64xf32> -> vector<8x64xf32>
    %c1_118 = arith.constant 1 : index
    %c0_119 = arith.constant 0 : index
    %c0_120 = arith.constant 0 : index
    %225 = vector.load %arg12[%c1_118, %c0_119, %c0_120] : memref<3x1x64xf32, #tpu.memory_space<vmem>>, vector<1x1x64xf32>
    %226 = vector.shape_cast %225 : vector<1x1x64xf32> to vector<1x64xf32>
    %227 = vector.broadcast %226 : vector<1x64xf32> to vector<8x64xf32>
    %228 = arith.addf %224, %227 : vector<8x64xf32>
    %229 = vector.extract_strided_slice %214 {offsets = [0, 0], sizes = [8, 16], strides = [1, 1]} : vector<8x64xf32> to vector<8x16xf32>
    %230 = arith.truncf %229 : vector<8x16xf32> to vector<8x16xbf16>
    %231 = vector.extract_strided_slice %221 {offsets = [0, 0], sizes = [8, 16], strides = [1, 1]} : vector<8x64xf32> to vector<8x16xf32>
    %232 = arith.truncf %231 : vector<8x16xf32> to vector<8x16xbf16>
    %233 = vector.extract_strided_slice %228 {offsets = [0, 0], sizes = [8, 16], strides = [1, 1]} : vector<8x64xf32> to vector<8x16xf32>
    %234 = arith.truncf %233 : vector<8x16xf32> to vector<8x16xbf16>
    %cst_121 = arith.constant dense<0.000000e+00> : vector<8x8xf32>
    %235 = tpu.matmul %230, %232, %cst_121 {dimension_numbers = #tpu.dot_dimension_numbers<[1], [1], [0], [0], [0, 0, 1, 0], [], []>} : vector<8x16xbf16>, vector<8x16xbf16>, vector<8x8xf32> -> vector<8x8xf32>
    %236 = vector.broadcast %1 : vector<1x8xf32> to vector<8x8xf32>
    %237 = arith.addf %235, %236 : vector<8x8xf32>
    %cst_122 = arith.constant dense<0xFF800000> : vector<8xf32>
    %238 = vector.multi_reduction <maximumf>, %237, %cst_122 [1] : vector<8x8xf32> to vector<8xf32>
    %239 = vector.shape_cast %238 : vector<8xf32> to vector<8x1xf32>
    %240 = vector.broadcast %239 : vector<8x1xf32> to vector<8x8xf32>
    %241 = arith.subf %237, %240 : vector<8x8xf32>
    %242 = math.exp %241 : vector<8x8xf32>
    %cst_123 = arith.constant dense<0.000000e+00> : vector<8xf32>
    %243 = vector.multi_reduction <add>, %242, %cst_123 [1] : vector<8x8xf32> to vector<8xf32>
    %244 = vector.shape_cast %243 : vector<8xf32> to vector<8x1xf32>
    %245 = arith.truncf %242 : vector<8x8xf32> to vector<8x8xbf16>
    %cst_124 = arith.constant dense<0.000000e+00> : vector<8x16xf32>
    %246 = tpu.matmul %245, %234, %cst_124 {dimension_numbers = #tpu.dot_dimension_numbers<[1], [0], [0], [1], [0, 0, 1, 1], [], []>} : vector<8x8xbf16>, vector<8x16xbf16>, vector<8x16xf32> -> vector<8x16xf32>
    %247 = tpu.reciprocal %244 {approx = true} : vector<8x1xf32> -> vector<8x1xf32>
    %248 = vector.broadcast %247 : vector<8x1xf32> to vector<8x16xf32>
    %249 = arith.mulf %246, %248 : vector<8x16xf32>
    %c0_125 = arith.constant 0 : index
    %c0_126 = arith.constant 0 : index
    %250 = vector.load %arg26[%c0_125, %c0_126] : memref<8x64xf32, #tpu.memory_space<vmem>>, vector<8x16xf32>
    tpu.vector_store %arg26[%c0_125, %c0_126], %249 {strides = array<i32>} : memref<8x64xf32, #tpu.memory_space<vmem>>, vector<8x16xf32>,
    %251 = vector.extract_strided_slice %214 {offsets = [0, 16], sizes = [8, 16], strides = [1, 1]} : vector<8x64xf32> to vector<8x16xf32>
    %252 = arith.truncf %251 : vector<8x16xf32> to vector<8x16xbf16>
    %253 = vector.extract_strided_slice %221 {offsets = [0, 16], sizes = [8, 16], strides = [1, 1]} : vector<8x64xf32> to vector<8x16xf32>
    %254 = arith.truncf %253 : vector<8x16xf32> to vector<8x16xbf16>
    %255 = vector.extract_strided_slice %228 {offsets = [0, 16], sizes = [8, 16], strides = [1, 1]} : vector<8x64xf32> to vector<8x16xf32>
    %256 = arith.truncf %255 : vector<8x16xf32> to vector<8x16xbf16>
    %cst_127 = arith.constant dense<0.000000e+00> : vector<8x8xf32>
    %257 = tpu.matmul %252, %254, %cst_127 {dimension_numbers = #tpu.dot_dimension_numbers<[1], [1], [0], [0], [0, 0, 1, 0], [], []>} : vector<8x16xbf16>, vector<8x16xbf16>, vector<8x8xf32> -> vector<8x8xf32>
    %258 = vector.broadcast %1 : vector<1x8xf32> to vector<8x8xf32>
    %259 = arith.addf %257, %258 : vector<8x8xf32>
    %cst_128 = arith.constant dense<0xFF800000> : vector<8xf32>
    %260 = vector.multi_reduction <maximumf>, %259, %cst_128 [1] : vector<8x8xf32> to vector<8xf32>
    %261 = vector.shape_cast %260 : vector<8xf32> to vector<8x1xf32>
    %262 = vector.broadcast %261 : vector<8x1xf32> to vector<8x8xf32>
    %263 = arith.subf %259, %262 : vector<8x8xf32>
    %264 = math.exp %263 : vector<8x8xf32>
    %cst_129 = arith.constant dense<0.000000e+00> : vector<8xf32>
    %265 = vector.multi_reduction <add>, %264, %cst_129 [1] : vector<8x8xf32> to vector<8xf32>
    %266 = vector.shape_cast %265 : vector<8xf32> to vector<8x1xf32>
    %267 = arith.truncf %264 : vector<8x8xf32> to vector<8x8xbf16>
    %cst_130 = arith.constant dense<0.000000e+00> : vector<8x16xf32>
    %268 = tpu.matmul %267, %256, %cst_130 {dimension_numbers = #tpu.dot_dimension_numbers<[1], [0], [0], [1], [0, 0, 1, 1], [], []>} : vector<8x8xbf16>, vector<8x16xbf16>, vector<8x16xf32> -> vector<8x16xf32>
    %269 = tpu.reciprocal %266 {approx = true} : vector<8x1xf32> -> vector<8x1xf32>
    %270 = vector.broadcast %269 : vector<8x1xf32> to vector<8x16xf32>
    %271 = arith.mulf %268, %270 : vector<8x16xf32>
    %c0_131 = arith.constant 0 : index
    %c16_132 = arith.constant 16 : index
    %272 = vector.load %arg26[%c0_131, %c16_132] : memref<8x64xf32, #tpu.memory_space<vmem>>, vector<8x16xf32>
    tpu.vector_store %arg26[%c0_131, %c16_132], %271 {strides = array<i32>} : memref<8x64xf32, #tpu.memory_space<vmem>>, vector<8x16xf32>,
    %273 = vector.extract_strided_slice %214 {offsets = [0, 32], sizes = [8, 16], strides = [1, 1]} : vector<8x64xf32> to vector<8x16xf32>
    %274 = arith.truncf %273 : vector<8x16xf32> to vector<8x16xbf16>
    %275 = vector.extract_strided_slice %221 {offsets = [0, 32], sizes = [8, 16], strides = [1, 1]} : vector<8x64xf32> to vector<8x16xf32>
    %276 = arith.truncf %275 : vector<8x16xf32> to vector<8x16xbf16>
    %277 = vector.extract_strided_slice %228 {offsets = [0, 32], sizes = [8, 16], strides = [1, 1]} : vector<8x64xf32> to vector<8x16xf32>
    %278 = arith.truncf %277 : vector<8x16xf32> to vector<8x16xbf16>
    %cst_133 = arith.constant dense<0.000000e+00> : vector<8x8xf32>
    %279 = tpu.matmul %274, %276, %cst_133 {dimension_numbers = #tpu.dot_dimension_numbers<[1], [1], [0], [0], [0, 0, 1, 0], [], []>} : vector<8x16xbf16>, vector<8x16xbf16>, vector<8x8xf32> -> vector<8x8xf32>
    %280 = vector.broadcast %1 : vector<1x8xf32> to vector<8x8xf32>
    %281 = arith.addf %279, %280 : vector<8x8xf32>
    %cst_134 = arith.constant dense<0xFF800000> : vector<8xf32>
    %282 = vector.multi_reduction <maximumf>, %281, %cst_134 [1] : vector<8x8xf32> to vector<8xf32>
    %283 = vector.shape_cast %282 : vector<8xf32> to vector<8x1xf32>
    %284 = vector.broadcast %283 : vector<8x1xf32> to vector<8x8xf32>
    %285 = arith.subf %281, %284 : vector<8x8xf32>
    %286 = math.exp %285 : vector<8x8xf32>
    %cst_135 = arith.constant dense<0.000000e+00> : vector<8xf32>
    %287 = vector.multi_reduction <add>, %286, %cst_135 [1] : vector<8x8xf32> to vector<8xf32>
    %288 = vector.shape_cast %287 : vector<8xf32> to vector<8x1xf32>
    %289 = arith.truncf %286 : vector<8x8xf32> to vector<8x8xbf16>
    %cst_136 = arith.constant dense<0.000000e+00> : vector<8x16xf32>
    %290 = tpu.matmul %289, %278, %cst_136 {dimension_numbers = #tpu.dot_dimension_numbers<[1], [0], [0], [1], [0, 0, 1, 1], [], []>} : vector<8x8xbf16>, vector<8x16xbf16>, vector<8x16xf32> -> vector<8x16xf32>
    %291 = tpu.reciprocal %288 {approx = true} : vector<8x1xf32> -> vector<8x1xf32>
    %292 = vector.broadcast %291 : vector<8x1xf32> to vector<8x16xf32>
    %293 = arith.mulf %290, %292 : vector<8x16xf32>
    %c0_137 = arith.constant 0 : index
    %c32_138 = arith.constant 32 : index
    %294 = vector.load %arg26[%c0_137, %c32_138] : memref<8x64xf32, #tpu.memory_space<vmem>>, vector<8x16xf32>
    tpu.vector_store %arg26[%c0_137, %c32_138], %293 {strides = array<i32>} : memref<8x64xf32, #tpu.memory_space<vmem>>, vector<8x16xf32>,
    %295 = vector.extract_strided_slice %214 {offsets = [0, 48], sizes = [8, 16], strides = [1, 1]} : vector<8x64xf32> to vector<8x16xf32>
    %296 = arith.truncf %295 : vector<8x16xf32> to vector<8x16xbf16>
    %297 = vector.extract_strided_slice %221 {offsets = [0, 48], sizes = [8, 16], strides = [1, 1]} : vector<8x64xf32> to vector<8x16xf32>
    %298 = arith.truncf %297 : vector<8x16xf32> to vector<8x16xbf16>
    %299 = vector.extract_strided_slice %228 {offsets = [0, 48], sizes = [8, 16], strides = [1, 1]} : vector<8x64xf32> to vector<8x16xf32>
    %300 = arith.truncf %299 : vector<8x16xf32> to vector<8x16xbf16>
    %cst_139 = arith.constant dense<0.000000e+00> : vector<8x8xf32>
    %301 = tpu.matmul %296, %298, %cst_139 {dimension_numbers = #tpu.dot_dimension_numbers<[1], [1], [0], [0], [0, 0, 1, 0], [], []>} : vector<8x16xbf16>, vector<8x16xbf16>, vector<8x8xf32> -> vector<8x8xf32>
    %302 = vector.broadcast %1 : vector<1x8xf32> to vector<8x8xf32>
    %303 = arith.addf %301, %302 : vector<8x8xf32>
    %cst_140 = arith.constant dense<0xFF800000> : vector<8xf32>
    %304 = vector.multi_reduction <maximumf>, %303, %cst_140 [1] : vector<8x8xf32> to vector<8xf32>
    %305 = vector.shape_cast %304 : vector<8xf32> to vector<8x1xf32>
    %306 = vector.broadcast %305 : vector<8x1xf32> to vector<8x8xf32>
    %307 = arith.subf %303, %306 : vector<8x8xf32>
    %308 = math.exp %307 : vector<8x8xf32>
    %cst_141 = arith.constant dense<0.000000e+00> : vector<8xf32>
    %309 = vector.multi_reduction <add>, %308, %cst_141 [1] : vector<8x8xf32> to vector<8xf32>
    %310 = vector.shape_cast %309 : vector<8xf32> to vector<8x1xf32>
    %311 = arith.truncf %308 : vector<8x8xf32> to vector<8x8xbf16>
    %cst_142 = arith.constant dense<0.000000e+00> : vector<8x16xf32>
    %312 = tpu.matmul %311, %300, %cst_142 {dimension_numbers = #tpu.dot_dimension_numbers<[1], [0], [0], [1], [0, 0, 1, 1], [], []>} : vector<8x8xbf16>, vector<8x16xbf16>, vector<8x16xf32> -> vector<8x16xf32>
    %313 = tpu.reciprocal %310 {approx = true} : vector<8x1xf32> -> vector<8x1xf32>
    %314 = vector.broadcast %313 : vector<8x1xf32> to vector<8x16xf32>
    %315 = arith.mulf %312, %314 : vector<8x16xf32>
    %c0_143 = arith.constant 0 : index
    %c48_144 = arith.constant 48 : index
    %316 = vector.load %arg26[%c0_143, %c48_144] : memref<8x64xf32, #tpu.memory_space<vmem>>, vector<8x16xf32>
    tpu.vector_store %arg26[%c0_143, %c48_144], %315 {strides = array<i32>} : memref<8x64xf32, #tpu.memory_space<vmem>>, vector<8x16xf32>,
    %c0_145 = arith.constant 0 : index
    %c0_146 = arith.constant 0 : index
    %317 = vector.load %arg26[%c0_145, %c0_146] : memref<8x64xf32, #tpu.memory_space<vmem>>, vector<8x64xf32>
    %318 = arith.truncf %317 : vector<8x64xf32> to vector<8x64xbf16>
    %c1_147 = arith.constant 1 : index
    %c0_148 = arith.constant 0 : index
    %c0_149 = arith.constant 0 : index
    %319 = vector.load %arg13[%c1_147, %c0_148, %c0_149] : memref<3x64x64xbf16, #tpu.memory_space<vmem>>, vector<1x64x64xbf16>
    %320 = vector.shape_cast %319 : vector<1x64x64xbf16> to vector<64x64xbf16>
    %cst_150 = arith.constant dense<0.000000e+00> : vector<8x64xf32>
    %321 = tpu.matmul %318, %320, %cst_150 {dimension_numbers = #tpu.dot_dimension_numbers<[1], [0], [0], [1], [0, 0, 1, 1], [], []>} : vector<8x64xbf16>, vector<64x64xbf16>, vector<8x64xf32> -> vector<8x64xf32>
    %c1_151 = arith.constant 1 : index
    %c0_152 = arith.constant 0 : index
    %c0_153 = arith.constant 0 : index
    %322 = vector.load %arg14[%c1_151, %c0_152, %c0_153] : memref<3x1x64xf32, #tpu.memory_space<vmem>>, vector<1x1x64xf32>
    %323 = vector.shape_cast %322 : vector<1x1x64xf32> to vector<1x64xf32>
    %324 = vector.broadcast %323 : vector<1x64xf32> to vector<8x64xf32>
    %325 = arith.addf %321, %324 : vector<8x64xf32>
    %326 = arith.addf %204, %325 : vector<8x64xf32>
    %c1_154 = arith.constant 1 : index
    %c0_155 = arith.constant 0 : index
    %c0_156 = arith.constant 0 : index
    %327 = vector.load %arg15[%c1_154, %c0_155, %c0_156] : memref<3x1x64xf32, #tpu.memory_space<vmem>>, vector<1x1x64xf32>
    %328 = vector.shape_cast %327 : vector<1x1x64xf32> to vector<1x64xf32>
    %c1_157 = arith.constant 1 : index
    %c0_158 = arith.constant 0 : index
    %c0_159 = arith.constant 0 : index
    %329 = vector.load %arg16[%c1_157, %c0_158, %c0_159] : memref<3x1x64xf32, #tpu.memory_space<vmem>>, vector<1x1x64xf32>
    %330 = vector.shape_cast %329 : vector<1x1x64xf32> to vector<1x64xf32>
    %cst_160 = arith.constant dense<0.000000e+00> : vector<8xf32>
    %331 = vector.multi_reduction <add>, %326, %cst_160 [1] : vector<8x64xf32> to vector<8xf32>
    %332 = vector.shape_cast %331 : vector<8xf32> to vector<8x1xf32>
    %cst_161 = arith.constant 6.400000e+01 : f32
    %333 = vector.broadcast %cst_161 : f32 to vector<8x1xf32>
    %334 = arith.divf %332, %333 : vector<8x1xf32>
    %335 = vector.broadcast %334 : vector<8x1xf32> to vector<8x64xf32>
    %336 = arith.subf %326, %335 : vector<8x64xf32>
    %337 = arith.mulf %336, %336 : vector<8x64xf32>
    %cst_162 = arith.constant dense<0.000000e+00> : vector<8xf32>
    %338 = vector.multi_reduction <add>, %337, %cst_162 [1] : vector<8x64xf32> to vector<8xf32>
    %339 = vector.shape_cast %338 : vector<8xf32> to vector<8x1xf32>
    %cst_163 = arith.constant 6.400000e+01 : f32
    %340 = vector.broadcast %cst_163 : f32 to vector<8x1xf32>
    %341 = arith.divf %339, %340 : vector<8x1xf32>
    %342 = vector.broadcast %334 : vector<8x1xf32> to vector<8x64xf32>
    %343 = arith.subf %326, %342 : vector<8x64xf32>
    %cst_164 = arith.constant 9.99999974E-6 : f32
    %344 = vector.broadcast %cst_164 : f32 to vector<8x1xf32>
    %345 = arith.addf %341, %344 : vector<8x1xf32>
    %346 = math.rsqrt %345 : vector<8x1xf32>
    %347 = vector.broadcast %346 : vector<8x1xf32> to vector<8x64xf32>
    %348 = arith.mulf %343, %347 : vector<8x64xf32>
    %349 = vector.broadcast %328 : vector<1x64xf32> to vector<8x64xf32>
    %350 = arith.mulf %348, %349 : vector<8x64xf32>
    %351 = vector.broadcast %330 : vector<1x64xf32> to vector<8x64xf32>
    %352 = arith.addf %350, %351 : vector<8x64xf32>
    %353 = arith.truncf %352 : vector<8x64xf32> to vector<8x64xbf16>
    %c1_165 = arith.constant 1 : index
    %c0_166 = arith.constant 0 : index
    %c0_167 = arith.constant 0 : index
    %354 = vector.load %arg17[%c1_165, %c0_166, %c0_167] : memref<3x64x2048xbf16, #tpu.memory_space<vmem>>, vector<1x64x2048xbf16>
    %355 = vector.shape_cast %354 : vector<1x64x2048xbf16> to vector<64x2048xbf16>
    %cst_168 = arith.constant dense<0.000000e+00> : vector<8x2048xf32>
    %356 = tpu.matmul %353, %355, %cst_168 {dimension_numbers = #tpu.dot_dimension_numbers<[1], [0], [0], [1], [0, 0, 1, 1], [], []>} : vector<8x64xbf16>, vector<64x2048xbf16>, vector<8x2048xf32> -> vector<8x2048xf32>
    %c1_169 = arith.constant 1 : index
    %c0_170 = arith.constant 0 : index
    %c0_171 = arith.constant 0 : index
    %357 = vector.load %arg18[%c1_169, %c0_170, %c0_171] : memref<3x1x2048xf32, #tpu.memory_space<vmem>>, vector<1x1x2048xf32>
    %358 = vector.shape_cast %357 : vector<1x1x2048xf32> to vector<1x2048xf32>
    %359 = vector.broadcast %358 : vector<1x2048xf32> to vector<8x2048xf32>
    %360 = arith.addf %356, %359 : vector<8x2048xf32>
    %cst_172 = arith.constant 0.000000e+00 : f32
    %361 = vector.broadcast %cst_172 : f32 to vector<8x2048xf32>
    %362 = arith.maximumf %360, %361 : vector<8x2048xf32>
    %363 = arith.truncf %362 : vector<8x2048xf32> to vector<8x2048xbf16>
    %c1_173 = arith.constant 1 : index
    %c0_174 = arith.constant 0 : index
    %c0_175 = arith.constant 0 : index
    %364 = vector.load %arg19[%c1_173, %c0_174, %c0_175] : memref<3x2048x64xbf16, #tpu.memory_space<vmem>>, vector<1x2048x64xbf16>
    %365 = vector.shape_cast %364 : vector<1x2048x64xbf16> to vector<2048x64xbf16>
    %cst_176 = arith.constant dense<0.000000e+00> : vector<8x64xf32>
    %366 = tpu.matmul %363, %365, %cst_176 {dimension_numbers = #tpu.dot_dimension_numbers<[1], [0], [0], [1], [0, 0, 1, 1], [], []>} : vector<8x2048xbf16>, vector<2048x64xbf16>, vector<8x64xf32> -> vector<8x64xf32>
    %c1_177 = arith.constant 1 : index
    %c0_178 = arith.constant 0 : index
    %c0_179 = arith.constant 0 : index
    %367 = vector.load %arg20[%c1_177, %c0_178, %c0_179] : memref<3x1x64xf32, #tpu.memory_space<vmem>>, vector<1x1x64xf32>
    %368 = vector.shape_cast %367 : vector<1x1x64xf32> to vector<1x64xf32>
    %369 = vector.broadcast %368 : vector<1x64xf32> to vector<8x64xf32>
    %370 = arith.addf %366, %369 : vector<8x64xf32>
    %371 = arith.addf %352, %370 : vector<8x64xf32>
    %c1_180 = arith.constant 1 : index
    %c0_181 = arith.constant 0 : index
    %c0_182 = arith.constant 0 : index
    %372 = vector.load %arg21[%c1_180, %c0_181, %c0_182] : memref<3x1x64xf32, #tpu.memory_space<vmem>>, vector<1x1x64xf32>
    %373 = vector.shape_cast %372 : vector<1x1x64xf32> to vector<1x64xf32>
    %c1_183 = arith.constant 1 : index
    %c0_184 = arith.constant 0 : index
    %c0_185 = arith.constant 0 : index
    %374 = vector.load %arg22[%c1_183, %c0_184, %c0_185] : memref<3x1x64xf32, #tpu.memory_space<vmem>>, vector<1x1x64xf32>
    %375 = vector.shape_cast %374 : vector<1x1x64xf32> to vector<1x64xf32>
    %cst_186 = arith.constant dense<0.000000e+00> : vector<8xf32>
    %376 = vector.multi_reduction <add>, %371, %cst_186 [1] : vector<8x64xf32> to vector<8xf32>
    %377 = vector.shape_cast %376 : vector<8xf32> to vector<8x1xf32>
    %cst_187 = arith.constant 6.400000e+01 : f32
    %378 = vector.broadcast %cst_187 : f32 to vector<8x1xf32>
    %379 = arith.divf %377, %378 : vector<8x1xf32>
    %380 = vector.broadcast %379 : vector<8x1xf32> to vector<8x64xf32>
    %381 = arith.subf %371, %380 : vector<8x64xf32>
    %382 = arith.mulf %381, %381 : vector<8x64xf32>
    %cst_188 = arith.constant dense<0.000000e+00> : vector<8xf32>
    %383 = vector.multi_reduction <add>, %382, %cst_188 [1] : vector<8x64xf32> to vector<8xf32>
    %384 = vector.shape_cast %383 : vector<8xf32> to vector<8x1xf32>
    %cst_189 = arith.constant 6.400000e+01 : f32
    %385 = vector.broadcast %cst_189 : f32 to vector<8x1xf32>
    %386 = arith.divf %384, %385 : vector<8x1xf32>
    %387 = vector.broadcast %379 : vector<8x1xf32> to vector<8x64xf32>
    %388 = arith.subf %371, %387 : vector<8x64xf32>
    %cst_190 = arith.constant 9.99999974E-6 : f32
    %389 = vector.broadcast %cst_190 : f32 to vector<8x1xf32>
    %390 = arith.addf %386, %389 : vector<8x1xf32>
    %391 = math.rsqrt %390 : vector<8x1xf32>
    %392 = vector.broadcast %391 : vector<8x1xf32> to vector<8x64xf32>
    %393 = arith.mulf %388, %392 : vector<8x64xf32>
    %394 = vector.broadcast %373 : vector<1x64xf32> to vector<8x64xf32>
    %395 = arith.mulf %393, %394 : vector<8x64xf32>
    %396 = vector.broadcast %375 : vector<1x64xf32> to vector<8x64xf32>
    %397 = arith.addf %395, %396 : vector<8x64xf32>
    %398 = arith.truncf %397 : vector<8x64xf32> to vector<8x64xbf16>
    %c2 = arith.constant 2 : index
    %c0_191 = arith.constant 0 : index
    %c0_192 = arith.constant 0 : index
    %399 = vector.load %arg7[%c2, %c0_191, %c0_192] : memref<3x64x64xbf16, #tpu.memory_space<vmem>>, vector<1x64x64xbf16>
    %400 = vector.shape_cast %399 : vector<1x64x64xbf16> to vector<64x64xbf16>
    %cst_193 = arith.constant dense<0.000000e+00> : vector<8x64xf32>
    %401 = tpu.matmul %398, %400, %cst_193 {dimension_numbers = #tpu.dot_dimension_numbers<[1], [0], [0], [1], [0, 0, 1, 1], [], []>} : vector<8x64xbf16>, vector<64x64xbf16>, vector<8x64xf32> -> vector<8x64xf32>
    %c2_194 = arith.constant 2 : index
    %c0_195 = arith.constant 0 : index
    %c0_196 = arith.constant 0 : index
    %402 = vector.load %arg8[%c2_194, %c0_195, %c0_196] : memref<3x1x64xf32, #tpu.memory_space<vmem>>, vector<1x1x64xf32>
    %403 = vector.shape_cast %402 : vector<1x1x64xf32> to vector<1x64xf32>
    %404 = vector.broadcast %403 : vector<1x64xf32> to vector<8x64xf32>
    %405 = arith.addf %401, %404 : vector<8x64xf32>
    %cst_197 = arith.constant 2.500000e-01 : f32
    %406 = vector.broadcast %cst_197 : f32 to vector<8x64xf32>
    %407 = arith.mulf %405, %406 : vector<8x64xf32>
    %c2_198 = arith.constant 2 : index
    %c0_199 = arith.constant 0 : index
    %c0_200 = arith.constant 0 : index
    %408 = vector.load %arg9[%c2_198, %c0_199, %c0_200] : memref<3x64x64xbf16, #tpu.memory_space<vmem>>, vector<1x64x64xbf16>
    %409 = vector.shape_cast %408 : vector<1x64x64xbf16> to vector<64x64xbf16>
    %cst_201 = arith.constant dense<0.000000e+00> : vector<8x64xf32>
    %410 = tpu.matmul %398, %409, %cst_201 {dimension_numbers = #tpu.dot_dimension_numbers<[1], [0], [0], [1], [0, 0, 1, 1], [], []>} : vector<8x64xbf16>, vector<64x64xbf16>, vector<8x64xf32> -> vector<8x64xf32>
    %c2_202 = arith.constant 2 : index
    %c0_203 = arith.constant 0 : index
    %c0_204 = arith.constant 0 : index
    %411 = vector.load %arg10[%c2_202, %c0_203, %c0_204] : memref<3x1x64xf32, #tpu.memory_space<vmem>>, vector<1x1x64xf32>
    %412 = vector.shape_cast %411 : vector<1x1x64xf32> to vector<1x64xf32>
    %413 = vector.broadcast %412 : vector<1x64xf32> to vector<8x64xf32>
    %414 = arith.addf %410, %413 : vector<8x64xf32>
    %c2_205 = arith.constant 2 : index
    %c0_206 = arith.constant 0 : index
    %c0_207 = arith.constant 0 : index
    %415 = vector.load %arg11[%c2_205, %c0_206, %c0_207] : memref<3x64x64xbf16, #tpu.memory_space<vmem>>, vector<1x64x64xbf16>
    %416 = vector.shape_cast %415 : vector<1x64x64xbf16> to vector<64x64xbf16>
    %cst_208 = arith.constant dense<0.000000e+00> : vector<8x64xf32>
    %417 = tpu.matmul %398, %416, %cst_208 {dimension_numbers = #tpu.dot_dimension_numbers<[1], [0], [0], [1], [0, 0, 1, 1], [], []>} : vector<8x64xbf16>, vector<64x64xbf16>, vector<8x64xf32> -> vector<8x64xf32>
    %c2_209 = arith.constant 2 : index
    %c0_210 = arith.constant 0 : index
    %c0_211 = arith.constant 0 : index
    %418 = vector.load %arg12[%c2_209, %c0_210, %c0_211] : memref<3x1x64xf32, #tpu.memory_space<vmem>>, vector<1x1x64xf32>
    %419 = vector.shape_cast %418 : vector<1x1x64xf32> to vector<1x64xf32>
    %420 = vector.broadcast %419 : vector<1x64xf32> to vector<8x64xf32>
    %421 = arith.addf %417, %420 : vector<8x64xf32>
    %422 = vector.extract_strided_slice %407 {offsets = [0, 0], sizes = [8, 16], strides = [1, 1]} : vector<8x64xf32> to vector<8x16xf32>
    %423 = arith.truncf %422 : vector<8x16xf32> to vector<8x16xbf16>
    %424 = vector.extract_strided_slice %414 {offsets = [0, 0], sizes = [8, 16], strides = [1, 1]} : vector<8x64xf32> to vector<8x16xf32>
    %425 = arith.truncf %424 : vector<8x16xf32> to vector<8x16xbf16>
    %426 = vector.extract_strided_slice %421 {offsets = [0, 0], sizes = [8, 16], strides = [1, 1]} : vector<8x64xf32> to vector<8x16xf32>
    %427 = arith.truncf %426 : vector<8x16xf32> to vector<8x16xbf16>
    %cst_212 = arith.constant dense<0.000000e+00> : vector<8x8xf32>
    %428 = tpu.matmul %423, %425, %cst_212 {dimension_numbers = #tpu.dot_dimension_numbers<[1], [1], [0], [0], [0, 0, 1, 0], [], []>} : vector<8x16xbf16>, vector<8x16xbf16>, vector<8x8xf32> -> vector<8x8xf32>
    %429 = vector.broadcast %1 : vector<1x8xf32> to vector<8x8xf32>
    %430 = arith.addf %428, %429 : vector<8x8xf32>
    %cst_213 = arith.constant dense<0xFF800000> : vector<8xf32>
    %431 = vector.multi_reduction <maximumf>, %430, %cst_213 [1] : vector<8x8xf32> to vector<8xf32>
    %432 = vector.shape_cast %431 : vector<8xf32> to vector<8x1xf32>
    %433 = vector.broadcast %432 : vector<8x1xf32> to vector<8x8xf32>
    %434 = arith.subf %430, %433 : vector<8x8xf32>
    %435 = math.exp %434 : vector<8x8xf32>
    %cst_214 = arith.constant dense<0.000000e+00> : vector<8xf32>
    %436 = vector.multi_reduction <add>, %435, %cst_214 [1] : vector<8x8xf32> to vector<8xf32>
    %437 = vector.shape_cast %436 : vector<8xf32> to vector<8x1xf32>
    %438 = arith.truncf %435 : vector<8x8xf32> to vector<8x8xbf16>
    %cst_215 = arith.constant dense<0.000000e+00> : vector<8x16xf32>
    %439 = tpu.matmul %438, %427, %cst_215 {dimension_numbers = #tpu.dot_dimension_numbers<[1], [0], [0], [1], [0, 0, 1, 1], [], []>} : vector<8x8xbf16>, vector<8x16xbf16>, vector<8x16xf32> -> vector<8x16xf32>
    %440 = tpu.reciprocal %437 {approx = true} : vector<8x1xf32> -> vector<8x1xf32>
    %441 = vector.broadcast %440 : vector<8x1xf32> to vector<8x16xf32>
    %442 = arith.mulf %439, %441 : vector<8x16xf32>
    %c0_216 = arith.constant 0 : index
    %c0_217 = arith.constant 0 : index
    %443 = vector.load %arg26[%c0_216, %c0_217] : memref<8x64xf32, #tpu.memory_space<vmem>>, vector<8x16xf32>
    tpu.vector_store %arg26[%c0_216, %c0_217], %442 {strides = array<i32>} : memref<8x64xf32, #tpu.memory_space<vmem>>, vector<8x16xf32>,
    %444 = vector.extract_strided_slice %407 {offsets = [0, 16], sizes = [8, 16], strides = [1, 1]} : vector<8x64xf32> to vector<8x16xf32>
    %445 = arith.truncf %444 : vector<8x16xf32> to vector<8x16xbf16>
    %446 = vector.extract_strided_slice %414 {offsets = [0, 16], sizes = [8, 16], strides = [1, 1]} : vector<8x64xf32> to vector<8x16xf32>
    %447 = arith.truncf %446 : vector<8x16xf32> to vector<8x16xbf16>
    %448 = vector.extract_strided_slice %421 {offsets = [0, 16], sizes = [8, 16], strides = [1, 1]} : vector<8x64xf32> to vector<8x16xf32>
    %449 = arith.truncf %448 : vector<8x16xf32> to vector<8x16xbf16>
    %cst_218 = arith.constant dense<0.000000e+00> : vector<8x8xf32>
    %450 = tpu.matmul %445, %447, %cst_218 {dimension_numbers = #tpu.dot_dimension_numbers<[1], [1], [0], [0], [0, 0, 1, 0], [], []>} : vector<8x16xbf16>, vector<8x16xbf16>, vector<8x8xf32> -> vector<8x8xf32>
    %451 = vector.broadcast %1 : vector<1x8xf32> to vector<8x8xf32>
    %452 = arith.addf %450, %451 : vector<8x8xf32>
    %cst_219 = arith.constant dense<0xFF800000> : vector<8xf32>
    %453 = vector.multi_reduction <maximumf>, %452, %cst_219 [1] : vector<8x8xf32> to vector<8xf32>
    %454 = vector.shape_cast %453 : vector<8xf32> to vector<8x1xf32>
    %455 = vector.broadcast %454 : vector<8x1xf32> to vector<8x8xf32>
    %456 = arith.subf %452, %455 : vector<8x8xf32>
    %457 = math.exp %456 : vector<8x8xf32>
    %cst_220 = arith.constant dense<0.000000e+00> : vector<8xf32>
    %458 = vector.multi_reduction <add>, %457, %cst_220 [1] : vector<8x8xf32> to vector<8xf32>
    %459 = vector.shape_cast %458 : vector<8xf32> to vector<8x1xf32>
    %460 = arith.truncf %457 : vector<8x8xf32> to vector<8x8xbf16>
    %cst_221 = arith.constant dense<0.000000e+00> : vector<8x16xf32>
    %461 = tpu.matmul %460, %449, %cst_221 {dimension_numbers = #tpu.dot_dimension_numbers<[1], [0], [0], [1], [0, 0, 1, 1], [], []>} : vector<8x8xbf16>, vector<8x16xbf16>, vector<8x16xf32> -> vector<8x16xf32>
    %462 = tpu.reciprocal %459 {approx = true} : vector<8x1xf32> -> vector<8x1xf32>
    %463 = vector.broadcast %462 : vector<8x1xf32> to vector<8x16xf32>
    %464 = arith.mulf %461, %463 : vector<8x16xf32>
    %c0_222 = arith.constant 0 : index
    %c16_223 = arith.constant 16 : index
    %465 = vector.load %arg26[%c0_222, %c16_223] : memref<8x64xf32, #tpu.memory_space<vmem>>, vector<8x16xf32>
    tpu.vector_store %arg26[%c0_222, %c16_223], %464 {strides = array<i32>} : memref<8x64xf32, #tpu.memory_space<vmem>>, vector<8x16xf32>,
    %466 = vector.extract_strided_slice %407 {offsets = [0, 32], sizes = [8, 16], strides = [1, 1]} : vector<8x64xf32> to vector<8x16xf32>
    %467 = arith.truncf %466 : vector<8x16xf32> to vector<8x16xbf16>
    %468 = vector.extract_strided_slice %414 {offsets = [0, 32], sizes = [8, 16], strides = [1, 1]} : vector<8x64xf32> to vector<8x16xf32>
    %469 = arith.truncf %468 : vector<8x16xf32> to vector<8x16xbf16>
    %470 = vector.extract_strided_slice %421 {offsets = [0, 32], sizes = [8, 16], strides = [1, 1]} : vector<8x64xf32> to vector<8x16xf32>
    %471 = arith.truncf %470 : vector<8x16xf32> to vector<8x16xbf16>
    %cst_224 = arith.constant dense<0.000000e+00> : vector<8x8xf32>
    %472 = tpu.matmul %467, %469, %cst_224 {dimension_numbers = #tpu.dot_dimension_numbers<[1], [1], [0], [0], [0, 0, 1, 0], [], []>} : vector<8x16xbf16>, vector<8x16xbf16>, vector<8x8xf32> -> vector<8x8xf32>
    %473 = vector.broadcast %1 : vector<1x8xf32> to vector<8x8xf32>
    %474 = arith.addf %472, %473 : vector<8x8xf32>
    %cst_225 = arith.constant dense<0xFF800000> : vector<8xf32>
    %475 = vector.multi_reduction <maximumf>, %474, %cst_225 [1] : vector<8x8xf32> to vector<8xf32>
    %476 = vector.shape_cast %475 : vector<8xf32> to vector<8x1xf32>
    %477 = vector.broadcast %476 : vector<8x1xf32> to vector<8x8xf32>
    %478 = arith.subf %474, %477 : vector<8x8xf32>
    %479 = math.exp %478 : vector<8x8xf32>
    %cst_226 = arith.constant dense<0.000000e+00> : vector<8xf32>
    %480 = vector.multi_reduction <add>, %479, %cst_226 [1] : vector<8x8xf32> to vector<8xf32>
    %481 = vector.shape_cast %480 : vector<8xf32> to vector<8x1xf32>
    %482 = arith.truncf %479 : vector<8x8xf32> to vector<8x8xbf16>
    %cst_227 = arith.constant dense<0.000000e+00> : vector<8x16xf32>
    %483 = tpu.matmul %482, %471, %cst_227 {dimension_numbers = #tpu.dot_dimension_numbers<[1], [0], [0], [1], [0, 0, 1, 1], [], []>} : vector<8x8xbf16>, vector<8x16xbf16>, vector<8x16xf32> -> vector<8x16xf32>
    %484 = tpu.reciprocal %481 {approx = true} : vector<8x1xf32> -> vector<8x1xf32>
    %485 = vector.broadcast %484 : vector<8x1xf32> to vector<8x16xf32>
    %486 = arith.mulf %483, %485 : vector<8x16xf32>
    %c0_228 = arith.constant 0 : index
    %c32_229 = arith.constant 32 : index
    %487 = vector.load %arg26[%c0_228, %c32_229] : memref<8x64xf32, #tpu.memory_space<vmem>>, vector<8x16xf32>
    tpu.vector_store %arg26[%c0_228, %c32_229], %486 {strides = array<i32>} : memref<8x64xf32, #tpu.memory_space<vmem>>, vector<8x16xf32>,
    %488 = vector.extract_strided_slice %407 {offsets = [0, 48], sizes = [8, 16], strides = [1, 1]} : vector<8x64xf32> to vector<8x16xf32>
    %489 = arith.truncf %488 : vector<8x16xf32> to vector<8x16xbf16>
    %490 = vector.extract_strided_slice %414 {offsets = [0, 48], sizes = [8, 16], strides = [1, 1]} : vector<8x64xf32> to vector<8x16xf32>
    %491 = arith.truncf %490 : vector<8x16xf32> to vector<8x16xbf16>
    %492 = vector.extract_strided_slice %421 {offsets = [0, 48], sizes = [8, 16], strides = [1, 1]} : vector<8x64xf32> to vector<8x16xf32>
    %493 = arith.truncf %492 : vector<8x16xf32> to vector<8x16xbf16>
    %cst_230 = arith.constant dense<0.000000e+00> : vector<8x8xf32>
    %494 = tpu.matmul %489, %491, %cst_230 {dimension_numbers = #tpu.dot_dimension_numbers<[1], [1], [0], [0], [0, 0, 1, 0], [], []>} : vector<8x16xbf16>, vector<8x16xbf16>, vector<8x8xf32> -> vector<8x8xf32>
    %495 = vector.broadcast %1 : vector<1x8xf32> to vector<8x8xf32>
    %496 = arith.addf %494, %495 : vector<8x8xf32>
    %cst_231 = arith.constant dense<0xFF800000> : vector<8xf32>
    %497 = vector.multi_reduction <maximumf>, %496, %cst_231 [1] : vector<8x8xf32> to vector<8xf32>
    %498 = vector.shape_cast %497 : vector<8xf32> to vector<8x1xf32>
    %499 = vector.broadcast %498 : vector<8x1xf32> to vector<8x8xf32>
    %500 = arith.subf %496, %499 : vector<8x8xf32>
    %501 = math.exp %500 : vector<8x8xf32>
    %cst_232 = arith.constant dense<0.000000e+00> : vector<8xf32>
    %502 = vector.multi_reduction <add>, %501, %cst_232 [1] : vector<8x8xf32> to vector<8xf32>
    %503 = vector.shape_cast %502 : vector<8xf32> to vector<8x1xf32>
    %504 = arith.truncf %501 : vector<8x8xf32> to vector<8x8xbf16>
    %cst_233 = arith.constant dense<0.000000e+00> : vector<8x16xf32>
    %505 = tpu.matmul %504, %493, %cst_233 {dimension_numbers = #tpu.dot_dimension_numbers<[1], [0], [0], [1], [0, 0, 1, 1], [], []>} : vector<8x8xbf16>, vector<8x16xbf16>, vector<8x16xf32> -> vector<8x16xf32>
    %506 = tpu.reciprocal %503 {approx = true} : vector<8x1xf32> -> vector<8x1xf32>
    %507 = vector.broadcast %506 : vector<8x1xf32> to vector<8x16xf32>
    %508 = arith.mulf %505, %507 : vector<8x16xf32>
    %c0_234 = arith.constant 0 : index
    %c48_235 = arith.constant 48 : index
    %509 = vector.load %arg26[%c0_234, %c48_235] : memref<8x64xf32, #tpu.memory_space<vmem>>, vector<8x16xf32>
    tpu.vector_store %arg26[%c0_234, %c48_235], %508 {strides = array<i32>} : memref<8x64xf32, #tpu.memory_space<vmem>>, vector<8x16xf32>,
    %c0_236 = arith.constant 0 : index
    %c0_237 = arith.constant 0 : index
    %510 = vector.load %arg26[%c0_236, %c0_237] : memref<8x64xf32, #tpu.memory_space<vmem>>, vector<8x64xf32>
    %511 = arith.truncf %510 : vector<8x64xf32> to vector<8x64xbf16>
    %c2_238 = arith.constant 2 : index
    %c0_239 = arith.constant 0 : index
    %c0_240 = arith.constant 0 : index
    %512 = vector.load %arg13[%c2_238, %c0_239, %c0_240] : memref<3x64x64xbf16, #tpu.memory_space<vmem>>, vector<1x64x64xbf16>
    %513 = vector.shape_cast %512 : vector<1x64x64xbf16> to vector<64x64xbf16>
    %cst_241 = arith.constant dense<0.000000e+00> : vector<8x64xf32>
    %514 = tpu.matmul %511, %513, %cst_241 {dimension_numbers = #tpu.dot_dimension_numbers<[1], [0], [0], [1], [0, 0, 1, 1], [], []>} : vector<8x64xbf16>, vector<64x64xbf16>, vector<8x64xf32> -> vector<8x64xf32>
    %c2_242 = arith.constant 2 : index
    %c0_243 = arith.constant 0 : index
    %c0_244 = arith.constant 0 : index
    %515 = vector.load %arg14[%c2_242, %c0_243, %c0_244] : memref<3x1x64xf32, #tpu.memory_space<vmem>>, vector<1x1x64xf32>
    %516 = vector.shape_cast %515 : vector<1x1x64xf32> to vector<1x64xf32>
    %517 = vector.broadcast %516 : vector<1x64xf32> to vector<8x64xf32>
    %518 = arith.addf %514, %517 : vector<8x64xf32>
    %519 = arith.addf %397, %518 : vector<8x64xf32>
    %c2_245 = arith.constant 2 : index
    %c0_246 = arith.constant 0 : index
    %c0_247 = arith.constant 0 : index
    %520 = vector.load %arg15[%c2_245, %c0_246, %c0_247] : memref<3x1x64xf32, #tpu.memory_space<vmem>>, vector<1x1x64xf32>
    %521 = vector.shape_cast %520 : vector<1x1x64xf32> to vector<1x64xf32>
    %c2_248 = arith.constant 2 : index
    %c0_249 = arith.constant 0 : index
    %c0_250 = arith.constant 0 : index
    %522 = vector.load %arg16[%c2_248, %c0_249, %c0_250] : memref<3x1x64xf32, #tpu.memory_space<vmem>>, vector<1x1x64xf32>
    %523 = vector.shape_cast %522 : vector<1x1x64xf32> to vector<1x64xf32>
    %cst_251 = arith.constant dense<0.000000e+00> : vector<8xf32>
    %524 = vector.multi_reduction <add>, %519, %cst_251 [1] : vector<8x64xf32> to vector<8xf32>
    %525 = vector.shape_cast %524 : vector<8xf32> to vector<8x1xf32>
    %cst_252 = arith.constant 6.400000e+01 : f32
    %526 = vector.broadcast %cst_252 : f32 to vector<8x1xf32>
    %527 = arith.divf %525, %526 : vector<8x1xf32>
    %528 = vector.broadcast %527 : vector<8x1xf32> to vector<8x64xf32>
    %529 = arith.subf %519, %528 : vector<8x64xf32>
    %530 = arith.mulf %529, %529 : vector<8x64xf32>
    %cst_253 = arith.constant dense<0.000000e+00> : vector<8xf32>
    %531 = vector.multi_reduction <add>, %530, %cst_253 [1] : vector<8x64xf32> to vector<8xf32>
    %532 = vector.shape_cast %531 : vector<8xf32> to vector<8x1xf32>
    %cst_254 = arith.constant 6.400000e+01 : f32
    %533 = vector.broadcast %cst_254 : f32 to vector<8x1xf32>
    %534 = arith.divf %532, %533 : vector<8x1xf32>
    %535 = vector.broadcast %527 : vector<8x1xf32> to vector<8x64xf32>
    %536 = arith.subf %519, %535 : vector<8x64xf32>
    %cst_255 = arith.constant 9.99999974E-6 : f32
    %537 = vector.broadcast %cst_255 : f32 to vector<8x1xf32>
    %538 = arith.addf %534, %537 : vector<8x1xf32>
    %539 = math.rsqrt %538 : vector<8x1xf32>
    %540 = vector.broadcast %539 : vector<8x1xf32> to vector<8x64xf32>
    %541 = arith.mulf %536, %540 : vector<8x64xf32>
    %542 = vector.broadcast %521 : vector<1x64xf32> to vector<8x64xf32>
    %543 = arith.mulf %541, %542 : vector<8x64xf32>
    %544 = vector.broadcast %523 : vector<1x64xf32> to vector<8x64xf32>
    %545 = arith.addf %543, %544 : vector<8x64xf32>
    %546 = arith.truncf %545 : vector<8x64xf32> to vector<8x64xbf16>
    %c2_256 = arith.constant 2 : index
    %c0_257 = arith.constant 0 : index
    %c0_258 = arith.constant 0 : index
    %547 = vector.load %arg17[%c2_256, %c0_257, %c0_258] : memref<3x64x2048xbf16, #tpu.memory_space<vmem>>, vector<1x64x2048xbf16>
    %548 = vector.shape_cast %547 : vector<1x64x2048xbf16> to vector<64x2048xbf16>
    %cst_259 = arith.constant dense<0.000000e+00> : vector<8x2048xf32>
    %549 = tpu.matmul %546, %548, %cst_259 {dimension_numbers = #tpu.dot_dimension_numbers<[1], [0], [0], [1], [0, 0, 1, 1], [], []>} : vector<8x64xbf16>, vector<64x2048xbf16>, vector<8x2048xf32> -> vector<8x2048xf32>
    %c2_260 = arith.constant 2 : index
    %c0_261 = arith.constant 0 : index
    %c0_262 = arith.constant 0 : index
    %550 = vector.load %arg18[%c2_260, %c0_261, %c0_262] : memref<3x1x2048xf32, #tpu.memory_space<vmem>>, vector<1x1x2048xf32>
    %551 = vector.shape_cast %550 : vector<1x1x2048xf32> to vector<1x2048xf32>
    %552 = vector.broadcast %551 : vector<1x2048xf32> to vector<8x2048xf32>
    %553 = arith.addf %549, %552 : vector<8x2048xf32>
    %cst_263 = arith.constant 0.000000e+00 : f32
    %554 = vector.broadcast %cst_263 : f32 to vector<8x2048xf32>
    %555 = arith.maximumf %553, %554 : vector<8x2048xf32>
    %556 = arith.truncf %555 : vector<8x2048xf32> to vector<8x2048xbf16>
    %c2_264 = arith.constant 2 : index
    %c0_265 = arith.constant 0 : index
    %c0_266 = arith.constant 0 : index
    %557 = vector.load %arg19[%c2_264, %c0_265, %c0_266] : memref<3x2048x64xbf16, #tpu.memory_space<vmem>>, vector<1x2048x64xbf16>
    %558 = vector.shape_cast %557 : vector<1x2048x64xbf16> to vector<2048x64xbf16>
    %cst_267 = arith.constant dense<0.000000e+00> : vector<8x64xf32>
    %559 = tpu.matmul %556, %558, %cst_267 {dimension_numbers = #tpu.dot_dimension_numbers<[1], [0], [0], [1], [0, 0, 1, 1], [], []>} : vector<8x2048xbf16>, vector<2048x64xbf16>, vector<8x64xf32> -> vector<8x64xf32>
    %c2_268 = arith.constant 2 : index
    %c0_269 = arith.constant 0 : index
    %c0_270 = arith.constant 0 : index
    %560 = vector.load %arg20[%c2_268, %c0_269, %c0_270] : memref<3x1x64xf32, #tpu.memory_space<vmem>>, vector<1x1x64xf32>
    %561 = vector.shape_cast %560 : vector<1x1x64xf32> to vector<1x64xf32>
    %562 = vector.broadcast %561 : vector<1x64xf32> to vector<8x64xf32>
    %563 = arith.addf %559, %562 : vector<8x64xf32>
    %564 = arith.addf %545, %563 : vector<8x64xf32>
    %c2_271 = arith.constant 2 : index
    %c0_272 = arith.constant 0 : index
    %c0_273 = arith.constant 0 : index
    %565 = vector.load %arg21[%c2_271, %c0_272, %c0_273] : memref<3x1x64xf32, #tpu.memory_space<vmem>>, vector<1x1x64xf32>
    %566 = vector.shape_cast %565 : vector<1x1x64xf32> to vector<1x64xf32>
    %c2_274 = arith.constant 2 : index
    %c0_275 = arith.constant 0 : index
    %c0_276 = arith.constant 0 : index
    %567 = vector.load %arg22[%c2_274, %c0_275, %c0_276] : memref<3x1x64xf32, #tpu.memory_space<vmem>>, vector<1x1x64xf32>
    %568 = vector.shape_cast %567 : vector<1x1x64xf32> to vector<1x64xf32>
    %cst_277 = arith.constant dense<0.000000e+00> : vector<8xf32>
    %569 = vector.multi_reduction <add>, %564, %cst_277 [1] : vector<8x64xf32> to vector<8xf32>
    %570 = vector.shape_cast %569 : vector<8xf32> to vector<8x1xf32>
    %cst_278 = arith.constant 6.400000e+01 : f32
    %571 = vector.broadcast %cst_278 : f32 to vector<8x1xf32>
    %572 = arith.divf %570, %571 : vector<8x1xf32>
    %573 = vector.broadcast %572 : vector<8x1xf32> to vector<8x64xf32>
    %574 = arith.subf %564, %573 : vector<8x64xf32>
    %575 = arith.mulf %574, %574 : vector<8x64xf32>
    %cst_279 = arith.constant dense<0.000000e+00> : vector<8xf32>
    %576 = vector.multi_reduction <add>, %575, %cst_279 [1] : vector<8x64xf32> to vector<8xf32>
    %577 = vector.shape_cast %576 : vector<8xf32> to vector<8x1xf32>
    %cst_280 = arith.constant 6.400000e+01 : f32
    %578 = vector.broadcast %cst_280 : f32 to vector<8x1xf32>
    %579 = arith.divf %577, %578 : vector<8x1xf32>
    %580 = vector.broadcast %572 : vector<8x1xf32> to vector<8x64xf32>
    %581 = arith.subf %564, %580 : vector<8x64xf32>
    %cst_281 = arith.constant 9.99999974E-6 : f32
    %582 = vector.broadcast %cst_281 : f32 to vector<8x1xf32>
    %583 = arith.addf %579, %582 : vector<8x1xf32>
    %584 = math.rsqrt %583 : vector<8x1xf32>
    %585 = vector.broadcast %584 : vector<8x1xf32> to vector<8x64xf32>
    %586 = arith.mulf %581, %585 : vector<8x64xf32>
    %587 = vector.broadcast %566 : vector<1x64xf32> to vector<8x64xf32>
    %588 = arith.mulf %586, %587 : vector<8x64xf32>
    %589 = vector.broadcast %568 : vector<1x64xf32> to vector<8x64xf32>
    %590 = arith.addf %588, %589 : vector<8x64xf32>
    %c0_282 = arith.constant 0 : index
    %c0_283 = arith.constant 0 : index
    %c0_284 = arith.constant 0 : index
    %591 = vector.load %arg4[%c0_282, %c0_283, %c0_284] : memref<1x1x8xf32, #tpu.memory_space<vmem>>, vector<1x1x8xf32>
    %592 = vector.shape_cast %591 : vector<1x1x8xf32> to vector<1x8xf32>
    %cst_285 = arith.constant dense<0.000000e+00> : vector<1x64xf32>
    %593 = tpu.matmul %592, %590, %cst_285 {dimension_numbers = #tpu.dot_dimension_numbers<[1], [0], [0], [1], [0, 0, 1, 1], [], []>} : vector<1x8xf32>, vector<8x64xf32>, vector<1x64xf32> -> vector<1x64xf32>
    %594 = arith.truncf %593 : vector<1x64xf32> to vector<1x64xbf16>
    %c0_286 = arith.constant 0 : index
    %c0_287 = arith.constant 0 : index
    %595 = vector.load %arg23[%c0_286, %c0_287] : memref<64x4xbf16, #tpu.memory_space<vmem>>, vector<64x4xbf16>
    %cst_288 = arith.constant dense<0.000000e+00> : vector<1x4xf32>
    %596 = tpu.matmul %594, %595, %cst_288 {dimension_numbers = #tpu.dot_dimension_numbers<[1], [0], [0], [1], [0, 0, 1, 1], [], []>} : vector<1x64xbf16>, vector<64x4xbf16>, vector<1x4xf32> -> vector<1x4xf32>
    %c0_289 = arith.constant 0 : index
    %c0_290 = arith.constant 0 : index
    %597 = vector.load %arg24[%c0_289, %c0_290] : memref<1x4xf32, #tpu.memory_space<vmem>>, vector<1x4xf32>
    %598 = arith.addf %596, %597 : vector<1x4xf32>
    %599 = vector.shape_cast %598 : vector<1x4xf32> to vector<1x1x4xf32>
    %c0_291 = arith.constant 0 : index
    %c0_292 = arith.constant 0 : index
    %c0_293 = arith.constant 0 : index
    %600 = vector.load %arg25[%c0_291, %c0_292, %c0_293] : memref<1x1x4xf32, #tpu.memory_space<vmem>>, vector<1x1x4xf32>
    tpu.vector_store %arg25[%c0_291, %c0_292, %c0_293], %599 {strides = array<i32>} : memref<1x1x4xf32, #tpu.memory_space<vmem>>, vector<1x1x4xf32>,
    return
  }
  func.func @transform_0(%arg0: i32) -> (i32, i32, i32) {
    %c0_i32 = arith.constant 0 : i32
    %c0_i32_0 = arith.constant 0 : i32
    %c0_i32_1 = arith.constant 0 : i32
    return %arg0, %c0_i32, %c0_i32_0 : i32, i32, i32
  }
  func.func @transform_1(%arg0: i32) -> (i32, i32) {
    %c0_i32 = arith.constant 0 : i32
    %c0_i32_0 = arith.constant 0 : i32
    %c0_i32_1 = arith.constant 0 : i32
    return %c0_i32, %c0_i32_0 : i32, i32
  }
  func.func @transform_2(%arg0: i32) -> (i32, i32, i32) {
    %c0_i32 = arith.constant 0 : i32
    %c0_i32_0 = arith.constant 0 : i32
    %c0_i32_1 = arith.constant 0 : i32
    return %arg0, %c0_i32, %c0_i32_0 : i32, i32, i32
  }
  func.func @transform_3(%arg0: i32) -> (i32, i32, i32) {
    %c0_i32 = arith.constant 0 : i32
    %c0_i32_0 = arith.constant 0 : i32
    %c0_i32_1 = arith.constant 0 : i32
    return %arg0, %c0_i32, %c0_i32_0 : i32, i32, i32
  }
  func.func @transform_4(%arg0: i32) -> (i32, i32) {
    %c0_i32 = arith.constant 0 : i32
    %c0_i32_0 = arith.constant 0 : i32
    %c0_i32_1 = arith.constant 0 : i32
    return %c0_i32, %c0_i32_0 : i32, i32
  }
  func.func @transform_5(%arg0: i32) -> (i32, i32) {
    %c0_i32 = arith.constant 0 : i32
    %c0_i32_0 = arith.constant 0 : i32
    %c0_i32_1 = arith.constant 0 : i32
    return %c0_i32, %c0_i32_0 : i32, i32
  }
  func.func @transform_6(%arg0: i32) -> (i32, i32, i32) {
    %c0_i32 = arith.constant 0 : i32
    %c0_i32_0 = arith.constant 0 : i32
    %c0_i32_1 = arith.constant 0 : i32
    %c0_i32_2 = arith.constant 0 : i32
    return %c0_i32, %c0_i32_0, %c0_i32_1 : i32, i32, i32
  }
  func.func @transform_7(%arg0: i32) -> (i32, i32, i32) {
    %c0_i32 = arith.constant 0 : i32
    %c0_i32_0 = arith.constant 0 : i32
    %c0_i32_1 = arith.constant 0 : i32
    %c0_i32_2 = arith.constant 0 : i32
    return %c0_i32, %c0_i32_0, %c0_i32_1 : i32, i32, i32
  }
  func.func @transform_8(%arg0: i32) -> (i32, i32, i32) {
    %c0_i32 = arith.constant 0 : i32
    %c0_i32_0 = arith.constant 0 : i32
    %c0_i32_1 = arith.constant 0 : i32
    %c0_i32_2 = arith.constant 0 : i32
    return %c0_i32, %c0_i32_0, %c0_i32_1 : i32, i32, i32
  }
  func.func @transform_9(%arg0: i32) -> (i32, i32, i32) {
    %c0_i32 = arith.constant 0 : i32
    %c0_i32_0 = arith.constant 0 : i32
    %c0_i32_1 = arith.constant 0 : i32
    %c0_i32_2 = arith.constant 0 : i32
    return %c0_i32, %c0_i32_0, %c0_i32_1 : i32, i32, i32
  }
  func.func @transform_10(%arg0: i32) -> (i32, i32, i32) {
    %c0_i32 = arith.constant 0 : i32
    %c0_i32_0 = arith.constant 0 : i32
    %c0_i32_1 = arith.constant 0 : i32
    %c0_i32_2 = arith.constant 0 : i32
    return %c0_i32, %c0_i32_0, %c0_i32_1 : i32, i32, i32
  }
  func.func @transform_11(%arg0: i32) -> (i32, i32, i32) {
    %c0_i32 = arith.constant 0 : i32
    %c0_i32_0 = arith.constant 0 : i32
    %c0_i32_1 = arith.constant 0 : i32
    %c0_i32_2 = arith.constant 0 : i32
    return %c0_i32, %c0_i32_0, %c0_i32_1 : i32, i32, i32
  }
  func.func @transform_12(%arg0: i32) -> (i32, i32, i32) {
    %c0_i32 = arith.constant 0 : i32
    %c0_i32_0 = arith.constant 0 : i32
    %c0_i32_1 = arith.constant 0 : i32
    %c0_i32_2 = arith.constant 0 : i32
    return %c0_i32, %c0_i32_0, %c0_i32_1 : i32, i32, i32
  }
  func.func @transform_13(%arg0: i32) -> (i32, i32, i32) {
    %c0_i32 = arith.constant 0 : i32
    %c0_i32_0 = arith.constant 0 : i32
    %c0_i32_1 = arith.constant 0 : i32
    %c0_i32_2 = arith.constant 0 : i32
    return %c0_i32, %c0_i32_0, %c0_i32_1 : i32, i32, i32
  }
  func.func @transform_14(%arg0: i32) -> (i32, i32, i32) {
    %c0_i32 = arith.constant 0 : i32
    %c0_i32_0 = arith.constant 0 : i32
    %c0_i32_1 = arith.constant 0 : i32
    %c0_i32_2 = arith.constant 0 : i32
    return %c0_i32, %c0_i32_0, %c0_i32_1 : i32, i32, i32
  }
  func.func @transform_15(%arg0: i32) -> (i32, i32, i32) {
    %c0_i32 = arith.constant 0 : i32
    %c0_i32_0 = arith.constant 0 : i32
    %c0_i32_1 = arith.constant 0 : i32
    %c0_i32_2 = arith.constant 0 : i32
    return %c0_i32, %c0_i32_0, %c0_i32_1 : i32, i32, i32
  }
  func.func @transform_16(%arg0: i32) -> (i32, i32, i32) {
    %c0_i32 = arith.constant 0 : i32
    %c0_i32_0 = arith.constant 0 : i32
    %c0_i32_1 = arith.constant 0 : i32
    %c0_i32_2 = arith.constant 0 : i32
    return %c0_i32, %c0_i32_0, %c0_i32_1 : i32, i32, i32
  }
  func.func @transform_17(%arg0: i32) -> (i32, i32, i32) {
    %c0_i32 = arith.constant 0 : i32
    %c0_i32_0 = arith.constant 0 : i32
    %c0_i32_1 = arith.constant 0 : i32
    %c0_i32_2 = arith.constant 0 : i32
    return %c0_i32, %c0_i32_0, %c0_i32_1 : i32, i32, i32
  }
  func.func @transform_18(%arg0: i32) -> (i32, i32, i32) {
    %c0_i32 = arith.constant 0 : i32
    %c0_i32_0 = arith.constant 0 : i32
    %c0_i32_1 = arith.constant 0 : i32
    %c0_i32_2 = arith.constant 0 : i32
    return %c0_i32, %c0_i32_0, %c0_i32_1 : i32, i32, i32
  }
  func.func @transform_19(%arg0: i32) -> (i32, i32, i32) {
    %c0_i32 = arith.constant 0 : i32
    %c0_i32_0 = arith.constant 0 : i32
    %c0_i32_1 = arith.constant 0 : i32
    %c0_i32_2 = arith.constant 0 : i32
    return %c0_i32, %c0_i32_0, %c0_i32_1 : i32, i32, i32
  }
  func.func @transform_20(%arg0: i32) -> (i32, i32, i32) {
    %c0_i32 = arith.constant 0 : i32
    %c0_i32_0 = arith.constant 0 : i32
    %c0_i32_1 = arith.constant 0 : i32
    %c0_i32_2 = arith.constant 0 : i32
    return %c0_i32, %c0_i32_0, %c0_i32_1 : i32, i32, i32
  }
  func.func @transform_21(%arg0: i32) -> (i32, i32, i32) {
    %c0_i32 = arith.constant 0 : i32
    %c0_i32_0 = arith.constant 0 : i32
    %c0_i32_1 = arith.constant 0 : i32
    %c0_i32_2 = arith.constant 0 : i32
    return %c0_i32, %c0_i32_0, %c0_i32_1 : i32, i32, i32
  }
  func.func @transform_22(%arg0: i32) -> (i32, i32) {
    %c0_i32 = arith.constant 0 : i32
    %c0_i32_0 = arith.constant 0 : i32
    %c0_i32_1 = arith.constant 0 : i32
    return %c0_i32, %c0_i32_0 : i32, i32
  }
  func.func @transform_23(%arg0: i32) -> (i32, i32) {
    %c0_i32 = arith.constant 0 : i32
    %c0_i32_0 = arith.constant 0 : i32
    %c0_i32_1 = arith.constant 0 : i32
    return %c0_i32, %c0_i32_0 : i32, i32
  }
  func.func @transform_24(%arg0: i32) -> (i32, i32, i32) {
    %c0_i32 = arith.constant 0 : i32
    %c0_i32_0 = arith.constant 0 : i32
    %c0_i32_1 = arith.constant 0 : i32
    return %arg0, %c0_i32, %c0_i32_0 : i32, i32, i32
  }
}

</mosaic_0001>

<bundles_post_ra>
// kernel: tpu_custom_call.1
= control target key start
LH: loop header
LB: loop body
LE: loop exit
PB: predicated region body
PF: predicated region fallthrough
CT: control target
= control target key end

     0   :  { %s16059_s0 = inlined_call_operand.vmem [shape: f32[2,8,9], index: 0, kind: input, shape index: {}]   ;;  %s16060_s1 = inlined_call_operand.vmem [shape: f32[8,64], index: 1, kind: input, shape index: {}]   ;;  %s16061_s2 = inlined_call_operand.vmem [shape: f32[2,1,8], index: 2, kind: input, shape index: {}]   ;;  %s16062_s3 = inlined_call_operand.vmem [shape: f32[2,1,8], index: 3, kind: input, shape index: {}]   ;;  %s16063_s4 = inlined_call_operand.vmem [shape: bf16[9,64], index: 4, kind: input, shape index: {}]   ;;  %s16064_s5 = inlined_call_operand.vmem [shape: f32[1,64], index: 5, kind: input, shape index: {}]   ;;  %s16065_s6 = inlined_call_operand.vmem [shape: bf16[3,64,64], index: 6, kind: input, shape index: {}]   ;;  %s16066_s7 = inlined_call_operand.vmem [shape: f32[3,1,64], index: 7, kind: input, shape index: {}]   ;;  %s16067_s8 = inlined_call_operand.vmem [shape: bf16[3,64,64], index: 8, kind: input, shape index: {}]   ;;  %s16068_s9 = inlined_call_operand.vmem [shape: f32[3,1,64], index: 9, kind: input, shape index: {}]   ;;  %s16069_s10 = inlined_call_operand.vmem [shape: bf16[3,64,64], index: 10, kind: input, shape index: {}]   ;;  %s16070_s11 = inlined_call_operand.vmem [shape: f32[3,1,64], index: 11, kind: input, shape index: {}]   ;;  %s16071_s12 = inlined_call_operand.vmem [shape: bf16[3,64,64], index: 12, kind: input, shape index: {}]   ;;  %s16072_s13 = inlined_call_operand.vmem [shape: f32[3,1,64], index: 13, kind: input, shape index: {}]   ;;  %s16073_s14 = inlined_call_operand.vmem [shape: f32[3,1,64], index: 14, kind: input, shape index: {}]   ;;  %s16074_s15 = inlined_call_operand.vmem [shape: f32[3,1,64], index: 15, kind: input, shape index: {}]   ;;  %s16075_s16 = inlined_call_operand.vmem [shape: bf16[3,64,2048], index: 16, kind: input, shape index: {}]   ;;  %s16076_s17 = inlined_call_operand.vmem [shape: f32[3,1,2048], index: 17, kind: input, shape index: {}]   ;;  %s16077_s18 = inlined_call_operand.vmem [shape: bf16[3,2048,64], index: 18, kind: input, shape index: {}]   ;;  %s16078_s19 = inlined_call_operand.vmem [shape: f32[3,1,64], index: 19, kind: input, shape index: {}]   ;;  %s16079_s20 = inlined_call_operand.vmem [shape: f32[3,1,64], index: 20, kind: input, shape index: {}]   ;;  %s16080_s21 = inlined_call_operand.vmem [shape: f32[3,1,64], index: 21, kind: input, shape index: {}]   ;;  %s16081_s22 = inlined_call_operand.vmem [shape: bf16[64,4], index: 22, kind: input, shape index: {}]   ;;  %s16082_s23 = inlined_call_operand.vmem [shape: f32[1,4], index: 23, kind: input, shape index: {}]   ;;  %s16083_s24 = inlined_call_operand.hbm [shape: f32[2,1,4], index: 24, kind: output, shape index: {}]  }
   0x1   :  { %16112 = sst [smem:[#allocation16_spill]] %s16059_s0 }
   0x2   :  { %16113 = sst [smem:[#allocation17_spill]] %s16060_s1 }
   0x3   :  { %16114 = sst [smem:[#allocation18_spill]] %s16061_s2 }
   0x4   :  { %16115 = sst [smem:[#allocation19_spill]] %s16062_s3 }
   0x5   :  { %16116 = sst [smem:[#allocation20_spill]] %s16063_s4 }
   0x6   :  { %16117 = sst [smem:[#allocation21_spill]] %s16064_s5 }
   0x7   :  { %16118 = sst [smem:[#allocation22_spill]] %s16065_s6 }
   0x8   :  { %16119 = sst [smem:[#allocation23_spill]] %s16066_s7 }
   0x9   :  { %16120 = sst [smem:[#allocation24_spill]] %s16067_s8 }
   0xa   :  { %16121 = sst [smem:[#allocation25_spill]] %s16072_s13 }
   0xb   :  { %16122 = sst [smem:[#allocation26_spill]] %s16081_s22 }
   0xc   :  { %16123 = sst [smem:[#allocation27_spill]] %s16082_s23 }
   0xd   :  { %16124 = sst [smem:[#allocation28_spill]] %s16083_s24 }
   0xe   :  { %29 = vsyncpa [#allocation4], 0 }
   0xf   :  { %31 = vsyncpa [#allocation4 + $0x1], 0  ;;  %s13347_s5 = smov 0   ;;  %s13349_s26 = smov 0  }
  0x10   :  { %s13351_s27 = smov 0   ;;  %s13353_s28 = smov 0  }
  0x11 LB: > { %16125 = sst [smem:[#allocation6_spill]] %s13197_s5  ;;  %s13368_s6 = sadd.s32 4294967295, %s13209_s28   ;;  %s13209_s28 = sphi %s13353_s28, %s16166_s28   ;;  %s13205_s27 = sphi %s13351_s27, %s16169_s27   ;;  %s13201_s26 = sphi %s13349_s26, %s16168_s26   ;;  %s13197_s5 = sphi %s13347_s5, %s16167_s5  }
  0x12   : > { %16126 = sst [smem:[#allocation7_spill]] %s13201_s26  ;;  %s10190_s2 = sadd.s32 4294967294, %s13209_s28  }
  0x13   : > { %16127 = sst [smem:[#allocation8_spill]] %s13205_s27  ;;  %s13372_s29 = sadd.s32 1, %s13209_s28  }
  0x14   : > { %16128 = sst [smem:[#allocation9_spill]] %s13209_s28  ;;  %s563_s0 = sadd.s32 1, %s13205_s27 }
  0x15   : > { %16129 = sst [smem:[#allocation10_spill]] %s13368_s6  ;;  %s560_s7 = ssub.s32 %s13209_s28, %s13372_s29 }
  0x16   : > { %16130 = sst [smem:[#allocation11_spill]] %s13372_s29  ;;  %p573_p0 = scmp.ne.s32.totalorder %s13205_s27, %s13201_s26 }
  0x17   : > { %p561_p1 = scmp.eq.s32.totalorder %s560_s7, 0  ;;  %p574_p2 = scmp.eq.s32.totalorder %s13368_s6, 1 }
  0x18   : > { %p579_p3 = scmp.ne.s32.totalorder %s13201_s26, %s13197_s5  ;;  %p580_p4 = scmp.eq.s32.totalorder %s10190_s2, 1 }
  0x19   : > { %s13383_s30 = scalar_select %p561_p1, %s13205_s27, %s563_s0  }
  0x1a   : > { %p13385_p5 = por %p574_p2, %p573_p0  ;;  %p13389_p6 = por %p580_p4, %p579_p3 }
  0x1b   : > { %16131 = sst [smem:[#allocation12_spill]] %s13383_s30  ;;  %p10193_p7 = scmp.ge.s32.totalorder %s13209_s28, 1 }
  0x1c   : > { %s16132_s3 = scalar_select %p13385_p5, 1, 0 }
  0x1d   : > { %s16134_s25 = scalar_select %p13389_p6, 1, 0 }
  0x1e   : > { %16133 = sst [smem:[#allocation13_spill]] %s16132_s3  ;;  %p680_p8 = scmp.lt.s32.totalorder %s13209_s28, 3 }
  0x1f   : > { %16135 = sst [smem:[#allocation14_spill]] %s16134_s25 }
  0x20   : > { %p681_p9 = pnand %p10193_p7, %p680_p8 }
  0x22   : > { %684 = sbr.rel (%p681_p9) target bundleno = 7638 (0x1dd6), region = 116 }
  0x27   : > { %vm782_vm0 = vcmask 1043456   ;;  %v13211_v0 = vmov 0.0   ;;  %s16136_s1 = sld [smem:[#allocation20_spill]]  ;;  %vm783_vm1 = vcmask 1044480   ;;  %p750_p10 = scmp.lt.s32.totalorder %s13368_s6, 1  ;;  %v13212_v2 = vmov 65535  }
  0x28   : > { %12290 = vmatprep.subr.bf16.mxu0 %v13211_v0  ;;  %12296 = vmatprep.subr.bf16.mxu1 %v13211_v0  ;;  %v784_v3 = vsel %vm782_vm0, 4294967295, %v13212_v2  ;;  %vm13213_vm2 = vmmov 0   ;;  %s16138_s8 = sld [smem:[#allocation22_spill]]  ;;  %vm778_vm3 = vcmask 72704   ;;  %vm871_vm4 = vcmask 523264   ;;  %v12659_v21 = vld [vmem:[%s16069_s10 + $0x18] sm:$0xff]  }
  0x29   : > { %12292 = vmatprep.mubr.msk.bf16.mxu0 %vm13213_vm2, %v13211_v0  ;;  %12304 = vmatprep.mubr.msk.bf16.mxu1 %vm13213_vm2, %v13211_v0  ;;  %v785_v4 = vsel %vm783_vm1, %v784_v3, 0  ;;  %s13407_s2 = scalar_select %p750_p10, %s13368_s6, 1  ;;  %v12660_v26 = vld [vmem:[%s16069_s10 + $0x10] sm:$0xff]   ;;  %v12661_v27 = vld [vmem:[%s16069_s10 + $0x8] sm:$0xff]   ;;  %v12662_v28 = vld [vmem:[%s16069_s10] sm:$0xff]   ;;  %vm1083_vm5 = vcmask 130048  }
  0x2a   : > { %s16139_s25 = sld [smem:[#allocation16_spill]]  ;;  %v10204_v30 = vld [vmem:[%s16068_s9] ss:$0 sm:$0xff]  ;;  %s16106_s27 = smov 112   ;;  %vm1130_vm6 = vcmask 64512   ;;  %vm1307_vm7 = vcmask 261248  }
  0x2b   : > { %16137 = sst [smem:[#allocation15_spill]] %s13407_s2  ;;  %s10194_s4 = sshll.u32 %s13407_s2, 3  ;;  %v10210_v45 = vld [vmem:[%s16070_s11] ss:$0 sm:$0xff]  ;;  %vm1423_vm8 = vcmask 392448   ;;  %vm1539_vm9 = vcmask 523648  }
  0x2c   : > { %s16140_s28 = sld [smem:[#allocation24_spill]]  ;;  %s16098_s29 = smov 32   ;;  %vm10102_vm10 = vcmask 24576  }
  0x2d   : > { %v12650_v1 = vld [vmem:[%s16136_s1] sm:$0x1f]   ;;  %s16142_s0 = sld [smem:[#allocation21_spill]]  ;;  %s16096_s3 = smov 48  }
  0x2e   : > { %v12651_v5 = vld [vmem:[%s16138_s8 + $0x18] sm:$0xff]   ;;  %v787_v6 = vand.u32 %v12650_v1, %v785_v4  ;;  %v12653_v7 = vld [vmem:[%s16138_s8 + $0x10] sm:$0xff]   ;;  %v12655_v11 = vld [vmem:[%s16138_s8 + $0x8] sm:$0xff]   ;;  %s16143_s1 = sld [smem:[#allocation17_spill]] }
  0x2f   : > { %12297 = vmatpush3.bf16.msra.mxu1 %v12651_v5  ;;  %v12657_v14 = vld [vmem:[%s16138_s8] sm:$0xff]   ;;  %s16144_s30 = sld [smem:[#allocation23_spill]] }
  0x30   : > { %12291 = vmatpush3.bf16.msra.mxu0 %v787_v6  ;;  %s753_s5 = scalar_lea.vmem %s16139_s25, %s10194_s4  ;;  %12298 = vmatprep.subr.bf16.mxu1 %v13211_v0  ;;  %s16100_s25 = smov 16  }
  0x31   : > { %v762_v8 = vld [vmem:[%s753_s5] sm:$0xff]  ;;  %12308 = vmatprep.subr.bf16.mxu0 %v13211_v0  ;;  %s16104_s5 = smov 96   ;;  %s16146_s13 = sld [smem:[#allocation25_spill]] }
  0x32   : > { %s16141_s24 = smov %s16140_s28  ;;  %v12652_v9 = vld [vmem:[%s16140_s28 + $0x18] sm:$0xff]   ;;  %v763_v10 = vpack.c.bf16 %v762_v8, %v762_v8  ;;  %s16102_s28 = smov 80  }
  0x33   : > { %12299 = vmatpush3.bf16.msra.mxu1 %v12653_v7  ;;  %v12654_v12 = vld [vmem:[%s16141_s24 + $0x10] sm:$0xff]   ;;  %v12656_v13 = vld [vmem:[%s16141_s24 + $0x8] sm:$0xff]   ;;  %v12658_v15 = vld [vmem:[%s16141_s24] sm:$0xff]   ;;  %s16159_s23 = sld [smem:[#allocation19_spill]] }
  0x34   : > { %12293 = vmatmul.mubr.msk.bf16.vlgmr.msra.gmra.mxu0 %vm778_vm3, %v763_v10  ;;  %12300 = vmatprep.subr.bf16.mxu1 %v13211_v0  ;;  %v10195_v16 = vld [vmem:[%s16142_s0] ss:$0 sm:$0xff]  ;;  %s16145_s0 = sld [smem:[#allocation18_spill]] }
  0x35   : > { %12309 = vmatpush3.bf16.msra.mxu0 %v12652_v9  ;;  %12316 = vmatprep.mubr.msk.bf16.mxu0 %vm13213_vm2, %v13211_v0  ;;  %v829_v17 = vld [vmem:[%s16143_s1] sm:$0xff]  ;;  %s16154_s1 = sld [smem:[#allocation25_spill]] }
  0x36   : > { %12310 = vmatprep.subr.bf16.mxu0 %v13211_v0  ;;  %v10198_v29 = vld [vmem:[%s16144_s30] ss:$0 sm:$0xff] }
  0x37   : > { %12301 = vmatpush3.bf16.msra.mxu1 %v12655_v11 }
  0x38   : > { %12302 = vmatprep.subr.bf16.mxu1 %v13211_v0 }
  0x39   : > { %12311 = vmatpush3.bf16.msra.mxu0 %v12654_v12 }
  0x3a   : > { %12312 = vmatprep.subr.bf16.mxu0 %v13211_v0  ;;  %s13527_s7 = scalar_lea.vmem %s16145_s0, %s13407_s2  ;;  %s16151_s0 = smov 32  }
  0x3b   : > { %12303 = vmatpush3.bf16.msra.mxu1 %v12657_v14  ;;  %v10216_v62 = vld [vmem:[%s13527_s7] ss:$0 sm:$0xff] }
  0x3c   : > { %12320 = vmatprep.subr.bf16.mxu1 %v13211_v0 }
  0x3d   : > { %12313 = vmatpush3.bf16.msra.mxu0 %v12656_v13 }
  0x3e   : > { %12314 = vmatprep.subr.bf16.mxu0 %v13211_v0 }
  0x41   : > { %12315 = vmatpush3.bf16.msra.mxu0 %v12658_v15 }
  0x42   : > { %12332 = vmatprep.subr.bf16.mxu0 %v13211_v0 }
  0xf4   : > { %v823_v18 = vpop.f32.mrf.mxu0 }
  0xf5   : > { %v824_v19 = vadd.f32 %v10195_v16, %v823_v18 }
  0xf6   : > { %v12294_v20 = vpop.f32.mrf.mxu0 }
  0xf7   : > { %v13457_v22 = vadd.f32 %v829_v17, %v824_v19 }
  0xf8   : > { %v826_v23 = vpop.f32.mrf.mxu0 }
  0xf9   : > { %v831_v24 = vpack.c.bf16 %v13457_v22, %v13457_v22 }
  0xfa   : > { %v12295_v25 = vpop.f32.mrf.mxu0 }
  0xfb   : > { %12305 = vmatmul.mubr.msk.bf16.vlgmr.msra.gmra.mxu1 %vm871_vm4, %v831_v24  ;;  %12317 = vmatmul.mubr.msk.bf16.vlgmr.msra.gmra.mxu0 %vm871_vm4, %v831_v24 }
  0xfc   : > { %12321 = vmatpush3.bf16.msra.mxu1 %v12659_v21  ;;  %12328 = vmatprep.mubr.msk.bf16.mxu1 %vm13213_vm2, %v13211_v0 }
  0xfd   : > { %12322 = vmatprep.subr.bf16.mxu1 %v13211_v0  ;;  %12334 = vmatprep.mubr.msk.bf16.mxu0 %vm13213_vm2, %v13211_v0 }
 0x100   : > { %12323 = vmatpush3.bf16.msra.mxu1 %v12660_v26 }
 0x101   : > { %12324 = vmatprep.subr.bf16.mxu1 %v13211_v0 }
 0x104   : > { %12325 = vmatpush3.bf16.msra.mxu1 %v12661_v27 }
 0x105   : > { %12326 = vmatprep.subr.bf16.mxu1 %v13211_v0 }
 0x108   : > { %12327 = vmatpush3.bf16.msra.mxu1 %v12662_v28 }
 0x109   : > { %12344 = vmatprep.subr.bf16.mxu1 %v13211_v0 }
 0x10b   : > { %12329 = vmatmul.mubr.msk.bf16.vlgmr.msra.gmra.mxu1 %vm871_vm4, %v831_v24 }
 0x10c   : > { %12346 = vmatprep.mubr.msk.bf16.mxu1 %vm13213_vm2, %v13211_v0 }
 0x1bb   : > { %v909_v31 = vpop.f32.mrf.mxu1  ;;  %v989_v32 = vpop.f32.mrf.mxu0 }
 0x1bc   : > { %v910_v33 = vadd.f32 %v10198_v29, %v909_v31  ;;  %v990_v34 = vadd.f32 %v10204_v30, %v989_v32 }
 0x1bd   : > { %v12306_v35 = vpop.f32.mrf.mxu1  ;;  %v12318_v36 = vpop.f32.mrf.mxu0 }
 0x1be   : > { %v915_v37 = vmul.f32 0.25, %v910_v33  ;;  %v1075_v38 = vpack.c.bf16 %v990_v34, %v990_v34 }
 0x1bf   : > { %v912_v39 = vpop.f32.mrf.mxu1  ;;  %v992_v40 = vpop.f32.mrf.mxu0 }
 0x1c0   : > { %1311 = vrot.lane.b32.xlu1 %v1075_v38, %s16104_s5  ;;  %1194 = vrot.lane.b32.xlu0 %v1075_v38, %s16106_s27  ;;  %v1088_v41 = vsel %vm1083_vm5, %v1075_v38, 0  ;;  %v1074_v44 = vpack.c.bf16 %v915_v37, %v915_v37 }
 0x1c1   : > { %v12307_v42 = vpop.f32.mrf.mxu1  ;;  %v12319_v43 = vpop.f32.mrf.mxu0  ;;  %12333 = vmatpush3.bf16.xpose.msra.mxu0 %v1088_v41 }
 0x1c2   : > { %12338 = vmatprep.subr.bf16.mxu0 %v13211_v0 }
 0x1c4   : > { %1309 = vrot.lane.b32.xlu1 %v1074_v44, %s16104_s5  ;;  %1191 = vrot.lane.b32.xlu0 %v1074_v44, %s16106_s27 }
 0x1c8   : > { %1425 = vrot.lane.b32.xlu1 %v1074_v44, %s16102_s28  ;;  %1427 = vrot.lane.b32.xlu0 %v1075_v38, %s16102_s28 }
 0x1c9   : > { %12335 = vmatmul.mubr.msk.bf16.vlgmr.msra.gmra.mxu0 %vm1083_vm5, %v1074_v44 }
 0x1ca   : > { %12340 = vmatprep.mubr.msk.bf16.mxu0 %vm13213_vm2, %v13211_v0 }
 0x1cb   : > { %v1068_v46 = vpop.f32.mrf.mxu1 }
 0x1cc   : > { %v1069_v47 = vadd.f32 %v10210_v45, %v1068_v46 }
 0x1cd   : > { %v12330_v48 = vpop.f32.mrf.mxu1 }
 0x1ce   : > { %v13503_v49 = vpack.c.bf16 %v1069_v47, %v1069_v47 }
 0x1cf   : > { %v1071_v50 = vpop.f32.mrf.mxu1 }
 0x1d0   : > { %v1145_v51 = vsel %vm782_vm0, %v13503_v49, 0 }
 0x1d1   : > { %v12331_v52 = vpop.f32.mrf.mxu1  ;;  %12339 = vmatpush3.bf16.msra.mxu0 %v1145_v51 }
 0x1d2   : > { %12350 = vmatprep.subr.bf16.mxu0 %v13211_v0 }
 0x232   : > { %v1195_v53 = vpop.permute.xlu0 %1194  ;;  %v1312_v55 = vpop.permute.xlu1 %1311 }
 0x233   : > { %v1200_v54 = vsel %vm1083_vm5, %v1195_v53, 0  ;;  %v1317_v57 = vsel %vm1083_vm5, %v1312_v55, 0 }
 0x234   : > { %12345 = vmatpush3.bf16.xpose.msra.mxu1 %v1200_v54 }
 0x235   : > { %12356 = vmatprep.subr.bf16.mxu1 %v13211_v0 }
 0x236   : > { %v1192_v56 = vpop.permute.xlu0 %1191  ;;  %v1310_v59 = vpop.permute.xlu1 %1309 }
 0x23a   : > { %v1428_v58 = vpop.permute.xlu0 %1427  ;;  %v1426_v61 = vpop.permute.xlu1 %1425 }
 0x23b   : > { %12347 = vmatmul.mubr.msk.bf16.vlgmr.msra.gmra.mxu1 %vm1083_vm5, %v1192_v56  ;;  %v1433_v60 = vsel %vm1083_vm5, %v1428_v58, 0 }
 0x23c   : > { %12357 = vmatpush3.bf16.xpose.msra.mxu1 %v1317_v57  ;;  %12358 = vmatprep.mubr.msk.bf16.mxu1 %vm13213_vm2, %v13211_v0 }
 0x23d   : > { %12368 = vmatprep.subr.bf16.mxu1 %v13211_v0 }
 0x243   : > { %12359 = vmatmul.mubr.msk.bf16.vlgmr.msra.gmra.mxu1 %vm1083_vm5, %v1310_v59 }
 0x244   : > { %12369 = vmatpush3.bf16.xpose.msra.mxu1 %v1433_v60  ;;  %12370 = vmatprep.mubr.msk.bf16.mxu1 %vm13213_vm2, %v13211_v0 }
 0x245   : > { %12380 = vmatprep.subr.bf16.mxu1 %v13211_v0 }
 0x24b   : > { %12371 = vmatmul.mubr.msk.bf16.vlgmr.msra.gmra.mxu1 %vm1083_vm5, %v1426_v61 }
 0x24c   : > { %12388 = vmatprep.mubr.msk.bf16.mxu1 %vm13213_vm2, %v13211_v0 }
 0x289   : > { %v1124_v63 = vpop.f32.mrf.mxu0 }
 0x28a   : > { %v1125_v1 = vadd.f32 %v10216_v62, %v1124_v63 }
 0x28b   : > { %v12336_v2 = vpop.f32.mrf.mxu0 }
 0x28c   : > { %v1131_v3 = vsel %vm1130_vm6, %v1125_v1, -inf }
 0x28d   : > { %1132 = vmax.xlane.f32.xlu0 %v1131_v3  ;;  %v1127_v4 = vpop.f32.mrf.mxu0 }
 0x28f   : > { %v12337_v5 = vpop.f32.mrf.mxu0 }
 0x290   : > { %v12664_v5 = vld [vmem:[%s16071_s12 + $0x10] sm:$0xff]  }
 0x2fb   : > { %v1236_v6 = vpop.f32.mrf.mxu1 }
 0x2fc   : > { %v1237_v7 = vadd.f32 %v10216_v62, %v1236_v6 }
 0x2fd   : > { %v12348_v8 = vpop.f32.mrf.mxu1 }
 0x2fe   : > { %v1242_v9 = vsel %vm1130_vm6, %v1237_v7, -inf }
 0x2ff   : > { %1243 = vmax.xlane.f32.xlu1 %v1242_v9  ;;  %v1239_v10 = vpop.f32.mrf.mxu1 }
 0x300   : > { %v12665_v10 = vld [vmem:[%s16071_s12 + $0x8] sm:$0xff]  }
 0x301   : > { %v12349_v11 = vpop.f32.mrf.mxu1 }
 0x303   : > { %v1353_v12 = vpop.f32.mrf.mxu1 }
 0x304   : > { %v1354_v13 = vadd.f32 %v10216_v62, %v1353_v12 }
 0x305   : > { %v12360_v14 = vpop.f32.mrf.mxu1 }
 0x306   : > { %v1359_v15 = vsel %vm1130_vm6, %v1354_v13, -inf }
 0x307   : > { %v1356_v16 = vpop.f32.mrf.mxu1  ;;  %1360 = vmax.xlane.f32.xlu0 %v1359_v15 }
 0x309   : > { %v12361_v17 = vpop.f32.mrf.mxu1 }
 0x30b   : > { %v1469_v18 = vpop.f32.mrf.mxu1 }
 0x30c   : > { %v1470_v19 = vadd.f32 %v10216_v62, %v1469_v18 }
 0x30d   : > { %v12372_v20 = vpop.f32.mrf.mxu1 }
 0x30e   : > { %v1475_v21 = vsel %vm1130_vm6, %v1470_v19, -inf }
 0x30f   : > { %v1472_v23 = vpop.f32.mrf.mxu1  ;;  %1476 = vmax.xlane.f32.xlu0 %v1475_v21 }
 0x310   : > { %1253 = vrot.lane.b32.xlu1 %v13503_v49, %s16106_s27  ;;  %s16148_s27 = smov 96  }
 0x311   : > { %v12373_v24 = vpop.f32.mrf.mxu1 }
 0x314   : > { %1485 = vrot.lane.b32.xlu1 %v13503_v49, %s16102_s28  ;;  %s16149_s28 = smov 80  }
 0x316   : > { %v1133_v25 = vpop.xlane.xlu0 %1132 }
 0x317   : > { %v1134_v26 = vsub.f32 %v1125_v1, %v1133_v25  ;;  %v12663_v1 = vld [vmem:[%s16071_s12 + $0x18] sm:$0xff]  }
 0x318   : > { %12381 = vmatpush3.bf16.msra.mxu1 %v12663_v1 }
 0x319   : > { %v1135_v27 = vmul.f32 1.442695, %v1134_v26  ;;  %12382 = vmatprep.subr.bf16.mxu1 %v13211_v0 }
 0x31b   : > { %13087 = vpow2.f32 %v1135_v27 }
 0x31c   : > { %12383 = vmatpush3.bf16.msra.mxu1 %v12664_v5  ;;  %v1658_v5 = vld [vmem:[%s16075_s16 + $0x8] sm:$0xff] }
 0x31d   : > { %12384 = vmatprep.subr.bf16.mxu1 %v13211_v0 }
 0x320   : > { %12385 = vmatpush3.bf16.msra.mxu1 %v12665_v10 }
 0x321   : > { %12386 = vmatprep.subr.bf16.mxu1 %v13211_v0 }
 0x325   : > { %1369 = vrot.lane.b32.xlu0 %v13503_v49, %s16104_s5  ;;  %s16147_s5 = smov 112  }
 0x328   : > { %v13088_v28 = vpop.eup %13087 }
 0x329   : > { %v1140_v29 = vpack.c.bf16 %v13088_v28, %v13088_v28  ;;  %v1137_v46 = vsel %vm1130_vm6, %v13088_v28, 0.0 }
 0x32b   : > { %12341 = vmatmul.mubr.msk.bf16.vlgmr.msra.gmra.mxu0 %vm1130_vm6, %v1140_v29 }
 0x32c   : > { %12352 = vmatprep.mubr.msk.bf16.mxu0 %vm13213_vm2, %v13211_v0 }
 0x388   : > { %v1244_v30 = vpop.xlane.xlu1 %1243 }
 0x389   : > { %v1245_v31 = vsub.f32 %v1237_v7, %v1244_v30  ;;  %v10225_v30 = vld [vmem:[%s16146_s13] ss:$0 sm:$0xff] }
 0x38b   : > { %v1246_v32 = vmul.f32 1.442695, %v1245_v31 }
 0x38c   : > { %v1254_v33 = vpop.permute.xlu1 %1253 }
 0x38d   : > { %13089 = vpow2.f32 %v1246_v32  ;;  %v1259_v34 = vsel %vm782_vm0, %v1254_v33, 0 }
 0x38e   : > { %12351 = vmatpush3.bf16.msra.mxu0 %v1259_v34 }
 0x38f   : > { %12362 = vmatprep.subr.bf16.mxu0 %v13211_v0 }
 0x390   : > { %v1361_v35 = vpop.xlane.xlu0 %1360  ;;  %v1486_v48 = vpop.permute.xlu1 %1485 }
 0x391   : > { %v1362_v36 = vsub.f32 %v1354_v13, %v1361_v35  ;;  %v1491_v51 = vsel %vm782_vm0, %v1486_v48, 0  ;;  %v12666_v13 = vld [vmem:[%s16071_s12] sm:$0xff]  }
 0x392   : > { %12387 = vmatpush3.bf16.msra.mxu1 %v12666_v13  ;;  %v1708_v13 = vld [vmem:[%s16075_s16 + $0x198] sm:$0xff] }
 0x393   : > { %v1363_v37 = vmul.f32 1.442695, %v1362_v36 }
 0x395   : > { %13091 = vpow2.f32 %v1363_v37 }
 0x398   : > { %v1477_v38 = vpop.xlane.xlu0 %1476 }
 0x399   : > { %v1478_v39 = vsub.f32 %v1470_v19, %v1477_v38 }
 0x39a   : > { %v13090_v40 = vpop.eup %13089 }
 0x39b   : > { %v1479_v41 = vmul.f32 1.442695, %v1478_v39  ;;  %v1248_v42 = vsel %vm1130_vm6, %v13090_v40, 0.0  ;;  %v1251_v43 = vpack.c.bf16 %v13090_v40, %v13090_v40 }
 0x39c   : > { %1249 = vadd.xlane.f32.xlu1 %v1248_v42  ;;  %v1370_v44 = vpop.permute.xlu0 %1369 }
 0x39d   : > { %13093 = vpow2.f32 %v1479_v41  ;;  %v1375_v45 = vsel %vm782_vm0, %v1370_v44, 0  ;;  %12353 = vmatmul.mubr.msk.bf16.vlgmr.msra.gmra.mxu0 %vm1130_vm6, %v1251_v43  ;;  %v1705_v43 = vld [vmem:[%s16075_s16 + $0x180] sm:$0xff]  ;;  %v1706_v44 = vld [vmem:[%s16075_s16 + $0x188] sm:$0xff] }
 0x39e   : > { %12363 = vmatpush3.bf16.msra.mxu0 %v1375_v45  ;;  %12364 = vmatprep.mubr.msk.bf16.mxu0 %vm13213_vm2, %v13211_v0 }
 0x39f   : > { %12374 = vmatprep.subr.bf16.mxu0 %v13211_v0 }
 0x3a0   : > { %1138 = vadd.xlane.f32.xlu1 %v1137_v46  ;;  %v1714_v46 = vld [vmem:[%s16075_s16 + $0x1c8] sm:$0xff] }
 0x3a1   : > { %v10283_v48 = vcombine.low %v1706_v44, %v1714_v46 }
 0x3a2   : > { %v13092_v47 = vpop.eup %13091 }
 0x3a3   : > { %v1365_v49 = vsel %vm1130_vm6, %v13092_v47, 0.0  ;;  %v1368_v50 = vpack.c.bf16 %v13092_v47, %v13092_v47 }
 0x3a4   : > { %1366 = vadd.xlane.f32.xlu0 %v1365_v49  ;;  %v10284_v49 = vcombine.high %v1706_v44, %v1714_v46  ;;  %v1659_v44 = vld [vmem:[%s16075_s16 + $0x10] sm:$0xff]  ;;  %v1660_v46 = vld [vmem:[%s16075_s16 + $0x18] sm:$0xff] }
 0x3a5   : > { %12365 = vmatmul.mubr.msk.bf16.vlgmr.msra.gmra.mxu0 %vm1130_vm6, %v1368_v50  ;;  %v1689_v50 = vld [vmem:[%s16075_s16 + $0x100] sm:$0xff] }
 0x3a6   : > { %12375 = vmatpush3.bf16.msra.mxu0 %v1491_v51  ;;  %12376 = vmatprep.mubr.msk.bf16.mxu0 %vm13213_vm2, %v13211_v0  ;;  %v1697_v51 = vld [vmem:[%s16075_s16 + $0x140] sm:$0xff] }
 0x3a7   : > { %2177 = vmatprep.subr.bf16.mxu1 %v10284_v49 }
 0x3aa   : > { %v13094_v52 = vpop.eup %13093 }
 0x3ab   : > { %v1481_v53 = vsel %vm1130_vm6, %v13094_v52, 0.0  ;;  %v1484_v54 = vpack.c.bf16 %v13094_v52, %v13094_v52  ;;  %v1690_v52 = vld [vmem:[%s16075_s16 + $0x108] sm:$0xff] }
 0x3ac   : > { %1482 = vadd.xlane.f32.xlu0 %v1481_v53  ;;  %v10266_v53 = vcombine.high %v1689_v50, %v1697_v51 }
 0x3ad   : > { %12377 = vmatmul.mubr.msk.bf16.vlgmr.msra.gmra.mxu0 %vm1130_vm6, %v1484_v54  ;;  %v1698_v54 = vld [vmem:[%s16075_s16 + $0x148] sm:$0xff] }
 0x3eb   : > { %v1181_v55 = vpop.f32.mrf.mxu0 }
 0x3ed   : > { %v12342_v56 = vpop.f32.mrf.mxu0 }
 0x3ee   : > { %v10267_v56 = vcombine.low %v1690_v52, %v1698_v54 }
 0x3ef   : > { %v1184_v57 = vpop.f32.mrf.mxu0 }
 0x3f0   : > { %v10268_v57 = vcombine.high %v1690_v52, %v1698_v54  ;;  %v1709_v52 = vld [vmem:[%s16075_s16 + $0x1a0] sm:$0xff]  ;;  %v1710_v54 = vld [vmem:[%s16075_s16 + $0x1a8] sm:$0xff] }
 0x3f1   : > { %v12343_v58 = vpop.f32.mrf.mxu0 }
 0x3f2   : > { %v1673_v58 = vld [vmem:[%s16075_s16 + $0x80] sm:$0xff] }
 0x425   : > { %v1250_v59 = vpop.xlane.xlu1 %1249 }
 0x429   : > { %v1139_v60 = vpop.xlane.xlu1 %1138 }
 0x42a   : > { %13095 = vrcp.f32 %v1139_v60  ;;  %v1674_v60 = vld [vmem:[%s16075_s16 + $0x88] sm:$0xff] }
 0x42b   : > { %13097 = vrcp.f32 %v1250_v59  ;;  %v1681_v59 = vld [vmem:[%s16075_s16 + $0xc0] sm:$0xff] }
 0x42d   : > { %v1367_v63 = vpop.xlane.xlu0 %1366 }
 0x42e   : > { %13099 = vrcp.f32 %v1367_v63  ;;  %v10249_v63 = vcombine.low %v1673_v58, %v1681_v59 }
 0x435   : > { %v1483_v3 = vpop.xlane.xlu0 %1482 }
 0x436   : > { %13101 = vrcp.f32 %v1483_v3  ;;  %v1657_v3 = vld [vmem:[%s16075_s16] sm:$0xff] }
 0x437   : > { %v13096_v61 = vpop.eup %13095 }
 0x438   : > { %v1188_v62 = vmul.f32 %v13096_v61, %v1181_v55  ;;  %v13098_v2 = vpop.eup %13097  ;;  %v10265_v55 = vcombine.low %v1689_v50, %v1697_v51  ;;  %v10250_v61 = vcombine.high %v1673_v58, %v1681_v59 }
 0x43a   : > { %1189 = vst.msk [vmem:[#allocation2] sm:$0xff] %vm1083_vm5, %v1188_v62  ;;  %v1682_v62 = vld [vmem:[%s16075_s16 + $0xc8] sm:$0xff] }
 0x43b   : > { %v13100_v11 = vpop.eup %13099  ;;  %v10251_v1 = vcombine.low %v1674_v60, %v1682_v62 }
 0x443   : > { %v13102_v18 = vpop.eup %13101 }
 0x45d   : > { %v1295_v4 = vpop.f32.mrf.mxu0 }
 0x45e   : > { %v1302_v6 = vmul.f32 %v13098_v2, %v1295_v4  ;;  %v10252_v2 = vcombine.high %v1674_v60, %v1682_v62  ;;  %v1665_v4 = vld [vmem:[%s16075_s16 + $0x40] sm:$0xff]  ;;  %v1694_v62 = vld [vmem:[%s16075_s16 + $0x128] sm:$0xff] }
 0x45f   : > { %v12354_v7 = vpop.f32.mrf.mxu0  ;;  %v1693_v60 = vld [vmem:[%s16075_s16 + $0x120] sm:$0xff] }
 0x460   : > { %1304 = vrot.lane.b32.xlu0 %v1302_v6, %s16100_s25  ;;  %v10234_v6 = vcombine.high %v1657_v3, %v1665_v4  ;;  %v1666_v7 = vld [vmem:[%s16075_s16 + $0x48] sm:$0xff]  ;;  %s13221_s25 = smov [#allocation3]  }
 0x461   : > { %v1298_v8 = vpop.f32.mrf.mxu0  ;;  %v10236_v10 = vcombine.high %v1658_v5, %v1666_v7  ;;  %s13153_s6 = sshll.u32 %s13221_s25, 4  ;;  %s13154_s6 = int_to_ptr.vmem [resolvable:$false] %s13153_s6 }
 0x462   : > { %v10233_v8 = vcombine.low %v1657_v3, %v1665_v4 }
 0x463   : > { %v12355_v9 = vpop.f32.mrf.mxu0 }
 0x464   : > { %v10235_v9 = vcombine.low %v1658_v5, %v1666_v7  ;;  %v1677_v5 = vld [vmem:[%s16075_s16 + $0xa0] sm:$0xff]  ;;  %v1678_v7 = vld [vmem:[%s16075_s16 + $0xa8] sm:$0xff] }
 0x465   : > { %v1411_v12 = vpop.f32.mrf.mxu0 }
 0x466   : > { %v1418_v14 = vmul.f32 %v13100_v11, %v1411_v12  ;;  %v1707_v11 = vld [vmem:[%s16075_s16 + $0x190] sm:$0xff] }
 0x467   : > { %v12366_v15 = vpop.f32.mrf.mxu0  ;;  %v1715_v12 = vld [vmem:[%s16075_s16 + $0x1d0] sm:$0xff] }
 0x468   : > { %1420 = vrot.lane.b32.xlu1 %v1418_v14, %s16098_s29  ;;  %v10285_v14 = vcombine.low %v1707_v11, %v1715_v12  ;;  %v10286_v15 = vcombine.high %v1707_v11, %v1715_v12  ;;  %s16152_s29 = smov 48  }
 0x469   : > { %v1414_v16 = vpop.f32.mrf.mxu0 }
 0x46a   : > { %v1716_v16 = vld [vmem:[%s16075_s16 + $0x1d8] sm:$0xff] }
 0x46b   : > { %v12367_v17 = vpop.f32.mrf.mxu0 }
 0x46c   : > { %v13220_v17 = vmov 0  }
 0x46d   : > { %v1527_v19 = vpop.f32.mrf.mxu0  ;;  %2160 = vmatprep.mubr.bf16.mxu0 %v13220_v17 }
 0x46e   : > { %v1534_v20 = vmul.f32 %v13102_v18, %v1527_v19  ;;  %v10287_v18 = vcombine.low %v1708_v13, %v1716_v16  ;;  %v10288_v19 = vcombine.high %v1708_v13, %v1716_v16  ;;  %v1661_v13 = vld [vmem:[%s16075_s16 + $0x20] sm:$0xff]  ;;  %v1670_v16 = vld [vmem:[%s16075_s16 + $0x68] sm:$0xff] }
 0x46f   : > { %v12378_v21 = vpop.f32.mrf.mxu0 }
 0x470   : > { %1536 = vrot.lane.b32.xlu1 %v1534_v20, %s16096_s3  ;;  %s16150_s3 = smov 16  }
 0x471   : > { %v1530_v23 = vpop.f32.mrf.mxu0 }
 0x473   : > { %v12379_v24 = vpop.f32.mrf.mxu0 }
 0x4d2   : > { %v1305_v25 = vpop.permute.xlu0 %1304 }
 0x4d3   : > { %1308 = vst.msk [vmem:[#allocation2] sm:$0xff] %vm1307_vm7, %v1305_v25  ;;  %v10231_v25 = vld [vmem:[%s16073_s14] ss:$0 sm:$0xff] }
 0x4da   : > { %v1421_v26 = vpop.permute.xlu1 %1420 }
 0x4db   : > { %1424 = vst.msk [vmem:[#allocation2] sm:$0xff] %vm1423_vm8, %v1421_v26 }
 0x4e2   : > { %v1537_v27 = vpop.permute.xlu1 %1536 }
 0x4e3   : > { %1540 = vst.msk [vmem:[#allocation2] sm:$0xff] %vm1539_vm9, %v1537_v27  ;;  %v10232_v27 = vld [vmem:[%s16074_s15] ss:$0 sm:$0xff] }
 0x4ea   : > { %v1541_v28 = vld [vmem:[#allocation2] sm:$0xff] }
 0x4eb   : > { %v1542_v29 = vpack.c.bf16 %v1541_v28, %v1541_v28 }
 0x4ed   : > { %12389 = vmatmul.mubr.msk.bf16.vlgmr.msra.gmra.mxu1 %vm871_vm4, %v1542_v29  ;;  %v1691_v29 = vld [vmem:[%s16075_s16 + $0x110] sm:$0xff] }
 0x4ee   : > { %2178 = vmatpush1.bf16.msra.mxu1 %v10283_v48  ;;  %2201 = vmatprep.mubr.bf16.mxu1 %v13220_v17 }
 0x4ef   : > { %2179 = vmatprep.subr.bf16.mxu1 %v10268_v57 }
 0x4f2   : > { %2180 = vmatpush1.bf16.msra.mxu1 %v10267_v56 }
 0x4f3   : > { %2181 = vmatprep.subr.bf16.mxu1 %v10252_v2 }
 0x4f6   : > { %2182 = vmatpush1.bf16.msra.mxu1 %v10251_v1 }
 0x4f7   : > { %2183 = vmatprep.subr.bf16.mxu1 %v10236_v10 }
 0x4fa   : > { %2184 = vmatpush1.bf16.msra.mxu1 %v10235_v9 }
 0x4fb   : > { %2259 = vmatprep.subr.bf16.mxu1 %v10288_v19 }
 0x5ad   : > { %v1619_v31 = vpop.f32.mrf.mxu1 }
 0x5ae   : > { %v1620_v32 = vadd.f32 %v10225_v30, %v1619_v31  ;;  %v1699_v30 = vld [vmem:[%s16075_s16 + $0x150] sm:$0xff]  ;;  %v1692_v31 = vld [vmem:[%s16075_s16 + $0x118] sm:$0xff] }
 0x5af   : > { %v12390_v33 = vpop.f32.mrf.mxu1 }
 0x5b0   : > { %v1625_v34 = vadd.f32 %v1620_v32, %v13457_v22  ;;  %v1713_v22 = vld [vmem:[%s16075_s16 + $0x1c0] sm:$0xff]  ;;  %v1700_v32 = vld [vmem:[%s16075_s16 + $0x158] sm:$0xff] }
 0x5b1   : > { %v1622_v35 = vpop.f32.mrf.mxu1  ;;  %v10282_v45 = vcombine.high %v1705_v43, %v1713_v22  ;;  %v10281_v47 = vcombine.low %v1705_v43, %v1713_v22 }
 0x5b2   : > { %v1628_v36 = vsel %vm871_vm4, %v1625_v34, 0.0  ;;  %v10270_v35 = vcombine.high %v1691_v29, %v1699_v30 }
 0x5b3   : > { %1629 = vadd.xlane.f32.xlu0 %v1628_v36  ;;  %v12391_v37 = vpop.f32.mrf.mxu1  ;;  %2136 = vmatprep.subr.bf16.mxu0 %v10282_v45  ;;  %v10272_v36 = vcombine.high %v1692_v31, %v1700_v32  ;;  %v1667_v45 = vld [vmem:[%s16075_s16 + $0x50] sm:$0xff] }
 0x5b4   : > { %2137 = vmatpush1.bf16.msra.mxu0 %v10281_v47  ;;  %v1675_v37 = vld [vmem:[%s16075_s16 + $0x90] sm:$0xff]  ;;  %v1668_v47 = vld [vmem:[%s16075_s16 + $0x58] sm:$0xff]  ;;  %v10238_v50 = vcombine.high %v1659_v44, %v1667_v45  ;;  %v10237_v56 = vcombine.low %v1659_v44, %v1667_v45 }
 0x5b5   : > { %2138 = vmatprep.subr.bf16.mxu0 %v10266_v53  ;;  %v10240_v51 = vcombine.high %v1660_v46, %v1668_v47  ;;  %v1717_v53 = vld [vmem:[%s16075_s16 + $0x1e0] sm:$0xff]  ;;  %v10239_v57 = vcombine.low %v1660_v46, %v1668_v47 }
 0x5b6   : > { %v10290_v58 = vcombine.high %v1709_v52, %v1717_v53  ;;  %v10289_v1 = vcombine.low %v1709_v52, %v1717_v53 }
 0x5b8   : > { %2139 = vmatpush1.bf16.msra.mxu0 %v10265_v55  ;;  %v1718_v55 = vld [vmem:[%s16075_s16 + $0x1e8] sm:$0xff] }
 0x5b9   : > { %2140 = vmatprep.subr.bf16.mxu0 %v10250_v61  ;;  %v10292_v59 = vcombine.high %v1710_v54, %v1718_v55  ;;  %v1701_v61 = vld [vmem:[%s16075_s16 + $0x160] sm:$0xff]  ;;  %v10291_v2 = vcombine.low %v1710_v54, %v1718_v55 }
 0x5ba   : > { %v10274_v3 = vcombine.high %v1693_v60, %v1701_v61  ;;  %v10273_v9 = vcombine.low %v1693_v60, %v1701_v61  ;;  %v12669_v60 = vld [vmem:[%s16077_s18 + $0x38] sm:$0xff]  }
 0x5bb   : > { %v12670_v61 = vld [vmem:[%s16077_s18 + $0xb8] sm:$0xff]  }
 0x5bc   : > { %2141 = vmatpush1.bf16.msra.mxu0 %v10249_v63  ;;  %v1702_v63 = vld [vmem:[%s16075_s16 + $0x168] sm:$0xff] }
 0x5bd   : > { %2142 = vmatprep.subr.bf16.mxu0 %v10234_v6  ;;  %v10276_v4 = vcombine.high %v1694_v62, %v1702_v63  ;;  %v1685_v6 = vld [vmem:[%s16075_s16 + $0xe0] sm:$0xff]  ;;  %v10275_v10 = vcombine.low %v1694_v62, %v1702_v63  ;;  %v12671_v62 = vld [vmem:[%s16077_s18 + $0x70] sm:$0xff]  }
 0x5be   : > { %v10258_v11 = vcombine.high %v1677_v5, %v1685_v6  ;;  %v12672_v63 = vld [vmem:[%s16077_s18 + $0xf0] sm:$0xff]  }
 0x5c0   : > { %2143 = vmatpush1.bf16.msra.mxu0 %v10233_v8  ;;  %v1686_v8 = vld [vmem:[%s16075_s16 + $0xe8] sm:$0xff] }
 0x5c1   : > { %2218 = vmatprep.subr.bf16.mxu0 %v10286_v15  ;;  %v10260_v12 = vcombine.high %v1678_v7, %v1686_v8  ;;  %v1662_v15 = vld [vmem:[%s16075_s16 + $0x28] sm:$0xff]  ;;  %v10259_v19 = vcombine.low %v1678_v7, %v1686_v8  ;;  %v12680_v7 = vld [vmem:[%s16077_s18 + $0xe0] sm:$0xff]  }
 0x5c2   : > { %v12681_v8 = vld [vmem:[%s16077_s18 + $0x20] sm:$0xff]  }
 0x63c   : > { %v1630_v38 = vpop.xlane.xlu0 %1629 }
 0x63d   : > { %v1632_v39 = vmul.f32 0.015625, %v1630_v38  ;;  %v1683_v38 = vld [vmem:[%s16075_s16 + $0xd0] sm:$0xff] }
 0x63e   : > { %v10254_v43 = vcombine.high %v1675_v37, %v1683_v38  ;;  %v10253_v48 = vcombine.low %v1675_v37, %v1683_v38 }
 0x63f   : > { %v13587_v40 = vsub.f32 %v1625_v34, %v1632_v39  ;;  %v1676_v39 = vld [vmem:[%s16075_s16 + $0x98] sm:$0xff] }
 0x641   : > { %v1634_v41 = vmul.f32 %v13587_v40, %v13587_v40 }
 0x643   : > { %v1635_v42 = vsel %vm871_vm4, %v1634_v41, 0.0  ;;  %v10269_v41 = vcombine.low %v1691_v29, %v1699_v30 }
 0x644   : > { %1636 = vadd.xlane.f32.xlu1 %v1635_v42  ;;  %v10271_v42 = vcombine.low %v1692_v31, %v1700_v32  ;;  %v1695_v31 = vld [vmem:[%s16075_s16 + $0x130] sm:$0xff] }
 0x645   : > { %v1703_v32 = vld [vmem:[%s16075_s16 + $0x170] sm:$0xff] }
 0x646   : > { %v10277_v44 = vcombine.low %v1695_v31, %v1703_v32 }
 0x6cd   : > { %v1637_v20 = vpop.xlane.xlu1 %1636 }
 0x6ce   : > { %v1638_v21 = vmul.f32 0.015625, %v1637_v20 }
 0x6d0   : > { %v1639_v23 = vadd.f32 1e-05, %v1638_v21  ;;  %v10244_v21 = vcombine.high %v1662_v15, %v1670_v16 }
 0x6d2   : > { %13103 = vrsqrt.f32 %v1639_v23  ;;  %v1711_v23 = vld [vmem:[%s16075_s16 + $0x1b0] sm:$0xff] }
 0x6df   : > { %v13104_v24 = vpop.eup %13103 }
 0x6e0   : > { %v1641_v26 = vmul.f32 %v13104_v24, %v13587_v40  ;;  %v1684_v40 = vld [vmem:[%s16075_s16 + $0xd8] sm:$0xff]  ;;  %v1719_v24 = vld [vmem:[%s16075_s16 + $0x1f0] sm:$0xff] }
 0x6e1   : > { %v10256_v22 = vcombine.high %v1676_v39, %v1684_v40  ;;  %v10255_v49 = vcombine.low %v1676_v39, %v1684_v40  ;;  %v10294_v29 = vcombine.high %v1711_v23, %v1719_v24  ;;  %v10293_v37 = vcombine.low %v1711_v23, %v1719_v24  ;;  %v12694_v23 = vld [vmem:[%s16077_s18 + $0x88] sm:$0xff]   ;;  %v12695_v24 = vld [vmem:[%s16077_s18 + $0x40] sm:$0xff]  }
 0x6e2   : > { %v1648_v28 = vmul.f32 %v10231_v25, %v1641_v26  ;;  %v1712_v25 = vld [vmem:[%s16075_s16 + $0x1b8] sm:$0xff]  ;;  %v10278_v39 = vcombine.high %v1695_v31, %v1703_v32 }
 0x6e3   : > { %v1720_v26 = vld [vmem:[%s16075_s16 + $0x1f8] sm:$0xff] }
 0x6e4   : > { %v13673_v33 = vadd.f32 %v10232_v27, %v1648_v28  ;;  %v10243_v28 = vcombine.low %v1662_v15, %v1670_v16  ;;  %v10296_v30 = vcombine.high %v1712_v25, %v1720_v26  ;;  %v10295_v38 = vcombine.low %v1712_v25, %v1720_v26  ;;  %v12688_v15 = vld [vmem:[%s16077_s18 + $0xd0] sm:$0xff]   ;;  %v12696_v25 = vld [vmem:[%s16077_s18 + $0xc0] sm:$0xff]  }
 0x6e5   : > { %v12689_v16 = vld [vmem:[%s16077_s18 + $0x10] sm:$0xff]   ;;  %v12697_v26 = vld [vmem:[%s16077_s18] sm:$0xff]  }
 0x6e6   : > { %v13677_v34 = vpack.c.bf16 %v13673_v33, %v13673_v33 }
 0x6e8   : > { %10297 = vmatmul.mubr.msk.bf16.vlgmr.msra.gmra.mxu0 %vm871_vm4, %v13677_v34  ;;  %10298 = vmatmul.mubr.msk.bf16.vlgmr.msra.gmra.mxu1 %vm871_vm4, %v13677_v34 }
 0x6e9   : > { %2219 = vmatpush1.bf16.msra.mxu0 %v10285_v14  ;;  %2260 = vmatpush1.bf16.msra.mxu1 %v10287_v18  ;;  %v1669_v14 = vld [vmem:[%s16075_s16 + $0x60] sm:$0xff]  ;;  %v10257_v18 = vcombine.low %v1677_v5, %v1685_v6  ;;  %v12678_v5 = vld [vmem:[%s16077_s18 + $0xa8] sm:$0xff]  }
 0x6ea   : > { %2220 = vmatprep.subr.bf16.mxu0 %v10270_v35  ;;  %2261 = vmatprep.subr.bf16.mxu1 %v10272_v36  ;;  %v10242_v20 = vcombine.high %v1661_v13, %v1669_v14  ;;  %v10241_v27 = vcombine.low %v1661_v13, %v1669_v14  ;;  %v1696_v35 = vld [vmem:[%s16075_s16 + $0x138] sm:$0xff]  ;;  %v12679_v6 = vld [vmem:[%s16077_s18 + $0x60] sm:$0xff]   ;;  %v12687_v14 = vld [vmem:[%s16077_s18 + $0x50] sm:$0xff]  }
 0x6eb   : > { %2242 = vmatprep.mubr.bf16.mxu0 %v13220_v17  ;;  %2283 = vmatprep.mubr.bf16.mxu1 %v13220_v17  ;;  %v1704_v36 = vld [vmem:[%s16075_s16 + $0x178] sm:$0xff] }
 0x6ec   : > { %v10280_v40 = vcombine.high %v1696_v35, %v1704_v36  ;;  %v10279_v45 = vcombine.low %v1696_v35, %v1704_v36  ;;  %v12686_v13 = vld [vmem:[%s16077_s18 + $0x98] sm:$0xff]   ;;  %v13934_v36 = vld [vmem:[%s16076_s17] sm:$0xff] }
 0x6ed   : > { %2221 = vmatpush1.bf16.msra.mxu0 %v10269_v41  ;;  %2262 = vmatpush1.bf16.msra.mxu1 %v10271_v42  ;;  %v1679_v41 = vld [vmem:[%s16075_s16 + $0xb0] sm:$0xff] }
 0x6ee   : > { %2222 = vmatprep.subr.bf16.mxu0 %v10254_v43  ;;  %2263 = vmatprep.subr.bf16.mxu1 %v10256_v22  ;;  %v1687_v42 = vld [vmem:[%s16075_s16 + $0xf0] sm:$0xff]  ;;  %v1680_v43 = vld [vmem:[%s16075_s16 + $0xb8] sm:$0xff] }
 0x6ef   : > { %v1688_v22 = vld [vmem:[%s16075_s16 + $0xf8] sm:$0xff]  ;;  %v10262_v46 = vcombine.high %v1679_v41, %v1687_v42  ;;  %v10261_v52 = vcombine.low %v1679_v41, %v1687_v42 }
 0x6f0   : > { %v10264_v47 = vcombine.high %v1680_v43, %v1688_v22  ;;  %v10263_v53 = vcombine.low %v1680_v43, %v1688_v22 }
 0x6f1   : > { %2223 = vmatpush1.bf16.msra.mxu0 %v10253_v48  ;;  %2264 = vmatpush1.bf16.msra.mxu1 %v10255_v49  ;;  %v1663_v48 = vld [vmem:[%s16075_s16 + $0x30] sm:$0xff] }
 0x6f2   : > { %2224 = vmatprep.subr.bf16.mxu0 %v10238_v50  ;;  %2265 = vmatprep.subr.bf16.mxu1 %v10240_v51  ;;  %v1671_v49 = vld [vmem:[%s16075_s16 + $0x70] sm:$0xff]  ;;  %v1664_v50 = vld [vmem:[%s16075_s16 + $0x38] sm:$0xff] }
 0x6f3   : > { %v1672_v51 = vld [vmem:[%s16075_s16 + $0x78] sm:$0xff]  ;;  %v10246_v54 = vcombine.high %v1663_v48, %v1671_v49 }
 0x6f4   : > { %v10248_v55 = vcombine.high %v1664_v50, %v1672_v51 }
 0x6f5   : > { %2225 = vmatpush1.bf16.msra.mxu0 %v10237_v56  ;;  %2266 = vmatpush1.bf16.msra.mxu1 %v10239_v57  ;;  %v10245_v56 = vcombine.low %v1663_v48, %v1671_v49  ;;  %v10247_v57 = vcombine.low %v1664_v50, %v1672_v51 }
 0x6f6   : > { %2300 = vmatprep.subr.bf16.mxu0 %v10290_v58  ;;  %2341 = vmatprep.subr.bf16.mxu1 %v10292_v59  ;;  %v12667_v58 = vld [vmem:[%s16077_s18 + $0x78] sm:$0xff]  }
 0x6f7   : > { %v12668_v59 = vld [vmem:[%s16077_s18 + $0xf8] sm:$0xff]  }
 0x6f8   : > { %10299 = vmatmul.mubr.msk.bf16.vlgmr.msra.gmra.mxu0 %vm871_vm4, %v13677_v34  ;;  %10300 = vmatmul.mubr.msk.bf16.vlgmr.msra.gmra.mxu1 %vm871_vm4, %v13677_v34 }
 0x6f9   : > { %2301 = vmatpush1.bf16.msra.mxu0 %v10289_v1  ;;  %2342 = vmatpush1.bf16.msra.mxu1 %v10291_v2  ;;  %v12673_v1 = vld [vmem:[%s16077_s18 + $0x30] sm:$0xff]  }
 0x6fa   : > { %2302 = vmatprep.subr.bf16.mxu0 %v10274_v3  ;;  %2343 = vmatprep.subr.bf16.mxu1 %v10276_v4  ;;  %v12674_v2 = vld [vmem:[%s16077_s18 + $0xb0] sm:$0xff]   ;;  %v12675_v3 = vld [vmem:[%s16077_s18 + $0x68] sm:$0xff]  }
 0x6fb   : > { %2324 = vmatprep.mubr.bf16.mxu0 %v13220_v17  ;;  %2365 = vmatprep.mubr.bf16.mxu1 %v13220_v17  ;;  %v12677_v4 = vld [vmem:[%s16077_s18 + $0x28] sm:$0xff]  }
 0x6fd   : > { %2303 = vmatpush1.bf16.msra.mxu0 %v10273_v9  ;;  %2344 = vmatpush1.bf16.msra.mxu1 %v10275_v10  ;;  %v12682_v9 = vld [vmem:[%s16077_s18 + $0xa0] sm:$0xff]   ;;  %v12683_v10 = vld [vmem:[%s16077_s18 + $0x58] sm:$0xff]  }
 0x6fe   : > { %2304 = vmatprep.subr.bf16.mxu0 %v10258_v11  ;;  %2345 = vmatprep.subr.bf16.mxu1 %v10260_v12  ;;  %v12684_v11 = vld [vmem:[%s16077_s18 + $0xd8] sm:$0xff]  }
 0x6ff   : > { %v12685_v12 = vld [vmem:[%s16077_s18 + $0x18] sm:$0xff]  }
 0x701   : > { %2305 = vmatpush1.bf16.msra.mxu0 %v10257_v18  ;;  %2346 = vmatpush1.bf16.msra.mxu1 %v10259_v19  ;;  %v12690_v18 = vld [vmem:[%s16077_s18 + $0x90] sm:$0xff]   ;;  %v12691_v19 = vld [vmem:[%s16077_s18 + $0x48] sm:$0xff]  }
 0x702   : > { %2306 = vmatprep.subr.bf16.mxu0 %v10242_v20  ;;  %2347 = vmatprep.subr.bf16.mxu1 %v10244_v21  ;;  %v12692_v20 = vld [vmem:[%s16077_s18 + $0xc8] sm:$0xff]  }
 0x703   : > { %v12693_v21 = vld [vmem:[%s16077_s18 + $0x8] sm:$0xff]  }
 0x705   : > { %2307 = vmatpush1.bf16.msra.mxu0 %v10241_v27  ;;  %2348 = vmatpush1.bf16.msra.mxu1 %v10243_v28  ;;  %v12698_v27 = vld [vmem:[%s16077_s18 + $0x80] sm:$0xff]   ;;  %v12699_v28 = vld [vmem:[%s16077_s18 + $0x178] sm:$0xff]  }
 0x706   : > { %2382 = vmatprep.subr.bf16.mxu0 %v10294_v29  ;;  %2423 = vmatprep.subr.bf16.mxu1 %v10296_v30  ;;  %v12700_v29 = vld [vmem:[%s16077_s18 + $0x1f8] sm:$0xff]   ;;  %v1725_v30 = vlaneseq }
 0x708   : > { %10301 = vmatmul.mubr.msk.bf16.vlgmr.msra.gmra.mxu0 %vm871_vm4, %v13677_v34  ;;  %10302 = vmatmul.mubr.msk.bf16.vlgmr.msra.gmra.mxu1 %vm871_vm4, %v13677_v34  ;;  %v13923_v31 = vshrl.u32 %v1725_v30, 7 }
 0x709   : > { %2383 = vmatpush1.bf16.msra.mxu0 %v10293_v37  ;;  %2424 = vmatpush1.bf16.msra.mxu1 %v10295_v38 }
 0x70a   : > { %2384 = vmatprep.subr.bf16.mxu0 %v10278_v39  ;;  %2425 = vmatprep.subr.bf16.mxu1 %v10280_v40  ;;  %v13926_v32 = vsub.s32 0, %v13923_v31  ;;  %v13929_v35 = vsub.s32 2, %v13923_v31  ;;  %v13937_v37 = vsub.s32 1, %v13923_v31  ;;  %v13940_v38 = vsub.s32 3, %v13923_v31 }
 0x70b   : > { %2406 = vmatprep.mubr.bf16.mxu0 %v13220_v17  ;;  %2447 = vmatprep.mubr.bf16.mxu1 %v13220_v17 }
 0x70c   : > { %v1728_v39 = vrot.slane %v13934_v36, %v13926_v32  ;;  %v1736_v40 = vrot.slane %v13934_v36, %v13929_v35  ;;  %v1732_v41 = vrot.slane %v13934_v36, %v13937_v37  ;;  %v1740_v42 = vrot.slane %v13934_v36, %v13940_v38 }
 0x70d   : > { %2385 = vmatpush1.bf16.msra.mxu0 %v10277_v44  ;;  %2426 = vmatpush1.bf16.msra.mxu1 %v10279_v45 }
 0x70e   : > { %2386 = vmatprep.subr.bf16.mxu0 %v10262_v46  ;;  %2427 = vmatprep.subr.bf16.mxu1 %v10264_v47 }
 0x711   : > { %2387 = vmatpush1.bf16.msra.mxu0 %v10261_v52  ;;  %2428 = vmatpush1.bf16.msra.mxu1 %v10263_v53 }
 0x712   : > { %2388 = vmatprep.subr.bf16.mxu0 %v10246_v54  ;;  %2429 = vmatprep.subr.bf16.mxu1 %v10248_v55 }
 0x715   : > { %2389 = vmatpush1.bf16.msra.mxu0 %v10245_v56  ;;  %2430 = vmatpush1.bf16.msra.mxu1 %v10247_v57 }
 0x716   : > { %11683 = vmatprep.subr.bf16.mxu0 %v12667_v58  ;;  %11705 = vmatprep.subr.bf16.mxu1 %v12668_v59 }
 0x718   : > { %10303 = vmatmul.mubr.msk.bf16.vlgmr.msra.gmra.mxu0 %vm871_vm4, %v13677_v34  ;;  %10304 = vmatmul.mubr.msk.bf16.vlgmr.msra.gmra.mxu1 %vm871_vm4, %v13677_v34  ;;  %v12676_v34 = vld [vmem:[%s16077_s18 + $0xe8] sm:$0xff]  }
 0x719   : > { %11684 = vmatpush3.bf16.msra.mxu0 %v12669_v60  ;;  %11706 = vmatpush3.bf16.msra.mxu1 %v12670_v61  ;;  %v12701_v60 = vld [vmem:[%s16077_s18 + $0x138] sm:$0xff]  }
 0x71a   : > { %11685 = vmatprep.subr.bf16.mxu0 %v12671_v62  ;;  %11707 = vmatprep.subr.bf16.mxu1 %v12672_v63  ;;  %v12702_v61 = vld [vmem:[%s16077_s18 + $0x1b8] sm:$0xff]  }
 0x71d   : > { %11686 = vmatpush3.bf16.msra.mxu0 %v12673_v1  ;;  %11708 = vmatpush3.bf16.msra.mxu1 %v12674_v2  ;;  %v12703_v1 = vld [vmem:[%s16077_s18 + $0x170] sm:$0xff]  }
 0x71e   : > { %11687 = vmatprep.subr.bf16.mxu0 %v12675_v3  ;;  %11709 = vmatprep.subr.bf16.mxu1 %v12676_v34  ;;  %v12704_v2 = vld [vmem:[%s16077_s18 + $0x1f0] sm:$0xff]  }
 0x71f   : > { %v12705_v3 = vld [vmem:[%s16077_s18 + $0x130] sm:$0xff]  }
 0x720   : > { %v12706_v34 = vld [vmem:[%s16077_s18 + $0x1b0] sm:$0xff]  }
 0x721   : > { %11688 = vmatpush3.bf16.msra.mxu0 %v12677_v4  ;;  %11710 = vmatpush3.bf16.msra.mxu1 %v12678_v5  ;;  %v13969_v4 = vsub.s32 5, %v13923_v31  ;;  %v13972_v5 = vsub.s32 7, %v13923_v31 }
 0x722   : > { %11689 = vmatprep.subr.bf16.mxu0 %v12679_v6  ;;  %11711 = vmatprep.subr.bf16.mxu1 %v12680_v7  ;;  %v12707_v6 = vld [vmem:[%s16077_s18 + $0x168] sm:$0xff]  }
 0x723   : > { %v12708_v7 = vld [vmem:[%s16077_s18 + $0x1e8] sm:$0xff]  }
 0x725   : > { %11690 = vmatpush3.bf16.msra.mxu0 %v12681_v8  ;;  %11712 = vmatpush3.bf16.msra.mxu1 %v12682_v9  ;;  %v1748_v8 = vrot.slane %v13934_v36, %v13969_v4  ;;  %v1756_v9 = vrot.slane %v13934_v36, %v13972_v5 }
 0x726   : > { %11691 = vmatprep.subr.bf16.mxu0 %v12683_v10  ;;  %11713 = vmatprep.subr.bf16.mxu1 %v12684_v11  ;;  %v12709_v10 = vld [vmem:[%s16077_s18 + $0x128] sm:$0xff]  }
 0x727   : > { %v12710_v11 = vld [vmem:[%s16077_s18 + $0x1a8] sm:$0xff]  }
 0x729   : > { %11692 = vmatpush3.bf16.msra.mxu0 %v12685_v12  ;;  %11714 = vmatpush3.bf16.msra.mxu1 %v12686_v13 }
 0x72a   : > { %11693 = vmatprep.subr.bf16.mxu0 %v12687_v14  ;;  %11715 = vmatprep.subr.bf16.mxu1 %v12688_v15  ;;  %v12711_v14 = vld [vmem:[%s16077_s18 + $0x160] sm:$0xff]  }
 0x72b   : > { %v12712_v15 = vld [vmem:[%s16077_s18 + $0x1e0] sm:$0xff]  }
 0x72d   : > { %11694 = vmatpush3.bf16.msra.mxu0 %v12689_v16  ;;  %11716 = vmatpush3.bf16.msra.mxu1 %v12690_v18 }
 0x72e   : > { %11695 = vmatprep.subr.bf16.mxu0 %v12691_v19  ;;  %11717 = vmatprep.subr.bf16.mxu1 %v12692_v20 }
 0x731   : > { %11696 = vmatpush3.bf16.msra.mxu0 %v12693_v21  ;;  %11718 = vmatpush3.bf16.msra.mxu1 %v12694_v23  ;;  %v12713_v21 = vld [vmem:[%s16077_s18 + $0x120] sm:$0xff]  }
 0x732   : > { %11697 = vmatprep.subr.bf16.mxu0 %v12695_v24  ;;  %11719 = vmatprep.subr.bf16.mxu1 %v12696_v25  ;;  %v12714_v23 = vld [vmem:[%s16077_s18 + $0x1a0] sm:$0xff]  }
 0x735   : > { %11698 = vmatpush3.bf16.msra.mxu0 %v12697_v26  ;;  %11720 = vmatpush3.bf16.msra.mxu1 %v12698_v27  ;;  %v12715_v26 = vld [vmem:[%s16077_s18 + $0x158] sm:$0xff]  }
 0x736   : > { %11727 = vmatprep.subr.bf16.mxu0 %v12699_v28  ;;  %11749 = vmatprep.subr.bf16.mxu1 %v12700_v29  ;;  %v12716_v27 = vld [vmem:[%s16077_s18 + $0x1d8] sm:$0xff]  }
 0x7a8   : > { %v2162_v43 = vpop.f32.mrf.mxu0  ;;  %v2203_v22 = vpop.f32.mrf.mxu1 }
 0x7a9   : > { %v2163_v44 = vadd.f32 %v2162_v43, %v1728_v39  ;;  %v2204_v45 = vadd.f32 %v2203_v22, %v1736_v40  ;;  %v12718_v43 = vld [vmem:[%s16077_s18 + $0x198] sm:$0xff]   ;;  %v14015_v22 = vsub.s32 4, %v13923_v31 }
 0x7aa   : > { %v2164_v46 = vpop.f32.mrf.mxu0  ;;  %v2205_v47 = vpop.f32.mrf.mxu1 }
 0x7ab   : > { %v2165_v48 = vadd.f32 %v2164_v46, %v1732_v41  ;;  %v2206_v49 = vadd.f32 %v2205_v47, %v1740_v42  ;;  %v2456_v50 = vmax.f32 %v2163_v44, 0.0  ;;  %v2458_v51 = vmax.f32 %v2204_v45, 0.0  ;;  %v12717_v42 = vld [vmem:[%s16077_s18 + $0x118] sm:$0xff]   ;;  %v12719_v45 = vld [vmem:[%s16077_s18 + $0x150] sm:$0xff]  }
 0x7ac   : > { %v2166_v52 = vpop.f32.mrf.mxu0  ;;  %v2207_v53 = vpop.f32.mrf.mxu1  ;;  %v14018_v44 = vsub.s32 6, %v13923_v31  ;;  %v12720_v46 = vld [vmem:[%s16077_s18 + $0x1d0] sm:$0xff]  }
 0x7ad   : > { %v2457_v54 = vmax.f32 %v2165_v48, 0.0  ;;  %v2459_v55 = vmax.f32 %v2206_v49, 0.0  ;;  %v2472_v62 = vpack.c.bf16 %v2456_v50, %v2456_v50  ;;  %v2474_v63 = vpack.c.bf16 %v2458_v51, %v2458_v51  ;;  %v12721_v47 = vld [vmem:[%s16077_s18 + $0x110] sm:$0xff]   ;;  %v12723_v50 = vld [vmem:[%s16077_s18 + $0x148] sm:$0xff]  }
 0x7ae   : > { %v2167_v56 = vpop.f32.mrf.mxu0  ;;  %v2208_v57 = vpop.f32.mrf.mxu1  ;;  %v12722_v31 = vld [vmem:[%s16077_s18 + $0x190] sm:$0xff]   ;;  %v1744_v48 = vrot.slane %v13934_v36, %v14015_v22  ;;  %v1752_v49 = vrot.slane %v13934_v36, %v14018_v44  ;;  %v12724_v51 = vld [vmem:[%s16077_s18 + $0x1c8] sm:$0xff]  }
 0x7af   : > { %v2473_v58 = vpack.c.bf16 %v2457_v54, %v2457_v54  ;;  %v2475_v59 = vpack.c.bf16 %v2459_v55, %v2459_v55  ;;  %v14045_v52 = vld [vmem:[%s16076_s17 + $0x8] sm:$0xff] }
 0x7b0   : > { %v1764_v36 = vrot.slane %v14045_v52, %v13937_v37  ;;  %v1772_v53 = vrot.slane %v14045_v52, %v13940_v38  ;;  %v12725_v54 = vld [vmem:[%s16077_s18 + $0x108] sm:$0xff]  }
 0x7b1   : > { %3551 = vmatprep.mubr.bf16.mxu0 %v2473_v58  ;;  %3591 = vmatprep.mubr.bf16.mxu1 %v2475_v59  ;;  %v12726_v55 = vld [vmem:[%s16077_s18 + $0x188] sm:$0xff]  }
 0x7b2   : > { %3552 = vmatmul.mubr.bf16.vlgmr.msra.gmra.mxu0 %v2472_v62  ;;  %3592 = vmatmul.mubr.bf16.vlgmr.msra.gmra.mxu1 %v2474_v63 }
 0x7b3   : > { %11728 = vmatpush3.bf16.msra.mxu0 %v12701_v60  ;;  %11750 = vmatpush3.bf16.msra.mxu1 %v12702_v61  ;;  %v12727_v60 = vld [vmem:[%s16077_s18 + $0x140] sm:$0xff]  }
 0x7b4   : > { %11729 = vmatprep.subr.bf16.mxu0 %v12703_v1  ;;  %11751 = vmatprep.subr.bf16.mxu1 %v12704_v2  ;;  %v12728_v61 = vld [vmem:[%s16077_s18 + $0x1c0] sm:$0xff]  }
 0x7b7   : > { %11730 = vmatpush3.bf16.msra.mxu0 %v12705_v3  ;;  %11752 = vmatpush3.bf16.msra.mxu1 %v12706_v34  ;;  %v12729_v3 = vld [vmem:[%s16077_s18 + $0x100] sm:$0xff]  }
 0x7b8   : > { %v2244_v12 = vpop.f32.mrf.mxu0  ;;  %v2285_v13 = vpop.f32.mrf.mxu1  ;;  %11731 = vmatprep.subr.bf16.mxu0 %v12707_v6  ;;  %11753 = vmatprep.subr.bf16.mxu1 %v12708_v7  ;;  %v12730_v34 = vld [vmem:[%s16077_s18 + $0x180] sm:$0xff]  }
 0x7b9   : > { %v2245_v56 = vadd.f32 %v2244_v12, %v1744_v48  ;;  %v2286_v57 = vadd.f32 %v2285_v13, %v1752_v49  ;;  %v12746_v49 = vld [vmem:[%s16077_s18 + $0x2a0] sm:$0xff]  }
 0x7ba   : > { %v2246_v16 = vpop.f32.mrf.mxu0  ;;  %v2287_v18 = vpop.f32.mrf.mxu1 }
 0x7bb   : > { %v2247_v19 = vadd.f32 %v2246_v16, %v1748_v8  ;;  %v2288_v20 = vadd.f32 %v2287_v18, %v1756_v9  ;;  %11732 = vmatpush3.bf16.msra.mxu0 %v12709_v10  ;;  %11754 = vmatpush3.bf16.msra.mxu1 %v12710_v11  ;;  %v2460_v6 = vmax.f32 %v2245_v56, 0.0  ;;  %v2462_v7 = vmax.f32 %v2286_v57, 0.0  ;;  %v12731_v10 = vld [vmem:[%s16077_s18 + $0x278] sm:$0xff]   ;;  %v12751_v56 = vld [vmem:[%s16077_s18 + $0x250] sm:$0xff]  }
 0x7bc   : > { %v2248_v24 = vpop.f32.mrf.mxu0  ;;  %v2289_v25 = vpop.f32.mrf.mxu1  ;;  %11733 = vmatprep.subr.bf16.mxu0 %v12711_v14  ;;  %11755 = vmatprep.subr.bf16.mxu1 %v12712_v15  ;;  %v12732_v11 = vld [vmem:[%s16077_s18 + $0x2f8] sm:$0xff]   ;;  %v12752_v57 = vld [vmem:[%s16077_s18 + $0x2d0] sm:$0xff]  }
 0x7bd   : > { %v2461_v28 = vmax.f32 %v2247_v19, 0.0  ;;  %v2463_v29 = vmax.f32 %v2288_v20, 0.0  ;;  %v12733_v16 = vld [vmem:[%s16077_s18 + $0x238] sm:$0xff]   ;;  %v2476_v18 = vpack.c.bf16 %v2460_v6, %v2460_v6  ;;  %v2478_v19 = vpack.c.bf16 %v2462_v7, %v2462_v7  ;;  %v12736_v24 = vld [vmem:[%s16077_s18 + $0x2f0] sm:$0xff]   ;;  %v12757_v6 = vld [vmem:[%s16077_s18 + $0x208] sm:$0xff]  }
 0x7be   : > { %v2249_v30 = vpop.f32.mrf.mxu0  ;;  %v2290_v39 = vpop.f32.mrf.mxu1  ;;  %v12734_v20 = vld [vmem:[%s16077_s18 + $0x2b8] sm:$0xff]  }
 0x7bf   : > { %v2477_v40 = vpack.c.bf16 %v2461_v28, %v2461_v28  ;;  %v2479_v41 = vpack.c.bf16 %v2463_v29, %v2463_v29  ;;  %11734 = vmatpush3.bf16.msra.mxu0 %v12713_v21  ;;  %11756 = vmatpush3.bf16.msra.mxu1 %v12714_v23  ;;  %v12735_v23 = vld [vmem:[%s16077_s18 + $0x270] sm:$0xff]   ;;  %v12739_v28 = vld [vmem:[%s16077_s18 + $0x268] sm:$0xff]  }
 0x7c0   : > { %11735 = vmatprep.subr.bf16.mxu0 %v12715_v26  ;;  %11757 = vmatprep.subr.bf16.mxu1 %v12716_v27  ;;  %v12737_v26 = vld [vmem:[%s16077_s18 + $0x230] sm:$0xff]   ;;  %v12740_v29 = vld [vmem:[%s16077_s18 + $0x2e8] sm:$0xff]  }
 0x7c1   : > { %3631 = vmatprep.mubr.bf16.mxu0 %v2477_v40  ;;  %3671 = vmatprep.mubr.bf16.mxu1 %v2479_v41  ;;  %v12738_v27 = vld [vmem:[%s16077_s18 + $0x2b0] sm:$0xff]   ;;  %v12741_v30 = vld [vmem:[%s16077_s18 + $0x228] sm:$0xff]  }
 0x7c2   : > { %v12742_v41 = vld [vmem:[%s16077_s18 + $0x2a8] sm:$0xff]  }
 0x7c3   : > { %11736 = vmatpush3.bf16.msra.mxu0 %v12717_v42  ;;  %11758 = vmatpush3.bf16.msra.mxu1 %v12718_v43  ;;  %v12743_v42 = vld [vmem:[%s16077_s18 + $0x260] sm:$0xff]  }
 0x7c4   : > { %11737 = vmatprep.subr.bf16.mxu0 %v12719_v45  ;;  %11759 = vmatprep.subr.bf16.mxu1 %v12720_v46  ;;  %v12744_v43 = vld [vmem:[%s16077_s18 + $0x2e0] sm:$0xff]  }
 0x7c7   : > { %11738 = vmatpush3.bf16.msra.mxu0 %v12721_v47  ;;  %11760 = vmatpush3.bf16.msra.mxu1 %v12722_v31  ;;  %v12745_v47 = vld [vmem:[%s16077_s18 + $0x220] sm:$0xff]  }
 0x7c8   : > { %v14057_v58 = vpop.f32.mrf.mxu0  ;;  %v14059_v59 = vpop.f32.mrf.mxu1  ;;  %11739 = vmatprep.subr.bf16.mxu0 %v12723_v50  ;;  %11761 = vmatprep.subr.bf16.mxu1 %v12724_v51  ;;  %v12747_v50 = vld [vmem:[%s16077_s18 + $0x258] sm:$0xff]  }
 0x7c9   : > { %v12748_v51 = vld [vmem:[%s16077_s18 + $0x2d8] sm:$0xff]  }
 0x7ca   : > { %v2328_v62 = vpop.f32.mrf.mxu0  ;;  %v2369_v63 = vpop.f32.mrf.mxu1 }
 0x7cb   : > { %v2329_v1 = vadd.f32 %v2328_v62, %v1764_v36  ;;  %v2370_v2 = vadd.f32 %v2369_v63, %v1772_v53  ;;  %11740 = vmatpush3.bf16.msra.mxu0 %v12725_v54  ;;  %11762 = vmatpush3.bf16.msra.mxu1 %v12726_v55  ;;  %v12749_v54 = vld [vmem:[%s16077_s18 + $0x218] sm:$0xff]   ;;  %v12754_v62 = vld [vmem:[%s16077_s18 + $0x290] sm:$0xff]   ;;  %v12755_v63 = vld [vmem:[%s16077_s18 + $0x248] sm:$0xff]  }
 0x7cc   : > { %v2330_v8 = vpop.f32.mrf.mxu0  ;;  %v2371_v9 = vpop.f32.mrf.mxu1  ;;  %11741 = vmatprep.subr.bf16.mxu0 %v12727_v60  ;;  %11763 = vmatprep.subr.bf16.mxu1 %v12728_v61  ;;  %v12750_v55 = vld [vmem:[%s16077_s18 + $0x298] sm:$0xff]   ;;  %v12753_v60 = vld [vmem:[%s16077_s18 + $0x210] sm:$0xff]   ;;  %v1760_v61 = vrot.slane %v14045_v52, %v13926_v32 }
 0x7cd   : > { %v2465_v12 = vmax.f32 %v2329_v1, 0.0  ;;  %v2467_v13 = vmax.f32 %v2370_v2, 0.0  ;;  %v1768_v1 = vrot.slane %v14045_v52, %v13929_v35  ;;  %v12756_v2 = vld [vmem:[%s16077_s18 + $0x2c8] sm:$0xff]   ;;  %v12759_v9 = vld [vmem:[%s16077_s18 + $0x240] sm:$0xff]  }
 0x7ce   : > { %v2331_v14 = vpop.f32.mrf.mxu0  ;;  %v2372_v15 = vpop.f32.mrf.mxu1  ;;  %v2327_v7 = vadd.f32 %v14057_v58, %v1760_v61  ;;  %v12758_v8 = vld [vmem:[%s16077_s18 + $0x288] sm:$0xff]   ;;  %v12761_v58 = vld [vmem:[%s16077_s18 + $0x200] sm:$0xff]  }
 0x7cf   : > { %11742 = vmatpush3.bf16.msra.mxu0 %v12729_v3  ;;  %11764 = vmatpush3.bf16.msra.mxu1 %v12730_v34  ;;  %v2481_v21 = vpack.c.bf16 %v2465_v12, %v2465_v12  ;;  %v2483_v25 = vpack.c.bf16 %v2467_v13, %v2467_v13  ;;  %v1780_v3 = vrot.slane %v14045_v52, %v13969_v4  ;;  %v12762_v15 = vld [vmem:[%s16077_s18 + $0x280] sm:$0xff]   ;;  %v12787_v61 = vld [vmem:[%s16077_s18 + $0x348] sm:$0xff]  }
 0x7d0   : > { %11771 = vmatprep.subr.bf16.mxu0 %v12731_v10  ;;  %11793 = vmatprep.subr.bf16.mxu1 %v12732_v11  ;;  %v1788_v34 = vrot.slane %v14045_v52, %v13972_v5  ;;  %v2368_v10 = vadd.f32 %v14059_v59, %v1768_v1  ;;  %v12760_v11 = vld [vmem:[%s16077_s18 + $0x2c0] sm:$0xff]   ;;  %v2464_v14 = vmax.f32 %v2327_v7, 0.0  ;;  %v12763_v59 = vld [vmem:[%s16077_s18 + $0x378] sm:$0xff]   ;;  %v12789_v1 = vld [vmem:[%s16077_s18 + $0x308] sm:$0xff]  }
 0x7d2   : > { %3632 = vmatmul.mubr.bf16.vlgmr.msra.gmra.mxu0 %v2476_v18  ;;  %3672 = vmatmul.mubr.bf16.vlgmr.msra.gmra.mxu1 %v2478_v19  ;;  %v12764_v18 = vld [vmem:[%s16077_s18 + $0x3f8] sm:$0xff]  }
 0x7d3   : > { %11772 = vmatpush3.bf16.msra.mxu0 %v12733_v16  ;;  %3711 = vmatprep.mubr.bf16.mxu0 %v2481_v21  ;;  %v2466_v16 = vmax.f32 %v2368_v10, 0.0  ;;  %v12765_v21 = vld [vmem:[%s16077_s18 + $0x338] sm:$0xff]  }
 0x7d4   : > { %11794 = vmatpush3.bf16.msra.mxu1 %v12734_v20  ;;  %3751 = vmatprep.mubr.bf16.mxu1 %v2483_v25 }
 0x7d5   : > { %11773 = vmatprep.subr.bf16.mxu0 %v12735_v23  ;;  %11795 = vmatprep.subr.bf16.mxu1 %v12736_v24  ;;  %v2480_v23 = vpack.c.bf16 %v2464_v14, %v2464_v14  ;;  %v12766_v24 = vld [vmem:[%s16077_s18 + $0x3b8] sm:$0xff]   ;;  %v2482_v25 = vpack.c.bf16 %v2466_v16, %v2466_v16 }
 0x7d7   : > { %11774 = vmatpush3.bf16.msra.mxu0 %v12737_v26  ;;  %v12767_v26 = vld [vmem:[%s16077_s18 + $0x370] sm:$0xff]  }
 0x7d8   : > { %11796 = vmatpush3.bf16.msra.mxu1 %v12738_v27  ;;  %v14106_v39 = vpop.f32.mrf.mxu0  ;;  %v14108_v40 = vpop.f32.mrf.mxu1  ;;  %11775 = vmatprep.subr.bf16.mxu0 %v12739_v28  ;;  %v12768_v28 = vld [vmem:[%s16077_s18 + $0x3f0] sm:$0xff]  }
 0x7d9   : > { %11797 = vmatprep.subr.bf16.mxu1 %v12740_v29 }
 0x7da   : > { %v2410_v45 = vpop.f32.mrf.mxu0  ;;  %v2451_v46 = vpop.f32.mrf.mxu1 }
 0x7db   : > { %11776 = vmatpush3.bf16.msra.mxu0 %v12741_v30  ;;  %v2411_v12 = vadd.f32 %v2410_v45, %v1780_v3  ;;  %v2452_v13 = vadd.f32 %v2451_v46, %v1788_v34  ;;  %v12769_v30 = vld [vmem:[%s16077_s18 + $0x330] sm:$0xff]   ;;  %v12773_v45 = vld [vmem:[%s16077_s18 + $0x328] sm:$0xff]  }
 0x7dc   : > { %11798 = vmatpush3.bf16.msra.mxu1 %v12742_v41  ;;  %v2412_v31 = vpop.f32.mrf.mxu0  ;;  %v2453_v48 = vpop.f32.mrf.mxu1  ;;  %11777 = vmatprep.subr.bf16.mxu0 %v12743_v42  ;;  %v12770_v41 = vld [vmem:[%s16077_s18 + $0x3b0] sm:$0xff]   ;;  %v12771_v42 = vld [vmem:[%s16077_s18 + $0x368] sm:$0xff]  }
 0x7dd   : > { %11799 = vmatprep.subr.bf16.mxu1 %v12744_v43  ;;  %v2469_v19 = vmax.f32 %v2411_v12, 0.0  ;;  %v2471_v20 = vmax.f32 %v2452_v13, 0.0  ;;  %v12772_v43 = vld [vmem:[%s16077_s18 + $0x3e8] sm:$0xff]   ;;  %v12776_v31 = vld [vmem:[%s16077_s18 + $0x3e0] sm:$0xff]  }
 0x7de   : > { %v2413_v36 = vpop.f32.mrf.mxu0  ;;  %v2454_v53 = vpop.f32.mrf.mxu1  ;;  %v12774_v46 = vld [vmem:[%s16077_s18 + $0x3a8] sm:$0xff]   ;;  %v12777_v48 = vld [vmem:[%s16077_s18 + $0x320] sm:$0xff]  }
 0x7df   : > { %11778 = vmatpush3.bf16.msra.mxu0 %v12745_v47  ;;  %v2485_v27 = vpack.c.bf16 %v2469_v19, %v2469_v19  ;;  %v2487_v29 = vpack.c.bf16 %v2471_v20, %v2471_v20  ;;  %v12775_v47 = vld [vmem:[%s16077_s18 + $0x360] sm:$0xff]   ;;  %v12781_v36 = vld [vmem:[%s16077_s18 + $0x318] sm:$0xff]   ;;  %v12790_v3 = vld [vmem:[%s16077_s18 + $0x388] sm:$0xff]  }
 0x7e0   : > { %11800 = vmatpush3.bf16.msra.mxu1 %v12746_v49  ;;  %11779 = vmatprep.subr.bf16.mxu0 %v12747_v50  ;;  %v12778_v49 = vld [vmem:[%s16077_s18 + $0x3a0] sm:$0xff]   ;;  %v12779_v50 = vld [vmem:[%s16077_s18 + $0x358] sm:$0xff]  }
 0x7e1   : > { %11801 = vmatprep.subr.bf16.mxu1 %v12748_v51  ;;  %v12780_v51 = vld [vmem:[%s16077_s18 + $0x3d8] sm:$0xff]   ;;  %v10305_v13 = vld [vmem:[%s16078_s19] ss:$0 sm:$0xff] }
 0x7e2   : > { %v12782_v53 = vld [vmem:[%s16077_s18 + $0x398] sm:$0xff]  }
 0x7e3   : > { %11780 = vmatpush3.bf16.msra.mxu0 %v12749_v54  ;;  %v12783_v54 = vld [vmem:[%s16077_s18 + $0x350] sm:$0xff]  }
 0x7e4   : > { %11802 = vmatpush3.bf16.msra.mxu1 %v12750_v55  ;;  %11781 = vmatprep.subr.bf16.mxu0 %v12751_v56  ;;  %v12784_v55 = vld [vmem:[%s16077_s18 + $0x3d0] sm:$0xff]  }
 0x7e5   : > { %11803 = vmatprep.subr.bf16.mxu1 %v12752_v57  ;;  %v12785_v56 = vld [vmem:[%s16077_s18 + $0x310] sm:$0xff]   ;;  %v1776_v57 = vrot.slane %v14045_v52, %v14015_v22 }
 0x7e7   : > { %11782 = vmatpush3.bf16.msra.mxu0 %v12753_v60  ;;  %v12786_v60 = vld [vmem:[%s16077_s18 + $0x390] sm:$0xff]  }
 0x7e8   : > { %11804 = vmatpush3.bf16.msra.mxu1 %v12754_v62  ;;  %11783 = vmatprep.subr.bf16.mxu0 %v12755_v63  ;;  %v1784_v62 = vrot.slane %v14045_v52, %v14018_v44  ;;  %v12788_v63 = vld [vmem:[%s16077_s18 + $0x3c8] sm:$0xff]   ;;  %v12791_v52 = vld [vmem:[%s16077_s18 + $0x340] sm:$0xff]  }
 0x7e9   : > { %11805 = vmatprep.subr.bf16.mxu1 %v12756_v2  ;;  %v2409_v2 = vadd.f32 %v14106_v39, %v1776_v57  ;;  %v12793_v39 = vld [vmem:[%s16077_s18 + $0x300] sm:$0xff]  }
 0x7ea   : > { %v2450_v34 = vadd.f32 %v14108_v40, %v1784_v62 }
 0x7eb   : > { %11784 = vmatpush3.bf16.msra.mxu0 %v12757_v6  ;;  %v12792_v6 = vld [vmem:[%s16077_s18 + $0x3c0] sm:$0xff]   ;;  %v2468_v7 = vmax.f32 %v2409_v2, 0.0 }
 0x7ec   : > { %11806 = vmatpush3.bf16.msra.mxu1 %v12758_v8  ;;  %11785 = vmatprep.subr.bf16.mxu0 %v12759_v9  ;;  %v12794_v8 = vld [vmem:[%s16077_s18 + $0x380] sm:$0xff]   ;;  %v2470_v9 = vmax.f32 %v2450_v34, 0.0 }
 0x7ed   : > { %11807 = vmatprep.subr.bf16.mxu1 %v12760_v11  ;;  %v2484_v40 = vpack.c.bf16 %v2468_v7, %v2468_v7 }
 0x7ee   : > { %v2486_v10 = vpack.c.bf16 %v2470_v9, %v2470_v9 }
 0x7ef   : > { %11786 = vmatpush3.bf16.msra.mxu0 %v12761_v58 }
 0x7f0   : > { %11808 = vmatpush3.bf16.msra.mxu1 %v12762_v15  ;;  %11815 = vmatprep.subr.bf16.mxu0 %v12763_v59 }
 0x7f1   : > { %11837 = vmatprep.subr.bf16.mxu1 %v12764_v18 }
 0x7f2   : > { %3712 = vmatmul.mubr.bf16.vlgmr.msra.gmra.mxu0 %v2480_v23 }
 0x7f3   : > { %3752 = vmatmul.mubr.bf16.vlgmr.msra.gmra.mxu1 %v2482_v25  ;;  %11816 = vmatpush3.bf16.msra.mxu0 %v12765_v21 }
 0x7f4   : > { %3791 = vmatprep.mubr.bf16.mxu0 %v2485_v27  ;;  %11838 = vmatpush3.bf16.msra.mxu1 %v12766_v24 }
 0x7f5   : > { %3831 = vmatprep.mubr.bf16.mxu1 %v2487_v29  ;;  %11817 = vmatprep.subr.bf16.mxu0 %v12767_v26 }
 0x7f6   : > { %11839 = vmatprep.subr.bf16.mxu1 %v12768_v28 }
 0x7f7   : > { %11818 = vmatpush3.bf16.msra.mxu0 %v12769_v30 }
 0x7f8   : > { %11840 = vmatpush3.bf16.msra.mxu1 %v12770_v41  ;;  %11819 = vmatprep.subr.bf16.mxu0 %v12771_v42 }
 0x7f9   : > { %11841 = vmatprep.subr.bf16.mxu1 %v12772_v43 }
 0x7fb   : > { %11820 = vmatpush3.bf16.msra.mxu0 %v12773_v45 }
 0x7fc   : > { %11842 = vmatpush3.bf16.msra.mxu1 %v12774_v46  ;;  %11821 = vmatprep.subr.bf16.mxu0 %v12775_v47 }
 0x7fd   : > { %11843 = vmatprep.subr.bf16.mxu1 %v12776_v31 }
 0x7ff   : > { %11822 = vmatpush3.bf16.msra.mxu0 %v12777_v48 }
 0x800   : > { %11844 = vmatpush3.bf16.msra.mxu1 %v12778_v49  ;;  %11823 = vmatprep.subr.bf16.mxu0 %v12779_v50 }
 0x801   : > { %11845 = vmatprep.subr.bf16.mxu1 %v12780_v51 }
 0x803   : > { %11824 = vmatpush3.bf16.msra.mxu0 %v12781_v36 }
 0x804   : > { %11846 = vmatpush3.bf16.msra.mxu1 %v12782_v53  ;;  %11825 = vmatprep.subr.bf16.mxu0 %v12783_v54 }
 0x805   : > { %11847 = vmatprep.subr.bf16.mxu1 %v12784_v55 }
 0x807   : > { %11826 = vmatpush3.bf16.msra.mxu0 %v12785_v56 }
 0x808   : > { %11848 = vmatpush3.bf16.msra.mxu1 %v12786_v60  ;;  %11827 = vmatprep.subr.bf16.mxu0 %v12787_v61 }
 0x809   : > { %11849 = vmatprep.subr.bf16.mxu1 %v12788_v63 }
 0x80b   : > { %11828 = vmatpush3.bf16.msra.mxu0 %v12789_v1 }
 0x80c   : > { %11850 = vmatpush3.bf16.msra.mxu1 %v12790_v3  ;;  %11829 = vmatprep.subr.bf16.mxu0 %v12791_v52 }
 0x80d   : > { %11851 = vmatprep.subr.bf16.mxu1 %v12792_v6 }
 0x80f   : > { %11830 = vmatpush3.bf16.msra.mxu0 %v12793_v39 }
 0x810   : > { %11852 = vmatpush3.bf16.msra.mxu1 %v12794_v8  ;;  %12392 = vmatprep.subr.bf16.mxu0 %v13211_v0 }
 0x811   : > { %12404 = vmatprep.subr.bf16.mxu1 %v13211_v0 }
 0x812   : > { %3792 = vmatmul.mubr.bf16.vlgmr.msra.gmra.mxu0 %v2484_v40 }
 0x813   : > { %3832 = vmatmul.mubr.bf16.vlgmr.msra.gmra.mxu1 %v2486_v10  ;;  %12400 = vmatprep.mubr.msk.bf16.mxu0 %vm13213_vm2, %v13211_v0 }
 0x814   : > { %12412 = vmatprep.mubr.msk.bf16.mxu1 %vm13213_vm2, %v13211_v0 }
 0x872   : > { %v11699_v11 = vpop.f32.mrf.mxu0  ;;  %v11721_v12 = vpop.f32.mrf.mxu1 }
 0x874   : > { %v11700_v58 = vpop.f32.mrf.mxu0  ;;  %v11722_v14 = vpop.f32.mrf.mxu1 }
 0x875   : > { %v11701_v15 = vadd.f32 %v11700_v58, %v11699_v11  ;;  %v11723_v59 = vadd.f32 %v11722_v14, %v11721_v12  ;;  %v12795_v58 = vld [vmem:[%s16138_s8 + $0x38] sm:$0xff]  }
 0x876   : > { %v11702_v16 = vpop.f32.mrf.mxu0  ;;  %v11724_v18 = vpop.f32.mrf.mxu1  ;;  %v12796_v14 = vld [vmem:[%s16141_s24 + $0x38] sm:$0xff]   ;;  %12393 = vmatpush3.bf16.msra.mxu0 %v12795_v58 }
 0x877   : > { %v3554_v19 = vadd.f32 %v11701_v15, %v10305_v13  ;;  %12405 = vmatpush3.bf16.msra.mxu1 %v12796_v14  ;;  %12394 = vmatprep.subr.bf16.mxu0 %v13211_v0  ;;  %v12798_v15 = vld [vmem:[%s16141_s24 + $0x30] sm:$0xff]   ;;  %v12800_v16 = vld [vmem:[%s16141_s24 + $0x28] sm:$0xff]   ;;  %v12801_v18 = vld [vmem:[%s16138_s8 + $0x20] sm:$0xff]  }
 0x878   : > { %v11703_v20 = vpop.f32.mrf.mxu0  ;;  %v11725_v21 = vpop.f32.mrf.mxu1  ;;  %12406 = vmatprep.subr.bf16.mxu1 %v13211_v0 }
 0x879   : > { %v3594_v23 = vadd.f32 %v11723_v59, %v3554_v19  ;;  %v12799_v59 = vld [vmem:[%s16138_s8 + $0x28] sm:$0xff]   ;;  %v12802_v19 = vld [vmem:[%s16141_s24 + $0x20] sm:$0xff]  }
 0x87b   : > { %12407 = vmatpush3.bf16.msra.mxu1 %v12798_v15 }
 0x87c   : > { %12408 = vmatprep.subr.bf16.mxu1 %v13211_v0 }
 0x87f   : > { %12409 = vmatpush3.bf16.msra.mxu1 %v12800_v16 }
 0x880   : > { %12410 = vmatprep.subr.bf16.mxu1 %v13211_v0 }
 0x883   : > { %12411 = vmatpush3.bf16.msra.mxu1 %v12802_v19 }
 0x884   : > { %12428 = vmatprep.subr.bf16.mxu1 %v13211_v0 }
 0x892   : > { %v11743_v24 = vpop.f32.mrf.mxu0  ;;  %v11765_v25 = vpop.f32.mrf.mxu1 }
 0x894   : > { %v11744_v26 = vpop.f32.mrf.mxu0  ;;  %v11766_v27 = vpop.f32.mrf.mxu1 }
 0x895   : > { %v11745_v50 = vadd.f32 %v11744_v26, %v11743_v24  ;;  %v11767_v36 = vadd.f32 %v11766_v27, %v11765_v25  ;;  %v10434_v25 = vld [vmem:[%s16079_s20] ss:$0 sm:$0xff] }
 0x896   : > { %v11746_v28 = vpop.f32.mrf.mxu0  ;;  %v11768_v29 = vpop.f32.mrf.mxu1  ;;  %v10435_v27 = vld [vmem:[%s16080_s21] ss:$0 sm:$0xff] }
 0x897   : > { %v3634_v51 = vadd.f32 %v11745_v50, %v3594_v23 }
 0x898   : > { %v11747_v30 = vpop.f32.mrf.mxu0  ;;  %v11769_v41 = vpop.f32.mrf.mxu1 }
 0x899   : > { %v3674_v54 = vadd.f32 %v11767_v36, %v3634_v51  ;;  %v12803_v30 = vld [vmem:[%s16069_s10 + $0x38] sm:$0xff]  }
 0x8b2   : > { %v11787_v42 = vpop.f32.mrf.mxu0 }
 0x8b3   : > { %v11809_v43 = vpop.f32.mrf.mxu1 }
 0x8b4   : > { %v11788_v45 = vpop.f32.mrf.mxu0 }
 0x8b5   : > { %v11810_v46 = vpop.f32.mrf.mxu1  ;;  %v11789_v53 = vadd.f32 %v11788_v45, %v11787_v42  ;;  %v12804_v42 = vld [vmem:[%s16069_s10 + $0x30] sm:$0xff]   ;;  %v12806_v45 = vld [vmem:[%s16069_s10 + $0x20] sm:$0xff]  }
 0x8b6   : > { %v11790_v47 = vpop.f32.mrf.mxu0  ;;  %v11811_v57 = vadd.f32 %v11810_v46, %v11809_v43  ;;  %v12805_v43 = vld [vmem:[%s16069_s10 + $0x28] sm:$0xff]   ;;  %v10445_v46 = vld [vmem:[%s16144_s30 + $0x1] ss:$0 sm:$0xff] }
 0x8b7   : > { %v11812_v31 = vpop.f32.mrf.mxu1  ;;  %v3714_v55 = vadd.f32 %v11789_v53, %v3674_v54  ;;  %v10460_v47 = vld [vmem:[%s16068_s9 + $0x1] ss:$0 sm:$0xff] }
 0x8b8   : > { %v11791_v48 = vpop.f32.mrf.mxu0 }
 0x8b9   : > { %v11813_v49 = vpop.f32.mrf.mxu1  ;;  %v3754_v62 = vadd.f32 %v11811_v57, %v3714_v55 }
 0x8d2   : > { %v11831_v56 = vpop.f32.mrf.mxu0 }
 0x8d3   : > { %v11853_v60 = vpop.f32.mrf.mxu1 }
 0x8d4   : > { %v11832_v61 = vpop.f32.mrf.mxu0 }
 0x8d5   : > { %v11833_v63 = vadd.f32 %v11832_v61, %v11831_v56  ;;  %v11854_v1 = vpop.f32.mrf.mxu1 }
 0x8d6   : > { %v11834_v2 = vpop.f32.mrf.mxu0  ;;  %v11855_v52 = vadd.f32 %v11854_v1, %v11853_v60 }
 0x8d7   : > { %v3794_v3 = vadd.f32 %v11833_v63, %v3754_v62  ;;  %v11856_v34 = vpop.f32.mrf.mxu1  ;;  %v10475_v63 = vld [vmem:[%s16070_s11 + $0x1] ss:$0 sm:$0xff] }
 0x8d8   : > { %v11835_v6 = vpop.f32.mrf.mxu0 }
 0x8d9   : > { %v3834_v39 = vadd.f32 %v11855_v52, %v3794_v3  ;;  %v11857_v7 = vpop.f32.mrf.mxu1 }
 0x8db   : > { %v3839_v8 = vadd.f32 %v3834_v39, %v13673_v33  ;;  %v12797_v33 = vld [vmem:[%s16138_s8 + $0x30] sm:$0xff]  }
 0x8dc   : > { %12395 = vmatpush3.bf16.msra.mxu0 %v12797_v33  ;;  %v13147_v33 = vld [vmem:[%s13527_s7] ss:$0 sm:$0xff] }
 0x8dd   : > { %v3842_v9 = vsel %vm871_vm4, %v3839_v8, 0.0  ;;  %12396 = vmatprep.subr.bf16.mxu0 %v13211_v0 }
 0x8de   : > { %3843 = vadd.xlane.f32.xlu0 %v3842_v9 }
 0x8e0   : > { %12397 = vmatpush3.bf16.msra.mxu0 %v12799_v59 }
 0x8e1   : > { %12398 = vmatprep.subr.bf16.mxu0 %v13211_v0 }
 0x8e4   : > { %12399 = vmatpush3.bf16.msra.mxu0 %v12801_v18 }
 0x8e5   : > { %12416 = vmatprep.subr.bf16.mxu0 %v13211_v0 }
 0x967   : > { %v3844_v40 = vpop.xlane.xlu0 %3843 }
 0x968   : > { %v3845_v10 = vmul.f32 0.015625, %v3844_v40 }
 0x96a   : > { %v3846_v11 = vsub.f32 %v3839_v8, %v3845_v10 }
 0x96c   : > { %v3847_v12 = vmul.f32 %v3846_v11, %v3846_v11 }
 0x96e   : > { %v3848_v13 = vsel %vm871_vm4, %v3847_v12, 0.0 }
 0x96f   : > { %3849 = vadd.xlane.f32.xlu0 %v3848_v13 }
 0x9f8   : > { %v3850_v20 = vpop.xlane.xlu0 %3849 }
 0x9f9   : > { %v3851_v21 = vmul.f32 0.015625, %v3850_v20 }
 0x9fb   : > { %v3852_v23 = vadd.f32 1e-05, %v3851_v21 }
 0x9fd   : > { %13105 = vrsqrt.f32 %v3852_v23 }
 0xa0a   : > { %v13106_v24 = vpop.eup %13105 }
 0xa0b   : > { %v3854_v26 = vmul.f32 %v13106_v24, %v3846_v11 }
 0xa0d   : > { %v3861_v28 = vmul.f32 %v10434_v25, %v3854_v26 }
 0xa0f   : > { %v14335_v29 = vadd.f32 %v10435_v27, %v3861_v28 }
 0xa11   : > { %v3869_v41 = vpack.c.bf16 %v14335_v29, %v14335_v29 }
 0xa13   : > { %12401 = vmatmul.mubr.msk.bf16.vlgmr.msra.gmra.mxu0 %vm871_vm4, %v3869_v41  ;;  %12413 = vmatmul.mubr.msk.bf16.vlgmr.msra.gmra.mxu1 %vm871_vm4, %v3869_v41 }
 0xa14   : > { %12417 = vmatpush3.bf16.msra.mxu0 %v12803_v30  ;;  %12424 = vmatprep.mubr.msk.bf16.mxu0 %vm13213_vm2, %v13211_v0 }
 0xa15   : > { %12418 = vmatprep.subr.bf16.mxu0 %v13211_v0  ;;  %12430 = vmatprep.mubr.msk.bf16.mxu1 %vm13213_vm2, %v13211_v0 }
 0xa18   : > { %12419 = vmatpush3.bf16.msra.mxu0 %v12804_v42 }
 0xa19   : > { %12420 = vmatprep.subr.bf16.mxu0 %v13211_v0 }
 0xa1c   : > { %12421 = vmatpush3.bf16.msra.mxu0 %v12805_v43 }
 0xa1d   : > { %12422 = vmatprep.subr.bf16.mxu0 %v13211_v0 }
 0xa20   : > { %12423 = vmatpush3.bf16.msra.mxu0 %v12806_v45 }
 0xa21   : > { %12434 = vmatprep.subr.bf16.mxu0 %v13211_v0 }
 0xa23   : > { %12425 = vmatmul.mubr.msk.bf16.vlgmr.msra.gmra.mxu0 %vm871_vm4, %v3869_v41 }
 0xa24   : > { %12436 = vmatprep.mubr.msk.bf16.mxu0 %vm13213_vm2, %v13211_v0 }
 0xad3   : > { %v3948_v31 = vpop.f32.mrf.mxu0  ;;  %v4030_v48 = vpop.f32.mrf.mxu1 }
 0xad4   : > { %v3949_v49 = vadd.f32 %v10445_v46, %v3948_v31  ;;  %v4031_v50 = vadd.f32 %v10460_v47, %v4030_v48 }
 0xad5   : > { %v12402_v51 = vpop.f32.mrf.mxu0  ;;  %v12414_v36 = vpop.f32.mrf.mxu1 }
 0xad6   : > { %v3954_v53 = vmul.f32 0.25, %v3949_v49  ;;  %v4118_v54 = vpack.c.bf16 %v4031_v50, %v4031_v50 }
 0xad7   : > { %v3951_v55 = vpop.f32.mrf.mxu0  ;;  %v4033_v56 = vpop.f32.mrf.mxu1 }
 0xad8   : > { %v4117_v57 = vpack.c.bf16 %v3954_v53, %v3954_v53  ;;  %4229 = vrot.lane.b32.xlu1 %v4118_v54, %s16147_s5  ;;  %v4124_v60 = vsel %vm1083_vm5, %v4118_v54, 0 }
 0xad9   : > { %v12403_v61 = vpop.f32.mrf.mxu0  ;;  %v12415_v62 = vpop.f32.mrf.mxu1  ;;  %12429 = vmatpush3.bf16.xpose.msra.mxu1 %v4124_v60 }
 0xada   : > { %4226 = vrot.lane.b32.xlu0 %v4117_v57, %s16147_s5  ;;  %12440 = vmatprep.subr.bf16.mxu1 %v13211_v0 }
 0xadc   : > { %4345 = vrot.lane.b32.xlu1 %v4118_v54, %s16148_s27 }
 0xade   : > { %4460 = vrot.lane.b32.xlu0 %v4118_v54, %s16149_s28 }
 0xae0   : > { %4343 = vrot.lane.b32.xlu1 %v4117_v57, %s16148_s27  ;;  %12431 = vmatmul.mubr.msk.bf16.vlgmr.msra.gmra.mxu1 %vm1083_vm5, %v4117_v57 }
 0xae1   : > { %12442 = vmatprep.mubr.msk.bf16.mxu1 %vm13213_vm2, %v13211_v0 }
 0xae3   : > { %v4111_v1 = vpop.f32.mrf.mxu0 }
 0xae4   : > { %v4112_v2 = vadd.f32 %v10475_v63, %v4111_v1  ;;  %4458 = vrot.lane.b32.xlu1 %v4117_v57, %s16149_s28 }
 0xae5   : > { %v12426_v3 = vpop.f32.mrf.mxu0 }
 0xae6   : > { %v4119_v52 = vpack.c.bf16 %v4112_v2, %v4112_v2 }
 0xae7   : > { %v4114_v34 = vpop.f32.mrf.mxu0 }
 0xae8   : > { %v4180_v6 = vsel %vm782_vm0, %v4119_v52, 0 }
 0xae9   : > { %v12427_v39 = vpop.f32.mrf.mxu0  ;;  %12435 = vmatpush3.bf16.msra.mxu0 %v4180_v6 }
 0xaea   : > { %12446 = vmatprep.subr.bf16.mxu0 %v13211_v0 }
 0xb4a   : > { %v4230_v7 = vpop.permute.xlu1 %4229 }
 0xb4b   : > { %v4235_v8 = vsel %vm1083_vm5, %v4230_v7, 0 }
 0xb4c   : > { %12441 = vmatpush3.bf16.xpose.msra.mxu1 %v4235_v8  ;;  %v4227_v40 = vpop.permute.xlu0 %4226 }
 0xb4d   : > { %12452 = vmatprep.subr.bf16.mxu1 %v13211_v0 }
 0xb4e   : > { %v4346_v9 = vpop.permute.xlu1 %4345 }
 0xb4f   : > { %v4351_v10 = vsel %vm1083_vm5, %v4346_v9, 0 }
 0xb50   : > { %v4461_v11 = vpop.permute.xlu0 %4460 }
 0xb51   : > { %v4466_v13 = vsel %vm1083_vm5, %v4461_v11, 0 }
 0xb52   : > { %v4344_v12 = vpop.permute.xlu1 %4343 }
 0xb53   : > { %12443 = vmatmul.mubr.msk.bf16.vlgmr.msra.gmra.mxu1 %vm1083_vm5, %v4227_v40 }
 0xb54   : > { %12453 = vmatpush3.bf16.xpose.msra.mxu1 %v4351_v10  ;;  %12454 = vmatprep.mubr.msk.bf16.mxu1 %vm13213_vm2, %v13211_v0 }
 0xb55   : > { %12464 = vmatprep.subr.bf16.mxu1 %v13211_v0 }
 0xb56   : > { %v4459_v58 = vpop.permute.xlu1 %4458 }
 0xb5b   : > { %12455 = vmatmul.mubr.msk.bf16.vlgmr.msra.gmra.mxu1 %vm1083_vm5, %v4344_v12 }
 0xb5c   : > { %12465 = vmatpush3.bf16.xpose.msra.mxu1 %v4466_v13  ;;  %12466 = vmatprep.mubr.msk.bf16.mxu1 %vm13213_vm2, %v13211_v0 }
 0xb5d   : > { %12476 = vmatprep.subr.bf16.mxu1 %v13211_v0 }
 0xb63   : > { %12467 = vmatmul.mubr.msk.bf16.vlgmr.msra.gmra.mxu1 %vm1083_vm5, %v4459_v58 }
 0xb64   : > { %12484 = vmatprep.mubr.msk.bf16.mxu1 %vm13213_vm2, %v13211_v0 }
 0xba0   : > { %v4160_v14 = vpop.f32.mrf.mxu1 }
 0xba1   : > { %v4161_v15 = vadd.f32 %v13147_v33, %v4160_v14 }
 0xba2   : > { %v12432_v59 = vpop.f32.mrf.mxu1 }
 0xba3   : > { %v4166_v16 = vsel %vm1130_vm6, %v4161_v15, -inf }
 0xba4   : > { %4167 = vmax.xlane.f32.xlu0 %v4166_v16  ;;  %v4163_v18 = vpop.f32.mrf.mxu1 }
 0xba6   : > { %v12433_v19 = vpop.f32.mrf.mxu1 }
 0xc13   : > { %v4271_v20 = vpop.f32.mrf.mxu1 }
 0xc14   : > { %v4272_v21 = vadd.f32 %v13147_v33, %v4271_v20 }
 0xc15   : > { %v12444_v23 = vpop.f32.mrf.mxu1 }
 0xc16   : > { %v4277_v24 = vsel %vm1130_vm6, %v4272_v21, -inf }
 0xc17   : > { %4278 = vmax.xlane.f32.xlu1 %v4277_v24  ;;  %v4274_v25 = vpop.f32.mrf.mxu1 }
 0xc18   : > { %v12807_v25 = vld [vmem:[%s16071_s12 + $0x38] sm:$0xff]  }
 0xc19   : > { %v12445_v26 = vpop.f32.mrf.mxu1  ;;  %12477 = vmatpush3.bf16.msra.mxu1 %v12807_v25 }
 0xc1a   : > { %12478 = vmatprep.subr.bf16.mxu1 %v13211_v0 }
 0xc1b   : > { %v4387_v27 = vpop.f32.mrf.mxu1 }
 0xc1c   : > { %v4388_v28 = vadd.f32 %v13147_v33, %v4387_v27 }
 0xc1d   : > { %v12456_v30 = vpop.f32.mrf.mxu1 }
 0xc1e   : > { %v4393_v41 = vsel %vm1130_vm6, %v4388_v28, -inf  ;;  %v12808_v30 = vld [vmem:[%s16071_s12 + $0x30] sm:$0xff]  }
 0xc1f   : > { %4394 = vmax.xlane.f32.xlu0 %v4393_v41  ;;  %v4390_v42 = vpop.f32.mrf.mxu1  ;;  %12479 = vmatpush3.bf16.msra.mxu1 %v12808_v30  ;;  %v10532_v30 = vld [vmem:[%s16075_s16 + $0x2c0] sm:$0xff] }
 0xc20   : > { %12480 = vmatprep.subr.bf16.mxu1 %v13211_v0 }
 0xc21   : > { %v12457_v43 = vpop.f32.mrf.mxu1 }
 0xc23   : > { %v4502_v45 = vpop.f32.mrf.mxu1 }
 0xc24   : > { %v4503_v46 = vadd.f32 %v13147_v33, %v4502_v45 }
 0xc25   : > { %v12468_v47 = vpop.f32.mrf.mxu1 }
 0xc26   : > { %v4508_v31 = vsel %vm1130_vm6, %v4503_v46, -inf }
 0xc27   : > { %4509 = vmax.xlane.f32.xlu0 %v4508_v31  ;;  %v4505_v48 = vpop.f32.mrf.mxu1 }
 0xc28   : > { %4288 = vrot.lane.b32.xlu1 %v4119_v52, %s16147_s5  ;;  %v12810_v48 = vld [vmem:[%s16071_s12 + $0x20] sm:$0xff]  }
 0xc29   : > { %v12469_v49 = vpop.f32.mrf.mxu1 }
 0xc2c   : > { %4518 = vrot.lane.b32.xlu1 %v4119_v52, %s16149_s28 }
 0xc2d   : > { %v4168_v50 = vpop.xlane.xlu0 %4167 }
 0xc2e   : > { %v4169_v51 = vsub.f32 %v4161_v15, %v4168_v50 }
 0xc30   : > { %v4170_v36 = vmul.f32 1.442695, %v4169_v51 }
 0xc32   : > { %13107 = vpow2.f32 %v4170_v36 }
 0xc3d   : > { %4403 = vrot.lane.b32.xlu0 %v4119_v52, %s16148_s27 }
 0xc3f   : > { %v13108_v53 = vpop.eup %13107 }
 0xc40   : > { %v4175_v54 = vpack.c.bf16 %v13108_v53, %v13108_v53  ;;  %v4172_v9 = vsel %vm1130_vm6, %v13108_v53, 0.0 }
 0xc42   : > { %12437 = vmatmul.mubr.msk.bf16.vlgmr.msra.gmra.mxu0 %vm1130_vm6, %v4175_v54 }
 0xc43   : > { %12448 = vmatprep.mubr.msk.bf16.mxu0 %vm13213_vm2, %v13211_v0 }
 0xca0   : > { %v4279_v55 = vpop.xlane.xlu1 %4278 }
 0xca1   : > { %v4280_v56 = vsub.f32 %v4272_v21, %v4279_v55 }
 0xca3   : > { %v4281_v57 = vmul.f32 1.442695, %v4280_v56 }
 0xca4   : > { %v4289_v60 = vpop.permute.xlu1 %4288 }
 0xca5   : > { %13109 = vpow2.f32 %v4281_v57  ;;  %v4294_v61 = vsel %vm782_vm0, %v4289_v60, 0 }
 0xca6   : > { %12447 = vmatpush3.bf16.msra.mxu0 %v4294_v61 }
 0xca7   : > { %12458 = vmatprep.subr.bf16.mxu0 %v13211_v0 }
 0xca8   : > { %v4395_v62 = vpop.xlane.xlu0 %4394  ;;  %v4519_v10 = vpop.permute.xlu1 %4518 }
 0xca9   : > { %v4396_v63 = vsub.f32 %v4388_v28, %v4395_v62  ;;  %v4524_v13 = vsel %vm782_vm0, %v4519_v10, 0 }
 0xcab   : > { %v4397_v1 = vmul.f32 1.442695, %v4396_v63 }
 0xcad   : > { %13111 = vpow2.f32 %v4397_v1 }
 0xcb0   : > { %v4510_v2 = vpop.xlane.xlu0 %4509 }
 0xcb1   : > { %v4511_v3 = vsub.f32 %v4503_v46, %v4510_v2  ;;  %v12809_v46 = vld [vmem:[%s16071_s12 + $0x28] sm:$0xff]  }
 0xcb2   : > { %v13110_v52 = vpop.eup %13109  ;;  %12481 = vmatpush3.bf16.msra.mxu1 %v12809_v46 }
 0xcb3   : > { %v4512_v34 = vmul.f32 1.442695, %v4511_v3  ;;  %v4283_v6 = vsel %vm1130_vm6, %v13110_v52, 0.0  ;;  %v4286_v39 = vpack.c.bf16 %v13110_v52, %v13110_v52  ;;  %12482 = vmatprep.subr.bf16.mxu1 %v13211_v0  ;;  %v10498_v3 = vld [vmem:[%s16146_s13 + $0x1] ss:$0 sm:$0xff]  ;;  %s13155_s13 = scalar_lea.vmem %s13154_s6, 32 }
 0xcb4   : > { %v4404_v7 = vpop.permute.xlu0 %4403  ;;  %4284 = vadd.xlane.f32.xlu1 %v4283_v6 }
 0xcb5   : > { %13113 = vpow2.f32 %v4512_v34  ;;  %v4409_v8 = vsel %vm782_vm0, %v4404_v7, 0  ;;  %12449 = vmatmul.mubr.msk.bf16.vlgmr.msra.gmra.mxu0 %vm1130_vm6, %v4286_v39 }
 0xcb6   : > { %12459 = vmatpush3.bf16.msra.mxu0 %v4409_v8  ;;  %12460 = vmatprep.mubr.msk.bf16.mxu0 %vm13213_vm2, %v13211_v0 }
 0xcb7   : > { %12470 = vmatprep.subr.bf16.mxu0 %v13211_v0  ;;  %12483 = vmatpush3.bf16.msra.mxu1 %v12810_v48  ;;  %v10516_v48 = vld [vmem:[%s16075_s16 + $0x240] sm:$0xff] }
 0xcb8   : > { %4173 = vadd.xlane.f32.xlu1 %v4172_v9 }
 0xcba   : > { %v13112_v40 = vpop.eup %13111 }
 0xcbb   : > { %v4399_v11 = vsel %vm1130_vm6, %v13112_v40, 0.0  ;;  %v4402_v12 = vpack.c.bf16 %v13112_v40, %v13112_v40 }
 0xcbc   : > { %4400 = vadd.xlane.f32.xlu0 %v4399_v11 }
 0xcbd   : > { %12461 = vmatmul.mubr.msk.bf16.vlgmr.msra.gmra.mxu0 %vm1130_vm6, %v4402_v12 }
 0xcbe   : > { %12471 = vmatpush3.bf16.msra.mxu0 %v4524_v13  ;;  %12472 = vmatprep.mubr.msk.bf16.mxu0 %vm13213_vm2, %v13211_v0 }
 0xcc2   : > { %v13114_v58 = vpop.eup %13113 }
 0xcc3   : > { %v4514_v14 = vsel %vm1130_vm6, %v13114_v58, 0.0  ;;  %v4517_v33 = vpack.c.bf16 %v13114_v58, %v13114_v58  ;;  %v10556_v58 = vld [vmem:[%s16075_s16 + $0x380] sm:$0xff] }
 0xcc4   : > { %4515 = vadd.xlane.f32.xlu0 %v4514_v14  ;;  %v10557_v14 = vld [vmem:[%s16075_s16 + $0x388] sm:$0xff] }
 0xcc5   : > { %12473 = vmatmul.mubr.msk.bf16.vlgmr.msra.gmra.mxu0 %vm1130_vm6, %v4517_v33 }
 0xcc6   : > { %5197 = vmatprep.mubr.bf16.mxu0 %v13220_v17 }
 0xd02   : > { %v4216_v15 = vpop.f32.mrf.mxu0 }
 0xd04   : > { %v12438_v59 = vpop.f32.mrf.mxu0 }
 0xd06   : > { %v4219_v16 = vpop.f32.mrf.mxu0 }
 0xd08   : > { %v12439_v18 = vpop.f32.mrf.mxu0 }
 0xd3d   : > { %v4285_v19 = vpop.xlane.xlu1 %4284 }
 0xd41   : > { %v4174_v20 = vpop.xlane.xlu1 %4173 }
 0xd42   : > { %13115 = vrcp.f32 %v4174_v20  ;;  %v10548_v20 = vld [vmem:[%s16075_s16 + $0x340] sm:$0xff] }
 0xd43   : > { %13117 = vrcp.f32 %v4285_v19  ;;  %v10540_v19 = vld [vmem:[%s16075_s16 + $0x300] sm:$0xff] }
 0xd44   : > { %v10606_v25 = vcombine.low %v10540_v19, %v10548_v20 }
 0xd45   : > { %v4401_v24 = vpop.xlane.xlu0 %4400 }
 0xd46   : > { %13119 = vrcp.f32 %v4401_v24  ;;  %v10549_v24 = vld [vmem:[%s16075_s16 + $0x348] sm:$0xff] }
 0xd4d   : > { %v4516_v27 = vpop.xlane.xlu0 %4515 }
 0xd4e   : > { %13121 = vrcp.f32 %v4516_v27 }
 0xd4f   : > { %v13116_v21 = vpop.eup %13115 }
 0xd50   : > { %v4223_v23 = vmul.f32 %v13116_v21, %v4216_v15  ;;  %v13118_v26 = vpop.eup %13117  ;;  %v10565_v15 = vld [vmem:[%s16075_s16 + $0x3c8] sm:$0xff] }
 0xd51   : > { %v10624_v16 = vcombine.low %v10557_v14, %v10565_v15  ;;  %v10625_v18 = vcombine.high %v10557_v14, %v10565_v15  ;;  %v10541_v21 = vld [vmem:[%s16075_s16 + $0x308] sm:$0xff]  ;;  %v10526_v14 = vld [vmem:[%s16075_s16 + $0x290] sm:$0xff]  ;;  %v10527_v15 = vld [vmem:[%s16075_s16 + $0x298] sm:$0xff] }
 0xd52   : > { %4224 = vst.msk [vmem:[#allocation2] sm:$0xff] %vm1083_vm5, %v4223_v23  ;;  %v10607_v23 = vcombine.high %v10540_v19, %v10548_v20  ;;  %v10609_v27 = vcombine.high %v10541_v21, %v10549_v24 }
 0xd53   : > { %v13120_v47 = vpop.eup %13119  ;;  %5214 = vmatprep.subr.bf16.mxu1 %v10625_v18 }
 0xd5b   : > { %v13122_v53 = vpop.eup %13121 }
 0xd75   : > { %v4330_v28 = vpop.f32.mrf.mxu0 }
 0xd76   : > { %v4337_v41 = vmul.f32 %v13118_v26, %v4330_v28  ;;  %v10608_v26 = vcombine.low %v10541_v21, %v10549_v24  ;;  %v10524_v28 = vld [vmem:[%s16075_s16 + $0x280] sm:$0xff]  ;;  %v10510_v21 = vld [vmem:[%s16075_s16 + $0x210] sm:$0xff]  ;;  %v10511_v24 = vld [vmem:[%s16075_s16 + $0x218] sm:$0xff] }
 0xd77   : > { %v12450_v42 = vpop.f32.mrf.mxu0 }
 0xd78   : > { %4339 = vrot.lane.b32.xlu0 %v4337_v41, %s16150_s3  ;;  %v10525_v41 = vld [vmem:[%s16075_s16 + $0x288] sm:$0xff]  ;;  %v10591_v42 = vcombine.high %v10524_v28, %v10532_v30 }
 0xd79   : > { %v4333_v43 = vpop.f32.mrf.mxu0 }
 0xd7a   : > { %v10533_v43 = vld [vmem:[%s16075_s16 + $0x2c8] sm:$0xff] }
 0xd7b   : > { %v12451_v45 = vpop.f32.mrf.mxu0  ;;  %v10592_v46 = vcombine.low %v10525_v41, %v10533_v43 }
 0xd7c   : > { %v10590_v45 = vcombine.low %v10524_v28, %v10532_v30 }
 0xd7d   : > { %v4445_v31 = vpop.f32.mrf.mxu0 }
 0xd7e   : > { %v4452_v49 = vmul.f32 %v13120_v47, %v4445_v31  ;;  %v10593_v47 = vcombine.high %v10525_v41, %v10533_v43  ;;  %v10508_v31 = vld [vmem:[%s16075_s16 + $0x200] sm:$0xff]  ;;  %v10561_v43 = vld [vmem:[%s16075_s16 + $0x3a8] sm:$0xff] }
 0xd7f   : > { %v12462_v50 = vpop.f32.mrf.mxu0  ;;  %v10560_v41 = vld [vmem:[%s16075_s16 + $0x3a0] sm:$0xff] }
 0xd80   : > { %4454 = vrot.lane.b32.xlu1 %v4452_v49, %s16151_s0  ;;  %v10509_v49 = vld [vmem:[%s16075_s16 + $0x208] sm:$0xff]  ;;  %v10575_v50 = vcombine.high %v10508_v31, %v10516_v48 }
 0xd81   : > { %v4448_v51 = vpop.f32.mrf.mxu0 }
 0xd82   : > { %v10517_v51 = vld [vmem:[%s16075_s16 + $0x248] sm:$0xff] }
 0xd83   : > { %v12463_v36 = vpop.f32.mrf.mxu0 }
 0xd84   : > { %v10574_v36 = vcombine.low %v10508_v31, %v10516_v48 }
 0xd85   : > { %v4560_v54 = vpop.f32.mrf.mxu0 }
 0xd86   : > { %v4567_v55 = vmul.f32 %v13122_v53, %v4560_v54  ;;  %v10576_v53 = vcombine.low %v10509_v49, %v10517_v51  ;;  %v10577_v54 = vcombine.high %v10509_v49, %v10517_v51  ;;  %v10544_v49 = vld [vmem:[%s16075_s16 + $0x320] sm:$0xff]  ;;  %v10545_v51 = vld [vmem:[%s16075_s16 + $0x328] sm:$0xff] }
 0xd87   : > { %v12474_v56 = vpop.f32.mrf.mxu0 }
 0xd88   : > { %4569 = vrot.lane.b32.xlu1 %v4567_v55, %s16152_s29  ;;  %v10558_v55 = vld [vmem:[%s16075_s16 + $0x390] sm:$0xff] }
 0xd89   : > { %v4563_v57 = vpop.f32.mrf.mxu0  ;;  %v10566_v56 = vld [vmem:[%s16075_s16 + $0x3d0] sm:$0xff] }
 0xd8a   : > { %v10559_v57 = vld [vmem:[%s16075_s16 + $0x398] sm:$0xff] }
 0xd8b   : > { %v12475_v60 = vpop.f32.mrf.mxu0 }
 0xd8c   : > { %v10626_v60 = vcombine.low %v10558_v55, %v10566_v56 }
 0xdea   : > { %v4340_v61 = vpop.permute.xlu0 %4339 }
 0xdeb   : > { %4342 = vst.msk [vmem:[#allocation2] sm:$0xff] %vm1307_vm7, %v4340_v61  ;;  %v10627_v61 = vcombine.high %v10558_v55, %v10566_v56 }
 0xdf2   : > { %v4455_v62 = vpop.permute.xlu1 %4454 }
 0xdf3   : > { %4457 = vst.msk [vmem:[#allocation2] sm:$0xff] %vm1423_vm8, %v4455_v62  ;;  %v10567_v62 = vld [vmem:[%s16075_s16 + $0x3d8] sm:$0xff] }
 0xdfa   : > { %v4570_v63 = vpop.permute.xlu1 %4569 }
 0xdfb   : > { %4572 = vst.msk [vmem:[#allocation2] sm:$0xff] %vm1539_vm9, %v4570_v63  ;;  %v10628_v63 = vcombine.low %v10559_v57, %v10567_v62 }
 0xe02   : > { %v4573_v1 = vld [vmem:[#allocation2] sm:$0xff] }
 0xe03   : > { %v4574_v2 = vpack.c.bf16 %v4573_v1, %v4573_v1  ;;  %v10629_v1 = vcombine.high %v10559_v57, %v10567_v62  ;;  %v10528_v57 = vld [vmem:[%s16075_s16 + $0x2a0] sm:$0xff]  ;;  %v10537_v62 = vld [vmem:[%s16075_s16 + $0x2e8] sm:$0xff] }
 0xe05   : > { %12485 = vmatmul.mubr.msk.bf16.vlgmr.msra.gmra.mxu1 %vm871_vm4, %v4574_v2 }
 0xe06   : > { %5238 = vmatprep.mubr.bf16.mxu1 %v13220_v17  ;;  %5215 = vmatpush1.bf16.msra.mxu1 %v10624_v16 }
 0xe07   : > { %5216 = vmatprep.subr.bf16.mxu1 %v10609_v27 }
 0xe0a   : > { %5217 = vmatpush1.bf16.msra.mxu1 %v10608_v26 }
 0xe0b   : > { %5218 = vmatprep.subr.bf16.mxu1 %v10593_v47 }
 0xe0e   : > { %5219 = vmatpush1.bf16.msra.mxu1 %v10592_v46 }
 0xe0f   : > { %5220 = vmatprep.subr.bf16.mxu1 %v10577_v54 }
 0xe12   : > { %5221 = vmatpush1.bf16.msra.mxu1 %v10576_v53 }
 0xe13   : > { %5296 = vmatprep.subr.bf16.mxu1 %v10629_v1 }
 0xec5   : > { %v4653_v52 = vpop.f32.mrf.mxu1 }
 0xec6   : > { %v4654_v34 = vadd.f32 %v10498_v3, %v4653_v52 }
 0xec7   : > { %v12486_v6 = vpop.f32.mrf.mxu1 }
 0xec8   : > { %v4659_v39 = vadd.f32 %v4654_v34, %v14335_v29  ;;  %v10564_v29 = vld [vmem:[%s16075_s16 + $0x3c0] sm:$0xff] }
 0xec9   : > { %v4656_v7 = vpop.f32.mrf.mxu1  ;;  %v10623_v33 = vcombine.high %v10556_v58, %v10564_v29  ;;  %v10622_v59 = vcombine.low %v10556_v58, %v10564_v29  ;;  %v10506_v6 = vld [vmem:[%s16073_s14 + $0x1] ss:$0 sm:$0xff] }
 0xeca   : > { %v4664_v8 = vsel %vm871_vm4, %v4659_v39, 0.0  ;;  %v10507_v7 = vld [vmem:[%s16074_s15 + $0x1] ss:$0 sm:$0xff] }
 0xecb   : > { %4665 = vadd.xlane.f32.xlu0 %v4664_v8  ;;  %v12487_v9 = vpop.f32.mrf.mxu1  ;;  %5173 = vmatprep.subr.bf16.mxu0 %v10623_v33  ;;  %v10534_v33 = vld [vmem:[%s16075_s16 + $0x2d0] sm:$0xff] }
 0xecc   : > { %5174 = vmatpush1.bf16.msra.mxu0 %v10622_v59  ;;  %v10542_v9 = vld [vmem:[%s16075_s16 + $0x310] sm:$0xff]  ;;  %v10535_v59 = vld [vmem:[%s16075_s16 + $0x2d8] sm:$0xff]  ;;  %v10595_v19 = vcombine.high %v10526_v14, %v10534_v33  ;;  %v10594_v26 = vcombine.low %v10526_v14, %v10534_v33 }
 0xecd   : > { %5175 = vmatprep.subr.bf16.mxu0 %v10607_v23  ;;  %v10597_v20 = vcombine.high %v10527_v15, %v10535_v59  ;;  %v10518_v23 = vld [vmem:[%s16075_s16 + $0x250] sm:$0xff]  ;;  %v10596_v27 = vcombine.low %v10527_v15, %v10535_v59 }
 0xece   : > { %v10579_v28 = vcombine.high %v10510_v21, %v10518_v23  ;;  %v10578_v46 = vcombine.low %v10510_v21, %v10518_v23 }
 0xed0   : > { %5176 = vmatpush1.bf16.msra.mxu0 %v10606_v25  ;;  %v10519_v25 = vld [vmem:[%s16075_s16 + $0x258] sm:$0xff] }
 0xed1   : > { %5177 = vmatprep.subr.bf16.mxu0 %v10591_v42  ;;  %v10581_v30 = vcombine.high %v10511_v24, %v10519_v25  ;;  %v10568_v42 = vld [vmem:[%s16075_s16 + $0x3e0] sm:$0xff]  ;;  %v10580_v47 = vcombine.low %v10511_v24, %v10519_v25 }
 0xed2   : > { %v10631_v31 = vcombine.high %v10560_v41, %v10568_v42  ;;  %v10630_v53 = vcombine.low %v10560_v41, %v10568_v42 }
 0xed4   : > { %5178 = vmatpush1.bf16.msra.mxu0 %v10590_v45  ;;  %v10569_v45 = vld [vmem:[%s16075_s16 + $0x3e8] sm:$0xff] }
 0xed5   : > { %5179 = vmatprep.subr.bf16.mxu0 %v10575_v50  ;;  %v10633_v48 = vcombine.high %v10561_v43, %v10569_v45  ;;  %v10552_v50 = vld [vmem:[%s16075_s16 + $0x360] sm:$0xff]  ;;  %v10632_v54 = vcombine.low %v10561_v43, %v10569_v45 }
 0xed6   : > { %v10615_v55 = vcombine.high %v10544_v49, %v10552_v50 }
 0xed8   : > { %5180 = vmatpush1.bf16.msra.mxu0 %v10574_v36  ;;  %v10553_v36 = vld [vmem:[%s16075_s16 + $0x368] sm:$0xff] }
 0xed9   : > { %5255 = vmatprep.subr.bf16.mxu0 %v10627_v61  ;;  %v10617_v56 = vcombine.high %v10545_v51, %v10553_v36  ;;  %v10529_v61 = vld [vmem:[%s16075_s16 + $0x2a8] sm:$0xff]  ;;  %v10616_v1 = vcombine.low %v10545_v51, %v10553_v36 }
 0xf54   : > { %v4666_v40 = vpop.xlane.xlu0 %4665 }
 0xf55   : > { %v4667_v10 = vmul.f32 0.015625, %v4666_v40  ;;  %v10550_v40 = vld [vmem:[%s16075_s16 + $0x350] sm:$0xff] }
 0xf56   : > { %v10611_v58 = vcombine.high %v10542_v9, %v10550_v40  ;;  %v10610_v16 = vcombine.low %v10542_v9, %v10550_v40 }
 0xf57   : > { %v14458_v11 = vsub.f32 %v4659_v39, %v4667_v10  ;;  %v10543_v10 = vld [vmem:[%s16075_s16 + $0x318] sm:$0xff] }
 0xf59   : > { %v4669_v12 = vmul.f32 %v14458_v11, %v14458_v11 }
 0xf5b   : > { %v4670_v13 = vsel %vm871_vm4, %v4669_v12, 0.0 }
 0xf5c   : > { %4671 = vadd.xlane.f32.xlu1 %v4670_v13 }
 0xfe5   : > { %v4672_v2 = vpop.xlane.xlu1 %4671 }
 0xfe6   : > { %v4673_v3 = vmul.f32 0.015625, %v4672_v2 }
 0xfe8   : > { %v4674_v52 = vadd.f32 1e-05, %v4673_v3  ;;  %v10601_v3 = vcombine.high %v10529_v61, %v10537_v62 }
 0xfea   : > { %13123 = vrsqrt.f32 %v4674_v52  ;;  %v10512_v52 = vld [vmem:[%s16075_s16 + $0x220] sm:$0xff] }
 0xff7   : > { %v13124_v34 = vpop.eup %13123 }
 0xff8   : > { %v4676_v39 = vmul.f32 %v13124_v34, %v14458_v11  ;;  %v10551_v11 = vld [vmem:[%s16075_s16 + $0x358] sm:$0xff]  ;;  %v10520_v34 = vld [vmem:[%s16075_s16 + $0x260] sm:$0xff] }
 0xff9   : > { %v10613_v29 = vcombine.high %v10543_v10, %v10551_v11  ;;  %v10612_v18 = vcombine.low %v10543_v10, %v10551_v11  ;;  %v10583_v9 = vcombine.high %v10512_v52, %v10520_v34  ;;  %v10562_v10 = vld [vmem:[%s16075_s16 + $0x3b0] sm:$0xff]  ;;  %v10582_v14 = vcombine.low %v10512_v52, %v10520_v34  ;;  %v12822_v52 = vld [vmem:[%s16077_s18 + $0x4a8] sm:$0xff]   ;;  %v12823_v34 = vld [vmem:[%s16077_s18 + $0x460] sm:$0xff]  }
 0xffa   : > { %v4683_v8 = vmul.f32 %v10506_v6, %v4676_v39  ;;  %v10513_v6 = vld [vmem:[%s16075_s16 + $0x228] sm:$0xff]  ;;  %v10570_v11 = vld [vmem:[%s16075_s16 + $0x3f0] sm:$0xff] }
 0xffb   : > { %v10521_v39 = vld [vmem:[%s16075_s16 + $0x268] sm:$0xff]  ;;  %v10635_v15 = vcombine.high %v10562_v10, %v10570_v11  ;;  %v10634_v21 = vcombine.low %v10562_v10, %v10570_v11  ;;  %v12830_v10 = vld [vmem:[%s16077_s18 + $0x498] sm:$0xff]   ;;  %v12831_v11 = vld [vmem:[%s16077_s18 + $0x450] sm:$0xff]  }
 0xffc   : > { %v14542_v12 = vadd.f32 %v10507_v7, %v4683_v8  ;;  %v10600_v8 = vcombine.low %v10529_v61, %v10537_v62  ;;  %v10585_v40 = vcombine.high %v10513_v6, %v10521_v39  ;;  %v10584_v33 = vcombine.low %v10513_v6, %v10521_v39  ;;  %v12815_v61 = vld [vmem:[%s16077_s18 + $0x470] sm:$0xff]   ;;  %v12824_v6 = vld [vmem:[%s16077_s18 + $0x4e0] sm:$0xff]  }
 0xffd   : > { %v12816_v62 = vld [vmem:[%s16077_s18 + $0x4f0] sm:$0xff]   ;;  %v12825_v39 = vld [vmem:[%s16077_s18 + $0x420] sm:$0xff]  }
 0xffe   : > { %v14546_v13 = vpack.c.bf16 %v14542_v12, %v14542_v12 }
0x1000   : > { %10638 = vmatmul.mubr.msk.bf16.vlgmr.msra.gmra.mxu0 %vm871_vm4, %v14546_v13  ;;  %10639 = vmatmul.mubr.msk.bf16.vlgmr.msra.gmra.mxu1 %vm871_vm4, %v14546_v13 }
0x1001   : > { %5256 = vmatpush1.bf16.msra.mxu0 %v10626_v60  ;;  %5297 = vmatpush1.bf16.msra.mxu1 %v10628_v63  ;;  %v10536_v60 = vld [vmem:[%s16075_s16 + $0x2e0] sm:$0xff]  ;;  %v10614_v63 = vcombine.low %v10544_v49, %v10552_v50 }
0x1002   : > { %5257 = vmatprep.subr.bf16.mxu0 %v10611_v58  ;;  %5298 = vmatprep.subr.bf16.mxu1 %v10613_v29  ;;  %v10599_v2 = vcombine.high %v10528_v57, %v10536_v60  ;;  %v10598_v7 = vcombine.low %v10528_v57, %v10536_v60  ;;  %v10563_v58 = vld [vmem:[%s16075_s16 + $0x3b8] sm:$0xff] }
0x1003   : > { %5279 = vmatprep.mubr.bf16.mxu0 %v13220_v17  ;;  %5320 = vmatprep.mubr.bf16.mxu1 %v13220_v17  ;;  %v10571_v29 = vld [vmem:[%s16075_s16 + $0x3f8] sm:$0xff] }
0x1004   : > { %v10637_v59 = vcombine.high %v10563_v58, %v10571_v29  ;;  %v10636_v23 = vcombine.low %v10563_v58, %v10571_v29  ;;  %v12813_v57 = vld [vmem:[%s16077_s18 + $0x438] sm:$0xff]   ;;  %v12832_v58 = vld [vmem:[%s16077_s18 + $0x4d0] sm:$0xff]  }
0x1005   : > { %5258 = vmatpush1.bf16.msra.mxu0 %v10610_v16  ;;  %5299 = vmatpush1.bf16.msra.mxu1 %v10612_v18  ;;  %v10546_v16 = vld [vmem:[%s16075_s16 + $0x330] sm:$0xff]  ;;  %v12814_v60 = vld [vmem:[%s16077_s18 + $0x4b8] sm:$0xff]  }
0x1006   : > { %5259 = vmatprep.subr.bf16.mxu0 %v10595_v19  ;;  %5300 = vmatprep.subr.bf16.mxu1 %v10597_v20  ;;  %v10554_v18 = vld [vmem:[%s16075_s16 + $0x370] sm:$0xff]  ;;  %v10547_v19 = vld [vmem:[%s16075_s16 + $0x338] sm:$0xff] }
0x1007   : > { %v10555_v20 = vld [vmem:[%s16075_s16 + $0x378] sm:$0xff]  ;;  %v10619_v24 = vcombine.high %v10546_v16, %v10554_v18  ;;  %v10618_v41 = vcombine.low %v10546_v16, %v10554_v18  ;;  %v12833_v29 = vld [vmem:[%s16077_s18 + $0x410] sm:$0xff]   ;;  %v12838_v16 = vld [vmem:[%s16077_s18 + $0x488] sm:$0xff]  }
0x1008   : > { %v10621_v25 = vcombine.high %v10547_v19, %v10555_v20  ;;  %v10620_v42 = vcombine.low %v10547_v19, %v10555_v20  ;;  %v12839_v18 = vld [vmem:[%s16077_s18 + $0x440] sm:$0xff]  }
0x1009   : > { %5260 = vmatpush1.bf16.msra.mxu0 %v10594_v26  ;;  %5301 = vmatpush1.bf16.msra.mxu1 %v10596_v27  ;;  %v10530_v26 = vld [vmem:[%s16075_s16 + $0x2b0] sm:$0xff]  ;;  %v12840_v19 = vld [vmem:[%s16077_s18 + $0x4c0] sm:$0xff]  }
0x100a   : > { %5261 = vmatprep.subr.bf16.mxu0 %v10579_v28  ;;  %5302 = vmatprep.subr.bf16.mxu1 %v10581_v30  ;;  %v10538_v27 = vld [vmem:[%s16075_s16 + $0x2f0] sm:$0xff]  ;;  %v10531_v28 = vld [vmem:[%s16075_s16 + $0x2b8] sm:$0xff]  ;;  %v12841_v20 = vld [vmem:[%s16077_s18 + $0x400] sm:$0xff]  }
0x100b   : > { %v10539_v30 = vld [vmem:[%s16075_s16 + $0x2f8] sm:$0xff]  ;;  %v10603_v43 = vcombine.high %v10530_v26, %v10538_v27  ;;  %v10602_v49 = vcombine.low %v10530_v26, %v10538_v27 }
0x100c   : > { %v10605_v45 = vcombine.high %v10531_v28, %v10539_v30  ;;  %v10604_v50 = vcombine.low %v10531_v28, %v10539_v30 }
0x100d   : > { %5262 = vmatpush1.bf16.msra.mxu0 %v10578_v46  ;;  %5303 = vmatpush1.bf16.msra.mxu1 %v10580_v47  ;;  %v10514_v46 = vld [vmem:[%s16075_s16 + $0x230] sm:$0xff] }
0x100e   : > { %5337 = vmatprep.subr.bf16.mxu0 %v10631_v31  ;;  %5378 = vmatprep.subr.bf16.mxu1 %v10633_v48  ;;  %v10522_v47 = vld [vmem:[%s16075_s16 + $0x270] sm:$0xff]  ;;  %v10515_v31 = vld [vmem:[%s16075_s16 + $0x238] sm:$0xff] }
0x100f   : > { %v10523_v48 = vld [vmem:[%s16075_s16 + $0x278] sm:$0xff]  ;;  %v10587_v51 = vcombine.high %v10514_v46, %v10522_v47 }
0x1010   : > { %10640 = vmatmul.mubr.msk.bf16.vlgmr.msra.gmra.mxu0 %vm871_vm4, %v14546_v13  ;;  %10641 = vmatmul.mubr.msk.bf16.vlgmr.msra.gmra.mxu1 %vm871_vm4, %v14546_v13  ;;  %v10589_v36 = vcombine.high %v10515_v31, %v10523_v48 }
0x1011   : > { %5338 = vmatpush1.bf16.msra.mxu0 %v10630_v53  ;;  %5379 = vmatpush1.bf16.msra.mxu1 %v10632_v54  ;;  %v10586_v53 = vcombine.low %v10514_v46, %v10522_v47  ;;  %v10588_v54 = vcombine.low %v10515_v31, %v10523_v48 }
0x1012   : > { %5339 = vmatprep.subr.bf16.mxu0 %v10615_v55  ;;  %5380 = vmatprep.subr.bf16.mxu1 %v10617_v56  ;;  %v12811_v55 = vld [vmem:[%s16077_s18 + $0x478] sm:$0xff]  }
0x1013   : > { %5361 = vmatprep.mubr.bf16.mxu0 %v13220_v17  ;;  %5402 = vmatprep.mubr.bf16.mxu1 %v13220_v17  ;;  %v12812_v56 = vld [vmem:[%s16077_s18 + $0x4f8] sm:$0xff]  }
0x1015   : > { %5340 = vmatpush1.bf16.msra.mxu0 %v10614_v63  ;;  %5381 = vmatpush1.bf16.msra.mxu1 %v10616_v1  ;;  %v12817_v63 = vld [vmem:[%s16077_s18 + $0x430] sm:$0xff]  }
0x1016   : > { %5341 = vmatprep.subr.bf16.mxu0 %v10599_v2  ;;  %5382 = vmatprep.subr.bf16.mxu1 %v10601_v3  ;;  %v12818_v1 = vld [vmem:[%s16077_s18 + $0x4b0] sm:$0xff]   ;;  %v12819_v2 = vld [vmem:[%s16077_s18 + $0x468] sm:$0xff]  }
0x1017   : > { %v12821_v3 = vld [vmem:[%s16077_s18 + $0x428] sm:$0xff]  }
0x1019   : > { %5342 = vmatpush1.bf16.msra.mxu0 %v10598_v7  ;;  %5383 = vmatpush1.bf16.msra.mxu1 %v10600_v8  ;;  %v12826_v7 = vld [vmem:[%s16077_s18 + $0x4a0] sm:$0xff]   ;;  %v12827_v8 = vld [vmem:[%s16077_s18 + $0x458] sm:$0xff]  }
0x101a   : > { %5343 = vmatprep.subr.bf16.mxu0 %v10583_v9  ;;  %5384 = vmatprep.subr.bf16.mxu1 %v10585_v40  ;;  %v12828_v9 = vld [vmem:[%s16077_s18 + $0x4d8] sm:$0xff]  }
0x101b   : > { %v12829_v40 = vld [vmem:[%s16077_s18 + $0x418] sm:$0xff]  }
0x101d   : > { %5344 = vmatpush1.bf16.msra.mxu0 %v10582_v14  ;;  %5385 = vmatpush1.bf16.msra.mxu1 %v10584_v33  ;;  %v12834_v14 = vld [vmem:[%s16077_s18 + $0x490] sm:$0xff]   ;;  %v12835_v33 = vld [vmem:[%s16077_s18 + $0x448] sm:$0xff]  }
0x101e   : > { %5419 = vmatprep.subr.bf16.mxu0 %v10635_v15  ;;  %5460 = vmatprep.subr.bf16.mxu1 %v10637_v59  ;;  %v12836_v15 = vld [vmem:[%s16077_s18 + $0x4c8] sm:$0xff]  }
0x101f   : > { %v12837_v59 = vld [vmem:[%s16077_s18 + $0x408] sm:$0xff]  }
0x1020   : > { %10642 = vmatmul.mubr.msk.bf16.vlgmr.msra.gmra.mxu0 %vm871_vm4, %v14546_v13  ;;  %10643 = vmatmul.mubr.msk.bf16.vlgmr.msra.gmra.mxu1 %vm871_vm4, %v14546_v13 }
0x1021   : > { %5420 = vmatpush1.bf16.msra.mxu0 %v10634_v21  ;;  %5461 = vmatpush1.bf16.msra.mxu1 %v10636_v23  ;;  %v12842_v21 = vld [vmem:[%s16077_s18 + $0x480] sm:$0xff]   ;;  %v12843_v23 = vld [vmem:[%s16077_s18 + $0x578] sm:$0xff]  }
0x1022   : > { %5421 = vmatprep.subr.bf16.mxu0 %v10619_v24  ;;  %5462 = vmatprep.subr.bf16.mxu1 %v10621_v25  ;;  %v12844_v24 = vld [vmem:[%s16077_s18 + $0x5f8] sm:$0xff]   ;;  %v14795_v25 = vld [vmem:[%s16076_s17 + $0x10] sm:$0xff] }
0x1023   : > { %5443 = vmatprep.mubr.bf16.mxu0 %v13220_v17  ;;  %5484 = vmatprep.mubr.bf16.mxu1 %v13220_v17  ;;  %v4765_v26 = vrot.slane %v14795_v25, %v13926_v32  ;;  %v4773_v27 = vrot.slane %v14795_v25, %v13929_v35  ;;  %v4769_v28 = vrot.slane %v14795_v25, %v13937_v37 }
0x1024   : > { %v4777_v30 = vrot.slane %v14795_v25, %v13940_v38 }
0x1025   : > { %5422 = vmatpush1.bf16.msra.mxu0 %v10618_v41  ;;  %5463 = vmatpush1.bf16.msra.mxu1 %v10620_v42 }
0x1026   : > { %5423 = vmatprep.subr.bf16.mxu0 %v10603_v43  ;;  %5464 = vmatprep.subr.bf16.mxu1 %v10605_v45 }
0x1029   : > { %5424 = vmatpush1.bf16.msra.mxu0 %v10602_v49  ;;  %5465 = vmatpush1.bf16.msra.mxu1 %v10604_v50 }
0x102a   : > { %5425 = vmatprep.subr.bf16.mxu0 %v10587_v51  ;;  %5466 = vmatprep.subr.bf16.mxu1 %v10589_v36 }
0x102d   : > { %5426 = vmatpush1.bf16.msra.mxu0 %v10586_v53  ;;  %5467 = vmatpush1.bf16.msra.mxu1 %v10588_v54 }
0x102e   : > { %11895 = vmatprep.subr.bf16.mxu0 %v12811_v55  ;;  %11917 = vmatprep.subr.bf16.mxu1 %v12812_v56 }
0x1030   : > { %10644 = vmatmul.mubr.msk.bf16.vlgmr.msra.gmra.mxu0 %vm871_vm4, %v14546_v13  ;;  %10645 = vmatmul.mubr.msk.bf16.vlgmr.msra.gmra.mxu1 %vm871_vm4, %v14546_v13  ;;  %v12820_v13 = vld [vmem:[%s16077_s18 + $0x4e8] sm:$0xff]  }
0x1031   : > { %11896 = vmatpush3.bf16.msra.mxu0 %v12813_v57  ;;  %11918 = vmatpush3.bf16.msra.mxu1 %v12814_v60 }
0x1032   : > { %11897 = vmatprep.subr.bf16.mxu0 %v12815_v61  ;;  %11919 = vmatprep.subr.bf16.mxu1 %v12816_v62  ;;  %v12845_v61 = vld [vmem:[%s16077_s18 + $0x538] sm:$0xff]  }
0x1033   : > { %v12846_v62 = vld [vmem:[%s16077_s18 + $0x5b8] sm:$0xff]  }
0x1035   : > { %11898 = vmatpush3.bf16.msra.mxu0 %v12817_v63  ;;  %11920 = vmatpush3.bf16.msra.mxu1 %v12818_v1 }
0x1036   : > { %11899 = vmatprep.subr.bf16.mxu0 %v12819_v2  ;;  %11921 = vmatprep.subr.bf16.mxu1 %v12820_v13  ;;  %v12847_v2 = vld [vmem:[%s16077_s18 + $0x570] sm:$0xff]  }
0x1037   : > { %v12848_v13 = vld [vmem:[%s16077_s18 + $0x5f0] sm:$0xff]  }
0x1039   : > { %11900 = vmatpush3.bf16.msra.mxu0 %v12821_v3  ;;  %11922 = vmatpush3.bf16.msra.mxu1 %v12822_v52  ;;  %v12849_v3 = vld [vmem:[%s16077_s18 + $0x530] sm:$0xff]  }
0x103a   : > { %11901 = vmatprep.subr.bf16.mxu0 %v12823_v34  ;;  %11923 = vmatprep.subr.bf16.mxu1 %v12824_v6  ;;  %v12850_v52 = vld [vmem:[%s16077_s18 + $0x5b0] sm:$0xff]   ;;  %v12851_v34 = vld [vmem:[%s16077_s18 + $0x568] sm:$0xff]  }
0x103b   : > { %v12852_v6 = vld [vmem:[%s16077_s18 + $0x5e8] sm:$0xff]  }
0x103d   : > { %11902 = vmatpush3.bf16.msra.mxu0 %v12825_v39  ;;  %11924 = vmatpush3.bf16.msra.mxu1 %v12826_v7  ;;  %v4785_v39 = vrot.slane %v14795_v25, %v13969_v4  ;;  %v4793_v7 = vrot.slane %v14795_v25, %v13972_v5 }
0x103e   : > { %11903 = vmatprep.subr.bf16.mxu0 %v12827_v8  ;;  %11925 = vmatprep.subr.bf16.mxu1 %v12828_v9  ;;  %v12853_v8 = vld [vmem:[%s16077_s18 + $0x528] sm:$0xff]  }
0x103f   : > { %v12854_v9 = vld [vmem:[%s16077_s18 + $0x5a8] sm:$0xff]  }
0x1041   : > { %11904 = vmatpush3.bf16.msra.mxu0 %v12829_v40  ;;  %11926 = vmatpush3.bf16.msra.mxu1 %v12830_v10 }
0x1042   : > { %11905 = vmatprep.subr.bf16.mxu0 %v12831_v11  ;;  %11927 = vmatprep.subr.bf16.mxu1 %v12832_v58  ;;  %v12855_v11 = vld [vmem:[%s16077_s18 + $0x560] sm:$0xff]  }
0x1043   : > { %v12856_v58 = vld [vmem:[%s16077_s18 + $0x5e0] sm:$0xff]  }
0x1045   : > { %11906 = vmatpush3.bf16.msra.mxu0 %v12833_v29  ;;  %11928 = vmatpush3.bf16.msra.mxu1 %v12834_v14 }
0x1046   : > { %11907 = vmatprep.subr.bf16.mxu0 %v12835_v33  ;;  %11929 = vmatprep.subr.bf16.mxu1 %v12836_v15 }
0x1049   : > { %11908 = vmatpush3.bf16.msra.mxu0 %v12837_v59  ;;  %11930 = vmatpush3.bf16.msra.mxu1 %v12838_v16  ;;  %v12857_v59 = vld [vmem:[%s16077_s18 + $0x520] sm:$0xff]  }
0x104a   : > { %11909 = vmatprep.subr.bf16.mxu0 %v12839_v18  ;;  %11931 = vmatprep.subr.bf16.mxu1 %v12840_v19  ;;  %v12858_v16 = vld [vmem:[%s16077_s18 + $0x5a0] sm:$0xff]  }
0x104d   : > { %11910 = vmatpush3.bf16.msra.mxu0 %v12841_v20  ;;  %11932 = vmatpush3.bf16.msra.mxu1 %v12842_v21  ;;  %v12859_v20 = vld [vmem:[%s16077_s18 + $0x558] sm:$0xff]  }
0x104e   : > { %11939 = vmatprep.subr.bf16.mxu0 %v12843_v23  ;;  %11961 = vmatprep.subr.bf16.mxu1 %v12844_v24  ;;  %v12860_v21 = vld [vmem:[%s16077_s18 + $0x5d8] sm:$0xff]  }
0x10c0   : > { %v5199_v41 = vpop.f32.mrf.mxu0  ;;  %v5240_v42 = vpop.f32.mrf.mxu1 }
0x10c1   : > { %v5200_v43 = vadd.f32 %v5199_v41, %v4765_v26  ;;  %v5241_v45 = vadd.f32 %v5240_v42, %v4773_v27  ;;  %v12861_v41 = vld [vmem:[%s16077_s18 + $0x518] sm:$0xff]  }
0x10c2   : > { %v5201_v46 = vpop.f32.mrf.mxu0  ;;  %v5242_v47 = vpop.f32.mrf.mxu1  ;;  %v12862_v42 = vld [vmem:[%s16077_s18 + $0x598] sm:$0xff]  }
0x10c3   : > { %v5202_v31 = vadd.f32 %v5201_v46, %v4769_v28  ;;  %v5243_v48 = vadd.f32 %v5242_v47, %v4777_v30  ;;  %v5493_v49 = vmax.f32 %v5200_v43, 0.0  ;;  %v5495_v50 = vmax.f32 %v5241_v45, 0.0  ;;  %v12863_v43 = vld [vmem:[%s16077_s18 + $0x550] sm:$0xff]  }
0x10c4   : > { %v5203_v51 = vpop.f32.mrf.mxu0  ;;  %v5244_v36 = vpop.f32.mrf.mxu1  ;;  %v12864_v45 = vld [vmem:[%s16077_s18 + $0x5d0] sm:$0xff]  }
0x10c5   : > { %v5494_v53 = vmax.f32 %v5202_v31, 0.0  ;;  %v5496_v54 = vmax.f32 %v5243_v48, 0.0  ;;  %v5509_v63 = vpack.c.bf16 %v5493_v49, %v5493_v49  ;;  %v5511_v1 = vpack.c.bf16 %v5495_v50, %v5495_v50  ;;  %v12865_v46 = vld [vmem:[%s16077_s18 + $0x510] sm:$0xff]   ;;  %v12867_v49 = vld [vmem:[%s16077_s18 + $0x548] sm:$0xff]   ;;  %v14888_v51 = vld [vmem:[%s16076_s17 + $0x18] sm:$0xff] }
0x10c6   : > { %v5204_v55 = vpop.f32.mrf.mxu0  ;;  %v5245_v56 = vpop.f32.mrf.mxu1  ;;  %v12866_v47 = vld [vmem:[%s16077_s18 + $0x590] sm:$0xff]   ;;  %v4781_v31 = vrot.slane %v14795_v25, %v14015_v22  ;;  %v4789_v48 = vrot.slane %v14795_v25, %v14018_v44  ;;  %v12868_v50 = vld [vmem:[%s16077_s18 + $0x5c8] sm:$0xff]   ;;  %v4801_v25 = vrot.slane %v14888_v51, %v13937_v37  ;;  %v4809_v36 = vrot.slane %v14888_v51, %v13940_v38 }
0x10c7   : > { %v5510_v57 = vpack.c.bf16 %v5494_v53, %v5494_v53  ;;  %v5512_v60 = vpack.c.bf16 %v5496_v54, %v5496_v54  ;;  %v12869_v53 = vld [vmem:[%s16077_s18 + $0x508] sm:$0xff]  }
0x10c8   : > { %v12870_v54 = vld [vmem:[%s16077_s18 + $0x588] sm:$0xff]  }
0x10c9   : > { %6590 = vmatprep.mubr.bf16.mxu0 %v5510_v57  ;;  %6630 = vmatprep.mubr.bf16.mxu1 %v5512_v60 }
0x10ca   : > { %6591 = vmatmul.mubr.bf16.vlgmr.msra.gmra.mxu0 %v5509_v63  ;;  %6631 = vmatmul.mubr.bf16.vlgmr.msra.gmra.mxu1 %v5511_v1 }
0x10cb   : > { %11940 = vmatpush3.bf16.msra.mxu0 %v12845_v61  ;;  %11962 = vmatpush3.bf16.msra.mxu1 %v12846_v62  ;;  %v12871_v61 = vld [vmem:[%s16077_s18 + $0x540] sm:$0xff]  }
0x10cc   : > { %11941 = vmatprep.subr.bf16.mxu0 %v12847_v2  ;;  %11963 = vmatprep.subr.bf16.mxu1 %v12848_v13  ;;  %v12872_v62 = vld [vmem:[%s16077_s18 + $0x5c0] sm:$0xff]  }
0x10cf   : > { %11942 = vmatpush3.bf16.msra.mxu0 %v12849_v3  ;;  %11964 = vmatpush3.bf16.msra.mxu1 %v12850_v52  ;;  %v12873_v3 = vld [vmem:[%s16077_s18 + $0x500] sm:$0xff]  }
0x10d0   : > { %v5281_v40 = vpop.f32.mrf.mxu0  ;;  %v5322_v10 = vpop.f32.mrf.mxu1  ;;  %11943 = vmatprep.subr.bf16.mxu0 %v12851_v34  ;;  %11965 = vmatprep.subr.bf16.mxu1 %v12852_v6  ;;  %v12874_v52 = vld [vmem:[%s16077_s18 + $0x580] sm:$0xff]  }
0x10d1   : > { %v5282_v55 = vadd.f32 %v5281_v40, %v4781_v31  ;;  %v5323_v56 = vadd.f32 %v5322_v10, %v4789_v48  ;;  %v12890_v48 = vld [vmem:[%s16077_s18 + $0x6a0] sm:$0xff]  }
0x10d2   : > { %v5283_v29 = vpop.f32.mrf.mxu0  ;;  %v5324_v14 = vpop.f32.mrf.mxu1 }
0x10d3   : > { %v5284_v33 = vadd.f32 %v5283_v29, %v4785_v39  ;;  %v5325_v15 = vadd.f32 %v5324_v14, %v4793_v7  ;;  %11944 = vmatpush3.bf16.msra.mxu0 %v12853_v8  ;;  %11966 = vmatpush3.bf16.msra.mxu1 %v12854_v9  ;;  %v5497_v34 = vmax.f32 %v5282_v55, 0.0  ;;  %v5499_v6 = vmax.f32 %v5323_v56, 0.0  ;;  %v12875_v8 = vld [vmem:[%s16077_s18 + $0x678] sm:$0xff]   ;;  %v12895_v55 = vld [vmem:[%s16077_s18 + $0x650] sm:$0xff]  }
0x10d4   : > { %v5285_v18 = vpop.f32.mrf.mxu0  ;;  %v5326_v19 = vpop.f32.mrf.mxu1  ;;  %11945 = vmatprep.subr.bf16.mxu0 %v12855_v11  ;;  %11967 = vmatprep.subr.bf16.mxu1 %v12856_v58  ;;  %v12876_v9 = vld [vmem:[%s16077_s18 + $0x6f8] sm:$0xff]   ;;  %v12896_v56 = vld [vmem:[%s16077_s18 + $0x6d0] sm:$0xff]  }
0x10d5   : > { %v5498_v23 = vmax.f32 %v5284_v33, 0.0  ;;  %v5500_v24 = vmax.f32 %v5325_v15, 0.0  ;;  %v12877_v29 = vld [vmem:[%s16077_s18 + $0x638] sm:$0xff]   ;;  %v5513_v14 = vpack.c.bf16 %v5497_v34, %v5497_v34  ;;  %v5515_v33 = vpack.c.bf16 %v5499_v6, %v5499_v6  ;;  %v12880_v18 = vld [vmem:[%s16077_s18 + $0x6f0] sm:$0xff]   ;;  %v12901_v34 = vld [vmem:[%s16077_s18 + $0x608] sm:$0xff]  }
0x10d6   : > { %v5286_v26 = vpop.f32.mrf.mxu0  ;;  %v5327_v27 = vpop.f32.mrf.mxu1  ;;  %v12878_v15 = vld [vmem:[%s16077_s18 + $0x6b8] sm:$0xff]  }
0x10d7   : > { %v5514_v28 = vpack.c.bf16 %v5498_v23, %v5498_v23  ;;  %v5516_v30 = vpack.c.bf16 %v5500_v24, %v5500_v24  ;;  %11946 = vmatpush3.bf16.msra.mxu0 %v12857_v59  ;;  %11968 = vmatpush3.bf16.msra.mxu1 %v12858_v16  ;;  %v12879_v16 = vld [vmem:[%s16077_s18 + $0x670] sm:$0xff]   ;;  %v12883_v23 = vld [vmem:[%s16077_s18 + $0x668] sm:$0xff]  }
0x10d8   : > { %11947 = vmatprep.subr.bf16.mxu0 %v12859_v20  ;;  %11969 = vmatprep.subr.bf16.mxu1 %v12860_v21  ;;  %v12881_v20 = vld [vmem:[%s16077_s18 + $0x630] sm:$0xff]   ;;  %v12884_v24 = vld [vmem:[%s16077_s18 + $0x6e8] sm:$0xff]  }
0x10d9   : > { %6670 = vmatprep.mubr.bf16.mxu0 %v5514_v28  ;;  %6710 = vmatprep.mubr.bf16.mxu1 %v5516_v30  ;;  %v12882_v21 = vld [vmem:[%s16077_s18 + $0x6b0] sm:$0xff]   ;;  %v12885_v26 = vld [vmem:[%s16077_s18 + $0x628] sm:$0xff]  }
0x10da   : > { %v12886_v30 = vld [vmem:[%s16077_s18 + $0x6a8] sm:$0xff]  }
0x10db   : > { %11948 = vmatpush3.bf16.msra.mxu0 %v12861_v41  ;;  %11970 = vmatpush3.bf16.msra.mxu1 %v12862_v42  ;;  %v12887_v41 = vld [vmem:[%s16077_s18 + $0x660] sm:$0xff]  }
0x10dc   : > { %11949 = vmatprep.subr.bf16.mxu0 %v12863_v43  ;;  %11971 = vmatprep.subr.bf16.mxu1 %v12864_v45  ;;  %v12888_v42 = vld [vmem:[%s16077_s18 + $0x6e0] sm:$0xff]  }
0x10df   : > { %11950 = vmatpush3.bf16.msra.mxu0 %v12865_v46  ;;  %11972 = vmatpush3.bf16.msra.mxu1 %v12866_v47  ;;  %v12889_v46 = vld [vmem:[%s16077_s18 + $0x620] sm:$0xff]  }
0x10e0   : > { %v14900_v57 = vpop.f32.mrf.mxu0  ;;  %v14902_v60 = vpop.f32.mrf.mxu1  ;;  %11951 = vmatprep.subr.bf16.mxu0 %v12867_v49  ;;  %11973 = vmatprep.subr.bf16.mxu1 %v12868_v50  ;;  %v12891_v49 = vld [vmem:[%s16077_s18 + $0x658] sm:$0xff]  }
0x10e1   : > { %v12892_v50 = vld [vmem:[%s16077_s18 + $0x6d8] sm:$0xff]  }
0x10e2   : > { %v5365_v63 = vpop.f32.mrf.mxu0  ;;  %v5406_v1 = vpop.f32.mrf.mxu1 }
0x10e3   : > { %v5366_v2 = vadd.f32 %v5365_v63, %v4801_v25  ;;  %v5407_v13 = vadd.f32 %v5406_v1, %v4809_v36  ;;  %11952 = vmatpush3.bf16.msra.mxu0 %v12869_v53  ;;  %11974 = vmatpush3.bf16.msra.mxu1 %v12870_v54  ;;  %v12893_v53 = vld [vmem:[%s16077_s18 + $0x618] sm:$0xff]   ;;  %v12898_v63 = vld [vmem:[%s16077_s18 + $0x690] sm:$0xff]   ;;  %v12899_v1 = vld [vmem:[%s16077_s18 + $0x648] sm:$0xff]  }
0x10e4   : > { %v5367_v39 = vpop.f32.mrf.mxu0  ;;  %v5408_v7 = vpop.f32.mrf.mxu1  ;;  %11953 = vmatprep.subr.bf16.mxu0 %v12871_v61  ;;  %11975 = vmatprep.subr.bf16.mxu1 %v12872_v62  ;;  %v12894_v54 = vld [vmem:[%s16077_s18 + $0x698] sm:$0xff]   ;;  %v12897_v61 = vld [vmem:[%s16077_s18 + $0x610] sm:$0xff]   ;;  %v4797_v62 = vrot.slane %v14888_v51, %v13926_v32 }
0x10e5   : > { %v5502_v40 = vmax.f32 %v5366_v2, 0.0  ;;  %v5504_v10 = vmax.f32 %v5407_v13, 0.0  ;;  %v4805_v2 = vrot.slane %v14888_v51, %v13929_v35  ;;  %v12900_v13 = vld [vmem:[%s16077_s18 + $0x6c8] sm:$0xff]   ;;  %v12903_v7 = vld [vmem:[%s16077_s18 + $0x640] sm:$0xff]  }
0x10e6   : > { %v5368_v11 = vpop.f32.mrf.mxu0  ;;  %v5409_v58 = vpop.f32.mrf.mxu1  ;;  %v5364_v6 = vadd.f32 %v14900_v57, %v4797_v62  ;;  %v12902_v39 = vld [vmem:[%s16077_s18 + $0x688] sm:$0xff]   ;;  %v12905_v57 = vld [vmem:[%s16077_s18 + $0x600] sm:$0xff]  }
0x10e7   : > { %11954 = vmatpush3.bf16.msra.mxu0 %v12873_v3  ;;  %11976 = vmatpush3.bf16.msra.mxu1 %v12874_v52  ;;  %v5518_v59 = vpack.c.bf16 %v5502_v40, %v5502_v40  ;;  %v5520_v19 = vpack.c.bf16 %v5504_v10, %v5504_v10  ;;  %v4817_v3 = vrot.slane %v14888_v51, %v13969_v4  ;;  %v12906_v58 = vld [vmem:[%s16077_s18 + $0x680] sm:$0xff]   ;;  %v12931_v62 = vld [vmem:[%s16077_s18 + $0x748] sm:$0xff]  }
0x10e8   : > { %11983 = vmatprep.subr.bf16.mxu0 %v12875_v8  ;;  %12005 = vmatprep.subr.bf16.mxu1 %v12876_v9  ;;  %v4825_v52 = vrot.slane %v14888_v51, %v13972_v5  ;;  %v5405_v8 = vadd.f32 %v14902_v60, %v4805_v2  ;;  %v12904_v9 = vld [vmem:[%s16077_s18 + $0x6c0] sm:$0xff]   ;;  %v5501_v11 = vmax.f32 %v5364_v6, 0.0  ;;  %v12907_v60 = vld [vmem:[%s16077_s18 + $0x778] sm:$0xff]   ;;  %v12933_v2 = vld [vmem:[%s16077_s18 + $0x708] sm:$0xff]  }
0x10ea   : > { %6671 = vmatmul.mubr.bf16.vlgmr.msra.gmra.mxu0 %v5513_v14  ;;  %6711 = vmatmul.mubr.bf16.vlgmr.msra.gmra.mxu1 %v5515_v33  ;;  %v12908_v14 = vld [vmem:[%s16077_s18 + $0x7f8] sm:$0xff]  }
0x10eb   : > { %11984 = vmatpush3.bf16.msra.mxu0 %v12877_v29  ;;  %6750 = vmatprep.mubr.bf16.mxu0 %v5518_v59  ;;  %v5503_v29 = vmax.f32 %v5405_v8, 0.0  ;;  %v12909_v59 = vld [vmem:[%s16077_s18 + $0x738] sm:$0xff]  }
0x10ec   : > { %12006 = vmatpush3.bf16.msra.mxu1 %v12878_v15  ;;  %6790 = vmatprep.mubr.bf16.mxu1 %v5520_v19 }
0x10ed   : > { %11985 = vmatprep.subr.bf16.mxu0 %v12879_v16  ;;  %12007 = vmatprep.subr.bf16.mxu1 %v12880_v18  ;;  %v5517_v16 = vpack.c.bf16 %v5501_v11, %v5501_v11  ;;  %v12910_v18 = vld [vmem:[%s16077_s18 + $0x7b8] sm:$0xff]   ;;  %v5519_v19 = vpack.c.bf16 %v5503_v29, %v5503_v29 }
0x10ef   : > { %11986 = vmatpush3.bf16.msra.mxu0 %v12881_v20  ;;  %v12911_v20 = vld [vmem:[%s16077_s18 + $0x770] sm:$0xff]  }
0x10f0   : > { %12008 = vmatpush3.bf16.msra.mxu1 %v12882_v21  ;;  %v14949_v27 = vpop.f32.mrf.mxu0  ;;  %v14951_v28 = vpop.f32.mrf.mxu1  ;;  %11987 = vmatprep.subr.bf16.mxu0 %v12883_v23  ;;  %v12912_v23 = vld [vmem:[%s16077_s18 + $0x7f0] sm:$0xff]  }
0x10f1   : > { %12009 = vmatprep.subr.bf16.mxu1 %v12884_v24 }
0x10f2   : > { %v5447_v43 = vpop.f32.mrf.mxu0  ;;  %v5488_v45 = vpop.f32.mrf.mxu1 }
0x10f3   : > { %11988 = vmatpush3.bf16.msra.mxu0 %v12885_v26  ;;  %v5448_v40 = vadd.f32 %v5447_v43, %v4817_v3  ;;  %v5489_v10 = vadd.f32 %v5488_v45, %v4825_v52  ;;  %v12913_v26 = vld [vmem:[%s16077_s18 + $0x730] sm:$0xff]   ;;  %v12917_v43 = vld [vmem:[%s16077_s18 + $0x728] sm:$0xff]  }
0x10f4   : > { %12010 = vmatpush3.bf16.msra.mxu1 %v12886_v30  ;;  %v5449_v47 = vpop.f32.mrf.mxu0  ;;  %v5490_v31 = vpop.f32.mrf.mxu1  ;;  %11989 = vmatprep.subr.bf16.mxu0 %v12887_v41  ;;  %v12914_v30 = vld [vmem:[%s16077_s18 + $0x7b0] sm:$0xff]   ;;  %v12915_v41 = vld [vmem:[%s16077_s18 + $0x768] sm:$0xff]  }
0x10f5   : > { %12011 = vmatprep.subr.bf16.mxu1 %v12888_v42  ;;  %v5506_v33 = vmax.f32 %v5448_v40, 0.0  ;;  %v5508_v15 = vmax.f32 %v5489_v10, 0.0  ;;  %v12916_v42 = vld [vmem:[%s16077_s18 + $0x7e8] sm:$0xff]   ;;  %v12920_v47 = vld [vmem:[%s16077_s18 + $0x7e0] sm:$0xff]  }
0x10f6   : > { %v5450_v25 = vpop.f32.mrf.mxu0  ;;  %v5491_v36 = vpop.f32.mrf.mxu1  ;;  %v12918_v45 = vld [vmem:[%s16077_s18 + $0x7a8] sm:$0xff]   ;;  %v12921_v31 = vld [vmem:[%s16077_s18 + $0x720] sm:$0xff]  }
0x10f7   : > { %11990 = vmatpush3.bf16.msra.mxu0 %v12889_v46  ;;  %v5522_v21 = vpack.c.bf16 %v5506_v33, %v5506_v33  ;;  %v5524_v24 = vpack.c.bf16 %v5508_v15, %v5508_v15  ;;  %v12919_v46 = vld [vmem:[%s16077_s18 + $0x760] sm:$0xff]   ;;  %v12925_v25 = vld [vmem:[%s16077_s18 + $0x718] sm:$0xff]   ;;  %v12934_v3 = vld [vmem:[%s16077_s18 + $0x788] sm:$0xff]  }
0x10f8   : > { %12012 = vmatpush3.bf16.msra.mxu1 %v12890_v48  ;;  %11991 = vmatprep.subr.bf16.mxu0 %v12891_v49  ;;  %v12922_v48 = vld [vmem:[%s16077_s18 + $0x7a0] sm:$0xff]   ;;  %v12923_v49 = vld [vmem:[%s16077_s18 + $0x758] sm:$0xff]  }
0x10f9   : > { %12013 = vmatprep.subr.bf16.mxu1 %v12892_v50  ;;  %v12924_v50 = vld [vmem:[%s16077_s18 + $0x7d8] sm:$0xff]   ;;  %v10903_v10 = vld [vmem:[%s16078_s19 + $0x1] ss:$0 sm:$0xff] }
0x10fa   : > { %v12926_v36 = vld [vmem:[%s16077_s18 + $0x798] sm:$0xff]  }
0x10fb   : > { %11992 = vmatpush3.bf16.msra.mxu0 %v12893_v53  ;;  %v12927_v53 = vld [vmem:[%s16077_s18 + $0x750] sm:$0xff]  }
0x10fc   : > { %12014 = vmatpush3.bf16.msra.mxu1 %v12894_v54  ;;  %11993 = vmatprep.subr.bf16.mxu0 %v12895_v55  ;;  %v12928_v54 = vld [vmem:[%s16077_s18 + $0x7d0] sm:$0xff]  }
0x10fd   : > { %12015 = vmatprep.subr.bf16.mxu1 %v12896_v56  ;;  %v12929_v55 = vld [vmem:[%s16077_s18 + $0x710] sm:$0xff]   ;;  %v4813_v56 = vrot.slane %v14888_v51, %v14015_v22 }
0x10ff   : > { %11994 = vmatpush3.bf16.msra.mxu0 %v12897_v61  ;;  %v12930_v61 = vld [vmem:[%s16077_s18 + $0x790] sm:$0xff]  }
0x1100   : > { %12016 = vmatpush3.bf16.msra.mxu1 %v12898_v63  ;;  %11995 = vmatprep.subr.bf16.mxu0 %v12899_v1  ;;  %v4821_v63 = vrot.slane %v14888_v51, %v14018_v44  ;;  %v12932_v1 = vld [vmem:[%s16077_s18 + $0x7c8] sm:$0xff]   ;;  %v12935_v51 = vld [vmem:[%s16077_s18 + $0x740] sm:$0xff]  }
0x1101   : > { %12017 = vmatprep.subr.bf16.mxu1 %v12900_v13  ;;  %v5446_v13 = vadd.f32 %v14949_v27, %v4813_v56  ;;  %v12937_v27 = vld [vmem:[%s16077_s18 + $0x700] sm:$0xff]  }
0x1102   : > { %v5487_v52 = vadd.f32 %v14951_v28, %v4821_v63 }
0x1103   : > { %11996 = vmatpush3.bf16.msra.mxu0 %v12901_v34  ;;  %v12936_v34 = vld [vmem:[%s16077_s18 + $0x7c0] sm:$0xff]   ;;  %v5505_v6 = vmax.f32 %v5446_v13, 0.0 }
0x1104   : > { %12018 = vmatpush3.bf16.msra.mxu1 %v12902_v39  ;;  %11997 = vmatprep.subr.bf16.mxu0 %v12903_v7  ;;  %v12938_v39 = vld [vmem:[%s16077_s18 + $0x780] sm:$0xff]   ;;  %v5507_v7 = vmax.f32 %v5487_v52, 0.0 }
0x1105   : > { %12019 = vmatprep.subr.bf16.mxu1 %v12904_v9  ;;  %v5521_v28 = vpack.c.bf16 %v5505_v6, %v5505_v6 }
0x1106   : > { %v5523_v8 = vpack.c.bf16 %v5507_v7, %v5507_v7 }
0x1107   : > { %11998 = vmatpush3.bf16.msra.mxu0 %v12905_v57 }
0x1108   : > { %12020 = vmatpush3.bf16.msra.mxu1 %v12906_v58  ;;  %12027 = vmatprep.subr.bf16.mxu0 %v12907_v60 }
0x1109   : > { %12049 = vmatprep.subr.bf16.mxu1 %v12908_v14 }
0x110a   : > { %6751 = vmatmul.mubr.bf16.vlgmr.msra.gmra.mxu0 %v5517_v16 }
0x110b   : > { %6791 = vmatmul.mubr.bf16.vlgmr.msra.gmra.mxu1 %v5519_v19  ;;  %12028 = vmatpush3.bf16.msra.mxu0 %v12909_v59 }
0x110c   : > { %6830 = vmatprep.mubr.bf16.mxu0 %v5522_v21  ;;  %12050 = vmatpush3.bf16.msra.mxu1 %v12910_v18 }
0x110d   : > { %6870 = vmatprep.mubr.bf16.mxu1 %v5524_v24  ;;  %12029 = vmatprep.subr.bf16.mxu0 %v12911_v20 }
0x110e   : > { %12051 = vmatprep.subr.bf16.mxu1 %v12912_v23 }
0x110f   : > { %12030 = vmatpush3.bf16.msra.mxu0 %v12913_v26 }
0x1110   : > { %12052 = vmatpush3.bf16.msra.mxu1 %v12914_v30  ;;  %12031 = vmatprep.subr.bf16.mxu0 %v12915_v41 }
0x1111   : > { %12053 = vmatprep.subr.bf16.mxu1 %v12916_v42 }
0x1113   : > { %12032 = vmatpush3.bf16.msra.mxu0 %v12917_v43 }
0x1114   : > { %12054 = vmatpush3.bf16.msra.mxu1 %v12918_v45  ;;  %12033 = vmatprep.subr.bf16.mxu0 %v12919_v46 }
0x1115   : > { %12055 = vmatprep.subr.bf16.mxu1 %v12920_v47 }
0x1117   : > { %12034 = vmatpush3.bf16.msra.mxu0 %v12921_v31 }
0x1118   : > { %12056 = vmatpush3.bf16.msra.mxu1 %v12922_v48  ;;  %12035 = vmatprep.subr.bf16.mxu0 %v12923_v49 }
0x1119   : > { %12057 = vmatprep.subr.bf16.mxu1 %v12924_v50 }
0x111b   : > { %12036 = vmatpush3.bf16.msra.mxu0 %v12925_v25 }
0x111c   : > { %12058 = vmatpush3.bf16.msra.mxu1 %v12926_v36  ;;  %12037 = vmatprep.subr.bf16.mxu0 %v12927_v53 }
0x111d   : > { %12059 = vmatprep.subr.bf16.mxu1 %v12928_v54 }
0x111f   : > { %12038 = vmatpush3.bf16.msra.mxu0 %v12929_v55 }
0x1120   : > { %12060 = vmatpush3.bf16.msra.mxu1 %v12930_v61  ;;  %12039 = vmatprep.subr.bf16.mxu0 %v12931_v62 }
0x1121   : > { %12061 = vmatprep.subr.bf16.mxu1 %v12932_v1 }
0x1123   : > { %12040 = vmatpush3.bf16.msra.mxu0 %v12933_v2 }
0x1124   : > { %12062 = vmatpush3.bf16.msra.mxu1 %v12934_v3  ;;  %12041 = vmatprep.subr.bf16.mxu0 %v12935_v51 }
0x1125   : > { %12063 = vmatprep.subr.bf16.mxu1 %v12936_v34 }
0x1127   : > { %12042 = vmatpush3.bf16.msra.mxu0 %v12937_v27 }
0x1128   : > { %12064 = vmatpush3.bf16.msra.mxu1 %v12938_v39  ;;  %12488 = vmatprep.subr.bf16.mxu0 %v13211_v0 }
0x1129   : > { %12500 = vmatprep.subr.bf16.mxu1 %v13211_v0 }
0x112a   : > { %6831 = vmatmul.mubr.bf16.vlgmr.msra.gmra.mxu0 %v5521_v28 }
0x112b   : > { %6871 = vmatmul.mubr.bf16.vlgmr.msra.gmra.mxu1 %v5523_v8  ;;  %12496 = vmatprep.mubr.msk.bf16.mxu0 %vm13213_vm2, %v13211_v0 }
0x112c   : > { %12508 = vmatprep.mubr.msk.bf16.mxu1 %vm13213_vm2, %v13211_v0 }
0x118a   : > { %v11911_v9 = vpop.f32.mrf.mxu0  ;;  %v11933_v40 = vpop.f32.mrf.mxu1 }
0x118c   : > { %v11912_v57 = vpop.f32.mrf.mxu0  ;;  %v11934_v11 = vpop.f32.mrf.mxu1 }
0x118d   : > { %v11913_v58 = vadd.f32 %v11912_v57, %v11911_v9  ;;  %v11935_v60 = vadd.f32 %v11934_v11, %v11933_v40  ;;  %v12939_v57 = vld [vmem:[%s16138_s8 + $0x58] sm:$0xff]  }
0x118e   : > { %v11914_v29 = vpop.f32.mrf.mxu0  ;;  %v11936_v14 = vpop.f32.mrf.mxu1  ;;  %v12940_v11 = vld [vmem:[%s16141_s24 + $0x58] sm:$0xff]   ;;  %12489 = vmatpush3.bf16.msra.mxu0 %v12939_v57 }
0x118f   : > { %v6593_v33 = vadd.f32 %v11913_v58, %v10903_v10  ;;  %12501 = vmatpush3.bf16.msra.mxu1 %v12940_v11  ;;  %12490 = vmatprep.subr.bf16.mxu0 %v13211_v0  ;;  %v12942_v58 = vld [vmem:[%s16141_s24 + $0x50] sm:$0xff]   ;;  %v12944_v29 = vld [vmem:[%s16141_s24 + $0x48] sm:$0xff]   ;;  %v12945_v14 = vld [vmem:[%s16138_s8 + $0x40] sm:$0xff]  }
0x1190   : > { %v11915_v15 = vpop.f32.mrf.mxu0  ;;  %v11937_v59 = vpop.f32.mrf.mxu1  ;;  %12502 = vmatprep.subr.bf16.mxu1 %v13211_v0 }
0x1191   : > { %v6633_v16 = vadd.f32 %v11935_v60, %v6593_v33  ;;  %v12943_v60 = vld [vmem:[%s16138_s8 + $0x48] sm:$0xff]   ;;  %v12946_v33 = vld [vmem:[%s16141_s24 + $0x40] sm:$0xff]  }
0x1193   : > { %12503 = vmatpush3.bf16.msra.mxu1 %v12942_v58 }
0x1194   : > { %12504 = vmatprep.subr.bf16.mxu1 %v13211_v0 }
0x1197   : > { %12505 = vmatpush3.bf16.msra.mxu1 %v12944_v29 }
0x1198   : > { %12506 = vmatprep.subr.bf16.mxu1 %v13211_v0 }
0x119b   : > { %12507 = vmatpush3.bf16.msra.mxu1 %v12946_v33 }
0x119c   : > { %12524 = vmatprep.subr.bf16.mxu1 %v13211_v0 }
0x11aa   : > { %v11955_v18 = vpop.f32.mrf.mxu0  ;;  %v11977_v19 = vpop.f32.mrf.mxu1 }
0x11ac   : > { %v11956_v20 = vpop.f32.mrf.mxu0  ;;  %v11978_v21 = vpop.f32.mrf.mxu1 }
0x11ad   : > { %v11957_v49 = vadd.f32 %v11956_v20, %v11955_v18  ;;  %v11979_v25 = vadd.f32 %v11978_v21, %v11977_v19  ;;  %v11034_v19 = vld [vmem:[%s16079_s20 + $0x1] ss:$0 sm:$0xff] }
0x11ae   : > { %v11958_v23 = vpop.f32.mrf.mxu0  ;;  %v11980_v24 = vpop.f32.mrf.mxu1  ;;  %v11035_v21 = vld [vmem:[%s16080_s21 + $0x1] ss:$0 sm:$0xff] }
0x11af   : > { %v6673_v50 = vadd.f32 %v11957_v49, %v6633_v16 }
0x11b0   : > { %v11959_v26 = vpop.f32.mrf.mxu0  ;;  %v11981_v30 = vpop.f32.mrf.mxu1 }
0x11b1   : > { %v6713_v53 = vadd.f32 %v11979_v25, %v6673_v50  ;;  %v12947_v26 = vld [vmem:[%s16069_s10 + $0x58] sm:$0xff]  }
0x11ca   : > { %v11999_v41 = vpop.f32.mrf.mxu0 }
0x11cb   : > { %v12021_v42 = vpop.f32.mrf.mxu1 }
0x11cc   : > { %v12000_v43 = vpop.f32.mrf.mxu0 }
0x11cd   : > { %v12022_v45 = vpop.f32.mrf.mxu1  ;;  %v12001_v36 = vadd.f32 %v12000_v43, %v11999_v41  ;;  %v12948_v41 = vld [vmem:[%s16069_s10 + $0x50] sm:$0xff]   ;;  %v12950_v43 = vld [vmem:[%s16069_s10 + $0x40] sm:$0xff]  }
0x11ce   : > { %v12002_v46 = vpop.f32.mrf.mxu0  ;;  %v12023_v56 = vadd.f32 %v12022_v45, %v12021_v42  ;;  %v12949_v42 = vld [vmem:[%s16069_s10 + $0x48] sm:$0xff]   ;;  %v11045_v45 = vld [vmem:[%s16144_s30 + $0x2] ss:$0 sm:$0xff] }
0x11cf   : > { %v12024_v47 = vpop.f32.mrf.mxu1  ;;  %v6753_v54 = vadd.f32 %v12001_v36, %v6713_v53  ;;  %v11060_v46 = vld [vmem:[%s16068_s9 + $0x2] ss:$0 sm:$0xff] }
0x11d0   : > { %v12003_v31 = vpop.f32.mrf.mxu0 }
0x11d1   : > { %v12025_v48 = vpop.f32.mrf.mxu1  ;;  %v6793_v63 = vadd.f32 %v12023_v56, %v6753_v54 }
0x11ea   : > { %v12043_v55 = vpop.f32.mrf.mxu0 }
0x11eb   : > { %v12065_v61 = vpop.f32.mrf.mxu1 }
0x11ec   : > { %v12044_v62 = vpop.f32.mrf.mxu0 }
0x11ed   : > { %v12045_v1 = vadd.f32 %v12044_v62, %v12043_v55  ;;  %v12066_v2 = vpop.f32.mrf.mxu1 }
0x11ee   : > { %v12046_v13 = vpop.f32.mrf.mxu0  ;;  %v12067_v51 = vadd.f32 %v12066_v2, %v12065_v61 }
0x11ef   : > { %v6833_v3 = vadd.f32 %v12045_v1, %v6793_v63  ;;  %v12068_v52 = vpop.f32.mrf.mxu1  ;;  %v11075_v1 = vld [vmem:[%s16070_s11 + $0x2] ss:$0 sm:$0xff] }
0x11f0   : > { %v12047_v34 = vpop.f32.mrf.mxu0 }
0x11f1   : > { %v6873_v27 = vadd.f32 %v12067_v51, %v6833_v3  ;;  %v12069_v6 = vpop.f32.mrf.mxu1 }
0x11f3   : > { %v6878_v39 = vadd.f32 %v6873_v27, %v14542_v12  ;;  %v12941_v12 = vld [vmem:[%s16138_s8 + $0x50] sm:$0xff]  }
0x11f4   : > { %12491 = vmatpush3.bf16.msra.mxu0 %v12941_v12  ;;  %v13148_v12 = vld [vmem:[%s13527_s7] ss:$0 sm:$0xff]  ;;  %s16157_s7 = sld [smem:[#allocation7_spill]] }
0x11f5   : > { %v6883_v7 = vsel %vm871_vm4, %v6878_v39, 0.0  ;;  %12492 = vmatprep.subr.bf16.mxu0 %v13211_v0 }
0x11f6   : > { %6884 = vadd.xlane.f32.xlu0 %v6883_v7 }
0x11f8   : > { %12493 = vmatpush3.bf16.msra.mxu0 %v12943_v60 }
0x11f9   : > { %12494 = vmatprep.subr.bf16.mxu0 %v13211_v0 }
0x11fa   : > { %s748_s26 = sand.u32 1, %s16157_s7  }
0x11fb   : > { %s10105_s7 = scalar_lea.sflag [#allocation4], %s748_s26 }
0x11fc   : > { %12495 = vmatpush3.bf16.msra.mxu0 %v12945_v14 }
0x11fd   : > { %12512 = vmatprep.subr.bf16.mxu0 %v13211_v0 }
0x127f   : > { %v6885_v28 = vpop.xlane.xlu0 %6884 }
0x1280   : > { %v6886_v8 = vmul.f32 0.015625, %v6885_v28 }
0x1282   : > { %v6887_v9 = vsub.f32 %v6878_v39, %v6886_v8 }
0x1284   : > { %v6888_v40 = vmul.f32 %v6887_v9, %v6887_v9 }
0x1286   : > { %v6889_v10 = vsel %vm871_vm4, %v6888_v40, 0.0 }
0x1287   : > { %6890 = vadd.xlane.f32.xlu0 %v6889_v10 }
0x1310   : > { %v6891_v15 = vpop.xlane.xlu0 %6890 }
0x1311   : > { %v6892_v59 = vmul.f32 0.015625, %v6891_v15 }
0x1313   : > { %v6893_v16 = vadd.f32 1e-05, %v6892_v59 }
0x1315   : > { %13125 = vrsqrt.f32 %v6893_v16 }
0x1322   : > { %v13126_v18 = vpop.eup %13125 }
0x1323   : > { %v6895_v20 = vmul.f32 %v13126_v18, %v6887_v9 }
0x1325   : > { %v6902_v23 = vmul.f32 %v11034_v19, %v6895_v20 }
0x1327   : > { %v15178_v24 = vadd.f32 %v11035_v21, %v6902_v23 }
0x1329   : > { %v6910_v30 = vpack.c.bf16 %v15178_v24, %v15178_v24 }
0x132b   : > { %12497 = vmatmul.mubr.msk.bf16.vlgmr.msra.gmra.mxu0 %vm871_vm4, %v6910_v30  ;;  %12509 = vmatmul.mubr.msk.bf16.vlgmr.msra.gmra.mxu1 %vm871_vm4, %v6910_v30 }
0x132c   : > { %12513 = vmatpush3.bf16.msra.mxu0 %v12947_v26  ;;  %12520 = vmatprep.mubr.msk.bf16.mxu0 %vm13213_vm2, %v13211_v0 }
0x132d   : > { %12514 = vmatprep.subr.bf16.mxu0 %v13211_v0  ;;  %12526 = vmatprep.mubr.msk.bf16.mxu1 %vm13213_vm2, %v13211_v0 }
0x1330   : > { %12515 = vmatpush3.bf16.msra.mxu0 %v12948_v41 }
0x1331   : > { %12516 = vmatprep.subr.bf16.mxu0 %v13211_v0 }
0x1334   : > { %12517 = vmatpush3.bf16.msra.mxu0 %v12949_v42 }
0x1335   : > { %12518 = vmatprep.subr.bf16.mxu0 %v13211_v0 }
0x1338   : > { %12519 = vmatpush3.bf16.msra.mxu0 %v12950_v43 }
0x1339   : > { %12530 = vmatprep.subr.bf16.mxu0 %v13211_v0 }
0x133b   : > { %12521 = vmatmul.mubr.msk.bf16.vlgmr.msra.gmra.mxu0 %vm871_vm4, %v6910_v30 }
0x133c   : > { %12532 = vmatprep.mubr.msk.bf16.mxu0 %vm13213_vm2, %v13211_v0 }
0x13eb   : > { %v6989_v47 = vpop.f32.mrf.mxu0  ;;  %v7071_v31 = vpop.f32.mrf.mxu1 }
0x13ec   : > { %v6990_v48 = vadd.f32 %v11045_v45, %v6989_v47  ;;  %v7072_v49 = vadd.f32 %v11060_v46, %v7071_v31 }
0x13ed   : > { %v12498_v50 = vpop.f32.mrf.mxu0  ;;  %v12510_v25 = vpop.f32.mrf.mxu1 }
0x13ee   : > { %v6995_v36 = vmul.f32 0.25, %v6990_v48  ;;  %v7159_v53 = vpack.c.bf16 %v7072_v49, %v7072_v49 }
0x13ef   : > { %v6992_v54 = vpop.f32.mrf.mxu0  ;;  %v7074_v55 = vpop.f32.mrf.mxu1 }
0x13f0   : > { %v7158_v56 = vpack.c.bf16 %v6995_v36, %v6995_v36  ;;  %7270 = vrot.lane.b32.xlu1 %v7159_v53, %s16147_s5  ;;  %v7165_v61 = vsel %vm1083_vm5, %v7159_v53, 0 }
0x13f1   : > { %v12499_v62 = vpop.f32.mrf.mxu0  ;;  %v12511_v63 = vpop.f32.mrf.mxu1  ;;  %12525 = vmatpush3.bf16.xpose.msra.mxu1 %v7165_v61 }
0x13f2   : > { %7267 = vrot.lane.b32.xlu0 %v7158_v56, %s16147_s5  ;;  %12536 = vmatprep.subr.bf16.mxu1 %v13211_v0 }
0x13f4   : > { %7386 = vrot.lane.b32.xlu1 %v7159_v53, %s16148_s27 }
0x13f6   : > { %7501 = vrot.lane.b32.xlu0 %v7159_v53, %s16149_s28 }
0x13f8   : > { %7384 = vrot.lane.b32.xlu1 %v7158_v56, %s16148_s27  ;;  %12527 = vmatmul.mubr.msk.bf16.vlgmr.msra.gmra.mxu1 %vm1083_vm5, %v7158_v56 }
0x13f9   : > { %12538 = vmatprep.mubr.msk.bf16.mxu1 %vm13213_vm2, %v13211_v0 }
0x13fb   : > { %v7152_v2 = vpop.f32.mrf.mxu0 }
0x13fc   : > { %v7153_v13 = vadd.f32 %v11075_v1, %v7152_v2  ;;  %7499 = vrot.lane.b32.xlu1 %v7158_v56, %s16149_s28 }
0x13fd   : > { %v12522_v3 = vpop.f32.mrf.mxu0 }
0x13fe   : > { %v7160_v51 = vpack.c.bf16 %v7153_v13, %v7153_v13 }
0x13ff   : > { %v7155_v52 = vpop.f32.mrf.mxu0 }
0x1400   : > { %v7221_v34 = vsel %vm782_vm0, %v7160_v51, 0 }
0x1401   : > { %v12523_v27 = vpop.f32.mrf.mxu0  ;;  %12531 = vmatpush3.bf16.msra.mxu0 %v7221_v34 }
0x1402   : > { %12542 = vmatprep.subr.bf16.mxu0 %v13211_v0 }
0x1462   : > { %v7271_v6 = vpop.permute.xlu1 %7270 }
0x1463   : > { %v7276_v39 = vsel %vm1083_vm5, %v7271_v6, 0 }
0x1464   : > { %12537 = vmatpush3.bf16.xpose.msra.mxu1 %v7276_v39  ;;  %v7268_v28 = vpop.permute.xlu0 %7267 }
0x1465   : > { %12548 = vmatprep.subr.bf16.mxu1 %v13211_v0 }
0x1466   : > { %v7387_v7 = vpop.permute.xlu1 %7386 }
0x1467   : > { %v7392_v8 = vsel %vm1083_vm5, %v7387_v7, 0 }
0x1468   : > { %v7502_v9 = vpop.permute.xlu0 %7501 }
0x1469   : > { %v7507_v10 = vsel %vm1083_vm5, %v7502_v9, 0 }
0x146a   : > { %v7385_v40 = vpop.permute.xlu1 %7384 }
0x146b   : > { %12539 = vmatmul.mubr.msk.bf16.vlgmr.msra.gmra.mxu1 %vm1083_vm5, %v7268_v28 }
0x146c   : > { %12549 = vmatpush3.bf16.xpose.msra.mxu1 %v7392_v8  ;;  %12550 = vmatprep.mubr.msk.bf16.mxu1 %vm13213_vm2, %v13211_v0 }
0x146d   : > { %12560 = vmatprep.subr.bf16.mxu1 %v13211_v0 }
0x146e   : > { %v7500_v57 = vpop.permute.xlu1 %7499 }
0x1473   : > { %12551 = vmatmul.mubr.msk.bf16.vlgmr.msra.gmra.mxu1 %vm1083_vm5, %v7385_v40 }
0x1474   : > { %12561 = vmatpush3.bf16.xpose.msra.mxu1 %v7507_v10  ;;  %12562 = vmatprep.mubr.msk.bf16.mxu1 %vm13213_vm2, %v13211_v0 }
0x1475   : > { %12572 = vmatprep.subr.bf16.mxu1 %v13211_v0 }
0x147b   : > { %12563 = vmatmul.mubr.msk.bf16.vlgmr.msra.gmra.mxu1 %vm1083_vm5, %v7500_v57 }
0x147c   : > { %12580 = vmatprep.mubr.msk.bf16.mxu1 %vm13213_vm2, %v13211_v0 }
0x14b8   : > { %v7201_v11 = vpop.f32.mrf.mxu1 }
0x14b9   : > { %v7202_v58 = vadd.f32 %v13148_v12, %v7201_v11 }
0x14ba   : > { %v12528_v60 = vpop.f32.mrf.mxu1 }
0x14bb   : > { %v7207_v29 = vsel %vm1130_vm6, %v7202_v58, -inf }
0x14bc   : > { %7208 = vmax.xlane.f32.xlu0 %v7207_v29  ;;  %v7204_v14 = vpop.f32.mrf.mxu1 }
0x14be   : > { %v12529_v33 = vpop.f32.mrf.mxu1 }
0x152b   : > { %v7312_v15 = vpop.f32.mrf.mxu1 }
0x152c   : > { %v7313_v59 = vadd.f32 %v13148_v12, %v7312_v15 }
0x152d   : > { %v12540_v16 = vpop.f32.mrf.mxu1 }
0x152e   : > { %v7318_v18 = vsel %vm1130_vm6, %v7313_v59, -inf }
0x152f   : > { %7319 = vmax.xlane.f32.xlu1 %v7318_v18  ;;  %v7315_v19 = vpop.f32.mrf.mxu1 }
0x1530   : > { %v12951_v19 = vld [vmem:[%s16071_s12 + $0x58] sm:$0xff]  }
0x1531   : > { %v12541_v20 = vpop.f32.mrf.mxu1  ;;  %12573 = vmatpush3.bf16.msra.mxu1 %v12951_v19 }
0x1532   : > { %12574 = vmatprep.subr.bf16.mxu1 %v13211_v0 }
0x1533   : > { %v7428_v21 = vpop.f32.mrf.mxu1 }
0x1534   : > { %v7429_v23 = vadd.f32 %v13148_v12, %v7428_v21 }
0x1535   : > { %v12552_v26 = vpop.f32.mrf.mxu1 }
0x1536   : > { %v7434_v30 = vsel %vm1130_vm6, %v7429_v23, -inf  ;;  %v12952_v26 = vld [vmem:[%s16071_s12 + $0x50] sm:$0xff]  }
0x1537   : > { %7435 = vmax.xlane.f32.xlu0 %v7434_v30  ;;  %v7431_v41 = vpop.f32.mrf.mxu1  ;;  %12575 = vmatpush3.bf16.msra.mxu1 %v12952_v26  ;;  %v11132_v26 = vld [vmem:[%s16075_s16 + $0x4c0] sm:$0xff] }
0x1538   : > { %12576 = vmatprep.subr.bf16.mxu1 %v13211_v0 }
0x1539   : > { %v12553_v42 = vpop.f32.mrf.mxu1 }
0x153b   : > { %v7543_v43 = vpop.f32.mrf.mxu1 }
0x153c   : > { %v7544_v45 = vadd.f32 %v13148_v12, %v7543_v43 }
0x153d   : > { %v12564_v46 = vpop.f32.mrf.mxu1 }
0x153e   : > { %v7549_v47 = vsel %vm1130_vm6, %v7544_v45, -inf }
0x153f   : > { %7550 = vmax.xlane.f32.xlu0 %v7549_v47  ;;  %v7546_v31 = vpop.f32.mrf.mxu1 }
0x1540   : > { %7329 = vrot.lane.b32.xlu1 %v7160_v51, %s16147_s5  ;;  %v12954_v31 = vld [vmem:[%s16071_s12 + $0x40] sm:$0xff]  }
0x1541   : > { %v12565_v48 = vpop.f32.mrf.mxu1 }
0x1544   : > { %7559 = vrot.lane.b32.xlu1 %v7160_v51, %s16149_s28  ;;  %s16158_s28 = sld [smem:[#allocation10_spill]] }
0x1545   : > { %v7209_v49 = vpop.xlane.xlu0 %7208 }
0x1546   : > { %v7210_v50 = vsub.f32 %v7202_v58, %v7209_v49 }
0x1548   : > { %v7211_v25 = vmul.f32 1.442695, %v7210_v50 }
0x154a   : > { %13127 = vpow2.f32 %v7211_v25  ;;  %s11642_s5 = sshll.u32 %s16158_s28, 4 }
0x1555   : > { %7444 = vrot.lane.b32.xlu0 %v7160_v51, %s16148_s27  ;;  %s749_s27 = scalar_lea.vmem [#allocation3], %s748_s26 }
0x1556   : > { %s10117_s22 = sshll.u32 %s749_s27, 4  ;;  %s16020_s22 = int_to_ptr.vmem [resolvable:$true] %s10117_s22 }
0x1557   : > { %v13128_v36 = vpop.eup %13127  ;;  %s13149_s28 = scalar_lea.vmem %s16020_s22, 16  ;;  %p13156_p0 = scmp.lt.s32.totalorder %s16020_s22, %s13154_s6 }
0x1558   : > { %v7216_v53 = vpack.c.bf16 %v13128_v36, %v13128_v36  ;;  %v7213_v7 = vsel %vm1130_vm6, %v13128_v36, 0.0  ;;  %p13150_p11 = scmp.ne.s32.totalorder %s16020_s22, %s13149_s28  ;;  %p13157_p1 = scmp.lt.s32.totalorder %s13155_s13, %s13149_s28 }
0x155a   : > { %12533 = vmatmul.mubr.msk.bf16.vlgmr.msra.gmra.mxu0 %vm1130_vm6, %v7216_v53  ;;  %p13151_p12 = pnand %p13150_p11, %p13385_p5  ;;  %p13158_p2 = por %p13157_p1, %p13156_p0 }
0x155b   : > { %12544 = vmatprep.mubr.msk.bf16.mxu0 %vm13213_vm2, %v13211_v0 }
0x155c   : > { %p13152_p13 = pneg %p13151_p12 }
0x155e   : > { %p13159_p3 = pnand %p13158_p2, %p13152_p13 }
0x15b8   : > { %v7320_v54 = vpop.xlane.xlu1 %7319 }
0x15b9   : > { %v7321_v55 = vsub.f32 %v7313_v59, %v7320_v54 }
0x15bb   : > { %v7322_v56 = vmul.f32 1.442695, %v7321_v55 }
0x15bc   : > { %v7330_v61 = vpop.permute.xlu1 %7329 }
0x15bd   : > { %13129 = vpow2.f32 %v7322_v56  ;;  %v7335_v62 = vsel %vm782_vm0, %v7330_v61, 0 }
0x15be   : > { %12543 = vmatpush3.bf16.msra.mxu0 %v7335_v62 }
0x15bf   : > { %12554 = vmatprep.subr.bf16.mxu0 %v13211_v0 }
0x15c0   : > { %v7436_v63 = vpop.xlane.xlu0 %7435  ;;  %v7560_v8 = vpop.permute.xlu1 %7559 }
0x15c1   : > { %v7437_v1 = vsub.f32 %v7429_v23, %v7436_v63  ;;  %v7565_v10 = vsel %vm782_vm0, %v7560_v8, 0 }
0x15c3   : > { %v7438_v2 = vmul.f32 1.442695, %v7437_v1 }
0x15c5   : > { %13131 = vpow2.f32 %v7438_v2 }
0x15c8   : > { %v7551_v13 = vpop.xlane.xlu0 %7550 }
0x15c9   : > { %v7552_v3 = vsub.f32 %v7544_v45, %v7551_v13  ;;  %v12953_v45 = vld [vmem:[%s16071_s12 + $0x48] sm:$0xff]  }
0x15ca   : > { %v13130_v51 = vpop.eup %13129  ;;  %12577 = vmatpush3.bf16.msra.mxu1 %v12953_v45 }
0x15cb   : > { %v7327_v52 = vpack.c.bf16 %v13130_v51, %v13130_v51  ;;  %v7553_v34 = vmul.f32 1.442695, %v7552_v3  ;;  %v7324_v27 = vsel %vm1130_vm6, %v13130_v51, 0.0  ;;  %12578 = vmatprep.subr.bf16.mxu1 %v13211_v0  ;;  %v11098_v3 = vld [vmem:[%s16154_s1 + $0x2] ss:$0 sm:$0xff]  ;;  %s16156_s1 = sld [smem:[#allocation15_spill]] }
0x15cc   : > { %v7445_v6 = vpop.permute.xlu0 %7444  ;;  %7325 = vadd.xlane.f32.xlu1 %v7324_v27 }
0x15cd   : > { %13133 = vpow2.f32 %v7553_v34  ;;  %v7450_v39 = vsel %vm782_vm0, %v7445_v6, 0  ;;  %12545 = vmatmul.mubr.msk.bf16.vlgmr.msra.gmra.mxu0 %vm1130_vm6, %v7327_v52 }
0x15ce   : > { %12555 = vmatpush3.bf16.msra.mxu0 %v7450_v39  ;;  %12556 = vmatprep.mubr.msk.bf16.mxu0 %vm13213_vm2, %v13211_v0 }
0x15cf   : > { %12566 = vmatprep.subr.bf16.mxu0 %v13211_v0  ;;  %12579 = vmatpush3.bf16.msra.mxu1 %v12954_v31  ;;  %v11116_v31 = vld [vmem:[%s16075_s16 + $0x440] sm:$0xff] }
0x15d0   : > { %7214 = vadd.xlane.f32.xlu1 %v7213_v7 }
0x15d1   : > { %s759_s4 = scalar_lea.vmem %s16159_s23, %s16156_s1  ;;  %s16160_s1 = sld [smem:[#allocation27_spill]] }
0x15d2   : > { %v13132_v28 = vpop.eup %13131 }
0x15d3   : > { %v7443_v9 = vpack.c.bf16 %v13132_v28, %v13132_v28  ;;  %v7440_v40 = vsel %vm1130_vm6, %v13132_v28, 0.0 }
0x15d4   : > { %7441 = vadd.xlane.f32.xlu0 %v7440_v40 }
0x15d5   : > { %12557 = vmatmul.mubr.msk.bf16.vlgmr.msra.gmra.mxu0 %vm1130_vm6, %v7443_v9 }
0x15d6   : > { %12567 = vmatpush3.bf16.msra.mxu0 %v7565_v10  ;;  %12568 = vmatprep.mubr.msk.bf16.mxu0 %vm13213_vm2, %v13211_v0 }
0x15da   : > { %v13134_v57 = vpop.eup %13133 }
0x15db   : > { %v7558_v11 = vpack.c.bf16 %v13134_v57, %v13134_v57  ;;  %v7555_v12 = vsel %vm1130_vm6, %v13134_v57, 0.0  ;;  %v11156_v57 = vld [vmem:[%s16075_s16 + $0x580] sm:$0xff] }
0x15dc   : > { %7556 = vadd.xlane.f32.xlu0 %v7555_v12 }
0x15dd   : > { %12569 = vmatmul.mubr.msk.bf16.vlgmr.msra.gmra.mxu0 %vm1130_vm6, %v7558_v11  ;;  %v11157_v11 = vld [vmem:[%s16075_s16 + $0x588] sm:$0xff] }
0x15de   : > { %8238 = vmatprep.mubr.bf16.mxu0 %v13220_v17 }
0x161a   : > { %v7257_v58 = vpop.f32.mrf.mxu0 }
0x161c   : > { %v12534_v60 = vpop.f32.mrf.mxu0 }
0x161e   : > { %v7260_v29 = vpop.f32.mrf.mxu0 }
0x1620   : > { %v12535_v14 = vpop.f32.mrf.mxu0 }
0x1655   : > { %v7326_v33 = vpop.xlane.xlu1 %7325 }
0x1659   : > { %v7215_v15 = vpop.xlane.xlu1 %7214 }
0x165a   : > { %13135 = vrcp.f32 %v7215_v15  ;;  %v11148_v15 = vld [vmem:[%s16075_s16 + $0x540] sm:$0xff] }
0x165b   : > { %13137 = vrcp.f32 %v7326_v33  ;;  %v11140_v33 = vld [vmem:[%s16075_s16 + $0x500] sm:$0xff] }
0x165c   : > { %v11206_v19 = vcombine.low %v11140_v33, %v11148_v15 }
0x165d   : > { %v7442_v18 = vpop.xlane.xlu0 %7441 }
0x165e   : > { %13139 = vrcp.f32 %v7442_v18  ;;  %v11149_v18 = vld [vmem:[%s16075_s16 + $0x548] sm:$0xff] }
0x1665   : > { %v7557_v21 = vpop.xlane.xlu0 %7556 }
0x1666   : > { %13141 = vrcp.f32 %v7557_v21 }
0x1667   : > { %v13136_v59 = vpop.eup %13135 }
0x1668   : > { %v7264_v16 = vmul.f32 %v13136_v59, %v7257_v58  ;;  %v13138_v20 = vpop.eup %13137  ;;  %v11165_v58 = vld [vmem:[%s16075_s16 + $0x5c8] sm:$0xff] }
0x1669   : > { %v11224_v29 = vcombine.low %v11157_v11, %v11165_v58  ;;  %v11225_v14 = vcombine.high %v11157_v11, %v11165_v58  ;;  %v11141_v59 = vld [vmem:[%s16075_s16 + $0x508] sm:$0xff]  ;;  %v11126_v11 = vld [vmem:[%s16075_s16 + $0x490] sm:$0xff]  ;;  %v11127_v58 = vld [vmem:[%s16075_s16 + $0x498] sm:$0xff] }
0x166a   : > { %7265 = vst.msk [vmem:[#allocation2] sm:$0xff] %vm1083_vm5, %v7264_v16  ;;  %v11207_v16 = vcombine.high %v11140_v33, %v11148_v15  ;;  %v11209_v21 = vcombine.high %v11141_v59, %v11149_v18 }
0x166b   : > { %v13140_v46 = vpop.eup %13139  ;;  %8255 = vmatprep.subr.bf16.mxu1 %v11225_v14 }
0x1673   : > { %v13142_v36 = vpop.eup %13141 }
0x168d   : > { %v7371_v23 = vpop.f32.mrf.mxu0 }
0x168e   : > { %v7378_v30 = vmul.f32 %v13138_v20, %v7371_v23  ;;  %v11208_v20 = vcombine.low %v11141_v59, %v11149_v18  ;;  %v11124_v23 = vld [vmem:[%s16075_s16 + $0x480] sm:$0xff]  ;;  %v11110_v59 = vld [vmem:[%s16075_s16 + $0x410] sm:$0xff]  ;;  %v11111_v18 = vld [vmem:[%s16075_s16 + $0x418] sm:$0xff] }
0x168f   : > { %v12546_v41 = vpop.f32.mrf.mxu0 }
0x1690   : > { %7380 = vrot.lane.b32.xlu0 %v7378_v30, %s16150_s3  ;;  %s16153_s3 = smov 48   ;;  %v11125_v30 = vld [vmem:[%s16075_s16 + $0x488] sm:$0xff]  ;;  %v11191_v41 = vcombine.high %v11124_v23, %v11132_v26 }
0x1691   : > { %v7374_v42 = vpop.f32.mrf.mxu0 }
0x1692   : > { %v11133_v42 = vld [vmem:[%s16075_s16 + $0x4c8] sm:$0xff] }
0x1693   : > { %v12547_v43 = vpop.f32.mrf.mxu0  ;;  %v11192_v45 = vcombine.low %v11125_v30, %v11133_v42 }
0x1694   : > { %v11190_v43 = vcombine.low %v11124_v23, %v11132_v26 }
0x1695   : > { %v7486_v47 = vpop.f32.mrf.mxu0 }
0x1696   : > { %v7493_v48 = vmul.f32 %v13140_v46, %v7486_v47  ;;  %v11193_v46 = vcombine.high %v11125_v30, %v11133_v42  ;;  %v11108_v47 = vld [vmem:[%s16075_s16 + $0x400] sm:$0xff]  ;;  %v11161_v42 = vld [vmem:[%s16075_s16 + $0x5a8] sm:$0xff] }
0x1697   : > { %v12558_v49 = vpop.f32.mrf.mxu0  ;;  %v11160_v30 = vld [vmem:[%s16075_s16 + $0x5a0] sm:$0xff] }
0x1698   : > { %7495 = vrot.lane.b32.xlu1 %v7493_v48, %s16151_s0  ;;  %v11109_v48 = vld [vmem:[%s16075_s16 + $0x408] sm:$0xff]  ;;  %v11175_v49 = vcombine.high %v11108_v47, %v11116_v31 }
0x1699   : > { %v7489_v50 = vpop.f32.mrf.mxu0 }
0x169a   : > { %v11117_v50 = vld [vmem:[%s16075_s16 + $0x448] sm:$0xff] }
0x169b   : > { %v12559_v25 = vpop.f32.mrf.mxu0 }
0x169c   : > { %v11174_v25 = vcombine.low %v11108_v47, %v11116_v31 }
0x169d   : > { %v7601_v53 = vpop.f32.mrf.mxu0 }
0x169e   : > { %v7608_v54 = vmul.f32 %v13142_v36, %v7601_v53  ;;  %v11176_v36 = vcombine.low %v11109_v48, %v11117_v50  ;;  %v11177_v53 = vcombine.high %v11109_v48, %v11117_v50  ;;  %v11144_v48 = vld [vmem:[%s16075_s16 + $0x520] sm:$0xff]  ;;  %v11145_v50 = vld [vmem:[%s16075_s16 + $0x528] sm:$0xff] }
0x169f   : > { %v12570_v55 = vpop.f32.mrf.mxu0 }
0x16a0   : > { %7610 = vrot.lane.b32.xlu1 %v7608_v54, %s16153_s3  ;;  %v11158_v54 = vld [vmem:[%s16075_s16 + $0x590] sm:$0xff]  ;;  %s16155_s3 = sld [smem:[#allocation26_spill]] }
0x16a1   : > { %v7604_v56 = vpop.f32.mrf.mxu0  ;;  %v11166_v55 = vld [vmem:[%s16075_s16 + $0x5d0] sm:$0xff] }
0x16a2   : > { %v11159_v56 = vld [vmem:[%s16075_s16 + $0x598] sm:$0xff] }
0x16a3   : > { %v12571_v61 = vpop.f32.mrf.mxu0 }
0x16a4   : > { %v11226_v61 = vcombine.low %v11158_v54, %v11166_v55 }
0x1702   : > { %v7381_v62 = vpop.permute.xlu0 %7380 }
0x1703   : > { %7383 = vst.msk [vmem:[#allocation2] sm:$0xff] %vm1307_vm7, %v7381_v62  ;;  %v11227_v62 = vcombine.high %v11158_v54, %v11166_v55 }
0x170a   : > { %v7496_v63 = vpop.permute.xlu1 %7495 }
0x170b   : > { %7498 = vst.msk [vmem:[#allocation2] sm:$0xff] %vm1423_vm8, %v7496_v63  ;;  %v11167_v63 = vld [vmem:[%s16075_s16 + $0x5d8] sm:$0xff] }
0x1712   : > { %v7611_v1 = vpop.permute.xlu1 %7610 }
0x1713   : > { %7613 = vst.msk [vmem:[#allocation2] sm:$0xff] %vm1539_vm9, %v7611_v1  ;;  %v11228_v1 = vcombine.low %v11159_v56, %v11167_v63 }
0x171a   : > { %v7614_v2 = vld [vmem:[#allocation2] sm:$0xff] }
0x171b   : > { %v7615_v13 = vpack.c.bf16 %v7614_v2, %v7614_v2  ;;  %v11229_v2 = vcombine.high %v11159_v56, %v11167_v63  ;;  %v11128_v56 = vld [vmem:[%s16075_s16 + $0x4a0] sm:$0xff]  ;;  %v11137_v63 = vld [vmem:[%s16075_s16 + $0x4e8] sm:$0xff] }
0x171d   : > { %12581 = vmatmul.mubr.msk.bf16.vlgmr.msra.gmra.mxu1 %vm871_vm4, %v7615_v13 }
0x171e   : > { %8279 = vmatprep.mubr.bf16.mxu1 %v13220_v17  ;;  %8256 = vmatpush1.bf16.msra.mxu1 %v11224_v29 }
0x171f   : > { %8257 = vmatprep.subr.bf16.mxu1 %v11209_v21 }
0x1722   : > { %8258 = vmatpush1.bf16.msra.mxu1 %v11208_v20 }
0x1723   : > { %8259 = vmatprep.subr.bf16.mxu1 %v11193_v46 }
0x1726   : > { %8260 = vmatpush1.bf16.msra.mxu1 %v11192_v45 }
0x1727   : > { %8261 = vmatprep.subr.bf16.mxu1 %v11177_v53 }
0x172a   : > { %8262 = vmatpush1.bf16.msra.mxu1 %v11176_v36 }
0x172b   : > { %8337 = vmatprep.subr.bf16.mxu1 %v11229_v2 }
0x17dd   : > { %v7694_v51 = vpop.f32.mrf.mxu1 }
0x17de   : > { %v7695_v52 = vadd.f32 %v11098_v3, %v7694_v51 }
0x17df   : > { %v12582_v34 = vpop.f32.mrf.mxu1 }
0x17e0   : > { %v7700_v27 = vadd.f32 %v7695_v52, %v15178_v24  ;;  %v11164_v24 = vld [vmem:[%s16075_s16 + $0x5c0] sm:$0xff] }
0x17e1   : > { %v7697_v6 = vpop.f32.mrf.mxu1  ;;  %v11223_v12 = vcombine.high %v11156_v57, %v11164_v24  ;;  %v11222_v60 = vcombine.low %v11156_v57, %v11164_v24  ;;  %v11106_v34 = vld [vmem:[%s16073_s14 + $0x2] ss:$0 sm:$0xff] }
0x17e2   : > { %v7705_v39 = vsel %vm871_vm4, %v7700_v27, 0.0  ;;  %v11107_v6 = vld [vmem:[%s16074_s15 + $0x2] ss:$0 sm:$0xff] }
0x17e3   : > { %7706 = vadd.xlane.f32.xlu0 %v7705_v39  ;;  %v12583_v7 = vpop.f32.mrf.mxu1  ;;  %8214 = vmatprep.subr.bf16.mxu0 %v11223_v12  ;;  %v11134_v12 = vld [vmem:[%s16075_s16 + $0x4d0] sm:$0xff] }
0x17e4   : > { %8215 = vmatpush1.bf16.msra.mxu0 %v11222_v60  ;;  %v11142_v7 = vld [vmem:[%s16075_s16 + $0x510] sm:$0xff]  ;;  %v11135_v60 = vld [vmem:[%s16075_s16 + $0x4d8] sm:$0xff]  ;;  %v11195_v33 = vcombine.high %v11126_v11, %v11134_v12  ;;  %v11194_v20 = vcombine.low %v11126_v11, %v11134_v12 }
0x17e5   : > { %8216 = vmatprep.subr.bf16.mxu0 %v11207_v16  ;;  %v11197_v15 = vcombine.high %v11127_v58, %v11135_v60  ;;  %v11118_v16 = vld [vmem:[%s16075_s16 + $0x450] sm:$0xff]  ;;  %v11196_v21 = vcombine.low %v11127_v58, %v11135_v60 }
0x17e6   : > { %v11179_v23 = vcombine.high %v11110_v59, %v11118_v16  ;;  %v11178_v45 = vcombine.low %v11110_v59, %v11118_v16 }
0x17e8   : > { %8217 = vmatpush1.bf16.msra.mxu0 %v11206_v19  ;;  %v11119_v19 = vld [vmem:[%s16075_s16 + $0x458] sm:$0xff] }
0x17e9   : > { %8218 = vmatprep.subr.bf16.mxu0 %v11191_v41  ;;  %v11181_v26 = vcombine.high %v11111_v18, %v11119_v19  ;;  %v11168_v41 = vld [vmem:[%s16075_s16 + $0x5e0] sm:$0xff]  ;;  %v11180_v46 = vcombine.low %v11111_v18, %v11119_v19 }
0x17ea   : > { %v11231_v47 = vcombine.high %v11160_v30, %v11168_v41  ;;  %v11230_v36 = vcombine.low %v11160_v30, %v11168_v41 }
0x17ec   : > { %8219 = vmatpush1.bf16.msra.mxu0 %v11190_v43  ;;  %v11169_v43 = vld [vmem:[%s16075_s16 + $0x5e8] sm:$0xff] }
0x17ed   : > { %8220 = vmatprep.subr.bf16.mxu0 %v11175_v49  ;;  %v11233_v31 = vcombine.high %v11161_v42, %v11169_v43  ;;  %v11152_v49 = vld [vmem:[%s16075_s16 + $0x560] sm:$0xff]  ;;  %v11232_v53 = vcombine.low %v11161_v42, %v11169_v43 }
0x17ee   : > { %v11215_v54 = vcombine.high %v11144_v48, %v11152_v49 }
0x17f0   : > { %8221 = vmatpush1.bf16.msra.mxu0 %v11174_v25  ;;  %v11153_v25 = vld [vmem:[%s16075_s16 + $0x568] sm:$0xff] }
0x17f1   : > { %8296 = vmatprep.subr.bf16.mxu0 %v11227_v62  ;;  %v11217_v55 = vcombine.high %v11145_v50, %v11153_v25  ;;  %v11129_v62 = vld [vmem:[%s16075_s16 + $0x4a8] sm:$0xff]  ;;  %v11216_v2 = vcombine.low %v11145_v50, %v11153_v25 }
0x186c   : > { %v7707_v28 = vpop.xlane.xlu0 %7706 }
0x186d   : > { %v7708_v8 = vmul.f32 0.015625, %v7707_v28  ;;  %v11150_v28 = vld [vmem:[%s16075_s16 + $0x550] sm:$0xff] }
0x186e   : > { %v11211_v57 = vcombine.high %v11142_v7, %v11150_v28  ;;  %v11210_v29 = vcombine.low %v11142_v7, %v11150_v28 }
0x186f   : > { %v15301_v9 = vsub.f32 %v7700_v27, %v7708_v8  ;;  %v11143_v8 = vld [vmem:[%s16075_s16 + $0x518] sm:$0xff] }
0x1871   : > { %v7710_v40 = vmul.f32 %v15301_v9, %v15301_v9 }
0x1873   : > { %v7711_v10 = vsel %vm871_vm4, %v7710_v40, 0.0 }
0x1874   : > { %7712 = vadd.xlane.f32.xlu1 %v7711_v10 }
0x18fd   : > { %v7713_v13 = vpop.xlane.xlu1 %7712 }
0x18fe   : > { %v7714_v3 = vmul.f32 0.015625, %v7713_v13 }
0x1900   : > { %v7715_v51 = vadd.f32 1e-05, %v7714_v3  ;;  %v11201_v3 = vcombine.high %v11129_v62, %v11137_v63 }
0x1902   : > { %13143 = vrsqrt.f32 %v7715_v51  ;;  %v11112_v51 = vld [vmem:[%s16075_s16 + $0x420] sm:$0xff] }
0x190f   : > { %v13144_v52 = vpop.eup %13143 }
0x1910   : > { %v7717_v27 = vmul.f32 %v13144_v52, %v15301_v9  ;;  %v11151_v9 = vld [vmem:[%s16075_s16 + $0x558] sm:$0xff]  ;;  %v11120_v52 = vld [vmem:[%s16075_s16 + $0x460] sm:$0xff] }
0x1911   : > { %v11213_v24 = vcombine.high %v11143_v8, %v11151_v9  ;;  %v11212_v14 = vcombine.low %v11143_v8, %v11151_v9  ;;  %v11183_v7 = vcombine.high %v11112_v51, %v11120_v52  ;;  %v11162_v8 = vld [vmem:[%s16075_s16 + $0x5b0] sm:$0xff]  ;;  %v11182_v11 = vcombine.low %v11112_v51, %v11120_v52  ;;  %v12967_v51 = vld [vmem:[%s16077_s18 + $0x860] sm:$0xff]  }
0x1912   : > { %v7724_v39 = vmul.f32 %v11106_v34, %v7717_v27  ;;  %v11113_v34 = vld [vmem:[%s16075_s16 + $0x428] sm:$0xff]  ;;  %v11170_v9 = vld [vmem:[%s16075_s16 + $0x5f0] sm:$0xff]  ;;  %v12968_v52 = vld [vmem:[%s16077_s18 + $0x8e0] sm:$0xff]  }
0x1913   : > { %v11121_v27 = vld [vmem:[%s16075_s16 + $0x468] sm:$0xff]  ;;  %v11235_v58 = vcombine.high %v11162_v8, %v11170_v9  ;;  %v11234_v59 = vcombine.low %v11162_v8, %v11170_v9  ;;  %v12975_v8 = vld [vmem:[%s16077_s18 + $0x850] sm:$0xff]  }
0x1914   : > { %v15385_v40 = vadd.f32 %v11107_v6, %v7724_v39  ;;  %v11200_v39 = vcombine.low %v11129_v62, %v11137_v63  ;;  %v11185_v28 = vcombine.high %v11113_v34, %v11121_v27  ;;  %v11184_v12 = vcombine.low %v11113_v34, %v11121_v27  ;;  %v12960_v62 = vld [vmem:[%s16077_s18 + $0x8f0] sm:$0xff]   ;;  %v12969_v34 = vld [vmem:[%s16077_s18 + $0x820] sm:$0xff]  }
0x1915   : > { %v12961_v63 = vld [vmem:[%s16077_s18 + $0x830] sm:$0xff]   ;;  %v12970_v27 = vld [vmem:[%s16077_s18 + $0x8a0] sm:$0xff]  }
0x1916   : > { %v15389_v10 = vpack.c.bf16 %v15385_v40, %v15385_v40  ;;  %v12976_v9 = vld [vmem:[%s16077_s18 + $0x8d0] sm:$0xff]  }
0x1918   : > { %11238 = vmatmul.mubr.msk.bf16.vlgmr.msra.gmra.mxu0 %vm871_vm4, %v15389_v10  ;;  %11239 = vmatmul.mubr.msk.bf16.vlgmr.msra.gmra.mxu1 %vm871_vm4, %v15389_v10 }
0x1919   : > { %8297 = vmatpush1.bf16.msra.mxu0 %v11226_v61  ;;  %8338 = vmatpush1.bf16.msra.mxu1 %v11228_v1  ;;  %v11136_v61 = vld [vmem:[%s16075_s16 + $0x4e0] sm:$0xff]  ;;  %v11214_v1 = vcombine.low %v11144_v48, %v11152_v49 }
0x191a   : > { %8298 = vmatprep.subr.bf16.mxu0 %v11211_v57  ;;  %8339 = vmatprep.subr.bf16.mxu1 %v11213_v24  ;;  %v11199_v13 = vcombine.high %v11128_v56, %v11136_v61  ;;  %v11198_v6 = vcombine.low %v11128_v56, %v11136_v61  ;;  %v11163_v57 = vld [vmem:[%s16075_s16 + $0x5b8] sm:$0xff]  ;;  %v12959_v61 = vld [vmem:[%s16077_s18 + $0x870] sm:$0xff]  }
0x191b   : > { %8320 = vmatprep.mubr.bf16.mxu0 %v13220_v17  ;;  %8361 = vmatprep.mubr.bf16.mxu1 %v13220_v17  ;;  %v11171_v24 = vld [vmem:[%s16075_s16 + $0x5f8] sm:$0xff] }
0x191c   : > { %v11237_v60 = vcombine.high %v11163_v57, %v11171_v24  ;;  %v11236_v16 = vcombine.low %v11163_v57, %v11171_v24  ;;  %v12958_v56 = vld [vmem:[%s16077_s18 + $0x8b8] sm:$0xff]   ;;  %v12977_v57 = vld [vmem:[%s16077_s18 + $0x810] sm:$0xff]  }
0x191d   : > { %8299 = vmatpush1.bf16.msra.mxu0 %v11210_v29  ;;  %8340 = vmatpush1.bf16.msra.mxu1 %v11212_v14  ;;  %v11146_v29 = vld [vmem:[%s16075_s16 + $0x530] sm:$0xff] }
0x191e   : > { %8300 = vmatprep.subr.bf16.mxu0 %v11195_v33  ;;  %8341 = vmatprep.subr.bf16.mxu1 %v11197_v15  ;;  %v11154_v14 = vld [vmem:[%s16075_s16 + $0x570] sm:$0xff]  ;;  %v11147_v33 = vld [vmem:[%s16075_s16 + $0x538] sm:$0xff] }
0x191f   : > { %v11155_v15 = vld [vmem:[%s16075_s16 + $0x578] sm:$0xff]  ;;  %v11219_v18 = vcombine.high %v11146_v29, %v11154_v14  ;;  %v11218_v30 = vcombine.low %v11146_v29, %v11154_v14  ;;  %v12978_v24 = vld [vmem:[%s16077_s18 + $0x890] sm:$0xff]   ;;  %v12983_v29 = vld [vmem:[%s16077_s18 + $0x840] sm:$0xff]  }
0x1920   : > { %v11221_v19 = vcombine.high %v11147_v33, %v11155_v15  ;;  %v11220_v41 = vcombine.low %v11147_v33, %v11155_v15  ;;  %v12984_v14 = vld [vmem:[%s16077_s18 + $0x8c0] sm:$0xff]  }
0x1921   : > { %8301 = vmatpush1.bf16.msra.mxu0 %v11194_v20  ;;  %8342 = vmatpush1.bf16.msra.mxu1 %v11196_v21  ;;  %v11130_v20 = vld [vmem:[%s16075_s16 + $0x4b0] sm:$0xff]  ;;  %v12985_v33 = vld [vmem:[%s16077_s18 + $0x800] sm:$0xff]  }
0x1922   : > { %8302 = vmatprep.subr.bf16.mxu0 %v11179_v23  ;;  %8343 = vmatprep.subr.bf16.mxu1 %v11181_v26  ;;  %v11138_v21 = vld [vmem:[%s16075_s16 + $0x4f0] sm:$0xff]  ;;  %v11131_v23 = vld [vmem:[%s16075_s16 + $0x4b8] sm:$0xff]  ;;  %v12986_v15 = vld [vmem:[%s16077_s18 + $0x880] sm:$0xff]  }
0x1923   : > { %v11139_v26 = vld [vmem:[%s16075_s16 + $0x4f8] sm:$0xff]  ;;  %v11203_v42 = vcombine.high %v11130_v20, %v11138_v21  ;;  %v11202_v48 = vcombine.low %v11130_v20, %v11138_v21 }
0x1924   : > { %v11205_v43 = vcombine.high %v11131_v23, %v11139_v26  ;;  %v11204_v49 = vcombine.low %v11131_v23, %v11139_v26 }
0x1925   : > { %8303 = vmatpush1.bf16.msra.mxu0 %v11178_v45  ;;  %8344 = vmatpush1.bf16.msra.mxu1 %v11180_v46  ;;  %v11114_v45 = vld [vmem:[%s16075_s16 + $0x430] sm:$0xff] }
0x1926   : > { %8378 = vmatprep.subr.bf16.mxu0 %v11231_v47  ;;  %8419 = vmatprep.subr.bf16.mxu1 %v11233_v31  ;;  %v11122_v46 = vld [vmem:[%s16075_s16 + $0x470] sm:$0xff]  ;;  %v11115_v47 = vld [vmem:[%s16075_s16 + $0x438] sm:$0xff] }
0x1927   : > { %v11123_v31 = vld [vmem:[%s16075_s16 + $0x478] sm:$0xff]  ;;  %v11187_v50 = vcombine.high %v11114_v45, %v11122_v46 }
0x1928   : > { %11240 = vmatmul.mubr.msk.bf16.vlgmr.msra.gmra.mxu0 %vm871_vm4, %v15389_v10  ;;  %11241 = vmatmul.mubr.msk.bf16.vlgmr.msra.gmra.mxu1 %vm871_vm4, %v15389_v10  ;;  %v11189_v25 = vcombine.high %v11115_v47, %v11123_v31 }
0x1929   : > { %8379 = vmatpush1.bf16.msra.mxu0 %v11230_v36  ;;  %8420 = vmatpush1.bf16.msra.mxu1 %v11232_v53  ;;  %v11186_v36 = vcombine.low %v11114_v45, %v11122_v46  ;;  %v11188_v53 = vcombine.low %v11115_v47, %v11123_v31 }
0x192a   : > { %8380 = vmatprep.subr.bf16.mxu0 %v11215_v54  ;;  %8421 = vmatprep.subr.bf16.mxu1 %v11217_v55  ;;  %v12955_v54 = vld [vmem:[%s16077_s18 + $0x878] sm:$0xff]  }
0x192b   : > { %8402 = vmatprep.mubr.bf16.mxu0 %v13220_v17  ;;  %8443 = vmatprep.mubr.bf16.mxu1 %v13220_v17  ;;  %v12957_v55 = vld [vmem:[%s16077_s18 + $0x838] sm:$0xff]  }
0x192d   : > { %8381 = vmatpush1.bf16.msra.mxu0 %v11214_v1  ;;  %8422 = vmatpush1.bf16.msra.mxu1 %v11216_v2  ;;  %v12962_v1 = vld [vmem:[%s16077_s18 + $0x8b0] sm:$0xff]   ;;  %v12963_v2 = vld [vmem:[%s16077_s18 + $0x868] sm:$0xff]  }
0x192e   : > { %8382 = vmatprep.subr.bf16.mxu0 %v11199_v13  ;;  %8423 = vmatprep.subr.bf16.mxu1 %v11201_v3  ;;  %v12965_v13 = vld [vmem:[%s16077_s18 + $0x828] sm:$0xff]  }
0x192f   : > { %v12966_v3 = vld [vmem:[%s16077_s18 + $0x8a8] sm:$0xff]  }
0x1931   : > { %8383 = vmatpush1.bf16.msra.mxu0 %v11198_v6  ;;  %8424 = vmatpush1.bf16.msra.mxu1 %v11200_v39  ;;  %v12971_v6 = vld [vmem:[%s16077_s18 + $0x858] sm:$0xff]  }
0x1932   : > { %8384 = vmatprep.subr.bf16.mxu0 %v11183_v7  ;;  %8425 = vmatprep.subr.bf16.mxu1 %v11185_v28  ;;  %v12972_v39 = vld [vmem:[%s16077_s18 + $0x8d8] sm:$0xff]  }
0x1933   : > { %v12973_v7 = vld [vmem:[%s16077_s18 + $0x818] sm:$0xff]  }
0x1934   : > { %v12974_v28 = vld [vmem:[%s16077_s18 + $0x898] sm:$0xff]  }
0x1935   : > { %8385 = vmatpush1.bf16.msra.mxu0 %v11182_v11  ;;  %8426 = vmatpush1.bf16.msra.mxu1 %v11184_v12  ;;  %v12979_v11 = vld [vmem:[%s16077_s18 + $0x848] sm:$0xff]  }
0x1936   : > { %8460 = vmatprep.subr.bf16.mxu0 %v11235_v58  ;;  %8501 = vmatprep.subr.bf16.mxu1 %v11237_v60  ;;  %v12980_v12 = vld [vmem:[%s16077_s18 + $0x8c8] sm:$0xff]  }
0x1937   : > { %v12981_v58 = vld [vmem:[%s16077_s18 + $0x808] sm:$0xff]  }
0x1938   : > { %11242 = vmatmul.mubr.msk.bf16.vlgmr.msra.gmra.mxu0 %vm871_vm4, %v15389_v10  ;;  %11243 = vmatmul.mubr.msk.bf16.vlgmr.msra.gmra.mxu1 %vm871_vm4, %v15389_v10  ;;  %v12982_v60 = vld [vmem:[%s16077_s18 + $0x888] sm:$0xff]  }
0x1939   : > { %8461 = vmatpush1.bf16.msra.mxu0 %v11234_v59  ;;  %8502 = vmatpush1.bf16.msra.mxu1 %v11236_v16  ;;  %v12987_v59 = vld [vmem:[%s16077_s18 + $0x978] sm:$0xff]  }
0x193a   : > { %8462 = vmatprep.subr.bf16.mxu0 %v11219_v18  ;;  %8503 = vmatprep.subr.bf16.mxu1 %v11221_v19  ;;  %v12988_v16 = vld [vmem:[%s16077_s18 + $0x9f8] sm:$0xff]   ;;  %v15638_v18 = vld [vmem:[%s16076_s17 + $0x20] sm:$0xff] }
0x193b   : > { %8484 = vmatprep.mubr.bf16.mxu0 %v13220_v17  ;;  %8525 = vmatprep.mubr.bf16.mxu1 %v13220_v17  ;;  %v12956_v17 = vld [vmem:[%s16077_s18 + $0x8f8] sm:$0xff]   ;;  %v7806_v19 = vrot.slane %v15638_v18, %v13926_v32  ;;  %v7814_v20 = vrot.slane %v15638_v18, %v13929_v35  ;;  %v7810_v21 = vrot.slane %v15638_v18, %v13937_v37 }
0x193c   : > { %v7818_v23 = vrot.slane %v15638_v18, %v13940_v38 }
0x193d   : > { %8463 = vmatpush1.bf16.msra.mxu0 %v11218_v30  ;;  %8504 = vmatpush1.bf16.msra.mxu1 %v11220_v41 }
0x193e   : > { %8464 = vmatprep.subr.bf16.mxu0 %v11203_v42  ;;  %8505 = vmatprep.subr.bf16.mxu1 %v11205_v43 }
0x1941   : > { %8465 = vmatpush1.bf16.msra.mxu0 %v11202_v48  ;;  %8506 = vmatpush1.bf16.msra.mxu1 %v11204_v49 }
0x1942   : > { %8466 = vmatprep.subr.bf16.mxu0 %v11187_v50  ;;  %8507 = vmatprep.subr.bf16.mxu1 %v11189_v25 }
0x1945   : > { %8467 = vmatpush1.bf16.msra.mxu0 %v11186_v36  ;;  %8508 = vmatpush1.bf16.msra.mxu1 %v11188_v53 }
0x1946   : > { %12107 = vmatprep.subr.bf16.mxu0 %v12955_v54  ;;  %12129 = vmatprep.subr.bf16.mxu1 %v12956_v17 }
0x1948   : > { %11244 = vmatmul.mubr.msk.bf16.vlgmr.msra.gmra.mxu0 %vm871_vm4, %v15389_v10  ;;  %11245 = vmatmul.mubr.msk.bf16.vlgmr.msra.gmra.mxu1 %vm871_vm4, %v15389_v10  ;;  %v12964_v10 = vld [vmem:[%s16077_s18 + $0x8e8] sm:$0xff]  }
0x1949   : > { %12108 = vmatpush3.bf16.msra.mxu0 %v12957_v55  ;;  %12130 = vmatpush3.bf16.msra.mxu1 %v12958_v56  ;;  %v12989_v56 = vld [vmem:[%s16077_s18 + $0x938] sm:$0xff]  }
0x194a   : > { %12109 = vmatprep.subr.bf16.mxu0 %v12959_v61  ;;  %12131 = vmatprep.subr.bf16.mxu1 %v12960_v62  ;;  %v12990_v61 = vld [vmem:[%s16077_s18 + $0x9b8] sm:$0xff]  }
0x194d   : > { %12110 = vmatpush3.bf16.msra.mxu0 %v12961_v63  ;;  %12132 = vmatpush3.bf16.msra.mxu1 %v12962_v1  ;;  %v12991_v1 = vld [vmem:[%s16077_s18 + $0x970] sm:$0xff]  }
0x194e   : > { %12111 = vmatprep.subr.bf16.mxu0 %v12963_v2  ;;  %12133 = vmatprep.subr.bf16.mxu1 %v12964_v10  ;;  %v12992_v2 = vld [vmem:[%s16077_s18 + $0x9f0] sm:$0xff]  }
0x194f   : > { %v12993_v10 = vld [vmem:[%s16077_s18 + $0x930] sm:$0xff]  }
0x1951   : > { %12112 = vmatpush3.bf16.msra.mxu0 %v12965_v13  ;;  %12134 = vmatpush3.bf16.msra.mxu1 %v12966_v3  ;;  %v12994_v13 = vld [vmem:[%s16077_s18 + $0x9b0] sm:$0xff]   ;;  %v12995_v3 = vld [vmem:[%s16077_s18 + $0x968] sm:$0xff]  }
0x1952   : > { %12113 = vmatprep.subr.bf16.mxu0 %v12967_v51  ;;  %12135 = vmatprep.subr.bf16.mxu1 %v12968_v52  ;;  %v12996_v51 = vld [vmem:[%s16077_s18 + $0x9e8] sm:$0xff]   ;;  %v7826_v52 = vrot.slane %v15638_v18, %v13969_v4 }
0x1955   : > { %12114 = vmatpush3.bf16.msra.mxu0 %v12969_v34  ;;  %12136 = vmatpush3.bf16.msra.mxu1 %v12970_v27  ;;  %v7834_v34 = vrot.slane %v15638_v18, %v13972_v5  ;;  %v12997_v27 = vld [vmem:[%s16077_s18 + $0x928] sm:$0xff]  }
0x1956   : > { %12115 = vmatprep.subr.bf16.mxu0 %v12971_v6  ;;  %12137 = vmatprep.subr.bf16.mxu1 %v12972_v39  ;;  %v12998_v6 = vld [vmem:[%s16077_s18 + $0x9a8] sm:$0xff]  }
0x1959   : > { %12116 = vmatpush3.bf16.msra.mxu0 %v12973_v7  ;;  %12138 = vmatpush3.bf16.msra.mxu1 %v12974_v28  ;;  %v12999_v28 = vld [vmem:[%s16077_s18 + $0x960] sm:$0xff]  }
0x195a   : > { %12117 = vmatprep.subr.bf16.mxu0 %v12975_v8  ;;  %12139 = vmatprep.subr.bf16.mxu1 %v12976_v9  ;;  %v13000_v8 = vld [vmem:[%s16077_s18 + $0x9e0] sm:$0xff]  }
0x195d   : > { %12118 = vmatpush3.bf16.msra.mxu0 %v12977_v57  ;;  %12140 = vmatpush3.bf16.msra.mxu1 %v12978_v24 }
0x195e   : > { %12119 = vmatprep.subr.bf16.mxu0 %v12979_v11  ;;  %12141 = vmatprep.subr.bf16.mxu1 %v12980_v12  ;;  %v13001_v12 = vld [vmem:[%s16077_s18 + $0x920] sm:$0xff]  }
0x1961   : > { %12120 = vmatpush3.bf16.msra.mxu0 %v12981_v58  ;;  %12142 = vmatpush3.bf16.msra.mxu1 %v12982_v60  ;;  %v13002_v58 = vld [vmem:[%s16077_s18 + $0x9a0] sm:$0xff]  }
0x1962   : > { %12121 = vmatprep.subr.bf16.mxu0 %v12983_v29  ;;  %12143 = vmatprep.subr.bf16.mxu1 %v12984_v14  ;;  %v13003_v14 = vld [vmem:[%s16077_s18 + $0x958] sm:$0xff]  }
0x1965   : > { %12122 = vmatpush3.bf16.msra.mxu0 %v12985_v33  ;;  %12144 = vmatpush3.bf16.msra.mxu1 %v12986_v15  ;;  %v13004_v33 = vld [vmem:[%s16077_s18 + $0x9d8] sm:$0xff]  }
0x1966   : > { %12151 = vmatprep.subr.bf16.mxu0 %v12987_v59  ;;  %12173 = vmatprep.subr.bf16.mxu1 %v12988_v16 }
0x19d8   : > { %v8240_v26 = vpop.f32.mrf.mxu0  ;;  %v8281_v30 = vpop.f32.mrf.mxu1 }
0x19d9   : > { %v8241_v41 = vadd.f32 %v8240_v26, %v7806_v19  ;;  %v8282_v42 = vadd.f32 %v8281_v30, %v7814_v20  ;;  %v13006_v26 = vld [vmem:[%s16077_s18 + $0x998] sm:$0xff]   ;;  %v13007_v30 = vld [vmem:[%s16077_s18 + $0x950] sm:$0xff]  }
0x19da   : > { %v8242_v43 = vpop.f32.mrf.mxu0  ;;  %v8283_v45 = vpop.f32.mrf.mxu1 }
0x19db   : > { %v8243_v46 = vadd.f32 %v8242_v43, %v7810_v21  ;;  %v8284_v47 = vadd.f32 %v8283_v45, %v7818_v23  ;;  %v8534_v31 = vmax.f32 %v8241_v41, 0.0  ;;  %v8536_v48 = vmax.f32 %v8282_v42, 0.0  ;;  %v13005_v23 = vld [vmem:[%s16077_s18 + $0x918] sm:$0xff]   ;;  %v13008_v41 = vld [vmem:[%s16077_s18 + $0x9d0] sm:$0xff]  }
0x19dc   : > { %v8244_v49 = vpop.f32.mrf.mxu0  ;;  %v8285_v50 = vpop.f32.mrf.mxu1  ;;  %v13009_v42 = vld [vmem:[%s16077_s18 + $0x910] sm:$0xff]   ;;  %v7822_v45 = vrot.slane %v15638_v18, %v14015_v22 }
0x19dd   : > { %v8535_v25 = vmax.f32 %v8243_v46, 0.0  ;;  %v8537_v36 = vmax.f32 %v8284_v47, 0.0  ;;  %v8550_v62 = vpack.c.bf16 %v8534_v31, %v8534_v31  ;;  %v8552_v63 = vpack.c.bf16 %v8536_v48, %v8536_v48  ;;  %v13010_v43 = vld [vmem:[%s16077_s18 + $0x990] sm:$0xff]   ;;  %v13011_v47 = vld [vmem:[%s16077_s18 + $0x948] sm:$0xff]  }
0x19de   : > { %v8245_v53 = vpop.f32.mrf.mxu0  ;;  %v8286_v54 = vpop.f32.mrf.mxu1  ;;  %v7830_v46 = vrot.slane %v15638_v18, %v14018_v44  ;;  %v13012_v31 = vld [vmem:[%s16077_s18 + $0x9c8] sm:$0xff]  }
0x19df   : > { %v8551_v17 = vpack.c.bf16 %v8535_v25, %v8535_v25  ;;  %v8553_v55 = vpack.c.bf16 %v8537_v36, %v8537_v36  ;;  %v15731_v48 = vld [vmem:[%s16076_s17 + $0x28] sm:$0xff] }
0x19e0   : > { %v7842_v18 = vrot.slane %v15731_v48, %v13937_v37  ;;  %v7850_v49 = vrot.slane %v15731_v48, %v13940_v38  ;;  %v13013_v50 = vld [vmem:[%s16077_s18 + $0x908] sm:$0xff]   ;;  %v13015_v37 = vld [vmem:[%s16077_s18 + $0x940] sm:$0xff]  }
0x19e1   : > { %9631 = vmatprep.mubr.bf16.mxu0 %v8551_v17  ;;  %9671 = vmatprep.mubr.bf16.mxu1 %v8553_v55  ;;  %v13014_v25 = vld [vmem:[%s16077_s18 + $0x988] sm:$0xff]   ;;  %v13016_v38 = vld [vmem:[%s16077_s18 + $0x9c0] sm:$0xff]  }
0x19e2   : > { %9632 = vmatmul.mubr.bf16.vlgmr.msra.gmra.mxu0 %v8550_v62  ;;  %9672 = vmatmul.mubr.bf16.vlgmr.msra.gmra.mxu1 %v8552_v63  ;;  %v13017_v63 = vld [vmem:[%s16077_s18 + $0x900] sm:$0xff]  }
0x19e3   : > { %12152 = vmatpush3.bf16.msra.mxu0 %v12989_v56  ;;  %12174 = vmatpush3.bf16.msra.mxu1 %v12990_v61 }
0x19e4   : > { %12153 = vmatprep.subr.bf16.mxu0 %v12991_v1  ;;  %12175 = vmatprep.subr.bf16.mxu1 %v12992_v2  ;;  %v13018_v1 = vld [vmem:[%s16077_s18 + $0x980] sm:$0xff]  }
0x19e7   : > { %12154 = vmatpush3.bf16.msra.mxu0 %v12993_v10  ;;  %12176 = vmatpush3.bf16.msra.mxu1 %v12994_v13 }
0x19e8   : > { %v8322_v39 = vpop.f32.mrf.mxu0  ;;  %v8363_v7 = vpop.f32.mrf.mxu1  ;;  %12155 = vmatprep.subr.bf16.mxu0 %v12995_v3  ;;  %12177 = vmatprep.subr.bf16.mxu1 %v12996_v51  ;;  %v13019_v51 = vld [vmem:[%s16077_s18 + $0xa78] sm:$0xff]  }
0x19e9   : > { %v8323_v36 = vadd.f32 %v8322_v39, %v7822_v45  ;;  %v8364_v53 = vadd.f32 %v8363_v7, %v7830_v46  ;;  %v13021_v7 = vld [vmem:[%s16077_s18 + $0xa38] sm:$0xff]  }
0x19ea   : > { %v8324_v9 = vpop.f32.mrf.mxu0  ;;  %v8365_v57 = vpop.f32.mrf.mxu1  ;;  %v13036_v45 = vld [vmem:[%s16077_s18 + $0xad8] sm:$0xff]  }
0x19eb   : > { %v8325_v24 = vadd.f32 %v8324_v9, %v7826_v52  ;;  %v8366_v11 = vadd.f32 %v8365_v57, %v7834_v34  ;;  %12156 = vmatpush3.bf16.msra.mxu0 %v12997_v27  ;;  %12178 = vmatpush3.bf16.msra.mxu1 %v12998_v6  ;;  %v8538_v2 = vmax.f32 %v8323_v36, 0.0  ;;  %v8540_v10 = vmax.f32 %v8364_v53, 0.0  ;;  %v13020_v52 = vld [vmem:[%s16077_s18 + $0xaf8] sm:$0xff]   ;;  %v13042_v53 = vld [vmem:[%s16077_s18 + $0xa90] sm:$0xff]  }
0x19ec   : > { %v8326_v60 = vpop.f32.mrf.mxu0  ;;  %v8367_v29 = vpop.f32.mrf.mxu1  ;;  %12157 = vmatprep.subr.bf16.mxu0 %v12999_v28  ;;  %12179 = vmatprep.subr.bf16.mxu1 %v13000_v8  ;;  %v13022_v9 = vld [vmem:[%s16077_s18 + $0xab8] sm:$0xff]   ;;  %v7838_v36 = vrot.slane %v15731_v48, %v13926_v32  ;;  %v7858_v32 = vrot.slane %v15731_v48, %v13969_v4  ;;  %v13047_v4 = vld [vmem:[%s16077_s18 + $0xa40] sm:$0xff]  }
0x19ed   : > { %v8539_v15 = vmax.f32 %v8325_v24, 0.0  ;;  %v8541_v59 = vmax.f32 %v8366_v11, 0.0  ;;  %v8554_v28 = vpack.c.bf16 %v8538_v2, %v8538_v2  ;;  %v8556_v8 = vpack.c.bf16 %v8540_v10, %v8540_v10  ;;  %v13023_v24 = vld [vmem:[%s16077_s18 + $0xa70] sm:$0xff]   ;;  %v13027_v29 = vld [vmem:[%s16077_s18 + $0xa68] sm:$0xff]  }
0x19ee   : > { %v8327_v16 = vpop.f32.mrf.mxu0  ;;  %v8368_v19 = vpop.f32.mrf.mxu1  ;;  %v13024_v11 = vld [vmem:[%s16077_s18 + $0xaf0] sm:$0xff]  }
0x19ef   : > { %v8555_v20 = vpack.c.bf16 %v8539_v15, %v8539_v15  ;;  %v8557_v21 = vpack.c.bf16 %v8541_v59, %v8541_v59  ;;  %12158 = vmatpush3.bf16.msra.mxu0 %v13001_v12  ;;  %12180 = vmatpush3.bf16.msra.mxu1 %v13002_v58  ;;  %v13025_v58 = vld [vmem:[%s16077_s18 + $0xa30] sm:$0xff]   ;;  %v13030_v16 = vld [vmem:[%s16077_s18 + $0xaa8] sm:$0xff]   ;;  %v13031_v19 = vld [vmem:[%s16077_s18 + $0xa60] sm:$0xff]  }
0x19f0   : > { %12159 = vmatprep.subr.bf16.mxu0 %v13003_v14  ;;  %12181 = vmatprep.subr.bf16.mxu1 %v13004_v33  ;;  %v13026_v60 = vld [vmem:[%s16077_s18 + $0xab0] sm:$0xff]   ;;  %v13028_v14 = vld [vmem:[%s16077_s18 + $0xae8] sm:$0xff]  }
0x19f1   : > { %9711 = vmatprep.mubr.bf16.mxu0 %v8555_v20  ;;  %9751 = vmatprep.mubr.bf16.mxu1 %v8557_v21  ;;  %v13029_v33 = vld [vmem:[%s16077_s18 + $0xa28] sm:$0xff]   ;;  %v13032_v20 = vld [vmem:[%s16077_s18 + $0xae0] sm:$0xff]  }
0x19f3   : > { %12160 = vmatpush3.bf16.msra.mxu0 %v13005_v23  ;;  %12182 = vmatpush3.bf16.msra.mxu1 %v13006_v26  ;;  %v13033_v26 = vld [vmem:[%s16077_s18 + $0xa20] sm:$0xff]  }
0x19f4   : > { %12161 = vmatprep.subr.bf16.mxu0 %v13007_v30  ;;  %12183 = vmatprep.subr.bf16.mxu1 %v13008_v41 }
0x19f7   : > { %12162 = vmatpush3.bf16.msra.mxu0 %v13009_v42  ;;  %12184 = vmatpush3.bf16.msra.mxu1 %v13010_v43  ;;  %v13034_v42 = vld [vmem:[%s16077_s18 + $0xaa0] sm:$0xff]   ;;  %v13035_v43 = vld [vmem:[%s16077_s18 + $0xa58] sm:$0xff]  }
0x19f8   : > { %v15743_v54 = vpop.f32.mrf.mxu0  ;;  %v15745_v17 = vpop.f32.mrf.mxu1  ;;  %12163 = vmatprep.subr.bf16.mxu0 %v13011_v47  ;;  %12185 = vmatprep.subr.bf16.mxu1 %v13012_v31  ;;  %v13037_v31 = vld [vmem:[%s16077_s18 + $0xa18] sm:$0xff]  }
0x19fa   : > { %v8406_v55 = vpop.f32.mrf.mxu0  ;;  %v8447_v56 = vpop.f32.mrf.mxu1 }
0x19fb   : > { %v8407_v61 = vadd.f32 %v8406_v55, %v7842_v18  ;;  %v8448_v62 = vadd.f32 %v8447_v56, %v7850_v49  ;;  %12164 = vmatpush3.bf16.msra.mxu0 %v13013_v50  ;;  %12186 = vmatpush3.bf16.msra.mxu1 %v13014_v25  ;;  %v13038_v18 = vld [vmem:[%s16077_s18 + $0xa98] sm:$0xff]   ;;  %v13039_v49 = vld [vmem:[%s16077_s18 + $0xa50] sm:$0xff]   ;;  %v13044_v55 = vld [vmem:[%s16077_s18 + $0xac8] sm:$0xff]   ;;  %v7866_v56 = vrot.slane %v15731_v48, %v13972_v5 }
0x19fc   : > { %v8408_v13 = vpop.f32.mrf.mxu0  ;;  %v8449_v3 = vpop.f32.mrf.mxu1  ;;  %12165 = vmatprep.subr.bf16.mxu0 %v13015_v37  ;;  %12187 = vmatprep.subr.bf16.mxu1 %v13016_v38  ;;  %v13040_v50 = vld [vmem:[%s16077_s18 + $0xad0] sm:$0xff]   ;;  %v13043_v37 = vld [vmem:[%s16077_s18 + $0xa48] sm:$0xff]   ;;  %v7846_v38 = vrot.slane %v15731_v48, %v13929_v35  ;;  %v13048_v5 = vld [vmem:[%s16077_s18 + $0xac0] sm:$0xff]  }
0x19fd   : > { %v8543_v34 = vmax.f32 %v8407_v61, 0.0  ;;  %v8545_v27 = vmax.f32 %v8448_v62, 0.0  ;;  %v13041_v25 = vld [vmem:[%s16077_s18 + $0xa10] sm:$0xff]   ;;  %v13045_v61 = vld [vmem:[%s16077_s18 + $0xa08] sm:$0xff]   ;;  %v8405_v62 = vadd.f32 %v15743_v54, %v7838_v36  ;;  %v13049_v54 = vld [vmem:[%s16077_s18 + $0xa00] sm:$0xff]  }
0x19fe   : > { %v8409_v6 = vpop.f32.mrf.mxu0  ;;  %v8450_v39 = vpop.f32.mrf.mxu1  ;;  %v13046_v35 = vld [vmem:[%s16077_s18 + $0xa88] sm:$0xff]   ;;  %v13050_v13 = vld [vmem:[%s16077_s18 + $0xa80] sm:$0xff]  }
0x19ff   : > { %12166 = vmatpush3.bf16.msra.mxu0 %v13017_v63  ;;  %12188 = vmatpush3.bf16.msra.mxu1 %v13018_v1  ;;  %v8559_v57 = vpack.c.bf16 %v8543_v34, %v8543_v34  ;;  %v8561_v12 = vpack.c.bf16 %v8545_v27, %v8545_v27  ;;  %v8446_v63 = vadd.f32 %v15745_v17, %v7846_v38  ;;  %v8542_v10 = vmax.f32 %v8405_v62, 0.0  ;;  %v13051_v17 = vld [vmem:[%s16077_s18 + $0xb78] sm:$0xff]   ;;  %v13082_v36 = vld [vmem:[%s16077_s18 + $0xb80] sm:$0xff]  }
0x1a00   : > { %12195 = vmatprep.subr.bf16.mxu0 %v13019_v51  ;;  %12217 = vmatprep.subr.bf16.mxu1 %v13020_v52  ;;  %v13052_v51 = vld [vmem:[%s16077_s18 + $0xbf8] sm:$0xff]  }
0x1a01   : > { %v8544_v3 = vmax.f32 %v8446_v63, 0.0  ;;  %v13053_v27 = vld [vmem:[%s16077_s18 + $0xb38] sm:$0xff]   ;;  %v8558_v6 = vpack.c.bf16 %v8542_v10, %v8542_v10 }
0x1a02   : > { %9712 = vmatmul.mubr.bf16.vlgmr.msra.gmra.mxu0 %v8554_v28  ;;  %9752 = vmatmul.mubr.bf16.vlgmr.msra.gmra.mxu1 %v8556_v8  ;;  %v13054_v39 = vld [vmem:[%s16077_s18 + $0xbb8] sm:$0xff]   ;;  %v13055_v28 = vld [vmem:[%s16077_s18 + $0xb70] sm:$0xff]  }
0x1a03   : > { %12196 = vmatpush3.bf16.msra.mxu0 %v13021_v7  ;;  %9791 = vmatprep.mubr.bf16.mxu0 %v8559_v57  ;;  %v8560_v7 = vpack.c.bf16 %v8544_v3, %v8544_v3 }
0x1a04   : > { %12218 = vmatpush3.bf16.msra.mxu1 %v13022_v9  ;;  %9831 = vmatprep.mubr.bf16.mxu1 %v8561_v12  ;;  %v13056_v9 = vld [vmem:[%s16077_s18 + $0xbf0] sm:$0xff]   ;;  %v13059_v12 = vld [vmem:[%s16077_s18 + $0xb68] sm:$0xff]  }
0x1a05   : > { %12197 = vmatprep.subr.bf16.mxu0 %v13023_v24  ;;  %12219 = vmatprep.subr.bf16.mxu1 %v13024_v11  ;;  %v13057_v24 = vld [vmem:[%s16077_s18 + $0xb30] sm:$0xff]  }
0x1a06   : > { %v13058_v11 = vld [vmem:[%s16077_s18 + $0xbb0] sm:$0xff]  }
0x1a07   : > { %12198 = vmatpush3.bf16.msra.mxu0 %v13025_v58  ;;  %v13060_v58 = vld [vmem:[%s16077_s18 + $0xbe8] sm:$0xff]  }
0x1a08   : > { %12220 = vmatpush3.bf16.msra.mxu1 %v13026_v60  ;;  %v15792_v15 = vpop.f32.mrf.mxu0  ;;  %v15794_v59 = vpop.f32.mrf.mxu1  ;;  %12199 = vmatprep.subr.bf16.mxu0 %v13027_v29  ;;  %v13061_v60 = vld [vmem:[%s16077_s18 + $0xb28] sm:$0xff]  }
0x1a09   : > { %12221 = vmatprep.subr.bf16.mxu1 %v13028_v14  ;;  %v13062_v29 = vld [vmem:[%s16077_s18 + $0xba8] sm:$0xff]   ;;  %v13063_v14 = vld [vmem:[%s16077_s18 + $0xb60] sm:$0xff]  }
0x1a0a   : > { %v8488_v21 = vpop.f32.mrf.mxu0  ;;  %v8529_v23 = vpop.f32.mrf.mxu1 }
0x1a0b   : > { %12200 = vmatpush3.bf16.msra.mxu0 %v13029_v33  ;;  %v8489_v1 = vadd.f32 %v8488_v21, %v7858_v32  ;;  %v8530_v2 = vadd.f32 %v8529_v23, %v7866_v56  ;;  %v13064_v33 = vld [vmem:[%s16077_s18 + $0xbe0] sm:$0xff]   ;;  %v13068_v21 = vld [vmem:[%s16077_s18 + $0xbd8] sm:$0xff]  }
0x1a0c   : > { %12222 = vmatpush3.bf16.msra.mxu1 %v13030_v16  ;;  %v8490_v30 = vpop.f32.mrf.mxu0  ;;  %v8531_v41 = vpop.f32.mrf.mxu1  ;;  %12201 = vmatprep.subr.bf16.mxu0 %v13031_v19  ;;  %v13065_v16 = vld [vmem:[%s16077_s18 + $0xb20] sm:$0xff]   ;;  %v13069_v23 = vld [vmem:[%s16077_s18 + $0xb18] sm:$0xff]  }
0x1a0d   : > { %12223 = vmatprep.subr.bf16.mxu1 %v13032_v20  ;;  %v8547_v52 = vmax.f32 %v8489_v1, 0.0  ;;  %v8549_v34 = vmax.f32 %v8530_v2, 0.0  ;;  %v13066_v19 = vld [vmem:[%s16077_s18 + $0xba0] sm:$0xff]   ;;  %v13067_v20 = vld [vmem:[%s16077_s18 + $0xb58] sm:$0xff]   ;;  %v13071_v30 = vld [vmem:[%s16077_s18 + $0xb50] sm:$0xff]  }
0x1a0e   : > { %v8491_v46 = vpop.f32.mrf.mxu0  ;;  %v8532_v47 = vpop.f32.mrf.mxu1  ;;  %v13072_v41 = vld [vmem:[%s16077_s18 + $0xbd0] sm:$0xff]   ;;  %v11503_v32 = vld [vmem:[%s16078_s19 + $0x2] ss:$0 sm:$0xff] }
0x1a0f   : > { %12202 = vmatpush3.bf16.msra.mxu0 %v13033_v26  ;;  %v8563_v8 = vpack.c.bf16 %v8547_v52, %v8547_v52  ;;  %v8565_v57 = vpack.c.bf16 %v8549_v34, %v8549_v34  ;;  %v13070_v26 = vld [vmem:[%s16077_s18 + $0xb98] sm:$0xff]   ;;  %v13075_v46 = vld [vmem:[%s16077_s18 + $0xb48] sm:$0xff]   ;;  %v7862_v47 = vrot.slane %v15731_v48, %v14018_v44  ;;  %v13079_v44 = vld [vmem:[%s16077_s18 + $0xb40] sm:$0xff]  }
0x1a10   : > { %12224 = vmatpush3.bf16.msra.mxu1 %v13034_v42  ;;  %12203 = vmatprep.subr.bf16.mxu0 %v13035_v43  ;;  %v13073_v42 = vld [vmem:[%s16077_s18 + $0xb10] sm:$0xff]   ;;  %v7854_v43 = vrot.slane %v15731_v48, %v14015_v22  ;;  %v13077_v22 = vld [vmem:[%s16077_s18 + $0xb08] sm:$0xff]  }
0x1a11   : > { %12225 = vmatprep.subr.bf16.mxu1 %v13036_v45  ;;  %v13074_v45 = vld [vmem:[%s16077_s18 + $0xb90] sm:$0xff]   ;;  %v8528_v48 = vadd.f32 %v15794_v59, %v7862_v47 }
0x1a13   : > { %12204 = vmatpush3.bf16.msra.mxu0 %v13037_v31  ;;  %v13076_v31 = vld [vmem:[%s16077_s18 + $0xbc8] sm:$0xff]  }
0x1a14   : > { %12226 = vmatpush3.bf16.msra.mxu1 %v13038_v18  ;;  %12205 = vmatprep.subr.bf16.mxu0 %v13039_v49  ;;  %v8487_v18 = vadd.f32 %v15792_v15, %v7854_v43  ;;  %v13078_v49 = vld [vmem:[%s16077_s18 + $0xb88] sm:$0xff]   ;;  %v13081_v15 = vld [vmem:[%s16077_s18 + $0xb00] sm:$0xff]  }
0x1a15   : > { %12227 = vmatprep.subr.bf16.mxu1 %v13040_v50  ;;  %v13080_v50 = vld [vmem:[%s16077_s18 + $0xbc0] sm:$0xff]  }
0x1a17   : > { %12206 = vmatpush3.bf16.msra.mxu0 %v13041_v25  ;;  %v8546_v25 = vmax.f32 %v8487_v18, 0.0 }
0x1a18   : > { %12228 = vmatpush3.bf16.msra.mxu1 %v13042_v53  ;;  %12207 = vmatprep.subr.bf16.mxu0 %v13043_v37  ;;  %v8548_v53 = vmax.f32 %v8528_v48, 0.0 }
0x1a19   : > { %12229 = vmatprep.subr.bf16.mxu1 %v13044_v55  ;;  %v8562_v59 = vpack.c.bf16 %v8546_v25, %v8546_v25  ;;  %v13085_v25 = vld [vmem:[%s16155_s3 + $0x8] sm:$0xff]  }
0x1a1a   : > { %v8564_v37 = vpack.c.bf16 %v8548_v53, %v8548_v53 }
0x1a1b   : > { %12208 = vmatpush3.bf16.msra.mxu0 %v13045_v61 }
0x1a1c   : > { %12230 = vmatpush3.bf16.msra.mxu1 %v13046_v35  ;;  %12209 = vmatprep.subr.bf16.mxu0 %v13047_v4 }
0x1a1d   : > { %12231 = vmatprep.subr.bf16.mxu1 %v13048_v5 }
0x1a1f   : > { %12210 = vmatpush3.bf16.msra.mxu0 %v13049_v54 }
0x1a20   : > { %12232 = vmatpush3.bf16.msra.mxu1 %v13050_v13  ;;  %12239 = vmatprep.subr.bf16.mxu0 %v13051_v17 }
0x1a21   : > { %12261 = vmatprep.subr.bf16.mxu1 %v13052_v51 }
0x1a22   : > { %9792 = vmatmul.mubr.bf16.vlgmr.msra.gmra.mxu0 %v8558_v6 }
0x1a23   : > { %9832 = vmatmul.mubr.bf16.vlgmr.msra.gmra.mxu1 %v8560_v7  ;;  %12240 = vmatpush3.bf16.msra.mxu0 %v13053_v27 }
0x1a24   : > { %9871 = vmatprep.mubr.bf16.mxu0 %v8563_v8  ;;  %12262 = vmatpush3.bf16.msra.mxu1 %v13054_v39 }
0x1a25   : > { %9911 = vmatprep.mubr.bf16.mxu1 %v8565_v57  ;;  %12241 = vmatprep.subr.bf16.mxu0 %v13055_v28 }
0x1a26   : > { %12263 = vmatprep.subr.bf16.mxu1 %v13056_v9 }
0x1a27   : > { %12242 = vmatpush3.bf16.msra.mxu0 %v13057_v24 }
0x1a28   : > { %12264 = vmatpush3.bf16.msra.mxu1 %v13058_v11  ;;  %12243 = vmatprep.subr.bf16.mxu0 %v13059_v12 }
0x1a29   : > { %12265 = vmatprep.subr.bf16.mxu1 %v13060_v58 }
0x1a2b   : > { %12244 = vmatpush3.bf16.msra.mxu0 %v13061_v60 }
0x1a2c   : > { %12266 = vmatpush3.bf16.msra.mxu1 %v13062_v29  ;;  %12245 = vmatprep.subr.bf16.mxu0 %v13063_v14 }
0x1a2d   : > { %12267 = vmatprep.subr.bf16.mxu1 %v13064_v33 }
0x1a2f   : > { %12246 = vmatpush3.bf16.msra.mxu0 %v13065_v16 }
0x1a30   : > { %12268 = vmatpush3.bf16.msra.mxu1 %v13066_v19  ;;  %12247 = vmatprep.subr.bf16.mxu0 %v13067_v20 }
0x1a31   : > { %12269 = vmatprep.subr.bf16.mxu1 %v13068_v21 }
0x1a33   : > { %12248 = vmatpush3.bf16.msra.mxu0 %v13069_v23 }
0x1a34   : > { %12270 = vmatpush3.bf16.msra.mxu1 %v13070_v26  ;;  %12249 = vmatprep.subr.bf16.mxu0 %v13071_v30 }
0x1a35   : > { %12271 = vmatprep.subr.bf16.mxu1 %v13072_v41 }
0x1a37   : > { %12250 = vmatpush3.bf16.msra.mxu0 %v13073_v42 }
0x1a38   : > { %12272 = vmatpush3.bf16.msra.mxu1 %v13074_v45  ;;  %12251 = vmatprep.subr.bf16.mxu0 %v13075_v46 }
0x1a39   : > { %12273 = vmatprep.subr.bf16.mxu1 %v13076_v31 }
0x1a3b   : > { %12252 = vmatpush3.bf16.msra.mxu0 %v13077_v22 }
0x1a3c   : > { %12274 = vmatpush3.bf16.msra.mxu1 %v13078_v49  ;;  %12253 = vmatprep.subr.bf16.mxu0 %v13079_v44 }
0x1a3d   : > { %12275 = vmatprep.subr.bf16.mxu1 %v13080_v50 }
0x1a3f   : > { %12254 = vmatpush3.bf16.msra.mxu0 %v13081_v15  ;;  %v13083_v15 = vld [vmem:[%s16155_s3 + $0x18] sm:$0xff]  }
0x1a40   : > { %12276 = vmatpush3.bf16.msra.mxu1 %v13082_v36  ;;  %12589 = vmatprep.subr.bf16.mxu0 %v13211_v0 }
0x1a41   : > { %12584 = vmatprep.subr.mxu1 %v13211_v0 }
0x1a42   : > { %9872 = vmatmul.mubr.bf16.vlgmr.msra.gmra.mxu0 %v8562_v59 }
0x1a43   : > { %9912 = vmatmul.mubr.bf16.vlgmr.msra.gmra.mxu1 %v8564_v37  ;;  %12597 = vmatprep.mubr.msk.bf16.mxu0 %vm13213_vm2, %v13211_v0 }
0x1a44   : > { %12586 = vmatprep.mubr.msk.f32.mxu1 %vm13213_vm2, %v13211_v0  ;;  %12590 = vmatpush3.bf16.msra.mxu0 %v13083_v15 }
0x1a45   : > { %12591 = vmatprep.subr.bf16.mxu0 %v13211_v0 }
0x1aa2   : > { %v12123_v38 = vpop.f32.mrf.mxu0  ;;  %v12145_v55 = vpop.f32.mrf.mxu1 }
0x1aa4   : > { %v12124_v56 = vpop.f32.mrf.mxu0  ;;  %v12146_v61 = vpop.f32.mrf.mxu1 }
0x1aa5   : > { %v12125_v62 = vadd.f32 %v12124_v56, %v12123_v38  ;;  %v12147_v35 = vadd.f32 %v12146_v61, %v12145_v55  ;;  %v11634_v38 = vld [vmem:[%s16079_s20 + $0x2] ss:$0 sm:$0xff]  ;;  %v9951_v61 = vld [vmem:[%s759_s4] sm:$0x1]  ;;  %s16162_s4 = sld [smem:[#allocation28_spill]] }
0x1aa6   : > { %v12126_v4 = vpop.f32.mrf.mxu0  ;;  %v12148_v63 = vpop.f32.mrf.mxu1 }
0x1aa7   : > { %v9634_v5 = vadd.f32 %v12125_v62, %v11503_v32  ;;  %v11635_v32 = vld [vmem:[%s16080_s21 + $0x2] ss:$0 sm:$0xff] }
0x1aa8   : > { %v12127_v1 = vpop.f32.mrf.mxu0  ;;  %v12149_v2 = vpop.f32.mrf.mxu1  ;;  %v13086_v62 = vld [vmem:[%s16155_s3] sm:$0xff]  }
0x1aa9   : > { %v9674_v54 = vadd.f32 %v12147_v35, %v9634_v5  ;;  %v10034_v5 = vld [vmem:[%s16160_s1] sm:$0x1] }
0x1aab   : > { %s16018_s0 = scalar_lea.hbm %s16162_s4, %s11642_s5 }
0x1ac2   : > { %v12167_v10 = vpop.f32.mrf.mxu0  ;;  %v12189_v13 = vpop.f32.mrf.mxu1 }
0x1ac4   : > { %v12168_v17 = vpop.f32.mrf.mxu0  ;;  %v12190_v3 = vpop.f32.mrf.mxu1 }
0x1ac5   : > { %v12169_v11 = vadd.f32 %v12168_v17, %v12167_v10  ;;  %v12191_v58 = vadd.f32 %v12190_v3, %v12189_v13 }
0x1ac6   : > { %v12170_v51 = vpop.f32.mrf.mxu0  ;;  %v12192_v52 = vpop.f32.mrf.mxu1 }
0x1ac7   : > { %v9714_v12 = vadd.f32 %v12169_v11, %v9674_v54 }
0x1ac8   : > { %v12171_v34 = vpop.f32.mrf.mxu0  ;;  %v12193_v27 = vpop.f32.mrf.mxu1 }
0x1ac9   : > { %v9754_v29 = vadd.f32 %v12191_v58, %v9714_v12 }
0x1ae2   : > { %v12211_v6 = vpop.f32.mrf.mxu0 }
0x1ae3   : > { %v12233_v39 = vpop.f32.mrf.mxu1 }
0x1ae4   : > { %v12212_v7 = vpop.f32.mrf.mxu0 }
0x1ae5   : > { %v12234_v28 = vpop.f32.mrf.mxu1  ;;  %v12213_v60 = vadd.f32 %v12212_v7, %v12211_v6 }
0x1ae6   : > { %v12214_v8 = vpop.f32.mrf.mxu0  ;;  %v12235_v16 = vadd.f32 %v12234_v28, %v12233_v39 }
0x1ae7   : > { %v12236_v9 = vpop.f32.mrf.mxu1  ;;  %v9794_v14 = vadd.f32 %v12213_v60, %v9754_v29 }
0x1ae8   : > { %v12215_v57 = vpop.f32.mrf.mxu0 }
0x1ae9   : > { %v12237_v24 = vpop.f32.mrf.mxu1  ;;  %v9834_v21 = vadd.f32 %v12235_v16, %v9794_v14 }
0x1b02   : > { %v12255_v33 = vpop.f32.mrf.mxu0 }
0x1b03   : > { %v12277_v19 = vpop.f32.mrf.mxu1 }
0x1b04   : > { %v12256_v20 = vpop.f32.mrf.mxu0 }
0x1b05   : > { %v12257_v23 = vadd.f32 %v12256_v20, %v12255_v33  ;;  %v12278_v26 = vpop.f32.mrf.mxu1 }
0x1b06   : > { %v12258_v30 = vpop.f32.mrf.mxu0  ;;  %v12279_v42 = vadd.f32 %v12278_v26, %v12277_v19 }
0x1b07   : > { %v9874_v41 = vadd.f32 %v12257_v23, %v9834_v21  ;;  %v12280_v43 = vpop.f32.mrf.mxu1 }
0x1b08   : > { %v12259_v45 = vpop.f32.mrf.mxu0 }
0x1b09   : > { %v9914_v46 = vadd.f32 %v12279_v42, %v9874_v41  ;;  %v12281_v47 = vpop.f32.mrf.mxu1 }
0x1b0b   : > { %v9919_v31 = vadd.f32 %v9914_v46, %v15385_v40  ;;  %v13084_v40 = vld [vmem:[%s16155_s3 + $0x10] sm:$0xff]  }
0x1b0c   : > { %12592 = vmatpush3.bf16.msra.mxu0 %v13084_v40 }
0x1b0d   : > { %v9924_v22 = vsel %vm871_vm4, %v9919_v31, 0.0  ;;  %12593 = vmatprep.subr.bf16.mxu0 %v13211_v0 }
0x1b0e   : > { %9925 = vadd.xlane.f32.xlu0 %v9924_v22 }
0x1b10   : > { %12594 = vmatpush3.bf16.msra.mxu0 %v13085_v25 }
0x1b11   : > { %12595 = vmatprep.subr.bf16.mxu0 %v13211_v0 }
0x1b14   : > { %12596 = vmatpush3.bf16.msra.mxu0 %v13086_v62 }
0x1b97   : > { %v9926_v18 = vpop.xlane.xlu0 %9925 }
0x1b98   : > { %v9927_v49 = vmul.f32 0.015625, %v9926_v18 }
0x1b9a   : > { %v9928_v44 = vsub.f32 %v9919_v31, %v9927_v49 }
0x1b9c   : > { %v9929_v48 = vmul.f32 %v9928_v44, %v9928_v44 }
0x1b9e   : > { %v9930_v50 = vsel %vm871_vm4, %v9929_v48, 0.0 }
0x1b9f   : > { %9931 = vadd.xlane.f32.xlu0 %v9930_v50 }
0x1c28   : > { %v9932_v36 = vpop.xlane.xlu0 %9931 }
0x1c29   : > { %v9933_v53 = vmul.f32 0.015625, %v9932_v36 }
0x1c2b   : > { %v9934_v59 = vadd.f32 1e-05, %v9933_v53 }
0x1c2d   : > { %13145 = vrsqrt.f32 %v9934_v59 }
0x1c3a   : > { %v13146_v37 = vpop.eup %13145 }
0x1c3b   : > { %v9936_v55 = vmul.f32 %v13146_v37, %v9928_v44 }
0x1c3d   : > { %v9943_v0 = vmul.f32 %v11634_v38, %v9936_v55 }
0x1c3f   : > { %v9950_v56 = vadd.f32 %v11635_v32, %v9943_v0 }
0x1c41   : > { %12585 = vmatpush3.msra.mxu1 %v9950_v56 }
0x1c42   : > { %12587 = vmatmul.mubr.msk.f32.vlgmr.msra.gmra.mxu1 %vm1130_vm6, %v9951_v61 }
0x1d02   : > { %v10021_v35 = vpop.f32.mrf.mxu1 }
0x1d03   : > { %v10025_v4 = vpack.c.bf16 %v10021_v35, %v10021_v35 }
0x1d04   : > { %v12588_v63 = vpop.f32.mrf.mxu1 }
0x1d05   : > { %12598 = vmatmul.mubr.msk.bf16.vlgmr.msra.gmra.mxu0 %vm871_vm4, %v10025_v4 }
0x1dc5   : > { %v10096_v1 = vpop.f32.mrf.mxu0 }
0x1dc6   : > { %v10097_v2 = vadd.f32 %v10096_v1, %v10034_v5 }
0x1dc7   : > { %v12599_v54 = vpop.f32.mrf.mxu0 }
0x1dc8   : > { %10103 = vst.msk [vmem:[%s749_s27] sm:$0x1] %vm10102_vm10, %v10097_v2 }
0x1dc9   : > { %v10099_v10 = vpop.f32.mrf.mxu0 }
0x1dca   : > { %13162 = shalt.err (!%p13159_p3)
}
0x1dcb   : > { %s13163_s1 = scalar_lea.hbm %s16018_s0, 16  ;;  %s13167_s27 = scalar_lea.hbm %s16162_s4, 32 }
0x1dcc   : > { %p13164_p4 = scmp.ne.s32.totalorder %s16018_s0, %s13163_s1  ;;  %p13168_p9 = scmp.lt.s32.totalorder %s16018_s0, %s16162_s4 }
0x1dcd   : > { %p13169_p10 = scmp.lt.s32.totalorder %s13167_s27, %s13163_s1 }
0x1dce   : > { %p13165_p7 = pnand %p13164_p4, %p13385_p5 }
0x1dcf   : > { %p13170_p11 = por %p13169_p10, %p13168_p9 }
0x1dd0   : > { %p13166_p8 = pneg %p13165_p7 }
0x1dd2   : > { %p13171_p12 = pnand %p13170_p11, %p13166_p8 }
0x1dd4   : > { %13174 = shalt.err (!%p13171_p12)
}
0x1dd5   : > { %12601 = dma.vmem_to_hbm [thread:$0]  (%p13385_p5), %s16020_s22, 16, %s16018_s0, %s10105_s7   ;;  %v12600_v13 = vpop.f32.mrf.mxu0 }
0x1dd6 PF: > { %s16163_s28 = sld [smem:[#allocation9_spill]] }
0x1dd7   : > { %s16164_s25 = sld [smem:[#allocation6_spill]] }
0x1ddc   : > { %p12607_p13 = scmp.ge.s32.totalorder %s16163_s28, 2 }
0x1ddd   : > { %s10129_s13 = sand.u32 1, %s16164_s25  }
0x1dde   : > { %p12604_p0 = pnand %p12607_p13, %p13389_p6  ;;  %s10130_s26 = scalar_lea.sflag [#allocation4], %s10129_s13 }
0x1de0   : > { %p12605_p1 = pneg %p12604_p0 }
0x1de2   : > { %13192 = dma.done.wait (%p12605_p1), %s10130_s26, 16  }
0x1de3   : > { %13194 = vsyncadd (%p12605_p1), %s10130_s26, 4294967280  ;;  %s16166_s28 = sld [smem:[#allocation11_spill]] }
0x1de4   : > { %s16167_s5 = sld [smem:[#allocation7_spill]] }
0x1de5   : > { %s16168_s26 = sld [smem:[#allocation8_spill]] }
0x1de6   : > { %s16169_s27 = sld [smem:[#allocation12_spill]] }
0x1de9   : > { %p34_p2 = scmp.ge.s32.totalorder %s16166_s28, 4  }
0x1deb   :  { %36 = sbr.rel (!%p34_p2) target bundleno = 17 (0x11), region = 189 }
0x1df0   :  { %10134 = vsyncpa [#allocation4], 1 }
0x1df1   :  { %10136 = vsyncpa [#allocation4 + $0x1], 1 }

</bundles_post_ra>
